<compile_context>
chip_gen: v6e
topology: v6e:2x2x1
jax: 0.10.0
libtpu: 0.0.40
codegen_flags: <defaults>
</compile_context>

<pallas_src>
import functools

import jax
import jax.numpy as jnp
from jax.experimental import pallas as pl
from jax.experimental.pallas import tpu as pltpu

EMBED_DIM = 50
Z_DIM = 100
IN_FEATS = Z_DIM + EMBED_DIM           # 150
H1, H2, H3 = 256, 512, 1024
OUT_FEATS = 28 * 28                    # 784
OUT_PAD = 896                          # 784 -> next multiple of 128 (lane-dense store)
BN_EPS = 1e-5


# ------------------------------ Pallas kernel -------------------------------
def _gen_kernel(z_ref, e_ref,
                w1n_ref, w1e_ref, t1_ref,
                w2_ref, t2_ref,
                w3_ref, t3_ref,
                w4_ref, b4_ref,
                o_ref):
    """One batch tile of the generator MLP, fully VMEM-resident.

    Weights are bf16 with the BN scale pre-folded in; accumulation, shifts,
    ReLU and Tanh stay f32.  Layer 1 is split into noise/embedding halves so
    the concat never materializes.
    """
    # Layer 1: h1 = relu(z @ W1n + e @ W1e + shift1)
    h = jnp.dot(z_ref[...], w1n_ref[...], preferred_element_type=jnp.float32)
    h = h + jnp.dot(e_ref[...], w1e_ref[...], preferred_element_type=jnp.float32)
    h = jnp.maximum(h + t1_ref[...], 0.0)

    # Layer 2
    h = jnp.dot(h.astype(jnp.bfloat16), w2_ref[...], preferred_element_type=jnp.float32)
    h = jnp.maximum(h + t2_ref[...], 0.0)

    # Layer 3
    h = jnp.dot(h.astype(jnp.bfloat16), w3_ref[...], preferred_element_type=jnp.float32)
    h = jnp.maximum(h + t3_ref[...], 0.0)

    # Output layer + Tanh
    h = jnp.dot(h.astype(jnp.bfloat16), w4_ref[...], preferred_element_type=jnp.float32)
    o_ref[...] = jnp.tanh(h + b4_ref[...])                          # (TB, OUT_PAD) f32


# ------------------------------ param handling ------------------------------
def _linear_init(key, fan_in, fan_out):
    """torch.nn.Linear default init: U(-1/sqrt(fan_in), 1/sqrt(fan_in))."""
    kw, kb = jax.random.split(key)
    bound = 1.0 / (fan_in ** 0.5)
    w = jax.random.uniform(kw, (fan_in, fan_out), jnp.float32, -bound, bound)
    b = jax.random.uniform(kb, (fan_out,), jnp.float32, -bound, bound)
    return w, b


def _bn_init(dim):
    """torch.nn.BatchNorm1d default: gamma=1, beta=0, running_mean=0, running_var=1."""
    return (jnp.ones((dim,), jnp.float32), jnp.zeros((dim,), jnp.float32),
            jnp.zeros((dim,), jnp.float32), jnp.ones((dim,), jnp.float32))


def init_params(key):
    k_emb, k1, k2, k3, k4 = jax.random.split(key, 5)
    return {
        "emb": jax.random.normal(k_emb, (10, EMBED_DIM), jnp.float32),  # nn.Embedding init
        "lin1": _linear_init(k1, IN_FEATS, H1), "bn1": _bn_init(H1),
        "lin2": _linear_init(k2, H1, H2),       "bn2": _bn_init(H2),
        "lin3": _linear_init(k3, H2, H3),       "bn3": _bn_init(H3),
        "lin4": _linear_init(k4, H3, OUT_FEATS),
    }


def _fold_bias_bn(b, bn):
    """Fold Linear bias + eval-mode BatchNorm into per-feature scale/shift (f32)."""
    gamma, beta, mean, var = bn
    scale = gamma / jnp.sqrt(var + BN_EPS)
    shift = scale * (b - mean) + beta
    return scale.reshape(1, -1), shift.reshape(1, -1)


def prepare_params(params):
    """Pad / cast / fold the parameters ONCE, outside the per-call hot path.

    BN scale is folded into the weight columns before the bf16 cast, so the
    kernel never multiplies by a scale.
    """
    (w1, b1), (w2, b2), (w3, b3), (w4, b4) = (
        params["lin1"], params["lin2"], params["lin3"], params["lin4"])

    s1, t1 = _fold_bias_bn(b1, params["bn1"])
    s2, t2 = _fold_bias_bn(b2, params["bn2"])
    s3, t3 = _fold_bias_bn(b3, params["bn3"])

    w1s = (w1 * s1)                      # (150, 256) scale baked in
    return {
        "emb": params["emb"],                                                  # (10, 50) f32
        "w1n": w1s[:Z_DIM].astype(jnp.bfloat16),                               # (100, 256)
        "w1e": w1s[Z_DIM:].astype(jnp.bfloat16),                               # (50, 256)
        "w2": (w2 * s2).astype(jnp.bfloat16),                                  # (256, 512)
        "w3": (w3 * s3).astype(jnp.bfloat16),                                  # (512, 1024)
        "w4": jnp.pad(w4, ((0, 0), (0, OUT_PAD - OUT_FEATS))).astype(jnp.bfloat16),  # (1024, 896)
        "t1": t1, "t2": t2, "t3": t3,                                          # (1, H) f32
        "b4": jnp.pad(b4, (0, OUT_PAD - OUT_FEATS)).reshape(1, OUT_PAD),       # (1, 896) f32
    }


# --------------------------------- forward ----------------------------------
def _pick_batch_tile(B):
    """Largest tile (<=512) that divides B; single tile for tiny/odd batches.

    No forced >=2-step grid: at small B the kernel is weight-DMA bound, so a
    single grid step (one weight fetch, one core) is strictly better on v7x.
    """
    for tb in (512, 256, 128, 64, 32, 16, 8):
        if B % tb == 0:
            return tb
    return B


def generator_forward(noise, labels, pp, *, single_buffer_weights=True):
    """noise: (B, 100) f32, labels: (B,) int32 -> images (B, 1, 28, 28) f32."""
    B = noise.shape[0]

    # Glue: embedding gather + bf16 casts only (no concat / no padded x buffer).
    z = noise.astype(jnp.bfloat16)                                    # (B, 100) bf16
    e = jnp.take(pp["emb"], labels, axis=0).astype(jnp.bfloat16)      # (B, 50)  bf16

    tb = _pick_batch_tile(B)
    num_steps = B // tb
    grid = (num_steps,)

    pipe = pl.Buffered(1) if single_buffer_weights else None

    def wspec(shape):
        # Grid-invariant operand: constant index map; single-buffer when supported.
        if pipe is None:
            return pl.BlockSpec(shape, lambda i: (0, 0))
        try:
            return pl.BlockSpec(shape, lambda i: (0, 0), pipeline_mode=pipe)
        except TypeError:   # older BlockSpec signature without pipeline_mode
            return pl.BlockSpec(shape, lambda i: (0, 0))

    flops = 2 * B * (IN_FEATS * H1 + H1 * H2 + H2 * H3 + H3 * OUT_FEATS)
    transcendentals = B * OUT_FEATS
    bytes_accessed = (
        2 * (IN_FEATS * H1 + H1 * H2 + H2 * H3 + H3 * OUT_PAD)   # bf16 weights
        + 4 * (H1 + H2 + H3 + OUT_PAD)                           # f32 shifts / bias
        + 2 * B * (Z_DIM + EMBED_DIM)                            # bf16 inputs
        + 4 * B * OUT_PAD)                                       # f32 output

    out_padded = pl.pallas_call(
        _gen_kernel,
        out_shape=jax.ShapeDtypeStruct((B, OUT_PAD), jnp.float32),
        grid_spec=pltpu.PrefetchScalarGridSpec(
            num_scalar_prefetch=0,
            grid=grid,
            in_specs=[
                pl.BlockSpec((tb, Z_DIM), lambda i: (i, 0)),       # noise tile (bf16)
                pl.BlockSpec((tb, EMBED_DIM), lambda i: (i, 0)),   # label-emb tile (bf16)
                wspec((Z_DIM, H1)),                                # w1 noise half (bf16)
                wspec((EMBED_DIM, H1)),                            # w1 emb half (bf16)
                wspec((1, H1)),                                    # shift1 (f32)
                wspec((H1, H2)),                                   # w2 (bf16)
                wspec((1, H2)),                                    # shift2
                wspec((H2, H3)),                                   # w3 (bf16)
                wspec((1, H3)),                                    # shift3
                wspec((H3, OUT_PAD)),                              # w4 (bf16)
                wspec((1, OUT_PAD)),                               # b4 (f32)
            ],
            out_specs=pl.BlockSpec((tb, OUT_PAD), lambda i: (i, 0)),
        ),
        compiler_params=pltpu.CompilerParams(
            dimension_semantics=(("arbitrary",) if num_steps == 1 else ("parallel",)),
            vmem_limit_bytes=32 << 20,
        ),
        cost_estimate=pl.CostEstimate(
            flops=flops, transcendentals=transcendentals, bytes_accessed=bytes_accessed),
    )(z, e,
      pp["w1n"], pp["w1e"], pp["t1"],
      pp["w2"], pp["t2"],
      pp["w3"], pp["t3"],
      pp["w4"], pp["b4"])

    return out_padded[:, :OUT_FEATS].reshape(B, 1, 28, 28)


# ------------------------------ pure-JAX ref ---------------------------------
def reference_forward(noise, labels, params):
    (w1, b1), (w2, b2), (w3, b3), (w4, b4) = (
        params["lin1"], params["lin2"], params["lin3"], params["lin4"])

    def bn(h, p):
        gamma, beta, mean, var = p
        return (h - mean) / jnp.sqrt(var + BN_EPS) * gamma + beta

    B = noise.shape[0]
    x = jnp.concatenate([noise, jnp.take(params["emb"], labels, axis=0)], axis=1)
    h = jax.nn.relu(bn(x @ w1 + b1, params["bn1"]))
    h = jax.nn.relu(bn(h @ w2 + b2, params["bn2"]))
    h = jax.nn.relu(bn(h @ w3 + b3, params["bn3"]))
    h = jnp.tanh(h @ w4 + b4)
    return h.reshape(B, 1, 28, 28)


if __name__ == "__main__":
    key = jax.random.PRNGKey(0)
    k_params, k_noise, k_lbl = jax.random.split(key, 3)

    params = init_params(k_params)
    padded_params = prepare_params(params)      # BN-fold / split / bf16-cast ONCE

    B = 16                                      # small batch -> TB=16, grid=(1,), one core
    noise = jax.random.normal(k_noise, (B, Z_DIM), jnp.float32)
    labels = jax.random.randint(k_lbl, (B,), 0, 10, jnp.int32)

    fwd = jax.jit(functools.partial(generator_forward, single_buffer_weights=True))
    try:
        out = jax.block_until_ready(fwd(noise, labels, padded_params))
    except Exception:
        # Portability guard: if this jax/Mosaic build rejects pipeline_mode=pl.Buffered(1)
        # on grid-invariant operands, fall back to default double-buffering.
        fwd = jax.jit(functools.partial(generator_forward, single_buffer_weights=False))
        out = jax.block_until_ready(fwd(noise, labels, padded_params))

    ref = reference_forward(noise, labels, params)
    assert out.shape == (B, 1, 28, 28)
    # bf16 weights (BN scale folded in) + bf16 LHS with f32 accumulation -> loosened tolerance
    assert jnp.allclose(out, ref, atol=5e-2, rtol=5e-2), "mismatch vs JAX reference"

    print("KERNEL_OK")
</pallas_src>

<mosaic_0001>
module attributes {stable_mosaic.version = 11 : i64} {
  func.func @_gen_kernel(%arg0: i32, %arg1: memref<16x100xbf16, #tpu.memory_space<vmem>>, %arg2: memref<16x50xbf16, #tpu.memory_space<vmem>>, %arg3: memref<100x256xbf16, #tpu.memory_space<vmem>>, %arg4: memref<50x256xbf16, #tpu.memory_space<vmem>>, %arg5: memref<1x256xf32, #tpu.memory_space<vmem>>, %arg6: memref<256x512xbf16, #tpu.memory_space<vmem>>, %arg7: memref<1x512xf32, #tpu.memory_space<vmem>>, %arg8: memref<512x1024xbf16, #tpu.memory_space<vmem>>, %arg9: memref<1x1024xf32, #tpu.memory_space<vmem>>, %arg10: memref<1024x896xbf16, #tpu.memory_space<vmem>>, %arg11: memref<1x896xf32, #tpu.memory_space<vmem>>, %arg12: memref<16x896xf32, #tpu.memory_space<vmem>>) attributes {dimension_semantics = [#tpu.dimension_semantics<arbitrary>], iteration_bounds = array<i64: 1>, scalar_prefetch = 0 : i64, scratch_operands = 0 : i64, tpu.core_type = #tpu.core_type<tc>, window_params = [{transform_indices = @transform_0, window_bounds = array<i64: 16, 100>}, {transform_indices = @transform_1, window_bounds = array<i64: 16, 50>}, {pipeline_mode = #tpu.pipeline_mode<synchronous>, transform_indices = @transform_2, window_bounds = array<i64: 100, 256>}, {pipeline_mode = #tpu.pipeline_mode<synchronous>, transform_indices = @transform_3, window_bounds = array<i64: 50, 256>}, {pipeline_mode = #tpu.pipeline_mode<synchronous>, transform_indices = @transform_4, window_bounds = array<i64: 1, 256>}, {pipeline_mode = #tpu.pipeline_mode<synchronous>, transform_indices = @transform_5, window_bounds = array<i64: 256, 512>}, {pipeline_mode = #tpu.pipeline_mode<synchronous>, transform_indices = @transform_6, window_bounds = array<i64: 1, 512>}, {pipeline_mode = #tpu.pipeline_mode<synchronous>, transform_indices = @transform_7, window_bounds = array<i64: 512, 1024>}, {pipeline_mode = #tpu.pipeline_mode<synchronous>, transform_indices = @transform_8, window_bounds = array<i64: 1, 1024>}, {pipeline_mode = #tpu.pipeline_mode<synchronous>, transform_indices = @transform_9, window_bounds = array<i64: 1024, 896>}, {pipeline_mode = #tpu.pipeline_mode<synchronous>, transform_indices = @transform_10, window_bounds = array<i64: 1, 896>}, {transform_indices = @transform_11, window_bounds = array<i64: 16, 896>}]} {
    %c0 = arith.constant 0 : index
    %c0_0 = arith.constant 0 : index
    %0 = vector.load %arg1[%c0, %c0_0] : memref<16x100xbf16, #tpu.memory_space<vmem>>, vector<16x100xbf16>
    %c0_1 = arith.constant 0 : index
    %c0_2 = arith.constant 0 : index
    %1 = vector.load %arg3[%c0_1, %c0_2] : memref<100x256xbf16, #tpu.memory_space<vmem>>, vector<100x256xbf16>
    %cst = arith.constant dense<0.000000e+00> : vector<16x256xf32>
    %2 = tpu.matmul %0, %1, %cst {dimension_numbers = #tpu.dot_dimension_numbers<[1], [0], [0], [1], [0, 0, 1, 1], [], []>} : vector<16x100xbf16>, vector<100x256xbf16>, vector<16x256xf32> -> vector<16x256xf32>
    %c0_3 = arith.constant 0 : index
    %c0_4 = arith.constant 0 : index
    %3 = vector.load %arg2[%c0_3, %c0_4] : memref<16x50xbf16, #tpu.memory_space<vmem>>, vector<16x50xbf16>
    %c0_5 = arith.constant 0 : index
    %c0_6 = arith.constant 0 : index
    %4 = vector.load %arg4[%c0_5, %c0_6] : memref<50x256xbf16, #tpu.memory_space<vmem>>, vector<50x256xbf16>
    %cst_7 = arith.constant dense<0.000000e+00> : vector<16x256xf32>
    %5 = tpu.matmul %3, %4, %cst_7 {dimension_numbers = #tpu.dot_dimension_numbers<[1], [0], [0], [1], [0, 0, 1, 1], [], []>} : vector<16x50xbf16>, vector<50x256xbf16>, vector<16x256xf32> -> vector<16x256xf32>
    %6 = arith.addf %2, %5 : vector<16x256xf32>
    %c0_8 = arith.constant 0 : index
    %c0_9 = arith.constant 0 : index
    %7 = vector.load %arg5[%c0_8, %c0_9] : memref<1x256xf32, #tpu.memory_space<vmem>>, vector<1x256xf32>
    %8 = vector.broadcast %7 : vector<1x256xf32> to vector<16x256xf32>
    %9 = arith.addf %6, %8 : vector<16x256xf32>
    %cst_10 = arith.constant 0.000000e+00 : f32
    %10 = vector.broadcast %cst_10 : f32 to vector<16x256xf32>
    %11 = arith.maximumf %9, %10 : vector<16x256xf32>
    %12 = arith.truncf %11 : vector<16x256xf32> to vector<16x256xbf16>
    %c0_11 = arith.constant 0 : index
    %c0_12 = arith.constant 0 : index
    %13 = vector.load %arg6[%c0_11, %c0_12] : memref<256x512xbf16, #tpu.memory_space<vmem>>, vector<256x512xbf16>
    %cst_13 = arith.constant dense<0.000000e+00> : vector<16x512xf32>
    %14 = tpu.matmul %12, %13, %cst_13 {dimension_numbers = #tpu.dot_dimension_numbers<[1], [0], [0], [1], [0, 0, 1, 1], [], []>} : vector<16x256xbf16>, vector<256x512xbf16>, vector<16x512xf32> -> vector<16x512xf32>
    %c0_14 = arith.constant 0 : index
    %c0_15 = arith.constant 0 : index
    %15 = vector.load %arg7[%c0_14, %c0_15] : memref<1x512xf32, #tpu.memory_space<vmem>>, vector<1x512xf32>
    %16 = vector.broadcast %15 : vector<1x512xf32> to vector<16x512xf32>
    %17 = arith.addf %14, %16 : vector<16x512xf32>
    %cst_16 = arith.constant 0.000000e+00 : f32
    %18 = vector.broadcast %cst_16 : f32 to vector<16x512xf32>
    %19 = arith.maximumf %17, %18 : vector<16x512xf32>
    %20 = arith.truncf %19 : vector<16x512xf32> to vector<16x512xbf16>
    %c0_17 = arith.constant 0 : index
    %c0_18 = arith.constant 0 : index
    %21 = vector.load %arg8[%c0_17, %c0_18] : memref<512x1024xbf16, #tpu.memory_space<vmem>>, vector<512x1024xbf16>
    %cst_19 = arith.constant dense<0.000000e+00> : vector<16x1024xf32>
    %22 = tpu.matmul %20, %21, %cst_19 {dimension_numbers = #tpu.dot_dimension_numbers<[1], [0], [0], [1], [0, 0, 1, 1], [], []>} : vector<16x512xbf16>, vector<512x1024xbf16>, vector<16x1024xf32> -> vector<16x1024xf32>
    %c0_20 = arith.constant 0 : index
    %c0_21 = arith.constant 0 : index
    %23 = vector.load %arg9[%c0_20, %c0_21] : memref<1x1024xf32, #tpu.memory_space<vmem>>, vector<1x1024xf32>
    %24 = vector.broadcast %23 : vector<1x1024xf32> to vector<16x1024xf32>
    %25 = arith.addf %22, %24 : vector<16x1024xf32>
    %cst_22 = arith.constant 0.000000e+00 : f32
    %26 = vector.broadcast %cst_22 : f32 to vector<16x1024xf32>
    %27 = arith.maximumf %25, %26 : vector<16x1024xf32>
    %28 = arith.truncf %27 : vector<16x1024xf32> to vector<16x1024xbf16>
    %c0_23 = arith.constant 0 : index
    %c0_24 = arith.constant 0 : index
    %29 = vector.load %arg10[%c0_23, %c0_24] : memref<1024x896xbf16, #tpu.memory_space<vmem>>, vector<1024x896xbf16>
    %cst_25 = arith.constant dense<0.000000e+00> : vector<16x896xf32>
    %30 = tpu.matmul %28, %29, %cst_25 {dimension_numbers = #tpu.dot_dimension_numbers<[1], [0], [0], [1], [0, 0, 1, 1], [], []>} : vector<16x1024xbf16>, vector<1024x896xbf16>, vector<16x896xf32> -> vector<16x896xf32>
    %c0_26 = arith.constant 0 : index
    %c0_27 = arith.constant 0 : index
    %31 = vector.load %arg11[%c0_26, %c0_27] : memref<1x896xf32, #tpu.memory_space<vmem>>, vector<1x896xf32>
    %32 = vector.broadcast %31 : vector<1x896xf32> to vector<16x896xf32>
    %33 = arith.addf %30, %32 : vector<16x896xf32>
    %34 = math.tanh %33 : vector<16x896xf32>
    %c0_28 = arith.constant 0 : index
    %c0_29 = arith.constant 0 : index
    %35 = vector.load %arg12[%c0_28, %c0_29] : memref<16x896xf32, #tpu.memory_space<vmem>>, vector<16x896xf32>
    tpu.vector_store %arg12[%c0_28, %c0_29], %34 {strides = array<i32>} : memref<16x896xf32, #tpu.memory_space<vmem>>, vector<16x896xf32>,
    return
  }
  func.func @transform_0(%arg0: i32) -> (i32, i32) {
    %c0_i32 = arith.constant 0 : i32
    %c0_i32_0 = arith.constant 0 : i32
    return %arg0, %c0_i32 : i32, i32
  }
  func.func @transform_1(%arg0: i32) -> (i32, i32) {
    %c0_i32 = arith.constant 0 : i32
    %c0_i32_0 = arith.constant 0 : i32
    return %arg0, %c0_i32 : i32, i32
  }
  func.func @transform_2(%arg0: i32) -> (i32, i32) {
    %c0_i32 = arith.constant 0 : i32
    %c0_i32_0 = arith.constant 0 : i32
    %c0_i32_1 = arith.constant 0 : i32
    return %c0_i32, %c0_i32_0 : i32, i32
  }
  func.func @transform_3(%arg0: i32) -> (i32, i32) {
    %c0_i32 = arith.constant 0 : i32
    %c0_i32_0 = arith.constant 0 : i32
    %c0_i32_1 = arith.constant 0 : i32
    return %c0_i32, %c0_i32_0 : i32, i32
  }
  func.func @transform_4(%arg0: i32) -> (i32, i32) {
    %c0_i32 = arith.constant 0 : i32
    %c0_i32_0 = arith.constant 0 : i32
    %c0_i32_1 = arith.constant 0 : i32
    return %c0_i32, %c0_i32_0 : i32, i32
  }
  func.func @transform_5(%arg0: i32) -> (i32, i32) {
    %c0_i32 = arith.constant 0 : i32
    %c0_i32_0 = arith.constant 0 : i32
    %c0_i32_1 = arith.constant 0 : i32
    return %c0_i32, %c0_i32_0 : i32, i32
  }
  func.func @transform_6(%arg0: i32) -> (i32, i32) {
    %c0_i32 = arith.constant 0 : i32
    %c0_i32_0 = arith.constant 0 : i32
    %c0_i32_1 = arith.constant 0 : i32
    return %c0_i32, %c0_i32_0 : i32, i32
  }
  func.func @transform_7(%arg0: i32) -> (i32, i32) {
    %c0_i32 = arith.constant 0 : i32
    %c0_i32_0 = arith.constant 0 : i32
    %c0_i32_1 = arith.constant 0 : i32
    return %c0_i32, %c0_i32_0 : i32, i32
  }
  func.func @transform_8(%arg0: i32) -> (i32, i32) {
    %c0_i32 = arith.constant 0 : i32
    %c0_i32_0 = arith.constant 0 : i32
    %c0_i32_1 = arith.constant 0 : i32
    return %c0_i32, %c0_i32_0 : i32, i32
  }
  func.func @transform_9(%arg0: i32) -> (i32, i32) {
    %c0_i32 = arith.constant 0 : i32
    %c0_i32_0 = arith.constant 0 : i32
    %c0_i32_1 = arith.constant 0 : i32
    return %c0_i32, %c0_i32_0 : i32, i32
  }
  func.func @transform_10(%arg0: i32) -> (i32, i32) {
    %c0_i32 = arith.constant 0 : i32
    %c0_i32_0 = arith.constant 0 : i32
    %c0_i32_1 = arith.constant 0 : i32
    return %c0_i32, %c0_i32_0 : i32, i32
  }
  func.func @transform_11(%arg0: i32) -> (i32, i32) {
    %c0_i32 = arith.constant 0 : i32
    %c0_i32_0 = arith.constant 0 : i32
    return %arg0, %c0_i32 : i32, i32
  }
}

module attributes {stable_mosaic.version = 11 : i64} {
  func.func @_gen_kernel(%arg0: i32, %arg1: memref<16x100xbf16, #tpu.memory_space<vmem>>, %arg2: memref<16x50xbf16, #tpu.memory_space<vmem>>, %arg3: memref<100x256xbf16, #tpu.memory_space<vmem>>, %arg4: memref<50x256xbf16, #tpu.memory_space<vmem>>, %arg5: memref<1x256xf32, #tpu.memory_space<vmem>>, %arg6: memref<256x512xbf16, #tpu.memory_space<vmem>>, %arg7: memref<1x512xf32, #tpu.memory_space<vmem>>, %arg8: memref<512x1024xbf16, #tpu.memory_space<vmem>>, %arg9: memref<1x1024xf32, #tpu.memory_space<vmem>>, %arg10: memref<1024x896xbf16, #tpu.memory_space<vmem>>, %arg11: memref<1x896xf32, #tpu.memory_space<vmem>>, %arg12: memref<16x896xf32, #tpu.memory_space<vmem>>) attributes {dimension_semantics = [#tpu.dimension_semantics<arbitrary>], iteration_bounds = array<i64: 1>, scalar_prefetch = 0 : i64, scratch_operands = 0 : i64, tpu.core_type = #tpu.core_type<tc>, window_params = [{transform_indices = @transform_0, window_bounds = array<i64: 16, 100>}, {transform_indices = @transform_1, window_bounds = array<i64: 16, 50>}, {pipeline_mode = #tpu.pipeline_mode<synchronous>, transform_indices = @transform_2, window_bounds = array<i64: 100, 256>}, {pipeline_mode = #tpu.pipeline_mode<synchronous>, transform_indices = @transform_3, window_bounds = array<i64: 50, 256>}, {pipeline_mode = #tpu.pipeline_mode<synchronous>, transform_indices = @transform_4, window_bounds = array<i64: 1, 256>}, {pipeline_mode = #tpu.pipeline_mode<synchronous>, transform_indices = @transform_5, window_bounds = array<i64: 256, 512>}, {pipeline_mode = #tpu.pipeline_mode<synchronous>, transform_indices = @transform_6, window_bounds = array<i64: 1, 512>}, {pipeline_mode = #tpu.pipeline_mode<synchronous>, transform_indices = @transform_7, window_bounds = array<i64: 512, 1024>}, {pipeline_mode = #tpu.pipeline_mode<synchronous>, transform_indices = @transform_8, window_bounds = array<i64: 1, 1024>}, {pipeline_mode = #tpu.pipeline_mode<synchronous>, transform_indices = @transform_9, window_bounds = array<i64: 1024, 896>}, {pipeline_mode = #tpu.pipeline_mode<synchronous>, transform_indices = @transform_10, window_bounds = array<i64: 1, 896>}, {transform_indices = @transform_11, window_bounds = array<i64: 16, 896>}]} {
    %c0 = arith.constant 0 : index
    %c0_0 = arith.constant 0 : index
    %0 = vector.load %arg1[%c0, %c0_0] : memref<16x100xbf16, #tpu.memory_space<vmem>>, vector<16x100xbf16>
    %c0_1 = arith.constant 0 : index
    %c0_2 = arith.constant 0 : index
    %1 = vector.load %arg3[%c0_1, %c0_2] : memref<100x256xbf16, #tpu.memory_space<vmem>>, vector<100x256xbf16>
    %cst = arith.constant dense<0.000000e+00> : vector<16x256xf32>
    %2 = tpu.matmul %0, %1, %cst {dimension_numbers = #tpu.dot_dimension_numbers<[1], [0], [0], [1], [0, 0, 1, 1], [], []>} : vector<16x100xbf16>, vector<100x256xbf16>, vector<16x256xf32> -> vector<16x256xf32>
    %c0_3 = arith.constant 0 : index
    %c0_4 = arith.constant 0 : index
    %3 = vector.load %arg2[%c0_3, %c0_4] : memref<16x50xbf16, #tpu.memory_space<vmem>>, vector<16x50xbf16>
    %c0_5 = arith.constant 0 : index
    %c0_6 = arith.constant 0 : index
    %4 = vector.load %arg4[%c0_5, %c0_6] : memref<50x256xbf16, #tpu.memory_space<vmem>>, vector<50x256xbf16>
    %cst_7 = arith.constant dense<0.000000e+00> : vector<16x256xf32>
    %5 = tpu.matmul %3, %4, %cst_7 {dimension_numbers = #tpu.dot_dimension_numbers<[1], [0], [0], [1], [0, 0, 1, 1], [], []>} : vector<16x50xbf16>, vector<50x256xbf16>, vector<16x256xf32> -> vector<16x256xf32>
    %6 = arith.addf %2, %5 : vector<16x256xf32>
    %c0_8 = arith.constant 0 : index
    %c0_9 = arith.constant 0 : index
    %7 = vector.load %arg5[%c0_8, %c0_9] : memref<1x256xf32, #tpu.memory_space<vmem>>, vector<1x256xf32>
    %8 = vector.broadcast %7 : vector<1x256xf32> to vector<16x256xf32>
    %9 = arith.addf %6, %8 : vector<16x256xf32>
    %cst_10 = arith.constant 0.000000e+00 : f32
    %10 = vector.broadcast %cst_10 : f32 to vector<16x256xf32>
    %11 = arith.maximumf %9, %10 : vector<16x256xf32>
    %12 = arith.truncf %11 : vector<16x256xf32> to vector<16x256xbf16>
    %c0_11 = arith.constant 0 : index
    %c0_12 = arith.constant 0 : index
    %13 = vector.load %arg6[%c0_11, %c0_12] : memref<256x512xbf16, #tpu.memory_space<vmem>>, vector<256x512xbf16>
    %cst_13 = arith.constant dense<0.000000e+00> : vector<16x512xf32>
    %14 = tpu.matmul %12, %13, %cst_13 {dimension_numbers = #tpu.dot_dimension_numbers<[1], [0], [0], [1], [0, 0, 1, 1], [], []>} : vector<16x256xbf16>, vector<256x512xbf16>, vector<16x512xf32> -> vector<16x512xf32>
    %c0_14 = arith.constant 0 : index
    %c0_15 = arith.constant 0 : index
    %15 = vector.load %arg7[%c0_14, %c0_15] : memref<1x512xf32, #tpu.memory_space<vmem>>, vector<1x512xf32>
    %16 = vector.broadcast %15 : vector<1x512xf32> to vector<16x512xf32>
    %17 = arith.addf %14, %16 : vector<16x512xf32>
    %cst_16 = arith.constant 0.000000e+00 : f32
    %18 = vector.broadcast %cst_16 : f32 to vector<16x512xf32>
    %19 = arith.maximumf %17, %18 : vector<16x512xf32>
    %20 = arith.truncf %19 : vector<16x512xf32> to vector<16x512xbf16>
    %c0_17 = arith.constant 0 : index
    %c0_18 = arith.constant 0 : index
    %21 = vector.load %arg8[%c0_17, %c0_18] : memref<512x1024xbf16, #tpu.memory_space<vmem>>, vector<512x1024xbf16>
    %cst_19 = arith.constant dense<0.000000e+00> : vector<16x1024xf32>
    %22 = tpu.matmul %20, %21, %cst_19 {dimension_numbers = #tpu.dot_dimension_numbers<[1], [0], [0], [1], [0, 0, 1, 1], [], []>} : vector<16x512xbf16>, vector<512x1024xbf16>, vector<16x1024xf32> -> vector<16x1024xf32>
    %c0_20 = arith.constant 0 : index
    %c0_21 = arith.constant 0 : index
    %23 = vector.load %arg9[%c0_20, %c0_21] : memref<1x1024xf32, #tpu.memory_space<vmem>>, vector<1x1024xf32>
    %24 = vector.broadcast %23 : vector<1x1024xf32> to vector<16x1024xf32>
    %25 = arith.addf %22, %24 : vector<16x1024xf32>
    %cst_22 = arith.constant 0.000000e+00 : f32
    %26 = vector.broadcast %cst_22 : f32 to vector<16x1024xf32>
    %27 = arith.maximumf %25, %26 : vector<16x1024xf32>
    %28 = arith.truncf %27 : vector<16x1024xf32> to vector<16x1024xbf16>
    %c0_23 = arith.constant 0 : index
    %c0_24 = arith.constant 0 : index
    %29 = vector.load %arg10[%c0_23, %c0_24] : memref<1024x896xbf16, #tpu.memory_space<vmem>>, vector<1024x896xbf16>
    %cst_25 = arith.constant dense<0.000000e+00> : vector<16x896xf32>
    %30 = tpu.matmul %28, %29, %cst_25 {dimension_numbers = #tpu.dot_dimension_numbers<[1], [0], [0], [1], [0, 0, 1, 1], [], []>} : vector<16x1024xbf16>, vector<1024x896xbf16>, vector<16x896xf32> -> vector<16x896xf32>
    %c0_26 = arith.constant 0 : index
    %c0_27 = arith.constant 0 : index
    %31 = vector.load %arg11[%c0_26, %c0_27] : memref<1x896xf32, #tpu.memory_space<vmem>>, vector<1x896xf32>
    %32 = vector.broadcast %31 : vector<1x896xf32> to vector<16x896xf32>
    %33 = arith.addf %30, %32 : vector<16x896xf32>
    %34 = math.tanh %33 : vector<16x896xf32>
    %c0_28 = arith.constant 0 : index
    %c0_29 = arith.constant 0 : index
    %35 = vector.load %arg12[%c0_28, %c0_29] : memref<16x896xf32, #tpu.memory_space<vmem>>, vector<16x896xf32>
    tpu.vector_store %arg12[%c0_28, %c0_29], %34 {strides = array<i32>} : memref<16x896xf32, #tpu.memory_space<vmem>>, vector<16x896xf32>,
    return
  }
  func.func @transform_0(%arg0: i32) -> (i32, i32) {
    %c0_i32 = arith.constant 0 : i32
    %c0_i32_0 = arith.constant 0 : i32
    return %arg0, %c0_i32 : i32, i32
  }
  func.func @transform_1(%arg0: i32) -> (i32, i32) {
    %c0_i32 = arith.constant 0 : i32
    %c0_i32_0 = arith.constant 0 : i32
    return %arg0, %c0_i32 : i32, i32
  }
  func.func @transform_2(%arg0: i32) -> (i32, i32) {
    %c0_i32 = arith.constant 0 : i32
    %c0_i32_0 = arith.constant 0 : i32
    %c0_i32_1 = arith.constant 0 : i32
    return %c0_i32, %c0_i32_0 : i32, i32
  }
  func.func @transform_3(%arg0: i32) -> (i32, i32) {
    %c0_i32 = arith.constant 0 : i32
    %c0_i32_0 = arith.constant 0 : i32
    %c0_i32_1 = arith.constant 0 : i32
    return %c0_i32, %c0_i32_0 : i32, i32
  }
  func.func @transform_4(%arg0: i32) -> (i32, i32) {
    %c0_i32 = arith.constant 0 : i32
    %c0_i32_0 = arith.constant 0 : i32
    %c0_i32_1 = arith.constant 0 : i32
    return %c0_i32, %c0_i32_0 : i32, i32
  }
  func.func @transform_5(%arg0: i32) -> (i32, i32) {
    %c0_i32 = arith.constant 0 : i32
    %c0_i32_0 = arith.constant 0 : i32
    %c0_i32_1 = arith.constant 0 : i32
    return %c0_i32, %c0_i32_0 : i32, i32
  }
  func.func @transform_6(%arg0: i32) -> (i32, i32) {
    %c0_i32 = arith.constant 0 : i32
    %c0_i32_0 = arith.constant 0 : i32
    %c0_i32_1 = arith.constant 0 : i32
    return %c0_i32, %c0_i32_0 : i32, i32
  }
  func.func @transform_7(%arg0: i32) -> (i32, i32) {
    %c0_i32 = arith.constant 0 : i32
    %c0_i32_0 = arith.constant 0 : i32
    %c0_i32_1 = arith.constant 0 : i32
    return %c0_i32, %c0_i32_0 : i32, i32
  }
  func.func @transform_8(%arg0: i32) -> (i32, i32) {
    %c0_i32 = arith.constant 0 : i32
    %c0_i32_0 = arith.constant 0 : i32
    %c0_i32_1 = arith.constant 0 : i32
    return %c0_i32, %c0_i32_0 : i32, i32
  }
  func.func @transform_9(%arg0: i32) -> (i32, i32) {
    %c0_i32 = arith.constant 0 : i32
    %c0_i32_0 = arith.constant 0 : i32
    %c0_i32_1 = arith.constant 0 : i32
    return %c0_i32, %c0_i32_0 : i32, i32
  }
  func.func @transform_10(%arg0: i32) -> (i32, i32) {
    %c0_i32 = arith.constant 0 : i32
    %c0_i32_0 = arith.constant 0 : i32
    %c0_i32_1 = arith.constant 0 : i32
    return %c0_i32, %c0_i32_0 : i32, i32
  }
  func.func @transform_11(%arg0: i32) -> (i32, i32) {
    %c0_i32 = arith.constant 0 : i32
    %c0_i32_0 = arith.constant 0 : i32
    return %arg0, %c0_i32 : i32, i32
  }
}

</mosaic_0001>

<bundles_post_ra>
// kernel: generator_forward.1
= control target key start
LH: loop header
LB: loop body
LE: loop exit
PB: predicated region body
PF: predicated region fallthrough
CT: control target
= control target key end

     0   :  { %16 = vsyncpa [#allocation3], 0  ;;  %s8632_s0 = inlined_call_operand.vmem [shape: bf16[16,100], index: 0, kind: input, shape index: {}]   ;;  %s8633_s1 = inlined_call_operand.vmem [shape: bf16[16,50], index: 1, kind: input, shape index: {}]   ;;  %s8634_s2 = inlined_call_operand.hbm [shape: bf16[100,256], index: 2, kind: input, shape index: {}]   ;;  %s8635_s3 = inlined_call_operand.hbm [shape: bf16[50,256], index: 3, kind: input, shape index: {}]   ;;  %s8636_s4 = inlined_call_operand.hbm [shape: f32[1,256], index: 4, kind: input, shape index: {}]   ;;  %s8637_s5 = inlined_call_operand.hbm [shape: bf16[256,512], index: 5, kind: input, shape index: {}]   ;;  %s8638_s6 = inlined_call_operand.hbm [shape: f32[1,512], index: 6, kind: input, shape index: {}]   ;;  %s8639_s7 = inlined_call_operand.hbm [shape: bf16[512,1024], index: 7, kind: input, shape index: {}]   ;;  %s8640_s8 = inlined_call_operand.hbm [shape: f32[1,1024], index: 8, kind: input, shape index: {}]   ;;  %s8641_s9 = inlined_call_operand.hbm [shape: bf16[1024,896], index: 9, kind: input, shape index: {}]   ;;  %s8642_s10 = inlined_call_operand.hbm [shape: f32[1,896], index: 10, kind: input, shape index: {}]   ;;  %s8643_s11 = inlined_call_operand.vmem [shape: f32[16,896], index: 11, kind: output, shape index: {}]  }
   0x1   :  { %17 = vsyncpa [#allocation5], 0 }
   0x2   :  { %18 = vsyncpa [#allocation8], 0 }
   0x3   :  { %19 = vsyncpa [#allocation11], 0 }
   0x4   :  { %20 = vsyncpa [#allocation14], 0  ;;  %s8326_s17 = smov [#allocation4]   ;;  %s8327_s19 = smov [#allocation7]  }
   0x5   :  { %s42_s18 = sshll.u32 %s8326_s17, 4  ;;  %s64_s20 = sshll.u32 %s8327_s19, 4  ;;  %s43_s18 = int_to_ptr.vmem [resolvable:$true] %s42_s18  ;;  %s65_s20 = int_to_ptr.vmem [resolvable:$true] %s64_s20 }
   0x6   :  { %s8144_s21 = scalar_lea.vmem %s43_s18, 896  ;;  %p8149_p1 = scmp.lt.s32.totalorder %s43_s18, %s43_s18 }
   0x7   :  { %p8145_p0 = scmp.ne.s32.totalorder %s43_s18, %s8144_s21  ;;  %p8150_p2 = scmp.lt.s32.totalorder %s8144_s21, %s8144_s21 }
   0x9   :  { %p8151_p3 = por %p8150_p2, %p8149_p1 }
   0xb   :  { %p8152_p4 = pnand %p8151_p3, %p8145_p0 }
   0xd   :  { %8155 = shalt.err (!%p8152_p4)
}
   0xe   :  { %s8328_s22 = smov 128   ;;  %s8329_s23 = smov 8  }
   0xf   :  { %48 = dma.hbm_to_vmem [thread:$0]  %s8635_s3, 896, %s43_s18, [#allocation5], %s8328_s22, %s8328_s22, %s8329_s23  }
  0x10   :  { %s8164_s26 = scalar_lea.vmem %s65_s20, 8192  ;;  %p8169_p6 = scmp.lt.s32.totalorder %s65_s20, %s65_s20 }
  0x11   :  { %p8165_p5 = scmp.ne.s32.totalorder %s65_s20, %s8164_s26  ;;  %p8170_p7 = scmp.lt.s32.totalorder %s8164_s26, %s8164_s26 }
  0x13   :  { %p8171_p8 = por %p8170_p7, %p8169_p6 }
  0x15   :  { %p8172_p9 = pnand %p8171_p8, %p8165_p5 }
  0x17   :  { %8175 = shalt.err (!%p8172_p9)
}
  0x18   :  { %s8330_s27 = smov 256   ;;  %s8331_s28 = smov 16  }
  0x19   :  { %70 = dma.hbm_to_vmem [thread:$0]  %s8637_s5, 8192, %s65_s20, [#allocation8], %s8330_s27, %s8330_s27, %s8331_s28  }
  0x1a   :  { %s8332_s12 = smov [#allocation10]  }
  0x1b   :  { %s86_s13 = sshll.u32 %s8332_s12, 4  ;;  %s87_s13 = int_to_ptr.vmem [resolvable:$true] %s86_s13 }
  0x1c   :  { %s8184_s14 = scalar_lea.vmem %s87_s13, 32768  ;;  %p8189_p11 = scmp.lt.s32.totalorder %s87_s13, %s87_s13 }
  0x1d   :  { %p8185_p10 = scmp.ne.s32.totalorder %s87_s13, %s8184_s14  ;;  %p8190_p12 = scmp.lt.s32.totalorder %s8184_s14, %s8184_s14 }
  0x1f   :  { %p8191_p13 = por %p8190_p12, %p8189_p11 }
  0x21   :  { %p8192_p0 = pnand %p8191_p13, %p8185_p10 }
  0x23   :  { %8195 = shalt.err (!%p8192_p0)
}
  0x24   :  { %s8333_s3 = smov 512   ;;  %s8334_s15 = smov 32  }
  0x25   :  { %92 = dma.hbm_to_vmem [thread:$0]  %s8639_s7, 32768, %s87_s13, [#allocation11], %s8333_s3, %s8333_s3, %s8334_s15  }
  0x26   :  { %s8335_s18 = smov [#allocation13]  }
  0x27   :  { %s108_s19 = sshll.u32 %s8335_s18, 4  ;;  %s109_s19 = int_to_ptr.vmem [resolvable:$true] %s108_s19 }
  0x28   :  { %s8204_s5 = scalar_lea.vmem %s109_s19, 57344  ;;  %p8209_p2 = scmp.lt.s32.totalorder %s109_s19, %s109_s19 }
  0x29   :  { %p8205_p1 = scmp.ne.s32.totalorder %s109_s19, %s8204_s5  ;;  %p8210_p3 = scmp.lt.s32.totalorder %s8204_s5, %s8204_s5 }
  0x2b   :  { %p8211_p4 = por %p8210_p3, %p8209_p2 }
  0x2d   :  { %p8212_p5 = pnand %p8211_p4, %p8205_p1 }
  0x2f   :  { %8215 = shalt.err (!%p8212_p5)
}
  0x30   :  { %s8336_s20 = smov 448   ;;  %s8337_s21 = smov 28  }
  0x31   :  { %114 = dma.hbm_to_vmem [thread:$0]  %s8641_s9, 57344, %s109_s19, [#allocation14], %s8336_s20, %s8336_s20, %s8337_s21  }
  0x32   :  { %s8338_s26 = smov [#allocation2]   ;;  %s8339_s28 = smov [#allocation6]  }
  0x33   :  { %s30_s27 = sshll.u32 %s8338_s26, 4  ;;  %s55_s7 = sshll.u32 %s8339_s28, 4  ;;  %s31_s27 = int_to_ptr.vmem [resolvable:$true] %s30_s27  ;;  %s56_s7 = int_to_ptr.vmem [resolvable:$true] %s55_s7 }
  0x34   :  { %s8224_s29 = scalar_lea.vmem %s31_s27, 1664  ;;  %p8229_p7 = scmp.lt.s32.totalorder %s31_s27, %s31_s27 }
  0x35   :  { %p8225_p6 = scmp.ne.s32.totalorder %s31_s27, %s8224_s29  ;;  %p8230_p8 = scmp.lt.s32.totalorder %s8224_s29, %s8224_s29 }
  0x37   :  { %p8231_p9 = por %p8230_p8, %p8229_p7 }
  0x39   :  { %p8232_p10 = pnand %p8231_p9, %p8225_p6 }
  0x3b   :  { %8235 = shalt.err (!%p8232_p10)
}
  0x3c   :  { %36 = dma.hbm_to_vmem [thread:$0]  %s8634_s2, 1664, %s31_s27, [#allocation3], %s8328_s22, %s8328_s22, %s8329_s23  }
  0x3d   :  { %s8244_s9 = scalar_lea.vmem %s56_s7, 32  ;;  %p8249_p12 = scmp.lt.s32.totalorder %s56_s7, %s56_s7 }
  0x3e   :  { %p8245_p11 = scmp.ne.s32.totalorder %s56_s7, %s8244_s9  ;;  %p8250_p13 = scmp.lt.s32.totalorder %s8244_s9, %s8244_s9 }
  0x40   :  { %p8251_p0 = por %p8250_p13, %p8249_p12 }
  0x42   :  { %p8252_p1 = pnand %p8251_p0, %p8245_p11 }
  0x44   :  { %8255 = shalt.err (!%p8252_p1)
}
  0x45   :  { %58 = dma.hbm_to_vmem [thread:$0]  %s8636_s4, 32, %s56_s7, [#allocation5]  }
  0x46   :  { %s8340_s3 = smov [#allocation9]   ;;  %s8341_s16 = smov [#allocation12]  }
  0x47   :  { %s77_s15 = sshll.u32 %s8340_s3, 4  ;;  %s99_s17 = sshll.u32 %s8341_s16, 4  ;;  %s78_s15 = int_to_ptr.vmem [resolvable:$true] %s77_s15  ;;  %s100_s17 = int_to_ptr.vmem [resolvable:$true] %s99_s17 }
  0x48   :  { %s8264_s18 = scalar_lea.vmem %s78_s15, 64  ;;  %p8269_p3 = scmp.lt.s32.totalorder %s78_s15, %s78_s15 }
  0x49   :  { %p8265_p2 = scmp.ne.s32.totalorder %s78_s15, %s8264_s18  ;;  %p8270_p4 = scmp.lt.s32.totalorder %s8264_s18, %s8264_s18 }
  0x4b   :  { %p8271_p5 = por %p8270_p4, %p8269_p3 }
  0x4d   :  { %p8272_p6 = pnand %p8271_p5, %p8265_p2 }
  0x4f   :  { %8275 = shalt.err (!%p8272_p6)
}
  0x50   :  { %80 = dma.hbm_to_vmem [thread:$0]  %s8638_s6, 64, %s78_s15, [#allocation8]  }
  0x51   :  { %s8284_s23 = scalar_lea.vmem %s100_s17, 128  ;;  %p8289_p8 = scmp.lt.s32.totalorder %s100_s17, %s100_s17 }
  0x52   :  { %p8285_p7 = scmp.ne.s32.totalorder %s100_s17, %s8284_s23  ;;  %p8290_p9 = scmp.lt.s32.totalorder %s8284_s23, %s8284_s23 }
  0x54   :  { %p8291_p10 = por %p8290_p9, %p8289_p8 }
  0x56   :  { %p8292_p11 = pnand %p8291_p10, %p8285_p7 }
  0x58   :  { %8295 = shalt.err (!%p8292_p11)
}
  0x59   :  { %102 = dma.hbm_to_vmem [thread:$0]  %s8640_s8, 128, %s100_s17, [#allocation11]  }
  0x5a   :  { %s8342_s5 = smov [#allocation15]  }
  0x5b   :  { %s121_s20 = sshll.u32 %s8342_s5, 4  ;;  %s122_s20 = int_to_ptr.vmem [resolvable:$true] %s121_s20 }
  0x5c   :  { %s8304_s21 = scalar_lea.vmem %s122_s20, 112  ;;  %s8308_s24 = scalar_lea.vmem %s122_s20, 128 }
  0x5d   :  { %p8305_p12 = scmp.ne.s32.totalorder %s122_s20, %s8304_s21  ;;  %p8309_p13 = scmp.lt.s32.totalorder %s122_s20, %s122_s20 }
  0x5e   :  { %p8310_p0 = scmp.lt.s32.totalorder %s8308_s24, %s8304_s21 }
  0x60   :  { %p8311_p1 = por %p8310_p0, %p8309_p13 }
  0x62   :  { %p8312_p2 = pnand %p8311_p1, %p8305_p12 }
  0x64   :  { %8315 = shalt.err (!%p8312_p2)
}
  0x65   :  { %124 = dma.hbm_to_vmem [thread:$0]  %s8642_s10, 112, %s122_s20, [#allocation14]  }
  0x66   :  { %8316 = dma.done.wait [#allocation3], 1664  }
  0x67   :  { %8317 = vsyncadd [#allocation3], 4294965632 }
  0x68   :  { %8318 = dma.done.wait [#allocation5], 928  }
  0x69   :  { %8319 = vsyncadd [#allocation5], 4294966368 }
  0x6a   :  { %8320 = dma.done.wait [#allocation8], 8256  }
  0x6b   :  { %8321 = vsyncadd [#allocation8], 4294959040 }
  0x6c   :  { %8322 = dma.done.wait [#allocation11], 32896  }
  0x6d   :  { %8323 = vsyncadd [#allocation11], 4294934400 }
  0x6e   :  { %8324 = dma.done.wait [#allocation14], 57456  }
  0x6f   :  { %8325 = vsyncadd [#allocation14], 4294909840  ;;  %v8343_v0 = vmov 0   ;;  %v167_v1 = vld [vmem:[#allocation2 + $0x60] sm:$0x33]  ;;  %vm345_vm0 = vcmask 1041408  }
  0x70   :  { %260 = vmatprep.mubr.bf16.mxu0 %v8343_v0  ;;  %384 = vmatprep.mubr.bf16.mxu1 %v8343_v0  ;;  %v6462_v2 = vcombine.high %v167_v1, %v167_v1  ;;  %v6461_v3 = vcombine.low %v167_v1, %v167_v1  ;;  %v7341_v4 = vld [vmem:[#allocation2 + $0x54] ss:$8 sps:$4 sm:$0xff]   ;;  %vm221_vm1 = vcmask 1040384   ;;  %v7343_v9 = vld [vmem:[#allocation2 + $0x50] ss:$8 sps:$4 sm:$0xff]   ;;  %v7367_v25 = vld [vmem:[%s8633_s1] sm:$0xff]  }
  0x71   :  { %v176_v5 = vld [vmem:[#allocation4 + $0x30] sm:$0x11]  ;;  %v7349_v11 = vld [vmem:[#allocation4 + $0x24] ss:$8 sps:$4 sm:$0xff]   ;;  %v7351_v13 = vld [vmem:[#allocation4 + $0x20] ss:$8 sps:$4 sm:$0xff]  }
  0x72   :  { %v6445_v6 = vcombine.high %v176_v5, %v176_v5  ;;  %v6444_v7 = vcombine.low %v176_v5, %v176_v5  ;;  %6463 = vmatprep.subr.msk.bf16.mxu1 %vm345_vm0, %v6462_v2  ;;  %v347_v8 = vsel %vm345_vm0, %v6461_v3, 0  ;;  %v7346_v12 = vld [vmem:[#allocation2 + $0x44] ss:$8 sps:$4 sm:$0xff]   ;;  %v7348_v15 = vld [vmem:[#allocation2 + $0x40] ss:$8 sps:$4 sm:$0xff]   ;;  %vm217_vm2 = vcmask 408576  }
  0x73   :  { %355 = vmatpush1.bf16.msra.mxu1 %v347_v8  ;;  %v7355_v14 = vld [vmem:[#allocation4 + $0x14] ss:$8 sps:$4 sm:$0xff]   ;;  %v7357_v17 = vld [vmem:[#allocation4 + $0x10] ss:$8 sps:$4 sm:$0xff]   ;;  %v7361_v18 = vld [vmem:[#allocation4 + $0x4] ss:$8 sps:$4 sm:$0xff]  }
  0x74   :  { %6446 = vmatprep.subr.msk.bf16.mxu0 %vm221_vm1, %v6445_v6  ;;  %v223_v10 = vsel %vm221_vm1, %v6444_v7, 0  ;;  %356 = vmatprep.subr.bf16.mxu1 %v7341_v4  ;;  %v7352_v16 = vld [vmem:[#allocation2 + $0x34] ss:$8 sps:$4 sm:$0xff]   ;;  %v7354_v19 = vld [vmem:[#allocation2 + $0x30] ss:$8 sps:$4 sm:$0xff]   ;;  %v7371_v36 = vld [vmem:[%s8632_s0] sm:$0xff]  }
  0x75   :  { %237 = vmatpush1.bf16.msra.mxu0 %v223_v10  ;;  %v7358_v20 = vld [vmem:[#allocation2 + $0x24] ss:$8 sps:$4 sm:$0xff]   ;;  %v7363_v21 = vld [vmem:[#allocation4] ss:$8 sps:$4 sm:$0xff]   ;;  %v7364_v23 = vld [vmem:[#allocation2 + $0x14] ss:$8 sps:$4 sm:$0xff]  }
  0x76   :  { %238 = vmatprep.subr.bf16.mxu0 %v7349_v11  ;;  %v7360_v22 = vld [vmem:[#allocation2 + $0x20] ss:$8 sps:$4 sm:$0xff]   ;;  %v7366_v28 = vld [vmem:[#allocation2 + $0x10] ss:$8 sps:$4 sm:$0xff]   ;;  %v7368_v29 = vld [vmem:[#allocation2 + $0x4] ss:$8 sps:$4 sm:$0xff]  }
  0x77   :  { %357 = vmatpush1.bf16.msra.mxu1 %v7343_v9  ;;  %v7374_v24 = vld [vmem:[#allocation7 + $0xe4] ss:$16 sps:$4 sm:$0xff]   ;;  %v7372_v26 = vld [vmem:[#allocation7 + $0xe0] ss:$16 sps:$4 sm:$0xff]   ;;  %v7377_v33 = vld [vmem:[#allocation7 + $0xec] ss:$16 sps:$4 sm:$0xff]  }
  0x78   :  { %358 = vmatprep.subr.bf16.mxu1 %v7346_v12  ;;  %v7380_v27 = vld [vmem:[#allocation7 + $0xc4] ss:$16 sps:$4 sm:$0xff]   ;;  %v7378_v30 = vld [vmem:[#allocation7 + $0xc0] ss:$16 sps:$4 sm:$0xff]   ;;  %v7375_v37 = vld [vmem:[#allocation7 + $0xe8] ss:$16 sps:$4 sm:$0xff]  }
  0x79   :  { %239 = vmatpush1.bf16.msra.mxu0 %v7351_v13  ;;  %v7386_v31 = vld [vmem:[#allocation7 + $0xa4] ss:$16 sps:$4 sm:$0xff]   ;;  %v7384_v34 = vld [vmem:[#allocation7 + $0xa0] ss:$16 sps:$4 sm:$0xff]   ;;  %vm341_vm3 = vcmask 818176  }
  0x7a   :  { %240 = vmatprep.subr.bf16.mxu0 %v7355_v14  ;;  %v7370_v32 = vld [vmem:[#allocation2] ss:$8 sps:$4 sm:$0xff]  }
  0x7b   :  { %359 = vmatpush1.bf16.msra.mxu1 %v7348_v15  ;;  %v7392_v35 = vld [vmem:[#allocation7 + $0x84] ss:$16 sps:$4 sm:$0xff]   ;;  %v7383_v38 = vld [vmem:[#allocation7 + $0xcc] ss:$16 sps:$4 sm:$0xff]   ;;  %v7390_v39 = vld [vmem:[#allocation7 + $0x80] ss:$16 sps:$4 sm:$0xff]  }
  0x7c   :  { %360 = vmatprep.subr.bf16.mxu1 %v7352_v16  ;;  %v7398_v40 = vld [vmem:[#allocation7 + $0x64] ss:$16 sps:$4 sm:$0xff]   ;;  %v7381_v41 = vld [vmem:[#allocation7 + $0xc8] ss:$16 sps:$4 sm:$0xff]   ;;  %v7389_v42 = vld [vmem:[#allocation7 + $0xac] ss:$16 sps:$4 sm:$0xff]  }
  0x7d   :  { %241 = vmatpush1.bf16.msra.mxu0 %v7357_v17  ;;  %v7396_v43 = vld [vmem:[#allocation7 + $0x60] ss:$16 sps:$4 sm:$0xff]   ;;  %v7404_v44 = vld [vmem:[#allocation7 + $0x44] ss:$16 sps:$4 sm:$0xff]   ;;  %v7387_v45 = vld [vmem:[#allocation7 + $0xa8] ss:$16 sps:$4 sm:$0xff]  }
  0x7e   :  { %242 = vmatprep.subr.bf16.mxu0 %v7361_v18  ;;  %v7395_v46 = vld [vmem:[#allocation7 + $0x8c] ss:$16 sps:$4 sm:$0xff]   ;;  %v7402_v47 = vld [vmem:[#allocation7 + $0x40] ss:$16 sps:$4 sm:$0xff]   ;;  %v7410_v48 = vld [vmem:[#allocation7 + $0x24] ss:$16 sps:$4 sm:$0xff]  }
  0x7f   :  { %361 = vmatpush1.bf16.msra.mxu1 %v7354_v19  ;;  %v7393_v49 = vld [vmem:[#allocation7 + $0x88] ss:$16 sps:$4 sm:$0xff]   ;;  %v7401_v50 = vld [vmem:[#allocation7 + $0x6c] ss:$16 sps:$4 sm:$0xff]   ;;  %v7408_v51 = vld [vmem:[#allocation7 + $0x20] ss:$16 sps:$4 sm:$0xff]  }
  0x80   :  { %362 = vmatprep.subr.bf16.mxu1 %v7358_v20  ;;  %v7399_v52 = vld [vmem:[#allocation7 + $0x68] ss:$16 sps:$4 sm:$0xff]   ;;  %v7416_v53 = vld [vmem:[#allocation7 + $0x4] ss:$16 sps:$4 sm:$0xff]   ;;  %v7407_v54 = vld [vmem:[#allocation7 + $0x4c] ss:$16 sps:$4 sm:$0xff]  }
  0x81   :  { %243 = vmatpush1.bf16.msra.mxu0 %v7363_v21  ;;  %v7414_v55 = vld [vmem:[#allocation7] ss:$16 sps:$4 sm:$0xff]   ;;  %v7422_v56 = vld [vmem:[#allocation7 + $0x1e4] ss:$16 sps:$4 sm:$0xff]   ;;  %v7405_v57 = vld [vmem:[#allocation7 + $0x48] ss:$16 sps:$4 sm:$0xff]  }
  0x82   :  { %823 = vmatprep.subr.bf16.mxu0 %v7374_v24  ;;  %v7413_v58 = vld [vmem:[#allocation7 + $0x2c] ss:$16 sps:$4 sm:$0xff]   ;;  %v7420_v59 = vld [vmem:[#allocation7 + $0x1e0] ss:$16 sps:$4 sm:$0xff]   ;;  %v7428_v60 = vld [vmem:[#allocation7 + $0x1c4] ss:$16 sps:$4 sm:$0xff]  }
  0x83   :  { %363 = vmatpush1.bf16.msra.mxu1 %v7360_v22  ;;  %v7411_v61 = vld [vmem:[#allocation7 + $0x28] ss:$16 sps:$4 sm:$0xff]   ;;  %v7419_v62 = vld [vmem:[#allocation7 + $0xc] ss:$16 sps:$4 sm:$0xff]   ;;  %v7426_v63 = vld [vmem:[#allocation7 + $0x1c0] ss:$16 sps:$4 sm:$0xff]  }
  0x84   :  { %6447 = vmatmul.mubr.msk.bf16.vlgmr.msra.gmra.mxu0 %vm217_vm2, %v7367_v25  ;;  %364 = vmatprep.subr.bf16.mxu1 %v7364_v23  ;;  %v7434_v0 = vld [vmem:[#allocation7 + $0x1a4] ss:$16 sps:$4 sm:$0xff]   ;;  %v7417_v1 = vld [vmem:[#allocation7 + $0x8] ss:$16 sps:$4 sm:$0xff]   ;;  %v7425_v2 = vld [vmem:[#allocation7 + $0x1ec] ss:$16 sps:$4 sm:$0xff]  }
  0x85   :  { %824 = vmatpush1.bf16.msra.mxu0 %v7372_v26  ;;  %v7432_v3 = vld [vmem:[#allocation7 + $0x1a0] ss:$16 sps:$4 sm:$0xff]   ;;  %v7423_v4 = vld [vmem:[#allocation7 + $0x1e8] ss:$16 sps:$4 sm:$0xff]   ;;  %v7431_v5 = vld [vmem:[#allocation7 + $0x1cc] ss:$16 sps:$4 sm:$0xff]  }
  0x86   :  { %825 = vmatprep.subr.bf16.mxu0 %v7380_v27  ;;  %v7429_v6 = vld [vmem:[#allocation7 + $0x1c8] ss:$16 sps:$4 sm:$0xff]   ;;  %v7437_v7 = vld [vmem:[#allocation7 + $0x1ac] ss:$16 sps:$4 sm:$0xff]   ;;  %v7438_v9 = vld [vmem:[#allocation7 + $0x180] ss:$16 sps:$4 sm:$0xff]  }
  0x87   :  { %365 = vmatpush1.bf16.msra.mxu1 %v7366_v28  ;;  %v7435_v8 = vld [vmem:[#allocation7 + $0x1a8] ss:$16 sps:$4 sm:$0xff]   ;;  %v7440_v10 = vld [vmem:[#allocation7 + $0x184] ss:$16 sps:$4 sm:$0xff]   ;;  %v7443_v12 = vld [vmem:[#allocation7 + $0x18c] ss:$16 sps:$4 sm:$0xff]  }
  0x88   :  { %366 = vmatprep.subr.bf16.mxu1 %v7368_v29  ;;  %v7441_v11 = vld [vmem:[#allocation7 + $0x188] ss:$16 sps:$4 sm:$0xff]   ;;  %v7446_v13 = vld [vmem:[#allocation7 + $0x164] ss:$16 sps:$4 sm:$0xff]   ;;  %v7449_v14 = vld [vmem:[#allocation7 + $0x16c] ss:$16 sps:$4 sm:$0xff]  }
  0x89   :  { %826 = vmatpush1.bf16.msra.mxu0 %v7378_v30  ;;  %v7444_v15 = vld [vmem:[#allocation7 + $0x160] ss:$16 sps:$4 sm:$0xff]   ;;  %v7447_v16 = vld [vmem:[#allocation7 + $0x168] ss:$16 sps:$4 sm:$0xff]   ;;  %v7452_v17 = vld [vmem:[#allocation7 + $0x144] ss:$16 sps:$4 sm:$0xff]  }
  0x8a   :  { %827 = vmatprep.subr.bf16.mxu0 %v7386_v31  ;;  %v7455_v18 = vld [vmem:[#allocation7 + $0x14c] ss:$16 sps:$4 sm:$0xff]   ;;  %v7450_v19 = vld [vmem:[#allocation7 + $0x140] ss:$16 sps:$4 sm:$0xff]   ;;  %v7453_v20 = vld [vmem:[#allocation7 + $0x148] ss:$16 sps:$4 sm:$0xff]  }
  0x8b   :  { %367 = vmatpush1.bf16.msra.mxu1 %v7370_v32  ;;  %v7458_v21 = vld [vmem:[#allocation7 + $0x124] ss:$16 sps:$4 sm:$0xff]   ;;  %v7461_v22 = vld [vmem:[#allocation7 + $0x12c] ss:$16 sps:$4 sm:$0xff]   ;;  %v7456_v23 = vld [vmem:[#allocation7 + $0x120] ss:$16 sps:$4 sm:$0xff]  }
  0x8c   :  { %866 = vmatprep.subr.bf16.mxu1 %v7377_v33  ;;  %v7459_v24 = vld [vmem:[#allocation7 + $0x128] ss:$16 sps:$4 sm:$0xff]   ;;  %v7464_v25 = vld [vmem:[#allocation7 + $0x104] ss:$16 sps:$4 sm:$0xff]   ;;  %v7467_v26 = vld [vmem:[#allocation7 + $0x10c] ss:$16 sps:$4 sm:$0xff]  }
  0x8d   :  { %828 = vmatpush1.bf16.msra.mxu0 %v7384_v34  ;;  %v7462_v27 = vld [vmem:[#allocation7 + $0x100] ss:$16 sps:$4 sm:$0xff]   ;;  %v7465_v28 = vld [vmem:[#allocation7 + $0x108] ss:$16 sps:$4 sm:$0xff]  }
  0x8e   :  { %829 = vmatprep.subr.bf16.mxu0 %v7392_v35  ;;  %6464 = vmatmul.mubr.msk.bf16.vlgmr.msra.gmra.mxu1 %vm341_vm3, %v7371_v36  ;;  %v977_v29 = vld [vmem:[#allocation10 + $0x1c0] sm:$0xff] }
  0x8f   :  { %867 = vmatpush1.bf16.msra.mxu1 %v7375_v37  ;;  %v981_v30 = vld [vmem:[#allocation10 + $0x1e0] sm:$0xff]  ;;  %v397_v37 = vlaneseq }
  0x90   :  { %868 = vmatprep.subr.bf16.mxu1 %v7383_v38  ;;  %v1105_v31 = vld [vmem:[#allocation10 + $0x5c0] sm:$0xff]  ;;  %v6585_v32 = vcombine.low %v977_v29, %v981_v30  ;;  %v6586_v33 = vcombine.high %v977_v29, %v981_v30 }
  0x91   :  { %830 = vmatpush1.bf16.msra.mxu0 %v7390_v39  ;;  %v1109_v34 = vld [vmem:[#allocation10 + $0x5e0] sm:$0xff]  ;;  %v8443_v38 = vshrl.u32 %v397_v37, 7 }
  0x92   :  { %831 = vmatprep.subr.bf16.mxu0 %v7398_v40  ;;  %v6713_v35 = vcombine.low %v1105_v31, %v1109_v34  ;;  %v6714_v36 = vcombine.high %v1105_v31, %v1109_v34  ;;  %v395_v40 = vld [vmem:[#allocation6] sm:$0x3]  ;;  %v1065_v34 = vld [vmem:[#allocation10 + $0x480] sm:$0xff] }
  0x93   :  { %869 = vmatpush1.bf16.msra.mxu1 %v7381_v41  ;;  %v8446_v41 = vsub.s32 0, %v8443_v38 }
  0x94   :  { %870 = vmatprep.subr.bf16.mxu1 %v7389_v42 }
  0x95   :  { %832 = vmatpush1.bf16.msra.mxu0 %v7396_v43  ;;  %v8449_v43 = vsub.s32 1, %v8443_v38 }
  0x96   :  { %833 = vmatprep.subr.bf16.mxu0 %v7404_v44 }
  0x97   :  { %871 = vmatpush1.bf16.msra.mxu1 %v7387_v45 }
  0x98   :  { %872 = vmatprep.subr.bf16.mxu1 %v7395_v46  ;;  %v400_v46 = vrot.slane %v395_v40, %v8446_v41 }
  0x99   :  { %834 = vmatpush1.bf16.msra.mxu0 %v7402_v47 }
  0x9a   :  { %835 = vmatprep.subr.bf16.mxu0 %v7410_v48 }
  0x9b   :  { %873 = vmatpush1.bf16.msra.mxu1 %v7393_v49 }
  0x9c   :  { %874 = vmatprep.subr.bf16.mxu1 %v7401_v50  ;;  %v404_v50 = vrot.slane %v395_v40, %v8449_v43 }
  0x9d   :  { %836 = vmatpush1.bf16.msra.mxu0 %v7408_v51 }
  0x9e   :  { %837 = vmatprep.subr.bf16.mxu0 %v7416_v53 }
  0x9f   :  { %875 = vmatpush1.bf16.msra.mxu1 %v7399_v52 }
  0xa0   :  { %876 = vmatprep.subr.bf16.mxu1 %v7407_v54 }
  0xa1   :  { %838 = vmatpush1.bf16.msra.mxu0 %v7414_v55 }
  0xa2   :  { %839 = vmatprep.subr.bf16.mxu0 %v7422_v56 }
  0xa3   :  { %877 = vmatpush1.bf16.msra.mxu1 %v7405_v57 }
  0xa4   :  { %878 = vmatprep.subr.bf16.mxu1 %v7413_v58 }
  0xa5   :  { %840 = vmatpush2.bf16.msra.mxu0 %v7420_v59 }
  0xa6   :  { %841 = vmatprep.subr.bf16.mxu0 %v7428_v60 }
  0xa7   :  { %879 = vmatpush1.bf16.msra.mxu1 %v7411_v61 }
  0xa8   :  { %880 = vmatprep.subr.bf16.mxu1 %v7419_v62  ;;  %v969_v62 = vld [vmem:[#allocation10 + $0x180] sm:$0xff] }
  0xa9   :  { %842 = vmatpush2.bf16.msra.mxu0 %v7426_v63  ;;  %v973_v63 = vld [vmem:[#allocation10 + $0x1a0] sm:$0xff] }
  0xaa   :  { %843 = vmatprep.subr.bf16.mxu0 %v7434_v0  ;;  %v1097_v0 = vld [vmem:[#allocation10 + $0x580] sm:$0xff] }
  0xab   :  { %881 = vmatpush1.bf16.msra.mxu1 %v7417_v1  ;;  %v1101_v1 = vld [vmem:[#allocation10 + $0x5a0] sm:$0xff] }
  0xac   :  { %882 = vmatprep.subr.bf16.mxu1 %v7425_v2 }
  0xad   :  { %844 = vmatpush2.bf16.msra.mxu0 %v7432_v3 }
  0xae   :  { %845 = vmatprep.subr.bf16.mxu0 %v7440_v10  ;;  %v6578_v10 = vcombine.high %v969_v62, %v973_v63 }
  0xaf   :  { %883 = vmatpush2.bf16.msra.mxu1 %v7423_v4 }
  0xb0   :  { %884 = vmatprep.subr.bf16.mxu1 %v7431_v5  ;;  %v961_v5 = vld [vmem:[#allocation10 + $0x140] sm:$0xff] }
  0xb1   :  { %846 = vmatpush2.bf16.msra.mxu0 %v7438_v9 }
  0xb2   :  { %847 = vmatprep.subr.bf16.mxu0 %v7446_v13  ;;  %v6705_v13 = vcombine.low %v1097_v0, %v1101_v1 }
  0xb3   :  { %885 = vmatpush2.bf16.msra.mxu1 %v7429_v6  ;;  %v965_v6 = vld [vmem:[#allocation10 + $0x160] sm:$0xff] }
  0xb4   :  { %886 = vmatprep.subr.bf16.mxu1 %v7437_v7  ;;  %v1089_v7 = vld [vmem:[#allocation10 + $0x540] sm:$0xff] }
  0xb5   :  { %848 = vmatpush2.bf16.msra.mxu0 %v7444_v15  ;;  %v957_v15 = vld [vmem:[#allocation10 + $0x120] sm:$0xff] }
  0xb6   :  { %849 = vmatprep.subr.bf16.mxu0 %v7452_v17  ;;  %v1085_v17 = vld [vmem:[#allocation10 + $0x520] sm:$0xff] }
  0xb7   :  { %887 = vmatpush2.bf16.msra.mxu1 %v7435_v8  ;;  %v1093_v8 = vld [vmem:[#allocation10 + $0x560] sm:$0xff] }
  0xb8   :  { %888 = vmatprep.subr.bf16.mxu1 %v7443_v12  ;;  %v6577_v12 = vcombine.low %v969_v62, %v973_v63  ;;  %v1173_v62 = vld [vmem:[#allocation10 + $0x7e0] sm:$0xff] }
  0xb9   :  { %850 = vmatpush2.bf16.msra.mxu0 %v7450_v19  ;;  %v6698_v19 = vcombine.high %v1089_v7, %v1093_v8 }
  0xba   :  { %851 = vmatprep.subr.bf16.mxu0 %v7458_v21  ;;  %v6697_v21 = vcombine.low %v1089_v7, %v1093_v8 }
  0xbb   :  { %889 = vmatpush2.bf16.msra.mxu1 %v7441_v11  ;;  %v6706_v11 = vcombine.high %v1097_v0, %v1101_v1 }
  0xbc   :  { %890 = vmatprep.subr.bf16.mxu1 %v7449_v14  ;;  %v953_v14 = vld [vmem:[#allocation10 + $0x100] sm:$0xff] }
  0xbd   :  { %852 = vmatpush2.bf16.msra.mxu0 %v7456_v23  ;;  %v949_v23 = vld [vmem:[#allocation10 + $0xe0] sm:$0xff] }
  0xbe   :  { %853 = vmatprep.subr.bf16.mxu0 %v7464_v25  ;;  %v1077_v25 = vld [vmem:[#allocation10 + $0x4e0] sm:$0xff] }
  0xbf   :  { %891 = vmatpush2.bf16.msra.mxu1 %v7447_v16  ;;  %v1081_v16 = vld [vmem:[#allocation10 + $0x500] sm:$0xff] }
  0xc0   :  { %892 = vmatprep.subr.bf16.mxu1 %v7455_v18  ;;  %v6570_v18 = vcombine.high %v961_v5, %v965_v6  ;;  %v6689_v29 = vcombine.low %v1081_v16, %v1085_v17 }
  0xc1   :  { %854 = vmatpush2.bf16.msra.mxu0 %v7462_v27  ;;  %v6690_v27 = vcombine.high %v1081_v16, %v1085_v17 }
  0xc2   :  { %2499 = vmatprep.subr.bf16.mxu0 %v6586_v33  ;;  %v941_v33 = vld [vmem:[#allocation10 + $0xa0] sm:$0xff] }
  0xc3   :  { %893 = vmatpush2.bf16.msra.mxu1 %v7453_v20  ;;  %v6569_v20 = vcombine.low %v961_v5, %v965_v6  ;;  %v1161_v5 = vld [vmem:[#allocation10 + $0x780] sm:$0xff] }
  0xc4   :  { %894 = vmatprep.subr.bf16.mxu1 %v7461_v22  ;;  %v945_v22 = vld [vmem:[#allocation10 + $0xc0] sm:$0xff] }
  0xc5   :  { %v6554_v30 = vcombine.high %v945_v22, %v949_v23  ;;  %v1165_v6 = vld [vmem:[#allocation10 + $0x7a0] sm:$0xff] }
  0xc6   :  { %v6769_v16 = vcombine.low %v1161_v5, %v1165_v6 }
  0xc7   :  { %895 = vmatpush2.bf16.msra.mxu1 %v7459_v24  ;;  %v1073_v24 = vld [vmem:[#allocation10 + $0x4c0] sm:$0xff] }
  0xc8   :  { %896 = vmatprep.subr.bf16.mxu1 %v7467_v26  ;;  %v6562_v26 = vcombine.high %v953_v14, %v957_v15  ;;  %v6682_v31 = vcombine.high %v1073_v24, %v1077_v25  ;;  %v6681_v37 = vcombine.low %v1073_v24, %v1077_v25 }
  0xcb   :  { %897 = vmatpush2.bf16.msra.mxu1 %v7465_v28  ;;  %v6561_v28 = vcombine.low %v953_v14, %v957_v15  ;;  %v1157_v14 = vld [vmem:[#allocation10 + $0x760] sm:$0xff] }
  0xcc   :  { %2542 = vmatprep.subr.bf16.mxu1 %v6714_v36  ;;  %v6553_v36 = vcombine.low %v945_v22, %v949_v23  ;;  %v1149_v22 = vld [vmem:[#allocation10 + $0x720] sm:$0xff] }
 0x144   :  { %v262_v39 = vpop.f32.mrf.mxu0 }
 0x146   :  { %v264_v42 = vpop.f32.mrf.mxu0 }
 0x148   :  { %v266_v47 = vpop.f32.mrf.mxu0 }
 0x14a   :  { %v268_v54 = vpop.f32.mrf.mxu0 }
 0x14e   :  { %v386_v44 = vpop.f32.mrf.mxu1 }
 0x14f   :  { %v387_v45 = vadd.f32 %v386_v44, %v262_v39  ;;  %v933_v44 = vld [vmem:[#allocation10 + $0x60] sm:$0xff] }
 0x150   :  { %v388_v48 = vpop.f32.mrf.mxu1 }
 0x151   :  { %v389_v49 = vadd.f32 %v388_v48, %v264_v42  ;;  %v407_v52 = vadd.f32 %v400_v46, %v387_v45  ;;  %v929_v42 = vld [vmem:[#allocation10 + $0x40] sm:$0xff] }
 0x152   :  { %v390_v51 = vpop.f32.mrf.mxu1  ;;  %v1057_v45 = vld [vmem:[#allocation10 + $0x440] sm:$0xff] }
 0x153   :  { %v391_v53 = vadd.f32 %v390_v51, %v266_v47  ;;  %v408_v56 = vadd.f32 %v404_v50, %v389_v49  ;;  %v411_v59 = vmax.f32 %v407_v52, 0.0  ;;  %v6538_v49 = vcombine.high %v929_v42, %v933_v44  ;;  %v921_v51 = vld [vmem:[#allocation10] sm:$0xff] }
 0x154   :  { %v392_v55 = vpop.f32.mrf.mxu1  ;;  %v925_v52 = vld [vmem:[#allocation10 + $0x20] sm:$0xff] }
 0x155   :  { %v409_v57 = vadd.f32 %v400_v46, %v391_v53  ;;  %v393_v58 = vadd.f32 %v392_v55, %v268_v54  ;;  %v412_v2 = vmax.f32 %v408_v56, 0.0  ;;  %v1061_v46 = vld [vmem:[#allocation10 + $0x460] sm:$0xff]  ;;  %v6537_v55 = vcombine.low %v929_v42, %v933_v44 }
 0x156   :  { %v1049_v53 = vld [vmem:[#allocation10 + $0x400] sm:$0xff]  ;;  %v6665_v56 = vcombine.low %v1057_v45, %v1061_v46  ;;  %v6529_v63 = vcombine.low %v921_v51, %v925_v52 }
 0x157   :  { %v413_v60 = vmax.f32 %v409_v57, 0.0  ;;  %v410_v61 = vadd.f32 %v404_v50, %v393_v58  ;;  %v6666_v50 = vcombine.high %v1057_v45, %v1061_v46  ;;  %v1053_v54 = vld [vmem:[#allocation10 + $0x420] sm:$0xff]  ;;  %v6530_v57 = vcombine.high %v921_v51, %v925_v52 }
 0x158   :  { %v6658_v58 = vcombine.high %v1049_v53, %v1053_v54  ;;  %v6657_v0 = vcombine.low %v1049_v53, %v1053_v54  ;;  %v1133_v44 = vld [vmem:[#allocation10 + $0x6a0] sm:$0xff] }
 0x159   :  { %v414_v3 = vmax.f32 %v410_v61, 0.0  ;;  %v415_v9 = vpack.c.bf16 %v413_v60, %v411_v59  ;;  %v1041_v59 = vld [vmem:[#allocation10 + $0x3c0] sm:$0xff] }
 0x15a   :  { %v1045_v60 = vld [vmem:[#allocation10 + $0x3e0] sm:$0xff] }
 0x15b   :  { %v416_v4 = vpack.c.bf16 %v414_v3, %v412_v2  ;;  %v1169_v61 = vld [vmem:[#allocation10 + $0x7c0] sm:$0xff]  ;;  %v6650_v1 = vcombine.high %v1041_v59, %v1045_v60  ;;  %v6649_v7 = vcombine.low %v1041_v59, %v1045_v60 }
 0x15c   :  { %v6778_v2 = vcombine.high %v1169_v61, %v1173_v62  ;;  %v1033_v3 = vld [vmem:[#allocation10 + $0x380] sm:$0xff]  ;;  %v6777_v8 = vcombine.low %v1169_v61, %v1173_v62 }
 0x15d   :  { %855 = vmatprep.mubr.bf16.mxu0 %v416_v4  ;;  %898 = vmatprep.mubr.bf16.mxu1 %v416_v4  ;;  %v1037_v4 = vld [vmem:[#allocation10 + $0x3a0] sm:$0xff] }
 0x15e   :  { %856 = vmatmul.mubr.bf16.vlgmr.msra.gmra.mxu0 %v415_v9  ;;  %899 = vmatmul.mubr.bf16.vlgmr.msra.gmra.mxu1 %v415_v9  ;;  %v6642_v9 = vcombine.high %v1033_v3, %v1037_v4  ;;  %v6641_v15 = vcombine.low %v1033_v3, %v1037_v4  ;;  %v1125_v52 = vld [vmem:[#allocation10 + $0x660] sm:$0xff]  ;;  %v1110_v4 = vld [vmem:[#allocation10 + $0x5e8] sm:$0xff] }
 0x15f   :  { %2500 = vmatpush1.bf16.msra.mxu0 %v6585_v32  ;;  %2543 = vmatpush1.bf16.msra.mxu1 %v6713_v35  ;;  %v937_v32 = vld [vmem:[#allocation10 + $0x80] sm:$0xff] }
 0x160   :  { %2501 = vmatprep.subr.bf16.mxu0 %v6578_v10  ;;  %2544 = vmatprep.subr.bf16.mxu1 %v6706_v11  ;;  %v1069_v35 = vld [vmem:[#allocation10 + $0x4a0] sm:$0xff]  ;;  %v6546_v39 = vcombine.high %v937_v32, %v941_v33  ;;  %v6545_v47 = vcombine.low %v937_v32, %v941_v33  ;;  %v6770_v10 = vcombine.high %v1161_v5, %v1165_v6 }
 0x161   :  { %v6674_v40 = vcombine.high %v1065_v34, %v1069_v35  ;;  %v6673_v48 = vcombine.low %v1065_v34, %v1069_v35  ;;  %v1025_v11 = vld [vmem:[#allocation10 + $0x340] sm:$0xff] }
 0x162   :  { %v1117_v60 = vld [vmem:[#allocation10 + $0x620] sm:$0xff] }
 0x163   :  { %2502 = vmatpush1.bf16.msra.mxu0 %v6577_v12  ;;  %2545 = vmatpush1.bf16.msra.mxu1 %v6705_v13  ;;  %v1029_v12 = vld [vmem:[#allocation10 + $0x360] sm:$0xff] }
 0x164   :  { %2503 = vmatprep.subr.bf16.mxu0 %v6570_v18  ;;  %2546 = vmatprep.subr.bf16.mxu1 %v6698_v19  ;;  %v1153_v13 = vld [vmem:[#allocation10 + $0x740] sm:$0xff]  ;;  %v6634_v17 = vcombine.high %v1025_v11, %v1029_v12  ;;  %v6633_v23 = vcombine.low %v1025_v11, %v1029_v12 }
 0x165   :  { %v6762_v18 = vcombine.high %v1153_v13, %v1157_v14  ;;  %v1017_v19 = vld [vmem:[#allocation10 + $0x300] sm:$0xff]  ;;  %v6761_v24 = vcombine.low %v1153_v13, %v1157_v14 }
 0x167   :  { %2504 = vmatpush1.bf16.msra.mxu0 %v6569_v20  ;;  %2547 = vmatpush1.bf16.msra.mxu1 %v6697_v21  ;;  %v1021_v20 = vld [vmem:[#allocation10 + $0x320] sm:$0xff] }
 0x168   :  { %2505 = vmatprep.subr.bf16.mxu0 %v6562_v26  ;;  %2548 = vmatprep.subr.bf16.mxu1 %v6690_v27  ;;  %v1145_v21 = vld [vmem:[#allocation10 + $0x700] sm:$0xff]  ;;  %v6626_v25 = vcombine.high %v1017_v19, %v1021_v20 }
 0x169   :  { %v6754_v26 = vcombine.high %v1145_v21, %v1149_v22  ;;  %v1009_v27 = vld [vmem:[#allocation10 + $0x2c0] sm:$0xff]  ;;  %v6753_v32 = vcombine.low %v1145_v21, %v1149_v22 }
 0x16b   :  { %2506 = vmatpush1.bf16.msra.mxu0 %v6561_v28  ;;  %2549 = vmatpush1.bf16.msra.mxu1 %v6689_v29  ;;  %v1013_v28 = vld [vmem:[#allocation10 + $0x2e0] sm:$0xff] }
 0x16c   :  { %2507 = vmatprep.subr.bf16.mxu0 %v6554_v30  ;;  %2550 = vmatprep.subr.bf16.mxu1 %v6682_v31  ;;  %v1137_v29 = vld [vmem:[#allocation10 + $0x6c0] sm:$0xff]  ;;  %v6625_v31 = vcombine.low %v1017_v19, %v1021_v20  ;;  %v6618_v33 = vcombine.high %v1009_v27, %v1013_v28  ;;  %v6617_v35 = vcombine.low %v1009_v27, %v1013_v28 }
 0x16d   :  { %v1141_v30 = vld [vmem:[#allocation10 + $0x6e0] sm:$0xff] }
 0x16e   :  { %v6746_v34 = vcombine.high %v1137_v29, %v1141_v30 }
 0x16f   :  { %2508 = vmatpush1.bf16.msra.mxu0 %v6553_v36  ;;  %2551 = vmatpush1.bf16.msra.mxu1 %v6681_v37  ;;  %v6745_v36 = vcombine.low %v1137_v29, %v1141_v30  ;;  %v1001_v37 = vld [vmem:[#allocation10 + $0x280] sm:$0xff] }
 0x170   :  { %2509 = vmatprep.subr.bf16.mxu0 %v6546_v39  ;;  %2552 = vmatprep.subr.bf16.mxu1 %v6674_v40  ;;  %v1005_v39 = vld [vmem:[#allocation10 + $0x2a0] sm:$0xff] }
 0x171   :  { %v1129_v40 = vld [vmem:[#allocation10 + $0x680] sm:$0xff]  ;;  %v6610_v42 = vcombine.high %v1001_v37, %v1005_v39  ;;  %v6609_v45 = vcombine.low %v1001_v37, %v1005_v39  ;;  %v970_v37 = vld [vmem:[#allocation10 + $0x188] sm:$0xff] }
 0x172   :  { %v6737_v46 = vcombine.low %v1129_v40, %v1133_v44 }
 0x173   :  { %2510 = vmatpush1.bf16.msra.mxu0 %v6545_v47  ;;  %2553 = vmatpush1.bf16.msra.mxu1 %v6673_v48  ;;  %v6738_v47 = vcombine.high %v1129_v40, %v1133_v44  ;;  %v993_v48 = vld [vmem:[#allocation10 + $0x240] sm:$0xff]  ;;  %v1098_v44 = vld [vmem:[#allocation10 + $0x588] sm:$0xff] }
 0x174   :  { %2511 = vmatprep.subr.bf16.mxu0 %v6538_v49  ;;  %2554 = vmatprep.subr.bf16.mxu1 %v6666_v50  ;;  %v997_v49 = vld [vmem:[#allocation10 + $0x260] sm:$0xff] }
 0x175   :  { %v1121_v50 = vld [vmem:[#allocation10 + $0x640] sm:$0xff]  ;;  %v6602_v51 = vcombine.high %v993_v48, %v997_v49  ;;  %v6601_v53 = vcombine.low %v993_v48, %v997_v49 }
 0x176   :  { %v6729_v54 = vcombine.low %v1121_v50, %v1125_v52 }
 0x177   :  { %2512 = vmatpush1.bf16.msra.mxu0 %v6537_v55  ;;  %2555 = vmatpush1.bf16.msra.mxu1 %v6665_v56  ;;  %v6730_v55 = vcombine.high %v1121_v50, %v1125_v52  ;;  %v985_v56 = vld [vmem:[#allocation10 + $0x200] sm:$0xff]  ;;  %v962_v50 = vld [vmem:[#allocation10 + $0x148] sm:$0xff] }
 0x178   :  { %2513 = vmatprep.subr.bf16.mxu0 %v6530_v57  ;;  %2556 = vmatprep.subr.bf16.mxu1 %v6658_v58  ;;  %v989_v57 = vld [vmem:[#allocation10 + $0x220] sm:$0xff] }
 0x179   :  { %v1113_v58 = vld [vmem:[#allocation10 + $0x600] sm:$0xff]  ;;  %v6594_v59 = vcombine.high %v985_v56, %v989_v57  ;;  %v6593_v61 = vcombine.low %v985_v56, %v989_v57 }
 0x17a   :  { %v6721_v62 = vcombine.low %v1113_v58, %v1117_v60 }
 0x17b   :  { %2514 = vmatpush1.bf16.msra.mxu0 %v6529_v63  ;;  %2557 = vmatpush1.bf16.msra.mxu1 %v6657_v0  ;;  %v6722_v63 = vcombine.high %v1113_v58, %v1117_v60  ;;  %v978_v0 = vld [vmem:[#allocation10 + $0x1c8] sm:$0xff] }
 0x17c   :  { %2515 = vmatprep.subr.bf16.mxu0 %v6650_v1  ;;  %2558 = vmatprep.subr.bf16.mxu1 %v6778_v2  ;;  %v982_v1 = vld [vmem:[#allocation10 + $0x1e8] sm:$0xff] }
 0x17d   :  { %v1106_v2 = vld [vmem:[#allocation10 + $0x5c8] sm:$0xff]  ;;  %v6588_v3 = vcombine.high %v978_v0, %v982_v1  ;;  %v6587_v5 = vcombine.low %v978_v0, %v982_v1 }
 0x17e   :  { %v6715_v6 = vcombine.low %v1106_v2, %v1110_v4  ;;  %v954_v60 = vld [vmem:[#allocation10 + $0x108] sm:$0xff] }
 0x17f   :  { %2516 = vmatpush2.bf16.msra.mxu0 %v6649_v7  ;;  %2559 = vmatpush2.bf16.msra.mxu1 %v6777_v8  ;;  %v6716_v7 = vcombine.high %v1106_v2, %v1110_v4  ;;  %v8454_v8 = vsub.s32 3, %v8443_v38  ;;  %v946_v4 = vld [vmem:[#allocation10 + $0xc8] sm:$0xff] }
 0x180   :  { %2517 = vmatprep.subr.bf16.mxu0 %v6642_v9  ;;  %2560 = vmatprep.subr.bf16.mxu1 %v6770_v10  ;;  %v8457_v9 = vsub.s32 2, %v8443_v38  ;;  %v481_v10 = vld [vmem:[#allocation9] sm:$0xf] }
 0x181   :  { %v490_v13 = vrot.slane %v481_v10, %v8449_v43  ;;  %v498_v14 = vrot.slane %v481_v10, %v8454_v8 }
 0x183   :  { %2518 = vmatpush2.bf16.msra.mxu0 %v6641_v15  ;;  %2561 = vmatpush2.bf16.msra.mxu1 %v6769_v16  ;;  %v486_v15 = vrot.slane %v481_v10, %v8446_v41  ;;  %v494_v16 = vrot.slane %v481_v10, %v8457_v9 }
 0x184   :  { %2519 = vmatprep.subr.bf16.mxu0 %v6634_v17  ;;  %2562 = vmatprep.subr.bf16.mxu1 %v6762_v18 }
 0x187   :  { %2520 = vmatpush2.bf16.msra.mxu0 %v6633_v23  ;;  %2563 = vmatpush2.bf16.msra.mxu1 %v6761_v24 }
 0x188   :  { %2521 = vmatprep.subr.bf16.mxu0 %v6626_v25  ;;  %2564 = vmatprep.subr.bf16.mxu1 %v6754_v26 }
 0x18b   :  { %2522 = vmatpush2.bf16.msra.mxu0 %v6625_v31  ;;  %2565 = vmatpush2.bf16.msra.mxu1 %v6753_v32 }
 0x18c   :  { %2523 = vmatprep.subr.bf16.mxu0 %v6618_v33  ;;  %2566 = vmatprep.subr.bf16.mxu1 %v6746_v34 }
 0x18f   :  { %2524 = vmatpush2.bf16.msra.mxu0 %v6617_v35  ;;  %2567 = vmatpush2.bf16.msra.mxu1 %v6745_v36 }
 0x190   :  { %2525 = vmatprep.subr.bf16.mxu0 %v6610_v42  ;;  %2568 = vmatprep.subr.bf16.mxu1 %v6738_v47  ;;  %v974_v42 = vld [vmem:[#allocation10 + $0x1a8] sm:$0xff] }
 0x191   :  { %v6579_v56 = vcombine.low %v970_v37, %v974_v42 }
 0x193   :  { %2526 = vmatpush2.bf16.msra.mxu0 %v6609_v45  ;;  %2569 = vmatpush2.bf16.msra.mxu1 %v6737_v46  ;;  %v1102_v45 = vld [vmem:[#allocation10 + $0x5a8] sm:$0xff] }
 0x194   :  { %2527 = vmatprep.subr.bf16.mxu0 %v6602_v51  ;;  %2570 = vmatprep.subr.bf16.mxu1 %v6730_v55  ;;  %v6580_v51 = vcombine.high %v970_v37, %v974_v42  ;;  %v6708_v52 = vcombine.high %v1098_v44, %v1102_v45  ;;  %v1094_v55 = vld [vmem:[#allocation10 + $0x568] sm:$0xff]  ;;  %v6707_v57 = vcombine.low %v1098_v44, %v1102_v45 }
 0x195   :  { %v1170_v42 = vld [vmem:[#allocation10 + $0x7c8] sm:$0xff] }
 0x196   :  { %v1174_v44 = vld [vmem:[#allocation10 + $0x7e8] sm:$0xff] }
 0x197   :  { %2528 = vmatpush2.bf16.msra.mxu0 %v6601_v53  ;;  %2571 = vmatpush2.bf16.msra.mxu1 %v6729_v54  ;;  %v966_v53 = vld [vmem:[#allocation10 + $0x168] sm:$0xff] }
 0x198   :  { %2529 = vmatprep.subr.bf16.mxu0 %v6594_v59  ;;  %2572 = vmatprep.subr.bf16.mxu1 %v6722_v63  ;;  %v1090_v54 = vld [vmem:[#allocation10 + $0x548] sm:$0xff]  ;;  %v6572_v58 = vcombine.high %v962_v50, %v966_v53  ;;  %v6571_v0 = vcombine.low %v962_v50, %v966_v53 }
 0x199   :  { %v6700_v59 = vcombine.high %v1090_v54, %v1094_v55  ;;  %v1086_v63 = vld [vmem:[#allocation10 + $0x528] sm:$0xff]  ;;  %v6699_v1 = vcombine.low %v1090_v54, %v1094_v55 }
 0x19a   :  { %v1034_v53 = vld [vmem:[#allocation10 + $0x388] sm:$0xff] }
 0x19b   :  { %2530 = vmatpush2.bf16.msra.mxu0 %v6593_v61  ;;  %2573 = vmatpush2.bf16.msra.mxu1 %v6721_v62  ;;  %v958_v61 = vld [vmem:[#allocation10 + $0x128] sm:$0xff] }
 0x19c   :  { %2585 = vmatprep.subr.bf16.mxu0 %v6588_v3  ;;  %2628 = vmatprep.subr.bf16.mxu1 %v6716_v7  ;;  %v1082_v62 = vld [vmem:[#allocation10 + $0x508] sm:$0xff]  ;;  %v6564_v2 = vcombine.high %v954_v60, %v958_v61  ;;  %v6563_v10 = vcombine.low %v954_v60, %v958_v61 }
 0x19d   :  { %v6692_v3 = vcombine.high %v1082_v62, %v1086_v63  ;;  %v1078_v7 = vld [vmem:[#allocation10 + $0x4e8] sm:$0xff] }
 0x19e   :  { %v1038_v54 = vld [vmem:[#allocation10 + $0x3a8] sm:$0xff] }
 0x19f   :  { %v1162_v55 = vld [vmem:[#allocation10 + $0x788] sm:$0xff] }
 0x1a0   :  { %v1026_v61 = vld [vmem:[#allocation10 + $0x348] sm:$0xff] }
 0x21e   :  { %v857_v11 = vpop.f32.mrf.mxu0  ;;  %v900_v12 = vpop.f32.mrf.mxu1 }
 0x21f   :  { %v858_v25 = vadd.f32 %v857_v11, %v486_v15  ;;  %v901_v26 = vadd.f32 %v900_v12, %v494_v16  ;;  %v6691_v11 = vcombine.low %v1082_v62, %v1086_v63  ;;  %v1030_v62 = vld [vmem:[#allocation10 + $0x368] sm:$0xff] }
 0x220   :  { %v859_v17 = vpop.f32.mrf.mxu0  ;;  %v902_v18 = vpop.f32.mrf.mxu1  ;;  %v1154_v63 = vld [vmem:[#allocation10 + $0x748] sm:$0xff] }
 0x221   :  { %v860_v21 = vadd.f32 %v859_v17, %v490_v13  ;;  %v903_v22 = vadd.f32 %v902_v18, %v498_v14  ;;  %v909_v39 = vmax.f32 %v858_v25, 0.0  ;;  %v911_v40 = vmax.f32 %v901_v26, 0.0  ;;  %v1070_v17 = vld [vmem:[#allocation10 + $0x4a8] sm:$0xff] }
 0x222   :  { %v861_v19 = vpop.f32.mrf.mxu0  ;;  %v904_v20 = vpop.f32.mrf.mxu1  ;;  %v1062_v25 = vld [vmem:[#allocation10 + $0x468] sm:$0xff] }
 0x223   :  { %v862_v23 = vadd.f32 %v861_v19, %v486_v15  ;;  %v905_v24 = vadd.f32 %v904_v20, %v494_v16  ;;  %v910_v33 = vmax.f32 %v860_v21, 0.0  ;;  %v912_v34 = vmax.f32 %v903_v22, 0.0  ;;  %v942_v15 = vld [vmem:[#allocation10 + $0xa8] sm:$0xff] }
 0x224   :  { %v863_v27 = vpop.f32.mrf.mxu0  ;;  %v906_v28 = vpop.f32.mrf.mxu1  ;;  %v1066_v16 = vld [vmem:[#allocation10 + $0x488] sm:$0xff] }
 0x225   :  { %v864_v29 = vadd.f32 %v863_v27, %v490_v13  ;;  %v907_v30 = vadd.f32 %v906_v28, %v498_v14  ;;  %v913_v31 = vmax.f32 %v862_v23, 0.0  ;;  %v915_v32 = vmax.f32 %v905_v24, 0.0  ;;  %v938_v14 = vld [vmem:[#allocation10 + $0x88] sm:$0xff] }
 0x226   :  { %v6548_v20 = vcombine.high %v938_v14, %v942_v15  ;;  %v6676_v21 = vcombine.high %v1066_v16, %v1070_v17  ;;  %v930_v22 = vld [vmem:[#allocation10 + $0x48] sm:$0xff]  ;;  %v6547_v26 = vcombine.low %v938_v14, %v942_v15  ;;  %v6675_v27 = vcombine.low %v1066_v16, %v1070_v17 }
 0x227   :  { %v914_v35 = vmax.f32 %v864_v29, 0.0  ;;  %v916_v36 = vmax.f32 %v907_v30, 0.0  ;;  %v8467_v48 = vpack.c.bf16 %v913_v31, %v909_v39  ;;  %v8469_v49 = vpack.c.bf16 %v915_v32, %v911_v40  ;;  %v934_v23 = vld [vmem:[#allocation10 + $0x68] sm:$0xff] }
 0x228   :  { %v1058_v24 = vld [vmem:[#allocation10 + $0x448] sm:$0xff]  ;;  %v6540_v28 = vcombine.high %v930_v22, %v934_v23 }
 0x229   :  { %v8463_v46 = vpack.c.bf16 %v914_v35, %v910_v33  ;;  %v8465_v47 = vpack.c.bf16 %v916_v36, %v912_v34  ;;  %v6668_v29 = vcombine.high %v1058_v24, %v1062_v25  ;;  %v922_v30 = vld [vmem:[#allocation10 + $0x8] sm:$0xff]  ;;  %v6539_v34 = vcombine.low %v930_v22, %v934_v23 }
 0x22a   :  { %v926_v31 = vld [vmem:[#allocation10 + $0x28] sm:$0xff]  ;;  %v6667_v35 = vcombine.low %v1058_v24, %v1062_v25 }
 0x22b   :  { %2531 = vmatprep.mubr.bf16.mxu0 %v8463_v46  ;;  %2574 = vmatprep.mubr.bf16.mxu1 %v8465_v47  ;;  %v1050_v32 = vld [vmem:[#allocation10 + $0x408] sm:$0xff]  ;;  %v6532_v36 = vcombine.high %v922_v30, %v926_v31  ;;  %v6531_v45 = vcombine.low %v922_v30, %v926_v31 }
 0x22c   :  { %2532 = vmatmul.mubr.bf16.vlgmr.msra.gmra.mxu0 %v8467_v48  ;;  %2575 = vmatmul.mubr.bf16.vlgmr.msra.gmra.mxu1 %v8469_v49  ;;  %v1054_v33 = vld [vmem:[#allocation10 + $0x428] sm:$0xff] }
 0x22d   :  { %2586 = vmatpush1.bf16.msra.mxu0 %v6587_v5  ;;  %2629 = vmatpush1.bf16.msra.mxu1 %v6715_v6  ;;  %v950_v5 = vld [vmem:[#allocation10 + $0xe8] sm:$0xff]  ;;  %v6660_v37 = vcombine.high %v1050_v32, %v1054_v33  ;;  %v6659_v50 = vcombine.low %v1050_v32, %v1054_v33 }
 0x22e   :  { %2617 = vmatprep.mubr.bf16.mxu0 %v8463_v46  ;;  %2660 = vmatprep.mubr.bf16.mxu1 %v8465_v47  ;;  %v1074_v6 = vld [vmem:[#allocation10 + $0x4c8] sm:$0xff]  ;;  %v6556_v12 = vcombine.high %v946_v4, %v950_v5  ;;  %v6555_v18 = vcombine.low %v946_v4, %v950_v5 }
 0x22f   :  { %2587 = vmatprep.subr.bf16.mxu0 %v6580_v51  ;;  %2630 = vmatprep.subr.bf16.mxu1 %v6708_v52  ;;  %v6684_v13 = vcombine.high %v1074_v6, %v1078_v7  ;;  %v6683_v19 = vcombine.low %v1074_v6, %v1078_v7  ;;  %v1042_v39 = vld [vmem:[#allocation10 + $0x3c8] sm:$0xff]  ;;  %v6780_v52 = vcombine.high %v1170_v42, %v1174_v44 }
 0x230   :  { %v1046_v40 = vld [vmem:[#allocation10 + $0x3e8] sm:$0xff] }
 0x231   :  { %2588 = vmatpush1.bf16.msra.mxu0 %v6579_v56  ;;  %2631 = vmatpush1.bf16.msra.mxu1 %v6707_v57  ;;  %v6652_v51 = vcombine.high %v1042_v39, %v1046_v40  ;;  %v1166_v56 = vld [vmem:[#allocation10 + $0x7a8] sm:$0xff]  ;;  %v6651_v57 = vcombine.low %v1042_v39, %v1046_v40 }
 0x232   :  { %2589 = vmatprep.subr.bf16.mxu0 %v6572_v58  ;;  %2632 = vmatprep.subr.bf16.mxu1 %v6700_v59  ;;  %v6779_v58 = vcombine.low %v1170_v42, %v1174_v44  ;;  %v6644_v59 = vcombine.high %v1034_v53, %v1038_v54  ;;  %v6772_v60 = vcombine.high %v1162_v55, %v1166_v56  ;;  %v1018_v5 = vld [vmem:[#allocation10 + $0x308] sm:$0xff] }
 0x233   :  { %v1022_v6 = vld [vmem:[#allocation10 + $0x328] sm:$0xff] }
 0x234   :  { %v1146_v7 = vld [vmem:[#allocation10 + $0x708] sm:$0xff] }
 0x235   :  { %2590 = vmatpush1.bf16.msra.mxu0 %v6571_v0  ;;  %2633 = vmatpush1.bf16.msra.mxu1 %v6699_v1  ;;  %v1158_v0 = vld [vmem:[#allocation10 + $0x768] sm:$0xff]  ;;  %v6643_v1 = vcombine.low %v1034_v53, %v1038_v54  ;;  %v979_v54 = vld [vmem:[#allocation10 + $0x1d0] sm:$0xff] }
 0x236   :  { %2591 = vmatprep.subr.bf16.mxu0 %v6564_v2  ;;  %2634 = vmatprep.subr.bf16.mxu1 %v6692_v3  ;;  %v6771_v2 = vcombine.low %v1162_v55, %v1166_v56  ;;  %v6636_v3 = vcombine.high %v1026_v61, %v1030_v62  ;;  %v6764_v4 = vcombine.high %v1154_v63, %v1158_v0  ;;  %v1010_v15 = vld [vmem:[#allocation10 + $0x2c8] sm:$0xff]  ;;  %v983_v55 = vld [vmem:[#allocation10 + $0x1f0] sm:$0xff] }
 0x237   :  { %v1014_v16 = vld [vmem:[#allocation10 + $0x2e8] sm:$0xff]  ;;  %v1107_v56 = vld [vmem:[#allocation10 + $0x5d0] sm:$0xff] }
 0x238   :  { %v1138_v17 = vld [vmem:[#allocation10 + $0x6c8] sm:$0xff] }
 0x239   :  { %2592 = vmatpush1.bf16.msra.mxu0 %v6563_v10  ;;  %2635 = vmatpush1.bf16.msra.mxu1 %v6691_v11  ;;  %v1150_v10 = vld [vmem:[#allocation10 + $0x728] sm:$0xff]  ;;  %v6635_v11 = vcombine.low %v1026_v61, %v1030_v62  ;;  %v971_v62 = vld [vmem:[#allocation10 + $0x190] sm:$0xff] }
 0x23a   :  { %2593 = vmatprep.subr.bf16.mxu0 %v6556_v12  ;;  %2636 = vmatprep.subr.bf16.mxu1 %v6684_v13  ;;  %v6763_v12 = vcombine.low %v1154_v63, %v1158_v0  ;;  %v6628_v13 = vcombine.high %v1018_v5, %v1022_v6  ;;  %v6756_v14 = vcombine.high %v1146_v7, %v1150_v10  ;;  %v1002_v23 = vld [vmem:[#allocation10 + $0x288] sm:$0xff]  ;;  %v975_v63 = vld [vmem:[#allocation10 + $0x1b0] sm:$0xff] }
 0x23b   :  { %v1006_v24 = vld [vmem:[#allocation10 + $0x2a8] sm:$0xff]  ;;  %v1099_v0 = vld [vmem:[#allocation10 + $0x590] sm:$0xff] }
 0x23c   :  { %v1130_v25 = vld [vmem:[#allocation10 + $0x688] sm:$0xff] }
 0x23d   :  { %2594 = vmatpush1.bf16.msra.mxu0 %v6555_v18  ;;  %2637 = vmatpush1.bf16.msra.mxu1 %v6683_v19  ;;  %v1142_v18 = vld [vmem:[#allocation10 + $0x6e8] sm:$0xff]  ;;  %v6627_v19 = vcombine.low %v1018_v5, %v1022_v6  ;;  %v963_v6 = vld [vmem:[#allocation10 + $0x150] sm:$0xff] }
 0x23e   :  { %2595 = vmatprep.subr.bf16.mxu0 %v6548_v20  ;;  %2638 = vmatprep.subr.bf16.mxu1 %v6676_v21  ;;  %v6755_v20 = vcombine.low %v1146_v7, %v1150_v10  ;;  %v6620_v21 = vcombine.high %v1010_v15, %v1014_v16  ;;  %v6748_v22 = vcombine.high %v1138_v17, %v1142_v18  ;;  %v994_v31 = vld [vmem:[#allocation10 + $0x248] sm:$0xff]  ;;  %v967_v7 = vld [vmem:[#allocation10 + $0x170] sm:$0xff] }
 0x23f   :  { %v998_v32 = vld [vmem:[#allocation10 + $0x268] sm:$0xff]  ;;  %v1091_v10 = vld [vmem:[#allocation10 + $0x550] sm:$0xff] }
 0x240   :  { %v1122_v33 = vld [vmem:[#allocation10 + $0x648] sm:$0xff] }
 0x241   :  { %2596 = vmatpush1.bf16.msra.mxu0 %v6547_v26  ;;  %2639 = vmatpush1.bf16.msra.mxu1 %v6675_v27  ;;  %v1134_v26 = vld [vmem:[#allocation10 + $0x6a8] sm:$0xff]  ;;  %v6619_v27 = vcombine.low %v1010_v15, %v1014_v16  ;;  %v955_v16 = vld [vmem:[#allocation10 + $0x110] sm:$0xff] }
 0x242   :  { %2597 = vmatprep.subr.bf16.mxu0 %v6540_v28  ;;  %2640 = vmatprep.subr.bf16.mxu1 %v6668_v29  ;;  %v6747_v28 = vcombine.low %v1138_v17, %v1142_v18  ;;  %v6612_v29 = vcombine.high %v1002_v23, %v1006_v24  ;;  %v6740_v30 = vcombine.high %v1130_v25, %v1134_v26  ;;  %v986_v40 = vld [vmem:[#allocation10 + $0x208] sm:$0xff]  ;;  %v959_v17 = vld [vmem:[#allocation10 + $0x130] sm:$0xff] }
 0x243   :  { %v990_v42 = vld [vmem:[#allocation10 + $0x228] sm:$0xff]  ;;  %v1083_v18 = vld [vmem:[#allocation10 + $0x510] sm:$0xff] }
 0x244   :  { %v1114_v44 = vld [vmem:[#allocation10 + $0x608] sm:$0xff] }
 0x245   :  { %2598 = vmatpush1.bf16.msra.mxu0 %v6539_v34  ;;  %2641 = vmatpush1.bf16.msra.mxu1 %v6667_v35  ;;  %v1126_v34 = vld [vmem:[#allocation10 + $0x668] sm:$0xff]  ;;  %v6611_v35 = vcombine.low %v1002_v23, %v1006_v24  ;;  %v947_v24 = vld [vmem:[#allocation10 + $0xd0] sm:$0xff] }
 0x246   :  { %2599 = vmatprep.subr.bf16.mxu0 %v6532_v36  ;;  %2642 = vmatprep.subr.bf16.mxu1 %v6660_v37  ;;  %v6739_v36 = vcombine.low %v1130_v25, %v1134_v26  ;;  %v6604_v37 = vcombine.high %v994_v31, %v998_v32  ;;  %v6732_v39 = vcombine.high %v1122_v33, %v1126_v34  ;;  %v951_v25 = vld [vmem:[#allocation10 + $0xf0] sm:$0xff] }
 0x247   :  { %v1075_v26 = vld [vmem:[#allocation10 + $0x4d0] sm:$0xff] }
 0x249   :  { %2600 = vmatpush1.bf16.msra.mxu0 %v6531_v45  ;;  %2643 = vmatpush1.bf16.msra.mxu1 %v6659_v50  ;;  %v1118_v45 = vld [vmem:[#allocation10 + $0x628] sm:$0xff]  ;;  %v6603_v50 = vcombine.low %v994_v31, %v998_v32  ;;  %v939_v32 = vld [vmem:[#allocation10 + $0x90] sm:$0xff] }
 0x24a   :  { %2601 = vmatprep.subr.bf16.mxu0 %v6652_v51  ;;  %2644 = vmatprep.subr.bf16.mxu1 %v6780_v52  ;;  %v6731_v51 = vcombine.low %v1122_v33, %v1126_v34  ;;  %v6596_v52 = vcombine.high %v986_v40, %v990_v42  ;;  %v6724_v53 = vcombine.high %v1114_v44, %v1118_v45  ;;  %v943_v33 = vld [vmem:[#allocation10 + $0xb0] sm:$0xff] }
 0x24b   :  { %v1067_v34 = vld [vmem:[#allocation10 + $0x490] sm:$0xff] }
 0x24d   :  { %2602 = vmatpush2.bf16.msra.mxu0 %v6651_v57  ;;  %2645 = vmatpush2.bf16.msra.mxu1 %v6779_v58  ;;  %v1111_v57 = vld [vmem:[#allocation10 + $0x5f0] sm:$0xff]  ;;  %v6595_v58 = vcombine.low %v986_v40, %v990_v42 }
 0x24e   :  { %2603 = vmatprep.subr.bf16.mxu0 %v6644_v59  ;;  %2646 = vmatprep.subr.bf16.mxu1 %v6772_v60  ;;  %v6723_v59 = vcombine.low %v1114_v44, %v1118_v45  ;;  %v6590_v60 = vcombine.high %v979_v54, %v983_v55  ;;  %v6718_v61 = vcombine.high %v1107_v56, %v1111_v57  ;;  %v931_v42 = vld [vmem:[#allocation10 + $0x50] sm:$0xff] }
 0x24f   :  { %v935_v44 = vld [vmem:[#allocation10 + $0x70] sm:$0xff] }
 0x250   :  { %v1059_v45 = vld [vmem:[#allocation10 + $0x450] sm:$0xff] }
 0x251   :  { %2604 = vmatpush2.bf16.msra.mxu0 %v6643_v1  ;;  %2647 = vmatpush2.bf16.msra.mxu1 %v6771_v2  ;;  %v1103_v1 = vld [vmem:[#allocation10 + $0x5b0] sm:$0xff]  ;;  %v6589_v2 = vcombine.low %v979_v54, %v983_v55 }
 0x252   :  { %2605 = vmatprep.subr.bf16.mxu0 %v6636_v3  ;;  %2648 = vmatprep.subr.bf16.mxu1 %v6764_v4  ;;  %v6717_v3 = vcombine.low %v1107_v56, %v1111_v57  ;;  %v6582_v4 = vcombine.high %v971_v62, %v975_v63  ;;  %v6710_v5 = vcombine.high %v1099_v0, %v1103_v1  ;;  %v923_v55 = vld [vmem:[#allocation10 + $0x10] sm:$0xff] }
 0x253   :  { %v927_v56 = vld [vmem:[#allocation10 + $0x30] sm:$0xff] }
 0x254   :  { %v1051_v57 = vld [vmem:[#allocation10 + $0x410] sm:$0xff] }
 0x255   :  { %2606 = vmatpush2.bf16.msra.mxu0 %v6635_v11  ;;  %2649 = vmatpush2.bf16.msra.mxu1 %v6763_v12  ;;  %v1095_v11 = vld [vmem:[#allocation10 + $0x570] sm:$0xff]  ;;  %v6581_v12 = vcombine.low %v971_v62, %v975_v63 }
 0x256   :  { %2607 = vmatprep.subr.bf16.mxu0 %v6628_v13  ;;  %2650 = vmatprep.subr.bf16.mxu1 %v6756_v14  ;;  %v6709_v13 = vcombine.low %v1099_v0, %v1103_v1  ;;  %v6574_v14 = vcombine.high %v963_v6, %v967_v7  ;;  %v6702_v15 = vcombine.high %v1091_v10, %v1095_v11  ;;  %v1043_v63 = vld [vmem:[#allocation10 + $0x3d0] sm:$0xff] }
 0x257   :  { %v1047_v0 = vld [vmem:[#allocation10 + $0x3f0] sm:$0xff] }
 0x258   :  { %v1171_v1 = vld [vmem:[#allocation10 + $0x7d0] sm:$0xff] }
 0x259   :  { %2608 = vmatpush2.bf16.msra.mxu0 %v6627_v19  ;;  %2651 = vmatpush2.bf16.msra.mxu1 %v6755_v20  ;;  %v1087_v19 = vld [vmem:[#allocation10 + $0x530] sm:$0xff]  ;;  %v6573_v20 = vcombine.low %v963_v6, %v967_v7 }
 0x25a   :  { %2609 = vmatprep.subr.bf16.mxu0 %v6620_v21  ;;  %2652 = vmatprep.subr.bf16.mxu1 %v6748_v22  ;;  %v6701_v21 = vcombine.low %v1091_v10, %v1095_v11  ;;  %v6566_v22 = vcombine.high %v955_v16, %v959_v17  ;;  %v6694_v23 = vcombine.high %v1083_v18, %v1087_v19  ;;  %v1035_v7 = vld [vmem:[#allocation10 + $0x390] sm:$0xff] }
 0x25b   :  { %v1039_v10 = vld [vmem:[#allocation10 + $0x3b0] sm:$0xff] }
 0x25c   :  { %v1163_v11 = vld [vmem:[#allocation10 + $0x790] sm:$0xff] }
 0x25d   :  { %2610 = vmatpush2.bf16.msra.mxu0 %v6619_v27  ;;  %2653 = vmatpush2.bf16.msra.mxu1 %v6747_v28  ;;  %v1079_v27 = vld [vmem:[#allocation10 + $0x4f0] sm:$0xff]  ;;  %v6565_v28 = vcombine.low %v955_v16, %v959_v17 }
 0x25e   :  { %2611 = vmatprep.subr.bf16.mxu0 %v6612_v29  ;;  %2654 = vmatprep.subr.bf16.mxu1 %v6740_v30  ;;  %v6693_v29 = vcombine.low %v1083_v18, %v1087_v19  ;;  %v6558_v30 = vcombine.high %v947_v24, %v951_v25  ;;  %v6686_v31 = vcombine.high %v1075_v26, %v1079_v27  ;;  %v1027_v17 = vld [vmem:[#allocation10 + $0x350] sm:$0xff] }
 0x25f   :  { %v1031_v18 = vld [vmem:[#allocation10 + $0x370] sm:$0xff] }
 0x260   :  { %v1155_v19 = vld [vmem:[#allocation10 + $0x750] sm:$0xff] }
 0x261   :  { %2612 = vmatpush2.bf16.msra.mxu0 %v6611_v35  ;;  %2655 = vmatpush2.bf16.msra.mxu1 %v6739_v36  ;;  %v1071_v35 = vld [vmem:[#allocation10 + $0x4b0] sm:$0xff]  ;;  %v6557_v36 = vcombine.low %v947_v24, %v951_v25 }
 0x262   :  { %2613 = vmatprep.subr.bf16.mxu0 %v6604_v37  ;;  %2656 = vmatprep.subr.bf16.mxu1 %v6732_v39  ;;  %v6685_v37 = vcombine.low %v1075_v26, %v1079_v27  ;;  %v6550_v39 = vcombine.high %v939_v32, %v943_v33  ;;  %v6678_v40 = vcombine.high %v1067_v34, %v1071_v35  ;;  %v1019_v25 = vld [vmem:[#allocation10 + $0x310] sm:$0xff] }
 0x263   :  { %v1023_v26 = vld [vmem:[#allocation10 + $0x330] sm:$0xff] }
 0x264   :  { %v1147_v27 = vld [vmem:[#allocation10 + $0x710] sm:$0xff] }
 0x265   :  { %2614 = vmatpush2.bf16.msra.mxu0 %v6603_v50  ;;  %2657 = vmatpush2.bf16.msra.mxu1 %v6731_v51  ;;  %v1063_v50 = vld [vmem:[#allocation10 + $0x470] sm:$0xff]  ;;  %v6549_v51 = vcombine.low %v939_v32, %v943_v33 }
 0x266   :  { %2615 = vmatprep.subr.bf16.mxu0 %v6596_v52  ;;  %2658 = vmatprep.subr.bf16.mxu1 %v6724_v53  ;;  %v6677_v52 = vcombine.low %v1067_v34, %v1071_v35  ;;  %v6542_v53 = vcombine.high %v931_v42, %v935_v44  ;;  %v6670_v54 = vcombine.high %v1059_v45, %v1063_v50  ;;  %v1011_v33 = vld [vmem:[#allocation10 + $0x2d0] sm:$0xff] }
 0x267   :  { %v1015_v34 = vld [vmem:[#allocation10 + $0x2f0] sm:$0xff] }
 0x268   :  { %v1139_v35 = vld [vmem:[#allocation10 + $0x6d0] sm:$0xff] }
 0x269   :  { %2616 = vmatpush2.bf16.msra.mxu0 %v6595_v58  ;;  %2659 = vmatpush2.bf16.msra.mxu1 %v6723_v59  ;;  %v1055_v58 = vld [vmem:[#allocation10 + $0x430] sm:$0xff]  ;;  %v6541_v59 = vcombine.low %v931_v42, %v935_v44 }
 0x26a   :  { %2671 = vmatprep.subr.bf16.mxu0 %v6590_v60  ;;  %2714 = vmatprep.subr.bf16.mxu1 %v6718_v61  ;;  %v6669_v60 = vcombine.low %v1059_v45, %v1063_v50  ;;  %v6534_v61 = vcombine.high %v923_v55, %v927_v56  ;;  %v6662_v62 = vcombine.high %v1051_v57, %v1055_v58  ;;  %v1003_v44 = vld [vmem:[#allocation10 + $0x290] sm:$0xff] }
 0x26b   :  { %v1007_v45 = vld [vmem:[#allocation10 + $0x2b0] sm:$0xff] }
 0x26c   :  { %2618 = vmatmul.mubr.bf16.vlgmr.msra.gmra.mxu0 %v8467_v48  ;;  %2661 = vmatmul.mubr.bf16.vlgmr.msra.gmra.mxu1 %v8469_v49  ;;  %v1131_v50 = vld [vmem:[#allocation10 + $0x690] sm:$0xff] }
 0x26d   :  { %2672 = vmatpush1.bf16.msra.mxu0 %v6589_v2  ;;  %2703 = vmatprep.mubr.bf16.mxu0 %v8463_v46  ;;  %v1175_v2 = vld [vmem:[#allocation10 + $0x7f0] sm:$0xff] }
 0x26e   :  { %2715 = vmatpush1.bf16.msra.mxu1 %v6717_v3  ;;  %2746 = vmatprep.mubr.bf16.mxu1 %v8465_v47  ;;  %v6533_v3 = vcombine.low %v923_v55, %v927_v56  ;;  %v6782_v6 = vcombine.high %v1171_v1, %v1175_v2  ;;  %v995_v56 = vld [vmem:[#allocation10 + $0x250] sm:$0xff] }
 0x26f   :  { %2673 = vmatprep.subr.bf16.mxu0 %v6582_v4  ;;  %2716 = vmatprep.subr.bf16.mxu1 %v6710_v5  ;;  %v6661_v4 = vcombine.low %v1051_v57, %v1055_v58  ;;  %v6654_v5 = vcombine.high %v1043_v63, %v1047_v0  ;;  %v999_v57 = vld [vmem:[#allocation10 + $0x270] sm:$0xff] }
 0x270   :  { %v1123_v58 = vld [vmem:[#allocation10 + $0x650] sm:$0xff] }
 0x271   :  { %2674 = vmatpush1.bf16.msra.mxu0 %v6581_v12  ;;  %v1167_v12 = vld [vmem:[#allocation10 + $0x7b0] sm:$0xff] }
 0x272   :  { %2717 = vmatpush1.bf16.msra.mxu1 %v6709_v13  ;;  %2675 = vmatprep.subr.bf16.mxu0 %v6574_v14  ;;  %v6653_v13 = vcombine.low %v1043_v63, %v1047_v0  ;;  %v6781_v14 = vcombine.low %v1171_v1, %v1175_v2  ;;  %v6774_v16 = vcombine.high %v1163_v11, %v1167_v12  ;;  %v987_v0 = vld [vmem:[#allocation10 + $0x210] sm:$0xff] }
 0x273   :  { %2718 = vmatprep.subr.bf16.mxu1 %v6702_v15  ;;  %v6646_v15 = vcombine.high %v1035_v7, %v1039_v10  ;;  %v991_v1 = vld [vmem:[#allocation10 + $0x230] sm:$0xff] }
 0x274   :  { %v1115_v2 = vld [vmem:[#allocation10 + $0x610] sm:$0xff] }
 0x275   :  { %2676 = vmatpush1.bf16.msra.mxu0 %v6573_v20  ;;  %v1159_v20 = vld [vmem:[#allocation10 + $0x770] sm:$0xff] }
 0x276   :  { %2719 = vmatpush1.bf16.msra.mxu1 %v6701_v21  ;;  %2677 = vmatprep.subr.bf16.mxu0 %v6566_v22  ;;  %v6645_v21 = vcombine.low %v1035_v7, %v1039_v10  ;;  %v6773_v22 = vcombine.low %v1163_v11, %v1167_v12  ;;  %v6766_v24 = vcombine.high %v1155_v19, %v1159_v20  ;;  %v980_v10 = vld [vmem:[#allocation10 + $0x1d8] sm:$0xff] }
 0x277   :  { %2720 = vmatprep.subr.bf16.mxu1 %v6694_v23  ;;  %v6638_v23 = vcombine.high %v1027_v17, %v1031_v18  ;;  %v984_v11 = vld [vmem:[#allocation10 + $0x1f8] sm:$0xff] }
 0x278   :  { %v1108_v12 = vld [vmem:[#allocation10 + $0x5d8] sm:$0xff] }
 0x279   :  { %2678 = vmatpush1.bf16.msra.mxu0 %v6565_v28  ;;  %v1151_v28 = vld [vmem:[#allocation10 + $0x730] sm:$0xff] }
 0x27a   :  { %2721 = vmatpush1.bf16.msra.mxu1 %v6693_v29  ;;  %2679 = vmatprep.subr.bf16.mxu0 %v6558_v30  ;;  %v6637_v29 = vcombine.low %v1027_v17, %v1031_v18  ;;  %v6765_v30 = vcombine.low %v1155_v19, %v1159_v20  ;;  %v6758_v32 = vcombine.high %v1147_v27, %v1151_v28  ;;  %v972_v18 = vld [vmem:[#allocation10 + $0x198] sm:$0xff] }
 0x27b   :  { %2722 = vmatprep.subr.bf16.mxu1 %v6686_v31  ;;  %v6630_v31 = vcombine.high %v1019_v25, %v1023_v26  ;;  %v976_v19 = vld [vmem:[#allocation10 + $0x1b8] sm:$0xff]  ;;  %v6591_v20 = vcombine.low %v980_v10, %v984_v11 }
 0x27d   :  { %2680 = vmatpush1.bf16.msra.mxu0 %v6557_v36  ;;  %v1143_v36 = vld [vmem:[#allocation10 + $0x6f0] sm:$0xff] }
 0x27e   :  { %2723 = vmatpush1.bf16.msra.mxu1 %v6685_v37  ;;  %2681 = vmatprep.subr.bf16.mxu0 %v6550_v39  ;;  %v6629_v37 = vcombine.low %v1019_v25, %v1023_v26  ;;  %v6757_v39 = vcombine.low %v1147_v27, %v1151_v28  ;;  %v6750_v42 = vcombine.high %v1139_v35, %v1143_v36  ;;  %v964_v25 = vld [vmem:[#allocation10 + $0x158] sm:$0xff] }
 0x27f   :  { %2724 = vmatprep.subr.bf16.mxu1 %v6678_v40  ;;  %v6622_v40 = vcombine.high %v1011_v33, %v1015_v34  ;;  %v968_v26 = vld [vmem:[#allocation10 + $0x178] sm:$0xff] }
 0x280   :  { %v1092_v28 = vld [vmem:[#allocation10 + $0x558] sm:$0xff] }
 0x281   :  { %2682 = vmatpush1.bf16.msra.mxu0 %v6549_v51  ;;  %v1135_v51 = vld [vmem:[#allocation10 + $0x6b0] sm:$0xff] }
 0x282   :  { %2725 = vmatpush1.bf16.msra.mxu1 %v6677_v52  ;;  %2683 = vmatprep.subr.bf16.mxu0 %v6542_v53  ;;  %v6621_v52 = vcombine.low %v1011_v33, %v1015_v34  ;;  %v6749_v53 = vcombine.low %v1139_v35, %v1143_v36  ;;  %v6742_v55 = vcombine.high %v1131_v50, %v1135_v51  ;;  %v956_v34 = vld [vmem:[#allocation10 + $0x118] sm:$0xff] }
 0x283   :  { %2726 = vmatprep.subr.bf16.mxu1 %v6670_v54  ;;  %v6614_v54 = vcombine.high %v1003_v44, %v1007_v45  ;;  %v960_v35 = vld [vmem:[#allocation10 + $0x138] sm:$0xff] }
 0x284   :  { %v1084_v36 = vld [vmem:[#allocation10 + $0x518] sm:$0xff] }
 0x285   :  { %2684 = vmatpush1.bf16.msra.mxu0 %v6541_v59  ;;  %v1127_v59 = vld [vmem:[#allocation10 + $0x670] sm:$0xff] }
 0x286   :  { %2727 = vmatpush1.bf16.msra.mxu1 %v6669_v60  ;;  %2685 = vmatprep.subr.bf16.mxu0 %v6534_v61  ;;  %v6613_v60 = vcombine.low %v1003_v44, %v1007_v45  ;;  %v6741_v61 = vcombine.low %v1131_v50, %v1135_v51  ;;  %v6734_v63 = vcombine.high %v1123_v58, %v1127_v59  ;;  %v948_v44 = vld [vmem:[#allocation10 + $0xd8] sm:$0xff] }
 0x287   :  { %2728 = vmatprep.subr.bf16.mxu1 %v6662_v62  ;;  %v6606_v62 = vcombine.high %v995_v56, %v999_v57  ;;  %v952_v45 = vld [vmem:[#allocation10 + $0xf8] sm:$0xff] }
 0x288   :  { %v1076_v50 = vld [vmem:[#allocation10 + $0x4d8] sm:$0xff] }
 0x289   :  { %2686 = vmatpush1.bf16.msra.mxu0 %v6533_v3  ;;  %v1119_v3 = vld [vmem:[#allocation10 + $0x630] sm:$0xff]  ;;  %v1080_v51 = vld [vmem:[#allocation10 + $0x4f8] sm:$0xff] }
 0x28a   :  { %2729 = vmatpush1.bf16.msra.mxu1 %v6661_v4  ;;  %2687 = vmatprep.subr.bf16.mxu0 %v6654_v5  ;;  %v6605_v4 = vcombine.low %v995_v56, %v999_v57  ;;  %v6733_v5 = vcombine.low %v1123_v58, %v1127_v59  ;;  %v6726_v7 = vcombine.high %v1115_v2, %v1119_v3  ;;  %v944_v56 = vld [vmem:[#allocation10 + $0xb8] sm:$0xff] }
 0x28b   :  { %2730 = vmatprep.subr.bf16.mxu1 %v6782_v6  ;;  %v6598_v6 = vcombine.high %v987_v0, %v991_v1  ;;  %v1068_v57 = vld [vmem:[#allocation10 + $0x498] sm:$0xff]  ;;  %v6559_v59 = vcombine.low %v948_v44, %v952_v45 }
 0x28c   :  { %v1072_v58 = vld [vmem:[#allocation10 + $0x4b8] sm:$0xff] }
 0x28d   :  { %2688 = vmatpush2.bf16.msra.mxu0 %v6653_v13  ;;  %v1112_v13 = vld [vmem:[#allocation10 + $0x5f8] sm:$0xff] }
 0x28e   :  { %2731 = vmatpush2.bf16.msra.mxu1 %v6781_v14  ;;  %2689 = vmatprep.subr.bf16.mxu0 %v6646_v15  ;;  %v6597_v14 = vcombine.low %v987_v0, %v991_v1  ;;  %v6725_v15 = vcombine.low %v1115_v2, %v1119_v3  ;;  %v6720_v17 = vcombine.high %v1108_v12, %v1112_v13  ;;  %v936_v0 = vld [vmem:[#allocation10 + $0x78] sm:$0xff] }
 0x28f   :  { %2732 = vmatprep.subr.bf16.mxu1 %v6774_v16  ;;  %v6592_v16 = vcombine.high %v980_v10, %v984_v11  ;;  %v1060_v1 = vld [vmem:[#allocation10 + $0x458] sm:$0xff] }
 0x290   :  { %v1064_v2 = vld [vmem:[#allocation10 + $0x478] sm:$0xff] }
 0x291   :  { %2690 = vmatpush2.bf16.msra.mxu0 %v6645_v21  ;;  %v1100_v21 = vld [vmem:[#allocation10 + $0x598] sm:$0xff] }
 0x292   :  { %2733 = vmatpush2.bf16.msra.mxu1 %v6773_v22  ;;  %2691 = vmatprep.subr.bf16.mxu0 %v6638_v23  ;;  %v1104_v22 = vld [vmem:[#allocation10 + $0x5b8] sm:$0xff]  ;;  %v6719_v23 = vcombine.low %v1108_v12, %v1112_v13 }
 0x293   :  { %2734 = vmatprep.subr.bf16.mxu1 %v6766_v24  ;;  %v6584_v24 = vcombine.high %v972_v18, %v976_v19  ;;  %v6712_v27 = vcombine.high %v1100_v21, %v1104_v22  ;;  %v928_v10 = vld [vmem:[#allocation10 + $0x38] sm:$0xff] }
 0x294   :  { %v1052_v11 = vld [vmem:[#allocation10 + $0x418] sm:$0xff] }
 0x295   :  { %2692 = vmatpush2.bf16.msra.mxu0 %v6637_v29  ;;  %v1096_v29 = vld [vmem:[#allocation10 + $0x578] sm:$0xff] }
 0x296   :  { %2735 = vmatpush2.bf16.msra.mxu1 %v6765_v30  ;;  %2693 = vmatprep.subr.bf16.mxu0 %v6630_v31  ;;  %v6583_v30 = vcombine.low %v972_v18, %v976_v19  ;;  %v6711_v31 = vcombine.low %v1100_v21, %v1104_v22  ;;  %v6704_v33 = vcombine.high %v1092_v28, %v1096_v29  ;;  %v1056_v12 = vld [vmem:[#allocation10 + $0x438] sm:$0xff] }
 0x297   :  { %2736 = vmatprep.subr.bf16.mxu1 %v6758_v32  ;;  %v6576_v32 = vcombine.high %v964_v25, %v968_v26  ;;  %v1048_v18 = vld [vmem:[#allocation10 + $0x3f8] sm:$0xff]  ;;  %v6663_v22 = vcombine.low %v1052_v11, %v1056_v12 }
 0x298   :  { %v1172_v19 = vld [vmem:[#allocation10 + $0x7d8] sm:$0xff] }
 0x299   :  { %2694 = vmatpush2.bf16.msra.mxu0 %v6629_v37  ;;  %v1088_v37 = vld [vmem:[#allocation10 + $0x538] sm:$0xff] }
 0x29a   :  { %2737 = vmatpush2.bf16.msra.mxu1 %v6757_v39  ;;  %2695 = vmatprep.subr.bf16.mxu0 %v6622_v40  ;;  %v6575_v39 = vcombine.low %v964_v25, %v968_v26  ;;  %v6703_v40 = vcombine.low %v1092_v28, %v1096_v29  ;;  %v1036_v25 = vld [vmem:[#allocation10 + $0x398] sm:$0xff] }
 0x29b   :  { %2738 = vmatprep.subr.bf16.mxu1 %v6750_v42  ;;  %v6568_v42 = vcombine.high %v956_v34, %v960_v35  ;;  %v1040_v26 = vld [vmem:[#allocation10 + $0x3b8] sm:$0xff] }
 0x29c   :  { %v1168_v28 = vld [vmem:[#allocation10 + $0x7b8] sm:$0xff] }
 0x29d   :  { %2696 = vmatpush2.bf16.msra.mxu0 %v6621_v52  ;;  %v6695_v52 = vcombine.low %v1084_v36, %v1088_v37 }
 0x29e   :  { %2739 = vmatpush2.bf16.msra.mxu1 %v6749_v53  ;;  %2697 = vmatprep.subr.bf16.mxu0 %v6614_v54  ;;  %v6560_v53 = vcombine.high %v948_v44, %v952_v45  ;;  %v6688_v54 = vcombine.high %v1076_v50, %v1080_v51  ;;  %v1024_v44 = vld [vmem:[#allocation10 + $0x338] sm:$0xff] }
 0x29f   :  { %2740 = vmatprep.subr.bf16.mxu1 %v6742_v55  ;;  %v940_v55 = vld [vmem:[#allocation10 + $0x98] sm:$0xff] }
 0x2a0   :  { %v6551_v3 = vcombine.low %v940_v55, %v944_v56  ;;  %v1148_v45 = vld [vmem:[#allocation10 + $0x718] sm:$0xff] }
 0x2a1   :  { %2698 = vmatpush2.bf16.msra.mxu0 %v6613_v60  ;;  %v6687_v60 = vcombine.low %v1076_v50, %v1080_v51  ;;  %v1152_v50 = vld [vmem:[#allocation10 + $0x738] sm:$0xff] }
 0x2a2   :  { %2741 = vmatpush2.bf16.msra.mxu1 %v6741_v61  ;;  %2699 = vmatprep.subr.bf16.mxu0 %v6606_v62  ;;  %v6552_v61 = vcombine.high %v940_v55, %v944_v56  ;;  %v6680_v62 = vcombine.high %v1068_v57, %v1072_v58  ;;  %v1016_v55 = vld [vmem:[#allocation10 + $0x2f8] sm:$0xff] }
 0x2a3   :  { %2742 = vmatprep.subr.bf16.mxu1 %v6734_v63  ;;  %v932_v63 = vld [vmem:[#allocation10 + $0x58] sm:$0xff] }
 0x2a4   :  { %v6543_v13 = vcombine.low %v932_v63, %v936_v0  ;;  %v1140_v56 = vld [vmem:[#allocation10 + $0x6d8] sm:$0xff] }
 0x2a5   :  { %2700 = vmatpush2.bf16.msra.mxu0 %v6605_v4  ;;  %v6679_v4 = vcombine.low %v1068_v57, %v1072_v58  ;;  %v1144_v57 = vld [vmem:[#allocation10 + $0x6f8] sm:$0xff] }
 0x2a6   :  { %2743 = vmatpush2.bf16.msra.mxu1 %v6733_v5  ;;  %2701 = vmatprep.subr.bf16.mxu0 %v6598_v6  ;;  %v6544_v5 = vcombine.high %v932_v63, %v936_v0  ;;  %v6672_v6 = vcombine.high %v1060_v1, %v1064_v2  ;;  %v1008_v63 = vld [vmem:[#allocation10 + $0x2b8] sm:$0xff] }
 0x2a7   :  { %2744 = vmatprep.subr.bf16.mxu1 %v6726_v7  ;;  %v924_v7 = vld [vmem:[#allocation10 + $0x18] sm:$0xff] }
 0x2a8   :  { %v6535_v21 = vcombine.low %v924_v7, %v928_v10  ;;  %v1132_v0 = vld [vmem:[#allocation10 + $0x698] sm:$0xff] }
 0x2a9   :  { %2702 = vmatpush2.bf16.msra.mxu0 %v6597_v14  ;;  %v6671_v14 = vcombine.low %v1060_v1, %v1064_v2  ;;  %v1136_v1 = vld [vmem:[#allocation10 + $0x6b8] sm:$0xff] }
 0x2aa   :  { %2745 = vmatpush2.bf16.msra.mxu1 %v6725_v15  ;;  %2757 = vmatprep.subr.bf16.mxu0 %v6592_v16  ;;  %v6536_v15 = vcombine.high %v924_v7, %v928_v10  ;;  %v6664_v16 = vcombine.high %v1052_v11, %v1056_v12  ;;  %v1000_v7 = vld [vmem:[#allocation10 + $0x278] sm:$0xff] }
 0x2ab   :  { %2800 = vmatprep.subr.bf16.mxu1 %v6720_v17  ;;  %v1044_v17 = vld [vmem:[#allocation10 + $0x3d8] sm:$0xff] }
 0x2ac   :  { %2704 = vmatmul.mubr.bf16.vlgmr.msra.gmra.mxu0 %v8467_v48  ;;  %v6655_v29 = vcombine.low %v1044_v17, %v1048_v18  ;;  %v1124_v10 = vld [vmem:[#allocation10 + $0x658] sm:$0xff] }
 0x2ad   :  { %2747 = vmatmul.mubr.bf16.vlgmr.msra.gmra.mxu1 %v8469_v49  ;;  %2758 = vmatpush1.bf16.msra.mxu0 %v6591_v20  ;;  %v1176_v20 = vld [vmem:[#allocation10 + $0x7f8] sm:$0xff] }
 0x2ae   :  { %2789 = vmatprep.mubr.bf16.mxu0 %v8463_v46  ;;  %2801 = vmatpush1.bf16.msra.mxu1 %v6719_v23  ;;  %v6696_v46 = vcombine.high %v1084_v36, %v1088_v37  ;;  %v6656_v23 = vcombine.high %v1044_v17, %v1048_v18  ;;  %v1160_v36 = vld [vmem:[#allocation10 + $0x778] sm:$0xff]  ;;  %v6647_v37 = vcombine.low %v1036_v25, %v1040_v26 }
 0x2af   :  { %2832 = vmatprep.mubr.bf16.mxu1 %v8465_v47  ;;  %2759 = vmatprep.subr.bf16.mxu0 %v6584_v24  ;;  %v6567_v47 = vcombine.low %v956_v34, %v960_v35  ;;  %v6784_v24 = vcombine.high %v1172_v19, %v1176_v20  ;;  %v1032_v34 = vld [vmem:[#allocation10 + $0x378] sm:$0xff] }
 0x2b0   :  { %2802 = vmatprep.subr.bf16.mxu1 %v6712_v27  ;;  %v1164_v27 = vld [vmem:[#allocation10 + $0x798] sm:$0xff] }
 0x2b1   :  { %2760 = vmatpush1.bf16.msra.mxu0 %v6583_v30  ;;  %v6783_v30 = vcombine.low %v1172_v19, %v1176_v20  ;;  %v1156_v35 = vld [vmem:[#allocation10 + $0x758] sm:$0xff] }
 0x2b2   :  { %2803 = vmatpush1.bf16.msra.mxu1 %v6711_v31  ;;  %2761 = vmatprep.subr.bf16.mxu0 %v6576_v32  ;;  %v6648_v31 = vcombine.high %v1036_v25, %v1040_v26  ;;  %v6776_v32 = vcombine.high %v1164_v27, %v1168_v28  ;;  %v1128_v11 = vld [vmem:[#allocation10 + $0x678] sm:$0xff]  ;;  %v7470_v26 = vld [vmem:[#allocation13 + $0x18c] ss:$28 sps:$4 sm:$0xff]  }
 0x2b3   :  { %2804 = vmatprep.subr.bf16.mxu1 %v6704_v33  ;;  %v1028_v33 = vld [vmem:[#allocation10 + $0x358] sm:$0xff] }
 0x2b4   :  { %v6639_v51 = vcombine.low %v1028_v33, %v1032_v34  ;;  %v992_v17 = vld [vmem:[#allocation10 + $0x238] sm:$0xff] }
 0x2b5   :  { %2762 = vmatpush1.bf16.msra.mxu0 %v6575_v39  ;;  %v6775_v39 = vcombine.low %v1164_v27, %v1168_v28  ;;  %v1116_v18 = vld [vmem:[#allocation10 + $0x618] sm:$0xff]  ;;  %v7485_v27 = vld [vmem:[#allocation13 + $0x50c] ss:$28 sps:$4 sm:$0xff]  }
 0x2b6   :  { %2805 = vmatpush1.bf16.msra.mxu1 %v6703_v40  ;;  %2763 = vmatprep.subr.bf16.mxu0 %v6568_v42  ;;  %v6640_v40 = vcombine.high %v1028_v33, %v1032_v34  ;;  %v6768_v42 = vcombine.high %v1156_v35, %v1160_v36  ;;  %v1120_v19 = vld [vmem:[#allocation10 + $0x638] sm:$0xff]  ;;  %v7468_v28 = vld [vmem:[#allocation13 + $0x188] ss:$28 sps:$4 sm:$0xff]  }
 0x2b7   :  { %2806 = vmatprep.subr.bf16.mxu1 %v6696_v46  ;;  %v1020_v46 = vld [vmem:[#allocation10 + $0x318] sm:$0xff]  ;;  %v6727_v25 = vcombine.low %v1116_v18, %v1120_v19 }
 0x2b8   :  { %v6631_v58 = vcombine.low %v1020_v46, %v1024_v44  ;;  %v7491_v33 = vld [vmem:[#allocation13 + $0x4d4] ss:$28 sps:$4 sm:$0xff]  }
 0x2b9   :  { %2764 = vmatpush1.bf16.msra.mxu0 %v6567_v47  ;;  %v6767_v47 = vcombine.low %v1156_v35, %v1160_v36  ;;  %v7471_v36 = vld [vmem:[#allocation13 + $0x150] ss:$28 sps:$4 sm:$0xff]  }
 0x2ba   :  { %2807 = vmatpush1.bf16.msra.mxu1 %v6695_v52  ;;  %2765 = vmatprep.subr.bf16.mxu0 %v6560_v53  ;;  %v6632_v52 = vcombine.high %v1020_v46, %v1024_v44  ;;  %v6760_v53 = vcombine.high %v1148_v45, %v1152_v50  ;;  %v7497_v44 = vld [vmem:[#allocation13 + $0x49c] ss:$28 sps:$4 sm:$0xff]  }
 0x2bb   :  { %2808 = vmatprep.subr.bf16.mxu1 %v6688_v54  ;;  %v1012_v54 = vld [vmem:[#allocation10 + $0x2d8] sm:$0xff] }
 0x2bc   :  { %v6623_v2 = vcombine.low %v1012_v54, %v1016_v55 }
 0x2bd   :  { %2766 = vmatpush1.bf16.msra.mxu0 %v6559_v59  ;;  %v6759_v59 = vcombine.low %v1148_v45, %v1152_v50  ;;  %v7474_v50 = vld [vmem:[#allocation13 + $0x118] ss:$28 sps:$4 sm:$0xff]  }
 0x2be   :  { %2809 = vmatpush1.bf16.msra.mxu1 %v6687_v60  ;;  %2767 = vmatprep.subr.bf16.mxu0 %v6552_v61  ;;  %v6624_v60 = vcombine.high %v1012_v54, %v1016_v55  ;;  %v6752_v61 = vcombine.high %v1140_v56, %v1144_v57  ;;  %v7503_v54 = vld [vmem:[#allocation13 + $0x464] ss:$28 sps:$4 sm:$0xff]  }
 0x2bf   :  { %2810 = vmatprep.subr.bf16.mxu1 %v6680_v62  ;;  %v1004_v62 = vld [vmem:[#allocation10 + $0x298] sm:$0xff] }
 0x2c0   :  { %v6615_v12 = vcombine.low %v1004_v62, %v1008_v63 }
 0x2c1   :  { %2768 = vmatpush1.bf16.msra.mxu0 %v6551_v3  ;;  %v6751_v3 = vcombine.low %v1140_v56, %v1144_v57  ;;  %v7477_v57 = vld [vmem:[#allocation13 + $0xe0] ss:$28 sps:$4 sm:$0xff]  }
 0x2c2   :  { %2811 = vmatpush1.bf16.msra.mxu1 %v6679_v4  ;;  %2769 = vmatprep.subr.bf16.mxu0 %v6544_v5  ;;  %v6616_v4 = vcombine.high %v1004_v62, %v1008_v63  ;;  %v6744_v5 = vcombine.high %v1132_v0, %v1136_v1  ;;  %v7509_v62 = vld [vmem:[#allocation13 + $0x42c] ss:$28 sps:$4 sm:$0xff]  }
 0x2c3   :  { %2812 = vmatprep.subr.bf16.mxu1 %v6672_v6  ;;  %v996_v6 = vld [vmem:[#allocation10 + $0x258] sm:$0xff] }
 0x2c4   :  { %v6607_v20 = vcombine.low %v996_v6, %v1000_v7 }
 0x2c5   :  { %2770 = vmatpush1.bf16.msra.mxu0 %v6543_v13  ;;  %v6743_v13 = vcombine.low %v1132_v0, %v1136_v1  ;;  %v7480_v0 = vld [vmem:[#allocation13 + $0xa8] ss:$28 sps:$4 sm:$0xff]   ;;  %v7488_v1 = vld [vmem:[#allocation13 + $0x74] ss:$28 sps:$4 sm:$0xff]  }
 0x2c6   :  { %2813 = vmatpush1.bf16.msra.mxu1 %v6671_v14  ;;  %2771 = vmatprep.subr.bf16.mxu0 %v6536_v15  ;;  %v6608_v14 = vcombine.high %v996_v6, %v1000_v7  ;;  %v6736_v15 = vcombine.high %v1124_v10, %v1128_v11  ;;  %v7513_v6 = vld [vmem:[#allocation13 + $0x3f0] ss:$28 sps:$4 sm:$0xff]   ;;  %v7521_v7 = vld [vmem:[#allocation13 + $0x3bc] ss:$28 sps:$4 sm:$0xff]  }
 0x2c7   :  { %2814 = vmatprep.subr.bf16.mxu1 %v6664_v16  ;;  %v988_v16 = vld [vmem:[#allocation10 + $0x218] sm:$0xff] }
 0x2c9   :  { %2772 = vmatpush1.bf16.msra.mxu0 %v6535_v21  ;;  %v6735_v21 = vcombine.low %v1124_v10, %v1128_v11  ;;  %v7492_v10 = vld [vmem:[#allocation13 + $0x38] ss:$28 sps:$4 sm:$0xff]   ;;  %v7500_v11 = vld [vmem:[#allocation13 + $0x4] ss:$28 sps:$4 sm:$0xff]  }
 0x2ca   :  { %2815 = vmatpush1.bf16.msra.mxu1 %v6663_v22  ;;  %2773 = vmatprep.subr.bf16.mxu0 %v6656_v23  ;;  %v6600_v22 = vcombine.high %v988_v16, %v992_v17  ;;  %v6728_v23 = vcombine.high %v1116_v18, %v1120_v19  ;;  %v7504_v18 = vld [vmem:[#allocation13 + $0x348] ss:$28 sps:$4 sm:$0xff]   ;;  %v7512_v19 = vld [vmem:[#allocation13 + $0x314] ss:$28 sps:$4 sm:$0xff]  }
 0x2cb   :  { %2816 = vmatprep.subr.bf16.mxu1 %v6784_v24  ;;  %v6599_v24 = vcombine.low %v988_v16, %v992_v17  ;;  %v7525_v16 = vld [vmem:[#allocation13 + $0x380] ss:$28 sps:$4 sm:$0xff]   ;;  %v7533_v17 = vld [vmem:[#allocation13 + $0x6cc] ss:$28 sps:$4 sm:$0xff]  }
 0x2cd   :  { %2774 = vmatpush2.bf16.msra.mxu0 %v6655_v29  ;;  %v8485_v29 = vld [vmem:[#allocation12] sm:$0xff] }
 0x2ce   :  { %2817 = vmatpush2.bf16.msra.mxu1 %v6783_v30  ;;  %2775 = vmatprep.subr.bf16.mxu0 %v6648_v31  ;;  %v7473_v30 = vld [vmem:[#allocation13 + $0x154] ss:$28 sps:$4 sm:$0xff]   ;;  %v7483_v31 = vld [vmem:[#allocation13 + $0x508] ss:$28 sps:$4 sm:$0xff]  }
 0x2cf   :  { %2818 = vmatprep.subr.bf16.mxu1 %v6776_v32  ;;  %v1186_v32 = vrot.slane %v8485_v29, %v8449_v43 }
 0x2d1   :  { %2776 = vmatpush2.bf16.msra.mxu0 %v6647_v37 }
 0x2d2   :  { %2819 = vmatpush2.bf16.msra.mxu1 %v6775_v39  ;;  %2777 = vmatprep.subr.bf16.mxu0 %v6640_v40  ;;  %v7476_v40 = vld [vmem:[#allocation13 + $0x11c] ss:$28 sps:$4 sm:$0xff]  }
 0x2d3   :  { %2820 = vmatprep.subr.bf16.mxu1 %v6768_v42  ;;  %v7489_v42 = vld [vmem:[#allocation13 + $0x4d0] ss:$28 sps:$4 sm:$0xff]  }
 0x2d5   :  { %2778 = vmatpush2.bf16.msra.mxu0 %v6639_v51 }
 0x2d6   :  { %2821 = vmatpush2.bf16.msra.mxu1 %v6767_v47  ;;  %2779 = vmatprep.subr.bf16.mxu0 %v6632_v52  ;;  %v7495_v47 = vld [vmem:[#allocation13 + $0x498] ss:$28 sps:$4 sm:$0xff]  }
 0x2d7   :  { %2822 = vmatprep.subr.bf16.mxu1 %v6760_v53 }
 0x2d9   :  { %2780 = vmatpush2.bf16.msra.mxu0 %v6631_v58  ;;  %v7482_v58 = vld [vmem:[#allocation13 + $0xac] ss:$28 sps:$4 sm:$0xff]  }
 0x2da   :  { %2823 = vmatpush2.bf16.msra.mxu1 %v6759_v59  ;;  %2781 = vmatprep.subr.bf16.mxu0 %v6624_v60  ;;  %v7501_v59 = vld [vmem:[#allocation13 + $0x460] ss:$28 sps:$4 sm:$0xff]  }
 0x2db   :  { %2824 = vmatprep.subr.bf16.mxu1 %v6752_v61 }
 0x2dd   :  { %2782 = vmatpush2.bf16.msra.mxu0 %v6623_v2  ;;  %v7507_v2 = vld [vmem:[#allocation13 + $0x428] ss:$28 sps:$4 sm:$0xff]  }
 0x2de   :  { %2825 = vmatpush2.bf16.msra.mxu1 %v6751_v3  ;;  %2783 = vmatprep.subr.bf16.mxu0 %v6616_v4  ;;  %v7515_v3 = vld [vmem:[#allocation13 + $0x3f4] ss:$28 sps:$4 sm:$0xff]  }
 0x2df   :  { %2826 = vmatprep.subr.bf16.mxu1 %v6744_v5  ;;  %v7486_v4 = vld [vmem:[#allocation13 + $0x70] ss:$28 sps:$4 sm:$0xff]   ;;  %v7494_v5 = vld [vmem:[#allocation13 + $0x3c] ss:$28 sps:$4 sm:$0xff]  }
 0x2e1   :  { %2784 = vmatpush2.bf16.msra.mxu0 %v6615_v12  ;;  %v7519_v12 = vld [vmem:[#allocation13 + $0x3b8] ss:$28 sps:$4 sm:$0xff]  }
 0x2e2   :  { %2827 = vmatpush2.bf16.msra.mxu1 %v6743_v13  ;;  %2785 = vmatprep.subr.bf16.mxu0 %v6608_v14  ;;  %v7527_v13 = vld [vmem:[#allocation13 + $0x384] ss:$28 sps:$4 sm:$0xff]  }
 0x2e3   :  { %2828 = vmatprep.subr.bf16.mxu1 %v6736_v15  ;;  %v7498_v14 = vld [vmem:[#allocation13] ss:$28 sps:$4 sm:$0xff]   ;;  %v7506_v15 = vld [vmem:[#allocation13 + $0x34c] ss:$28 sps:$4 sm:$0xff]  }
 0x2e5   :  { %2786 = vmatpush2.bf16.msra.mxu0 %v6607_v20  ;;  %v7531_v20 = vld [vmem:[#allocation13 + $0x6c8] ss:$28 sps:$4 sm:$0xff]  }
 0x2e6   :  { %2829 = vmatpush2.bf16.msra.mxu1 %v6735_v21  ;;  %2787 = vmatprep.subr.bf16.mxu0 %v6600_v22  ;;  %v7539_v21 = vld [vmem:[#allocation13 + $0x694] ss:$28 sps:$4 sm:$0xff]  }
 0x2e7   :  { %2830 = vmatprep.subr.bf16.mxu1 %v6728_v23  ;;  %v7510_v22 = vld [vmem:[#allocation13 + $0x310] ss:$28 sps:$4 sm:$0xff]   ;;  %v7518_v23 = vld [vmem:[#allocation13 + $0x2dc] ss:$28 sps:$4 sm:$0xff]  }
 0x2e9   :  { %2788 = vmatpush2.bf16.msra.mxu0 %v6599_v24  ;;  %v7537_v24 = vld [vmem:[#allocation13 + $0x690] ss:$28 sps:$4 sm:$0xff]  }
 0x2ea   :  { %2831 = vmatpush2.bf16.msra.mxu1 %v6727_v25  ;;  %5720 = vmatprep.subr.bf16.mxu0 %v7470_v26  ;;  %v7545_v25 = vld [vmem:[#allocation13 + $0x65c] ss:$28 sps:$4 sm:$0xff]  }
 0x2eb   :  { %5763 = vmatprep.subr.bf16.mxu1 %v7485_v27  ;;  %v7516_v26 = vld [vmem:[#allocation13 + $0x2d8] ss:$28 sps:$4 sm:$0xff]   ;;  %v7524_v27 = vld [vmem:[#allocation13 + $0x2a4] ss:$28 sps:$4 sm:$0xff]  }
 0x2ec   :  { %2790 = vmatmul.mubr.bf16.vlgmr.msra.gmra.mxu0 %v8467_v48  ;;  %v8490_v34 = vpop.f32.mrf.mxu0  ;;  %v8492_v35 = vpop.f32.mrf.mxu1 }
 0x2ed   :  { %2833 = vmatmul.mubr.bf16.vlgmr.msra.gmra.mxu1 %v8469_v49  ;;  %5721 = vmatpush1.bf16.msra.mxu0 %v7468_v28  ;;  %v7479_v49 = vld [vmem:[#allocation13 + $0xe4] ss:$28 sps:$4 sm:$0xff]   ;;  %v7543_v28 = vld [vmem:[#allocation13 + $0x658] ss:$28 sps:$4 sm:$0xff]  }
 0x2ee   :  { %v2535_v37 = vpop.f32.mrf.mxu0  ;;  %v2578_v39 = vpop.f32.mrf.mxu1  ;;  %5722 = vmatprep.subr.bf16.mxu0 %v7473_v30  ;;  %5764 = vmatpush1.bf16.msra.mxu1 %v7483_v31  ;;  %v7551_v30 = vld [vmem:[#allocation13 + $0x624] ss:$28 sps:$4 sm:$0xff]  }
 0x2ef   :  { %v2536_v46 = vadd.f32 %v2535_v37, %v1186_v32  ;;  %5765 = vmatprep.subr.bf16.mxu1 %v7491_v33  ;;  %v7522_v31 = vld [vmem:[#allocation13 + $0x2a0] ss:$28 sps:$4 sm:$0xff]   ;;  %v7528_v37 = vld [vmem:[#allocation13 + $0x268] ss:$28 sps:$4 sm:$0xff]  }
 0x2f0   :  { %v8495_v45 = vpop.f32.mrf.mxu0  ;;  %v8497_v48 = vpop.f32.mrf.mxu1  ;;  %v7549_v33 = vld [vmem:[#allocation13 + $0x620] ss:$28 sps:$4 sm:$0xff]  }
 0x2f1   :  { %5723 = vmatpush1.bf16.msra.mxu0 %v7471_v36  ;;  %v2579_v52 = vadd.f32 %v2578_v39, %v2536_v46  ;;  %v7554_v36 = vld [vmem:[#allocation13 + $0x5ec] ss:$28 sps:$4 sm:$0xff]   ;;  %v7536_v39 = vld [vmem:[#allocation13 + $0x234] ss:$28 sps:$4 sm:$0xff]   ;;  %v1182_v46 = vrot.slane %v8485_v29, %v8446_v41 }
 0x2f2   :  { %v2539_v51 = vpop.f32.mrf.mxu0  ;;  %5724 = vmatprep.subr.bf16.mxu0 %v7476_v40  ;;  %5766 = vmatpush1.bf16.msra.mxu1 %v7489_v42  ;;  %v2582_v55 = vpop.f32.mrf.mxu1  ;;  %v7552_v40 = vld [vmem:[#allocation13 + $0x5e8] ss:$28 sps:$4 sm:$0xff]   ;;  %v7557_v42 = vld [vmem:[#allocation13 + $0x5b4] ss:$28 sps:$4 sm:$0xff]  }
 0x2f3   :  { %v2540_v53 = vadd.f32 %v2539_v51, %v1186_v32  ;;  %5767 = vmatprep.subr.bf16.mxu1 %v7497_v44  ;;  %v2844_v60 = vmax.f32 %v2579_v52, 0.0  ;;  %v7530_v32 = vld [vmem:[#allocation13 + $0x26c] ss:$28 sps:$4 sm:$0xff]   ;;  %v7542_v51 = vld [vmem:[#allocation13 + $0x1fc] ss:$28 sps:$4 sm:$0xff]   ;;  %v2534_v52 = vadd.f32 %v8490_v34, %v1182_v46 }
 0x2f4   :  { %v7534_v44 = vld [vmem:[#allocation13 + $0x230] ss:$28 sps:$4 sm:$0xff]  }
 0x2f5   :  { %v2583_v56 = vadd.f32 %v2582_v55, %v2540_v53  ;;  %5725 = vmatpush1.bf16.msra.mxu0 %v7474_v50  ;;  %v2538_v50 = vadd.f32 %v8495_v45, %v1182_v46  ;;  %v7540_v53 = vld [vmem:[#allocation13 + $0x1f8] ss:$28 sps:$4 sm:$0xff]   ;;  %v7548_v55 = vld [vmem:[#allocation13 + $0x1c4] ss:$28 sps:$4 sm:$0xff]   ;;  %v2577_v45 = vadd.f32 %v8492_v35, %v2534_v52  ;;  %v7614_v34 = vld [vmem:[#allocation13 + $0xc0c] ss:$28 sps:$4 sm:$0xff]   ;;  %v1194_v35 = vrot.slane %v8485_v29, %v8454_v8 }
 0x2f6   :  { %5726 = vmatprep.subr.bf16.mxu0 %v7479_v49  ;;  %5768 = vmatpush1.bf16.msra.mxu1 %v7495_v47  ;;  %v7555_v49 = vld [vmem:[#allocation13 + $0x5b0] ss:$28 sps:$4 sm:$0xff]   ;;  %v7560_v47 = vld [vmem:[#allocation13 + $0x57c] ss:$28 sps:$4 sm:$0xff]   ;;  %v7632_v52 = vld [vmem:[#allocation13 + $0xb64] ss:$28 sps:$4 sm:$0xff]  }
 0x2f7   :  { %v2852_v61 = vmax.f32 %v2583_v56, 0.0  ;;  %5769 = vmatprep.subr.bf16.mxu1 %v7503_v54  ;;  %v2581_v54 = vadd.f32 %v8497_v48, %v2538_v50  ;;  %v7558_v56 = vld [vmem:[#allocation13 + $0x578] ss:$28 sps:$4 sm:$0xff]   ;;  %v7564_v48 = vld [vmem:[#allocation13 + $0x888] ss:$28 sps:$4 sm:$0xff]  }
 0x2f8   :  { %v7618_v46 = vld [vmem:[#allocation13 + $0xbd0] ss:$28 sps:$4 sm:$0xff]   ;;  %v7626_v50 = vld [vmem:[#allocation13 + $0xb9c] ss:$28 sps:$4 sm:$0xff]  }
 0x2f9   :  { %v8499_v63 = vpack.c.bf16 %v2852_v61, %v2844_v60  ;;  %5727 = vmatpush1.bf16.msra.mxu0 %v7477_v57  ;;  %v7563_v57 = vld [vmem:[#allocation13 + $0x544] ss:$28 sps:$4 sm:$0xff]   ;;  %v7566_v61 = vld [vmem:[#allocation13 + $0x88c] ss:$28 sps:$4 sm:$0xff]  }
 0x2fa   :  { %5728 = vmatprep.subr.bf16.mxu0 %v7482_v58  ;;  %5770 = vmatpush1.bf16.msra.mxu1 %v7501_v59  ;;  %v7546_v58 = vld [vmem:[#allocation13 + $0x1c0] ss:$28 sps:$4 sm:$0xff]   ;;  %v2851_v59 = vmax.f32 %v2581_v54, 0.0 }
 0x2fb   :  { %5752 = vmatprep.mubr.bf16.mxu0 %v8499_v63  ;;  %5771 = vmatprep.subr.bf16.mxu1 %v7509_v62  ;;  %v7561_v60 = vld [vmem:[#allocation13 + $0x540] ss:$28 sps:$4 sm:$0xff]   ;;  %v2843_v62 = vmax.f32 %v2577_v45, 0.0  ;;  %v7636_v45 = vld [vmem:[#allocation13 + $0xb28] ss:$28 sps:$4 sm:$0xff]  }
 0x2fc   :  { %v7630_v54 = vld [vmem:[#allocation13 + $0xb60] ss:$28 sps:$4 sm:$0xff]  }
 0x2fd   :  { %5729 = vmatpush1.bf16.msra.mxu0 %v7480_v0  ;;  %v8508_v0 = vpack.c.bf16 %v2851_v59, %v2843_v62  ;;  %v7644_v59 = vld [vmem:[#allocation13 + $0xaf4] ss:$28 sps:$4 sm:$0xff]   ;;  %v7650_v62 = vld [vmem:[#allocation13 + $0xabc] ss:$28 sps:$4 sm:$0xff]  }
 0x2fe   :  { %5730 = vmatprep.subr.bf16.mxu0 %v7488_v1  ;;  %5772 = vmatpush1.bf16.msra.mxu1 %v7507_v2  ;;  %v7569_v1 = vld [vmem:[#allocation13 + $0x854] ss:$28 sps:$4 sm:$0xff]   ;;  %v1190_v2 = vrot.slane %v8485_v29, %v8457_v9 }
 0x2ff   :  { %5773 = vmatprep.subr.bf16.mxu1 %v7515_v3 }
 0x301   :  { %5731 = vmatpush1.bf16.msra.mxu0 %v7486_v4 }
 0x302   :  { %5732 = vmatprep.subr.bf16.mxu0 %v7494_v5  ;;  %5774 = vmatpush1.bf16.msra.mxu1 %v7513_v6  ;;  %v7567_v5 = vld [vmem:[#allocation13 + $0x850] ss:$28 sps:$4 sm:$0xff]  }
 0x303   :  { %5775 = vmatprep.subr.bf16.mxu1 %v7521_v7 }
 0x305   :  { %5733 = vmatpush1.bf16.msra.mxu0 %v7492_v10  ;;  %v7572_v10 = vld [vmem:[#allocation13 + $0x81c] ss:$28 sps:$4 sm:$0xff]  }
 0x306   :  { %5734 = vmatprep.subr.bf16.mxu0 %v7500_v11  ;;  %5776 = vmatpush1.bf16.msra.mxu1 %v7519_v12 }
 0x307   :  { %5777 = vmatprep.subr.bf16.mxu1 %v7527_v13 }
 0x309   :  { %5735 = vmatpush1.bf16.msra.mxu0 %v7498_v14 }
 0x30a   :  { %5736 = vmatprep.subr.bf16.mxu0 %v7506_v15  ;;  %5778 = vmatpush1.bf16.msra.mxu1 %v7525_v16  ;;  %v7570_v16 = vld [vmem:[#allocation13 + $0x818] ss:$28 sps:$4 sm:$0xff]  }
 0x30b   :  { %5779 = vmatprep.subr.bf16.mxu1 %v7533_v17 }
 0x30d   :  { %5737 = vmatpush2.bf16.msra.mxu0 %v7504_v18  ;;  %v7575_v18 = vld [vmem:[#allocation13 + $0x7e4] ss:$28 sps:$4 sm:$0xff]  }
 0x30e   :  { %5738 = vmatprep.subr.bf16.mxu0 %v7512_v19  ;;  %5780 = vmatpush2.bf16.msra.mxu1 %v7531_v20 }
 0x30f   :  { %5781 = vmatprep.subr.bf16.mxu1 %v7539_v21 }
 0x311   :  { %5739 = vmatpush2.bf16.msra.mxu0 %v7510_v22 }
 0x312   :  { %5740 = vmatprep.subr.bf16.mxu0 %v7518_v23  ;;  %5782 = vmatpush2.bf16.msra.mxu1 %v7537_v24 }
 0x313   :  { %5783 = vmatprep.subr.bf16.mxu1 %v7545_v25  ;;  %v7573_v25 = vld [vmem:[#allocation13 + $0x7e0] ss:$28 sps:$4 sm:$0xff]  }
 0x315   :  { %5741 = vmatpush2.bf16.msra.mxu0 %v7516_v26 }
 0x316   :  { %5742 = vmatprep.subr.bf16.mxu0 %v7524_v27  ;;  %5784 = vmatpush2.bf16.msra.mxu1 %v7543_v28  ;;  %v7578_v27 = vld [vmem:[#allocation13 + $0x7ac] ss:$28 sps:$4 sm:$0xff]  }
 0x317   :  { %5785 = vmatprep.subr.bf16.mxu1 %v7551_v30 }
 0x319   :  { %5743 = vmatpush2.bf16.msra.mxu0 %v7522_v31 }
 0x31a   :  { %5744 = vmatprep.subr.bf16.mxu0 %v7530_v32  ;;  %5786 = vmatpush2.bf16.msra.mxu1 %v7549_v33  ;;  %v7576_v33 = vld [vmem:[#allocation13 + $0x7a8] ss:$28 sps:$4 sm:$0xff]  }
 0x31b   :  { %5787 = vmatprep.subr.bf16.mxu1 %v7554_v36  ;;  %v7612_v36 = vld [vmem:[#allocation13 + $0xc08] ss:$28 sps:$4 sm:$0xff]  }
 0x31d   :  { %5745 = vmatpush2.bf16.msra.mxu0 %v7528_v37 }
 0x31e   :  { %5746 = vmatprep.subr.bf16.mxu0 %v7536_v39  ;;  %5788 = vmatpush2.bf16.msra.mxu1 %v7552_v40  ;;  %v7581_v39 = vld [vmem:[#allocation13 + $0x774] ss:$28 sps:$4 sm:$0xff]  }
 0x31f   :  { %5789 = vmatprep.subr.bf16.mxu1 %v7557_v42  ;;  %v7620_v40 = vld [vmem:[#allocation13 + $0xbd4] ss:$28 sps:$4 sm:$0xff]  }
 0x320   :  { %v7579_v42 = vld [vmem:[#allocation13 + $0x770] ss:$28 sps:$4 sm:$0xff]  }
 0x321   :  { %5747 = vmatpush2.bf16.msra.mxu0 %v7534_v44  ;;  %v7584_v44 = vld [vmem:[#allocation13 + $0x73c] ss:$28 sps:$4 sm:$0xff]  }
 0x322   :  { %5748 = vmatprep.subr.bf16.mxu0 %v7542_v51  ;;  %5790 = vmatpush2.bf16.msra.mxu1 %v7555_v49  ;;  %v7582_v51 = vld [vmem:[#allocation13 + $0x738] ss:$28 sps:$4 sm:$0xff]  }
 0x323   :  { %5791 = vmatprep.subr.bf16.mxu1 %v7560_v47  ;;  %v7624_v49 = vld [vmem:[#allocation13 + $0xb98] ss:$28 sps:$4 sm:$0xff]   ;;  %v7587_v47 = vld [vmem:[#allocation13 + $0x704] ss:$28 sps:$4 sm:$0xff]  }
 0x325   :  { %5749 = vmatpush2.bf16.msra.mxu0 %v7540_v53  ;;  %v7585_v53 = vld [vmem:[#allocation13 + $0x700] ss:$28 sps:$4 sm:$0xff]  }
 0x326   :  { %5750 = vmatprep.subr.bf16.mxu0 %v7548_v55  ;;  %5792 = vmatpush2.bf16.msra.mxu1 %v7558_v56  ;;  %v7590_v55 = vld [vmem:[#allocation13 + $0xa4c] ss:$28 sps:$4 sm:$0xff]  }
 0x327   :  { %5793 = vmatprep.subr.bf16.mxu1 %v7563_v57  ;;  %v7638_v56 = vld [vmem:[#allocation13 + $0xb2c] ss:$28 sps:$4 sm:$0xff]  }
 0x328   :  { %v7588_v57 = vld [vmem:[#allocation13 + $0xa48] ss:$28 sps:$4 sm:$0xff]  }
 0x329   :  { %5751 = vmatpush2.bf16.msra.mxu0 %v7546_v58  ;;  %v7593_v58 = vld [vmem:[#allocation13 + $0xa14] ss:$28 sps:$4 sm:$0xff]  }
 0x32a   :  { %5794 = vmatpush2.bf16.msra.mxu1 %v7561_v60  ;;  %5806 = vmatprep.subr.bf16.mxu0 %v7566_v61  ;;  %v7591_v60 = vld [vmem:[#allocation13 + $0xa10] ss:$28 sps:$4 sm:$0xff]  }
 0x32b   :  { %5849 = vmatprep.subr.bf16.mxu1 %v7614_v34  ;;  %v7642_v61 = vld [vmem:[#allocation13 + $0xaf0] ss:$28 sps:$4 sm:$0xff]   ;;  %v7596_v34 = vld [vmem:[#allocation13 + $0x9dc] ss:$28 sps:$4 sm:$0xff]  }
 0x32c   :  { %v2619_v3 = vpop.f32.mrf.mxu0  ;;  %v2662_v4 = vpop.f32.mrf.mxu1  ;;  %5753 = vmatmul.mubr.bf16.vlgmr.msra.gmra.mxu0 %v8508_v0 }
 0x32d   :  { %5807 = vmatpush1.bf16.msra.mxu0 %v7564_v48  ;;  %v2620_v12 = vadd.f32 %v2619_v3, %v1190_v2  ;;  %v7594_v48 = vld [vmem:[#allocation13 + $0x9d8] ss:$28 sps:$4 sm:$0xff]   ;;  %v7597_v3 = vld [vmem:[#allocation13 + $0x9a0] ss:$28 sps:$4 sm:$0xff]  }
 0x32e   :  { %v2621_v6 = vpop.f32.mrf.mxu0  ;;  %v2664_v7 = vpop.f32.mrf.mxu1  ;;  %5808 = vmatprep.subr.bf16.mxu0 %v7569_v1  ;;  %v7648_v1 = vld [vmem:[#allocation13 + $0xab8] ss:$28 sps:$4 sm:$0xff]  }
 0x32f   :  { %v2622_v11 = vadd.f32 %v2621_v6, %v1194_v35  ;;  %v2663_v22 = vadd.f32 %v2662_v4, %v2620_v12  ;;  %v7654_v4 = vld [vmem:[#allocation13 + $0xa80] ss:$28 sps:$4 sm:$0xff]   ;;  %v7662_v6 = vld [vmem:[#allocation13 + $0xdcc] ss:$28 sps:$4 sm:$0xff]   ;;  %v7668_v12 = vld [vmem:[#allocation13 + $0xd94] ss:$28 sps:$4 sm:$0xff]  }
 0x330   :  { %v2623_v13 = vpop.f32.mrf.mxu0  ;;  %v2666_v14 = vpop.f32.mrf.mxu1 }
 0x331   :  { %v2624_v15 = vadd.f32 %v2623_v13, %v1190_v2  ;;  %5809 = vmatpush1.bf16.msra.mxu0 %v7567_v5  ;;  %v2665_v19 = vadd.f32 %v2664_v7, %v2622_v11  ;;  %v2845_v31 = vmax.f32 %v2663_v22, 0.0  ;;  %v7656_v2 = vld [vmem:[#allocation13 + $0xa84] ss:$28 sps:$4 sm:$0xff]   ;;  %v7602_v5 = vld [vmem:[#allocation13 + $0x96c] ss:$28 sps:$4 sm:$0xff]  }
 0x332   :  { %v2625_v17 = vpop.f32.mrf.mxu0  ;;  %5810 = vmatprep.subr.bf16.mxu0 %v7572_v10  ;;  %v2668_v23 = vpop.f32.mrf.mxu1  ;;  %v7600_v7 = vld [vmem:[#allocation13 + $0x968] ss:$28 sps:$4 sm:$0xff]   ;;  %v7605_v11 = vld [vmem:[#allocation13 + $0x934] ss:$28 sps:$4 sm:$0xff]   ;;  %v7678_v22 = vld [vmem:[#allocation13 + $0xd20] ss:$28 sps:$4 sm:$0xff]  }
 0x333   :  { %v2667_v20 = vadd.f32 %v2666_v14, %v2624_v15  ;;  %v2626_v21 = vadd.f32 %v2625_v17, %v1194_v35  ;;  %v2846_v28 = vmax.f32 %v2665_v19, 0.0  ;;  %v7599_v35 = vld [vmem:[#allocation13 + $0x9a4] ss:$28 sps:$4 sm:$0xff]   ;;  %v7603_v13 = vld [vmem:[#allocation13 + $0x930] ss:$28 sps:$4 sm:$0xff]  }
 0x334   :  { %v7660_v10 = vld [vmem:[#allocation13 + $0xdc8] ss:$28 sps:$4 sm:$0xff]   ;;  %v7666_v14 = vld [vmem:[#allocation13 + $0xd90] ss:$28 sps:$4 sm:$0xff]   ;;  %v7608_v15 = vld [vmem:[#allocation13 + $0x8fc] ss:$28 sps:$4 sm:$0xff]  }
 0x335   :  { %v2669_v24 = vadd.f32 %v2668_v23, %v2626_v21  ;;  %5811 = vmatpush1.bf16.msra.mxu0 %v7570_v16  ;;  %v2853_v26 = vmax.f32 %v2667_v20, 0.0  ;;  %v7674_v16 = vld [vmem:[#allocation13 + $0xd5c] ss:$28 sps:$4 sm:$0xff]   ;;  %v7611_v19 = vld [vmem:[#allocation13 + $0x8c4] ss:$28 sps:$4 sm:$0xff]  }
 0x336   :  { %5812 = vmatprep.subr.bf16.mxu0 %v7575_v18  ;;  %v7606_v17 = vld [vmem:[#allocation13 + $0x8f8] ss:$28 sps:$4 sm:$0xff]   ;;  %v7680_v20 = vld [vmem:[#allocation13 + $0xd24] ss:$28 sps:$4 sm:$0xff]  }
 0x337   :  { %v2854_v30 = vmax.f32 %v2669_v24, 0.0  ;;  %v8517_v37 = vpack.c.bf16 %v2853_v26, %v2845_v31  ;;  %v7672_v18 = vld [vmem:[#allocation13 + $0xd58] ss:$28 sps:$4 sm:$0xff]   ;;  %v7609_v21 = vld [vmem:[#allocation13 + $0x8c0] ss:$28 sps:$4 sm:$0xff]   ;;  %v1197_v26 = vsub.s32 4, %v8443_v38 }
 0x338   :  { %v7617_v23 = vld [vmem:[#allocation13 + $0x194] ss:$28 sps:$4 sm:$0xff]   ;;  %v7686_v24 = vld [vmem:[#allocation13 + $0xcec] ss:$28 sps:$4 sm:$0xff]  }
 0x339   :  { %v8515_v32 = vpack.c.bf16 %v2854_v30, %v2846_v28  ;;  %5813 = vmatpush1.bf16.msra.mxu0 %v7573_v25  ;;  %v1201_v25 = vsub.s32 5, %v8443_v38  ;;  %v7692_v28 = vld [vmem:[#allocation13 + $0xcb4] ss:$28 sps:$4 sm:$0xff]   ;;  %v1198_v31 = vrot.slane %v8485_v29, %v1197_v26 }
 0x33a   :  { %5814 = vmatprep.subr.bf16.mxu0 %v7578_v27  ;;  %v7684_v27 = vld [vmem:[#allocation13 + $0xce8] ss:$28 sps:$4 sm:$0xff]  }
 0x33b   :  { %5795 = vmatprep.mubr.bf16.mxu1 %v8515_v32  ;;  %v1202_v30 = vrot.slane %v8485_v29, %v1201_v25 }
 0x33c   :  { %5796 = vmatmul.mubr.bf16.vlgmr.msra.gmra.mxu1 %v8517_v37 }
 0x33d   :  { %5815 = vmatpush1.bf16.msra.mxu0 %v7576_v33  ;;  %5850 = vmatpush1.bf16.msra.mxu1 %v7612_v36 }
 0x33e   :  { %5816 = vmatprep.subr.bf16.mxu0 %v7581_v39  ;;  %5851 = vmatprep.subr.bf16.mxu1 %v7620_v40  ;;  %v7690_v39 = vld [vmem:[#allocation13 + $0xcb0] ss:$28 sps:$4 sm:$0xff]  }
 0x341   :  { %5817 = vmatpush1.bf16.msra.mxu0 %v7579_v42  ;;  %5852 = vmatpush1.bf16.msra.mxu1 %v7618_v46  ;;  %v7698_v42 = vld [vmem:[#allocation13 + $0xc7c] ss:$28 sps:$4 sm:$0xff]  }
 0x342   :  { %5818 = vmatprep.subr.bf16.mxu0 %v7584_v44  ;;  %5853 = vmatprep.subr.bf16.mxu1 %v7626_v50 }
 0x345   :  { %5819 = vmatpush1.bf16.msra.mxu0 %v7582_v51  ;;  %5854 = vmatpush1.bf16.msra.mxu1 %v7624_v49 }
 0x346   :  { %5820 = vmatprep.subr.bf16.mxu0 %v7587_v47  ;;  %5855 = vmatprep.subr.bf16.mxu1 %v7632_v52  ;;  %v7696_v52 = vld [vmem:[#allocation13 + $0xc78] ss:$28 sps:$4 sm:$0xff]  }
 0x349   :  { %5821 = vmatpush1.bf16.msra.mxu0 %v7585_v53  ;;  %5856 = vmatpush1.bf16.msra.mxu1 %v7630_v54  ;;  %v7704_v54 = vld [vmem:[#allocation13 + $0xc44] ss:$28 sps:$4 sm:$0xff]  }
 0x34a   :  { %5822 = vmatprep.subr.bf16.mxu0 %v7590_v55  ;;  %5857 = vmatprep.subr.bf16.mxu1 %v7638_v56 }
 0x34d   :  { %5823 = vmatpush2.bf16.msra.mxu0 %v7588_v57  ;;  %5858 = vmatpush1.bf16.msra.mxu1 %v7636_v45 }
 0x34e   :  { %5824 = vmatprep.subr.bf16.mxu0 %v7593_v58  ;;  %5859 = vmatprep.subr.bf16.mxu1 %v7644_v59 }
 0x351   :  { %5825 = vmatpush2.bf16.msra.mxu0 %v7591_v60  ;;  %5860 = vmatpush1.bf16.msra.mxu1 %v7642_v61  ;;  %v7702_v60 = vld [vmem:[#allocation13 + $0xc40] ss:$28 sps:$4 sm:$0xff]  }
 0x352   :  { %5826 = vmatprep.subr.bf16.mxu0 %v7596_v34  ;;  %5861 = vmatprep.subr.bf16.mxu1 %v7650_v62  ;;  %v7710_v34 = vld [vmem:[#allocation13 + $0x514] ss:$28 sps:$4 sm:$0xff]  }
 0x355   :  { %5827 = vmatpush2.bf16.msra.mxu0 %v7594_v48  ;;  %5862 = vmatpush1.bf16.msra.mxu1 %v7648_v1 }
 0x356   :  { %5828 = vmatprep.subr.bf16.mxu0 %v7599_v35  ;;  %5863 = vmatprep.subr.bf16.mxu1 %v7656_v2  ;;  %v7615_v2 = vld [vmem:[#allocation13 + $0x190] ss:$28 sps:$4 sm:$0xff]  }
 0x359   :  { %5829 = vmatpush2.bf16.msra.mxu0 %v7597_v3  ;;  %5864 = vmatpush1.bf16.msra.mxu1 %v7654_v4  ;;  %v7623_v4 = vld [vmem:[#allocation13 + $0x15c] ss:$28 sps:$4 sm:$0xff]  }
 0x35a   :  { %5830 = vmatprep.subr.bf16.mxu0 %v7602_v5  ;;  %5865 = vmatprep.subr.bf16.mxu1 %v7662_v6  ;;  %v7621_v5 = vld [vmem:[#allocation13 + $0x158] ss:$28 sps:$4 sm:$0xff]   ;;  %v7629_v6 = vld [vmem:[#allocation13 + $0x124] ss:$28 sps:$4 sm:$0xff]  }
 0x35d   :  { %5831 = vmatpush2.bf16.msra.mxu0 %v7600_v7  ;;  %5866 = vmatpush2.bf16.msra.mxu1 %v7660_v10  ;;  %v7627_v7 = vld [vmem:[#allocation13 + $0x120] ss:$28 sps:$4 sm:$0xff]   ;;  %v7635_v10 = vld [vmem:[#allocation13 + $0xec] ss:$28 sps:$4 sm:$0xff]  }
 0x35e   :  { %5832 = vmatprep.subr.bf16.mxu0 %v7605_v11  ;;  %5867 = vmatprep.subr.bf16.mxu1 %v7668_v12  ;;  %v7633_v11 = vld [vmem:[#allocation13 + $0xe8] ss:$28 sps:$4 sm:$0xff]   ;;  %v7641_v12 = vld [vmem:[#allocation13 + $0xb4] ss:$28 sps:$4 sm:$0xff]  }
 0x361   :  { %5833 = vmatpush2.bf16.msra.mxu0 %v7603_v13  ;;  %5868 = vmatpush2.bf16.msra.mxu1 %v7666_v14  ;;  %v7639_v13 = vld [vmem:[#allocation13 + $0xb0] ss:$28 sps:$4 sm:$0xff]   ;;  %v7647_v14 = vld [vmem:[#allocation13 + $0x7c] ss:$28 sps:$4 sm:$0xff]  }
 0x362   :  { %5834 = vmatprep.subr.bf16.mxu0 %v7608_v15  ;;  %5869 = vmatprep.subr.bf16.mxu1 %v7674_v16  ;;  %v7645_v15 = vld [vmem:[#allocation13 + $0x78] ss:$28 sps:$4 sm:$0xff]   ;;  %v7653_v16 = vld [vmem:[#allocation13 + $0x44] ss:$28 sps:$4 sm:$0xff]  }
 0x365   :  { %5835 = vmatpush2.bf16.msra.mxu0 %v7606_v17  ;;  %5870 = vmatpush2.bf16.msra.mxu1 %v7672_v18  ;;  %v7651_v17 = vld [vmem:[#allocation13 + $0x40] ss:$28 sps:$4 sm:$0xff]   ;;  %v7659_v18 = vld [vmem:[#allocation13 + $0xc] ss:$28 sps:$4 sm:$0xff]  }
 0x366   :  { %5836 = vmatprep.subr.bf16.mxu0 %v7611_v19  ;;  %5871 = vmatprep.subr.bf16.mxu1 %v7680_v20  ;;  %v7657_v19 = vld [vmem:[#allocation13 + $0x8] ss:$28 sps:$4 sm:$0xff]   ;;  %v7665_v20 = vld [vmem:[#allocation13 + $0x354] ss:$28 sps:$4 sm:$0xff]  }
 0x369   :  { %5837 = vmatpush2.bf16.msra.mxu0 %v7609_v21  ;;  %5872 = vmatpush2.bf16.msra.mxu1 %v7678_v22  ;;  %v7663_v21 = vld [vmem:[#allocation13 + $0x350] ss:$28 sps:$4 sm:$0xff]   ;;  %v7671_v22 = vld [vmem:[#allocation13 + $0x31c] ss:$28 sps:$4 sm:$0xff]  }
 0x36a   :  { %5892 = vmatprep.subr.bf16.mxu0 %v7617_v23  ;;  %5873 = vmatprep.subr.bf16.mxu1 %v7686_v24  ;;  %v7669_v23 = vld [vmem:[#allocation13 + $0x318] ss:$28 sps:$4 sm:$0xff]   ;;  %v7677_v24 = vld [vmem:[#allocation13 + $0x2e4] ss:$28 sps:$4 sm:$0xff]  }
 0x36c   :  { %v2705_v33 = vpop.f32.mrf.mxu0 }
 0x36d   :  { %v2748_v36 = vpop.f32.mrf.mxu1  ;;  %5874 = vmatpush2.bf16.msra.mxu1 %v7684_v27  ;;  %v2706_v50 = vadd.f32 %v2705_v33, %v1198_v31  ;;  %v7675_v27 = vld [vmem:[#allocation13 + $0x2e0] ss:$28 sps:$4 sm:$0xff]   ;;  %v1209_v33 = vsub.s32 7, %v8443_v38 }
 0x36e   :  { %v2707_v40 = vpop.f32.mrf.mxu0  ;;  %5875 = vmatprep.subr.bf16.mxu1 %v7692_v28  ;;  %v7683_v28 = vld [vmem:[#allocation13 + $0x2ac] ss:$28 sps:$4 sm:$0xff]  }
 0x36f   :  { %v2708_v46 = vadd.f32 %v2707_v40, %v1202_v30  ;;  %v2750_v44 = vpop.f32.mrf.mxu1  ;;  %v2749_v45 = vadd.f32 %v2748_v36, %v2706_v50  ;;  %v1205_v36 = vsub.s32 6, %v8443_v38  ;;  %v7695_v40 = vld [vmem:[#allocation13 + $0x23c] ss:$28 sps:$4 sm:$0xff]  }
 0x370   :  { %v2709_v51 = vpop.f32.mrf.mxu0 }
 0x371   :  { %v2710_v49 = vadd.f32 %v2709_v51, %v1198_v31  ;;  %v2752_v47 = vpop.f32.mrf.mxu1  ;;  %5876 = vmatpush2.bf16.msra.mxu1 %v7690_v39  ;;  %v2751_v55 = vadd.f32 %v2750_v44, %v2708_v46  ;;  %v2847_v1 = vmax.f32 %v2749_v45, 0.0  ;;  %v7689_v31 = vld [vmem:[#allocation13 + $0x274] ss:$28 sps:$4 sm:$0xff]   ;;  %v1206_v46 = vrot.slane %v8485_v29, %v1205_v36  ;;  %v7699_v45 = vld [vmem:[#allocation13 + $0x200] ss:$28 sps:$4 sm:$0xff]  }
 0x372   :  { %v2711_v53 = vpop.f32.mrf.mxu0  ;;  %5877 = vmatprep.subr.bf16.mxu1 %v7698_v42  ;;  %v7687_v39 = vld [vmem:[#allocation13 + $0x270] ss:$28 sps:$4 sm:$0xff]   ;;  %v1210_v42 = vrot.slane %v8485_v29, %v1209_v33  ;;  %v7693_v51 = vld [vmem:[#allocation13 + $0x238] ss:$28 sps:$4 sm:$0xff]  }
 0x373   :  { %v2753_v56 = vadd.f32 %v2752_v47, %v2710_v49  ;;  %v2712_v57 = vadd.f32 %v2711_v53, %v1202_v30  ;;  %v2754_v58 = vpop.f32.mrf.mxu1  ;;  %v2848_v62 = vmax.f32 %v2751_v55, 0.0  ;;  %v7681_v30 = vld [vmem:[#allocation13 + $0x2a8] ss:$28 sps:$4 sm:$0xff]   ;;  %v7735_v33 = vld [vmem:[#allocation13 + $0x7b0] ss:$28 sps:$4 sm:$0xff]  }
 0x374   :  { %v7701_v47 = vld [vmem:[#allocation13 + $0x204] ss:$28 sps:$4 sm:$0xff]  }
 0x375   :  { %v2755_v59 = vadd.f32 %v2754_v58, %v2712_v57  ;;  %5878 = vmatpush2.bf16.msra.mxu1 %v7696_v52  ;;  %v2855_v61 = vmax.f32 %v2753_v56, 0.0 }
 0x376   :  { %5879 = vmatprep.subr.bf16.mxu1 %v7704_v54 }
 0x377   :  { %v2856_v48 = vmax.f32 %v2755_v59, 0.0  ;;  %v8531_v3 = vpack.c.bf16 %v2855_v61, %v2847_v1  ;;  %v7707_v59 = vld [vmem:[#allocation13 + $0x1cc] ss:$28 sps:$4 sm:$0xff]  }
 0x378   :  { %v7705_v1 = vld [vmem:[#allocation13 + $0x1c8] ss:$28 sps:$4 sm:$0xff]  }
 0x379   :  { %v8529_v35 = vpack.c.bf16 %v2856_v48, %v2848_v62  ;;  %5880 = vmatpush2.bf16.msra.mxu1 %v7702_v60 }
 0x37a   :  { %5935 = vmatprep.subr.bf16.mxu1 %v7710_v34 }
 0x37b   :  { %5838 = vmatprep.mubr.bf16.mxu0 %v8529_v35 }
 0x37c   :  { %5839 = vmatmul.mubr.bf16.vlgmr.msra.gmra.mxu0 %v8531_v3 }
 0x37d   :  { %5893 = vmatpush1.bf16.msra.mxu0 %v7615_v2  ;;  %5924 = vmatprep.mubr.bf16.mxu0 %v8499_v63 }
 0x37e   :  { %5894 = vmatprep.subr.bf16.mxu0 %v7623_v4  ;;  %v7713_v4 = vld [vmem:[#allocation13 + $0x894] ss:$28 sps:$4 sm:$0xff]  }
 0x381   :  { %5895 = vmatpush1.bf16.msra.mxu0 %v7621_v5 }
 0x382   :  { %5896 = vmatprep.subr.bf16.mxu0 %v7629_v6 }
 0x385   :  { %5897 = vmatpush1.bf16.msra.mxu0 %v7627_v7 }
 0x386   :  { %5898 = vmatprep.subr.bf16.mxu0 %v7635_v10 }
 0x389   :  { %5899 = vmatpush1.bf16.msra.mxu0 %v7633_v11  ;;  %v7708_v11 = vld [vmem:[#allocation13 + $0x510] ss:$28 sps:$4 sm:$0xff]  }
 0x38a   :  { %5900 = vmatprep.subr.bf16.mxu0 %v7641_v12  ;;  %v7711_v12 = vld [vmem:[#allocation13 + $0x890] ss:$28 sps:$4 sm:$0xff]  }
 0x38d   :  { %5901 = vmatpush1.bf16.msra.mxu0 %v7639_v13 }
 0x38e   :  { %5902 = vmatprep.subr.bf16.mxu0 %v7647_v14  ;;  %v7716_v14 = vld [vmem:[#allocation13 + $0x4dc] ss:$28 sps:$4 sm:$0xff]  }
 0x391   :  { %5903 = vmatpush1.bf16.msra.mxu0 %v7645_v15  ;;  %v7719_v15 = vld [vmem:[#allocation13 + $0x85c] ss:$28 sps:$4 sm:$0xff]  }
 0x392   :  { %5904 = vmatprep.subr.bf16.mxu0 %v7653_v16  ;;  %v7714_v16 = vld [vmem:[#allocation13 + $0x4d8] ss:$28 sps:$4 sm:$0xff]  }
 0x395   :  { %5905 = vmatpush1.bf16.msra.mxu0 %v7651_v17  ;;  %v7717_v17 = vld [vmem:[#allocation13 + $0x858] ss:$28 sps:$4 sm:$0xff]  }
 0x396   :  { %5906 = vmatprep.subr.bf16.mxu0 %v7659_v18  ;;  %v7722_v18 = vld [vmem:[#allocation13 + $0x4a4] ss:$28 sps:$4 sm:$0xff]  }
 0x399   :  { %5907 = vmatpush1.bf16.msra.mxu0 %v7657_v19  ;;  %v7725_v19 = vld [vmem:[#allocation13 + $0x824] ss:$28 sps:$4 sm:$0xff]  }
 0x39a   :  { %5908 = vmatprep.subr.bf16.mxu0 %v7665_v20  ;;  %v7720_v20 = vld [vmem:[#allocation13 + $0x4a0] ss:$28 sps:$4 sm:$0xff]  }
 0x39d   :  { %5909 = vmatpush2.bf16.msra.mxu0 %v7663_v21  ;;  %v7723_v21 = vld [vmem:[#allocation13 + $0x820] ss:$28 sps:$4 sm:$0xff]  }
 0x39e   :  { %5910 = vmatprep.subr.bf16.mxu0 %v7671_v22  ;;  %v7728_v22 = vld [vmem:[#allocation13 + $0x46c] ss:$28 sps:$4 sm:$0xff]  }
 0x3a1   :  { %5911 = vmatpush2.bf16.msra.mxu0 %v7669_v23  ;;  %v7731_v23 = vld [vmem:[#allocation13 + $0x7ec] ss:$28 sps:$4 sm:$0xff]  }
 0x3a2   :  { %5912 = vmatprep.subr.bf16.mxu0 %v7677_v24  ;;  %v7726_v24 = vld [vmem:[#allocation13 + $0x468] ss:$28 sps:$4 sm:$0xff]  }
 0x3a5   :  { %5913 = vmatpush2.bf16.msra.mxu0 %v7675_v27  ;;  %v7729_v27 = vld [vmem:[#allocation13 + $0x7e8] ss:$28 sps:$4 sm:$0xff]  }
 0x3a6   :  { %5914 = vmatprep.subr.bf16.mxu0 %v7683_v28  ;;  %v7734_v28 = vld [vmem:[#allocation13 + $0x434] ss:$28 sps:$4 sm:$0xff]  }
 0x3a9   :  { %5915 = vmatpush2.bf16.msra.mxu0 %v7681_v30  ;;  %v7737_v30 = vld [vmem:[#allocation13 + $0x7b4] ss:$28 sps:$4 sm:$0xff]  }
 0x3aa   :  { %5916 = vmatprep.subr.bf16.mxu0 %v7689_v31  ;;  %v7732_v31 = vld [vmem:[#allocation13 + $0x430] ss:$28 sps:$4 sm:$0xff]  }
 0x3ac   :  { %v2791_v44 = vpop.f32.mrf.mxu0 }
 0x3ad   :  { %v2834_v50 = vpop.f32.mrf.mxu1  ;;  %5917 = vmatpush2.bf16.msra.mxu0 %v7687_v39  ;;  %v2792_v54 = vadd.f32 %v2791_v44, %v1206_v46  ;;  %v7740_v39 = vld [vmem:[#allocation13 + $0x3fc] ss:$28 sps:$4 sm:$0xff]   ;;  %v7746_v44 = vld [vmem:[#allocation13 + $0x3c4] ss:$28 sps:$4 sm:$0xff]  }
 0x3ae   :  { %v2793_v49 = vpop.f32.mrf.mxu0  ;;  %5918 = vmatprep.subr.bf16.mxu0 %v7695_v40  ;;  %v7743_v40 = vld [vmem:[#allocation13 + $0x77c] ss:$28 sps:$4 sm:$0xff]  }
 0x3af   :  { %v2794_v52 = vadd.f32 %v2793_v49, %v1210_v42  ;;  %v2836_v53 = vpop.f32.mrf.mxu1  ;;  %v2835_v34 = vadd.f32 %v2834_v50, %v2792_v54  ;;  %v7749_v50 = vld [vmem:[#allocation13 + $0x744] ss:$28 sps:$4 sm:$0xff]  }
 0x3b0   :  { %v2795_v55 = vpop.f32.mrf.mxu0  ;;  %v7747_v49 = vld [vmem:[#allocation13 + $0x740] ss:$28 sps:$4 sm:$0xff]   ;;  %v7753_v54 = vld [vmem:[#allocation13 + $0x708] ss:$28 sps:$4 sm:$0xff]  }
 0x3b1   :  { %v2796_v56 = vadd.f32 %v2795_v55, %v1206_v46  ;;  %v2838_v57 = vpop.f32.mrf.mxu1  ;;  %5919 = vmatpush2.bf16.msra.mxu0 %v7693_v51  ;;  %v2837_v60 = vadd.f32 %v2836_v53, %v2794_v52  ;;  %v2849_v7 = vmax.f32 %v2835_v34, 0.0  ;;  %v7741_v46 = vld [vmem:[#allocation13 + $0x778] ss:$28 sps:$4 sm:$0xff]   ;;  %v7744_v51 = vld [vmem:[#allocation13 + $0x3c0] ss:$28 sps:$4 sm:$0xff]  }
 0x3b2   :  { %v2797_v58 = vpop.f32.mrf.mxu0  ;;  %5920 = vmatprep.subr.bf16.mxu0 %v7701_v47  ;;  %v7752_v47 = vld [vmem:[#allocation13 + $0x38c] ss:$28 sps:$4 sm:$0xff]   ;;  %v7758_v55 = vld [vmem:[#allocation13 + $0x6d4] ss:$28 sps:$4 sm:$0xff]   ;;  %v7773_v34 = vld [vmem:[#allocation13 + $0x9e4] ss:$28 sps:$4 sm:$0xff]  }
 0x3b3   :  { %v2839_v29 = vadd.f32 %v2838_v57, %v2796_v56  ;;  %v2798_v61 = vadd.f32 %v2797_v58, %v1210_v42  ;;  %v2840_v62 = vpop.f32.mrf.mxu1  ;;  %v2850_v5 = vmax.f32 %v2837_v60, 0.0  ;;  %v7738_v42 = vld [vmem:[#allocation13 + $0x3f8] ss:$28 sps:$4 sm:$0xff]   ;;  %v7755_v52 = vld [vmem:[#allocation13 + $0x70c] ss:$28 sps:$4 sm:$0xff]  }
 0x3b4   :  { %v7750_v53 = vld [vmem:[#allocation13 + $0x388] ss:$28 sps:$4 sm:$0xff]   ;;  %v7761_v56 = vld [vmem:[#allocation13 + $0xa54] ss:$28 sps:$4 sm:$0xff]   ;;  %v7764_v58 = vld [vmem:[#allocation13 + $0x69c] ss:$28 sps:$4 sm:$0xff]  }
 0x3b5   :  { %v2841_v48 = vadd.f32 %v2840_v62, %v2798_v61  ;;  %5921 = vmatpush2.bf16.msra.mxu0 %v7699_v45  ;;  %v2857_v2 = vmax.f32 %v2839_v29, 0.0  ;;  %v7756_v57 = vld [vmem:[#allocation13 + $0x6d0] ss:$28 sps:$4 sm:$0xff]   ;;  %v7762_v60 = vld [vmem:[#allocation13 + $0x698] ss:$28 sps:$4 sm:$0xff]  }
 0x3b6   :  { %5922 = vmatprep.subr.bf16.mxu0 %v7707_v59  ;;  %v7759_v45 = vld [vmem:[#allocation13 + $0xa50] ss:$28 sps:$4 sm:$0xff]   ;;  %v7767_v59 = vld [vmem:[#allocation13 + $0xa1c] ss:$28 sps:$4 sm:$0xff]   ;;  %v7770_v61 = vld [vmem:[#allocation13 + $0x664] ss:$28 sps:$4 sm:$0xff]  }
 0x3b7   :  { %v2858_v6 = vmax.f32 %v2841_v48, 0.0  ;;  %v8544_v13 = vpack.c.bf16 %v2857_v2, %v2849_v7  ;;  %v7765_v29 = vld [vmem:[#allocation13 + $0xa18] ss:$28 sps:$4 sm:$0xff]   ;;  %v7768_v62 = vld [vmem:[#allocation13 + $0x660] ss:$28 sps:$4 sm:$0xff]  }
 0x3b8   :  { %v7771_v48 = vld [vmem:[#allocation13 + $0x9e0] ss:$28 sps:$4 sm:$0xff]   ;;  %v7779_v2 = vld [vmem:[#allocation13 + $0x9ac] ss:$28 sps:$4 sm:$0xff]   ;;  %v7785_v7 = vld [vmem:[#allocation13 + $0x974] ss:$28 sps:$4 sm:$0xff]  }
 0x3b9   :  { %v8542_v10 = vpack.c.bf16 %v2858_v6, %v2850_v5  ;;  %5923 = vmatpush2.bf16.msra.mxu0 %v7705_v1  ;;  %v7776_v1 = vld [vmem:[#allocation13 + $0x62c] ss:$28 sps:$4 sm:$0xff]   ;;  %v7782_v6 = vld [vmem:[#allocation13 + $0x5f4] ss:$28 sps:$4 sm:$0xff]  }
 0x3ba   :  { %5978 = vmatprep.subr.bf16.mxu0 %v7713_v4  ;;  %v7774_v4 = vld [vmem:[#allocation13 + $0x628] ss:$28 sps:$4 sm:$0xff]  }
 0x3bb   :  { %5881 = vmatprep.mubr.bf16.mxu1 %v8542_v10  ;;  %v7777_v5 = vld [vmem:[#allocation13 + $0x9a8] ss:$28 sps:$4 sm:$0xff]  }
 0x3bc   :  { %5925 = vmatmul.mubr.bf16.vlgmr.msra.gmra.mxu0 %v8508_v0  ;;  %5882 = vmatmul.mubr.bf16.vlgmr.msra.gmra.mxu1 %v8544_v13 }
 0x3bd   :  { %5936 = vmatpush1.bf16.msra.mxu1 %v7708_v11  ;;  %5979 = vmatpush1.bf16.msra.mxu0 %v7711_v12  ;;  %v7780_v11 = vld [vmem:[#allocation13 + $0x5f0] ss:$28 sps:$4 sm:$0xff]  }
 0x3be   :  { %6010 = vmatprep.mubr.bf16.mxu0 %v8529_v35  ;;  %5967 = vmatprep.mubr.bf16.mxu1 %v8515_v32  ;;  %v7783_v12 = vld [vmem:[#allocation13 + $0x970] ss:$28 sps:$4 sm:$0xff]  }
 0x3bf   :  { %5937 = vmatprep.subr.bf16.mxu1 %v7716_v14  ;;  %5980 = vmatprep.subr.bf16.mxu0 %v7719_v15  ;;  %v7788_v14 = vld [vmem:[#allocation13 + $0x5bc] ss:$28 sps:$4 sm:$0xff]  }
 0x3c0   :  { %v7791_v15 = vld [vmem:[#allocation13 + $0x93c] ss:$28 sps:$4 sm:$0xff]  }
 0x3c1   :  { %5938 = vmatpush1.bf16.msra.mxu1 %v7714_v16  ;;  %5981 = vmatpush1.bf16.msra.mxu0 %v7717_v17  ;;  %v7786_v16 = vld [vmem:[#allocation13 + $0x5b8] ss:$28 sps:$4 sm:$0xff]  }
 0x3c2   :  { %5939 = vmatprep.subr.bf16.mxu1 %v7722_v18  ;;  %5982 = vmatprep.subr.bf16.mxu0 %v7725_v19  ;;  %v7789_v17 = vld [vmem:[#allocation13 + $0x938] ss:$28 sps:$4 sm:$0xff]   ;;  %v7794_v18 = vld [vmem:[#allocation13 + $0x584] ss:$28 sps:$4 sm:$0xff]  }
 0x3c3   :  { %v7797_v19 = vld [vmem:[#allocation13 + $0x904] ss:$28 sps:$4 sm:$0xff]  }
 0x3c5   :  { %5940 = vmatpush1.bf16.msra.mxu1 %v7720_v20  ;;  %5983 = vmatpush1.bf16.msra.mxu0 %v7723_v21  ;;  %v7792_v20 = vld [vmem:[#allocation13 + $0x580] ss:$28 sps:$4 sm:$0xff]  }
 0x3c6   :  { %5941 = vmatprep.subr.bf16.mxu1 %v7728_v22  ;;  %5984 = vmatprep.subr.bf16.mxu0 %v7731_v23  ;;  %v7795_v21 = vld [vmem:[#allocation13 + $0x900] ss:$28 sps:$4 sm:$0xff]   ;;  %v7800_v22 = vld [vmem:[#allocation13 + $0x54c] ss:$28 sps:$4 sm:$0xff]  }
 0x3c7   :  { %v7803_v23 = vld [vmem:[#allocation13 + $0x8cc] ss:$28 sps:$4 sm:$0xff]  }
 0x3c9   :  { %5942 = vmatpush1.bf16.msra.mxu1 %v7726_v24  ;;  %5985 = vmatpush1.bf16.msra.mxu0 %v7729_v27  ;;  %v7798_v24 = vld [vmem:[#allocation13 + $0x548] ss:$28 sps:$4 sm:$0xff]  }
 0x3ca   :  { %5943 = vmatprep.subr.bf16.mxu1 %v7734_v28  ;;  %5986 = vmatprep.subr.bf16.mxu0 %v7737_v30  ;;  %v7801_v27 = vld [vmem:[#allocation13 + $0x8c8] ss:$28 sps:$4 sm:$0xff]   ;;  %v7806_v28 = vld [vmem:[#allocation13 + $0xc14] ss:$28 sps:$4 sm:$0xff]   ;;  %v7809_v30 = vld [vmem:[#allocation13 + $0x19c] ss:$28 sps:$4 sm:$0xff]  }
 0x3cd   :  { %5944 = vmatpush1.bf16.msra.mxu1 %v7732_v31  ;;  %5987 = vmatpush1.bf16.msra.mxu0 %v7735_v33  ;;  %v7804_v31 = vld [vmem:[#allocation13 + $0xc10] ss:$28 sps:$4 sm:$0xff]   ;;  %v7807_v33 = vld [vmem:[#allocation13 + $0x198] ss:$28 sps:$4 sm:$0xff]  }
 0x3ce   :  { %5945 = vmatprep.subr.bf16.mxu1 %v7740_v39  ;;  %5988 = vmatprep.subr.bf16.mxu0 %v7743_v40  ;;  %v7812_v39 = vld [vmem:[#allocation13 + $0xbdc] ss:$28 sps:$4 sm:$0xff]   ;;  %v7815_v40 = vld [vmem:[#allocation13 + $0x164] ss:$28 sps:$4 sm:$0xff]  }
 0x3d1   :  { %5946 = vmatpush1.bf16.msra.mxu1 %v7738_v42  ;;  %5989 = vmatpush1.bf16.msra.mxu0 %v7741_v46  ;;  %v7810_v42 = vld [vmem:[#allocation13 + $0xbd8] ss:$28 sps:$4 sm:$0xff]   ;;  %v7813_v46 = vld [vmem:[#allocation13 + $0x160] ss:$28 sps:$4 sm:$0xff]  }
 0x3d2   :  { %5947 = vmatprep.subr.bf16.mxu1 %v7746_v44  ;;  %5990 = vmatprep.subr.bf16.mxu0 %v7749_v50  ;;  %v7818_v44 = vld [vmem:[#allocation13 + $0xba4] ss:$28 sps:$4 sm:$0xff]   ;;  %v7821_v50 = vld [vmem:[#allocation13 + $0x12c] ss:$28 sps:$4 sm:$0xff]  }
 0x3d5   :  { %5948 = vmatpush1.bf16.msra.mxu1 %v7744_v51  ;;  %5991 = vmatpush1.bf16.msra.mxu0 %v7747_v49  ;;  %v7816_v51 = vld [vmem:[#allocation13 + $0xba0] ss:$28 sps:$4 sm:$0xff]   ;;  %v7819_v49 = vld [vmem:[#allocation13 + $0x128] ss:$28 sps:$4 sm:$0xff]  }
 0x3d6   :  { %5949 = vmatprep.subr.bf16.mxu1 %v7752_v47  ;;  %5992 = vmatprep.subr.bf16.mxu0 %v7755_v52  ;;  %v7824_v47 = vld [vmem:[#allocation13 + $0xb6c] ss:$28 sps:$4 sm:$0xff]   ;;  %v7827_v52 = vld [vmem:[#allocation13 + $0xf4] ss:$28 sps:$4 sm:$0xff]  }
 0x3d9   :  { %5950 = vmatpush1.bf16.msra.mxu1 %v7750_v53  ;;  %5993 = vmatpush1.bf16.msra.mxu0 %v7753_v54  ;;  %v7822_v53 = vld [vmem:[#allocation13 + $0xb68] ss:$28 sps:$4 sm:$0xff]   ;;  %v7825_v54 = vld [vmem:[#allocation13 + $0xf0] ss:$28 sps:$4 sm:$0xff]  }
 0x3da   :  { %5951 = vmatprep.subr.bf16.mxu1 %v7758_v55  ;;  %5994 = vmatprep.subr.bf16.mxu0 %v7761_v56  ;;  %v7830_v55 = vld [vmem:[#allocation13 + $0xb34] ss:$28 sps:$4 sm:$0xff]   ;;  %v7833_v56 = vld [vmem:[#allocation13 + $0xbc] ss:$28 sps:$4 sm:$0xff]  }
 0x3dd   :  { %5952 = vmatpush2.bf16.msra.mxu1 %v7756_v57  ;;  %5995 = vmatpush2.bf16.msra.mxu0 %v7759_v45  ;;  %v7828_v57 = vld [vmem:[#allocation13 + $0xb30] ss:$28 sps:$4 sm:$0xff]   ;;  %v7831_v45 = vld [vmem:[#allocation13 + $0xb8] ss:$28 sps:$4 sm:$0xff]  }
 0x3de   :  { %5953 = vmatprep.subr.bf16.mxu1 %v7764_v58  ;;  %5996 = vmatprep.subr.bf16.mxu0 %v7767_v59  ;;  %v7836_v58 = vld [vmem:[#allocation13 + $0xafc] ss:$28 sps:$4 sm:$0xff]   ;;  %v7839_v59 = vld [vmem:[#allocation13 + $0x84] ss:$28 sps:$4 sm:$0xff]  }
 0x3e1   :  { %5954 = vmatpush2.bf16.msra.mxu1 %v7762_v60  ;;  %5997 = vmatpush2.bf16.msra.mxu0 %v7765_v29  ;;  %v7834_v60 = vld [vmem:[#allocation13 + $0xaf8] ss:$28 sps:$4 sm:$0xff]   ;;  %v7837_v29 = vld [vmem:[#allocation13 + $0x80] ss:$28 sps:$4 sm:$0xff]  }
 0x3e2   :  { %5955 = vmatprep.subr.bf16.mxu1 %v7770_v61  ;;  %5998 = vmatprep.subr.bf16.mxu0 %v7773_v34  ;;  %v7842_v61 = vld [vmem:[#allocation13 + $0xac4] ss:$28 sps:$4 sm:$0xff]   ;;  %v7845_v34 = vld [vmem:[#allocation13 + $0x4c] ss:$28 sps:$4 sm:$0xff]  }
 0x3e5   :  { %5956 = vmatpush2.bf16.msra.mxu1 %v7768_v62  ;;  %5999 = vmatpush2.bf16.msra.mxu0 %v7771_v48  ;;  %v7840_v62 = vld [vmem:[#allocation13 + $0xac0] ss:$28 sps:$4 sm:$0xff]   ;;  %v7843_v48 = vld [vmem:[#allocation13 + $0x48] ss:$28 sps:$4 sm:$0xff]  }
 0x3e6   :  { %5957 = vmatprep.subr.bf16.mxu1 %v7776_v1  ;;  %6000 = vmatprep.subr.bf16.mxu0 %v7779_v2  ;;  %v7848_v1 = vld [vmem:[#allocation13 + $0xa8c] ss:$28 sps:$4 sm:$0xff]   ;;  %v7851_v2 = vld [vmem:[#allocation13 + $0x14] ss:$28 sps:$4 sm:$0xff]  }
 0x3e9   :  { %5958 = vmatpush2.bf16.msra.mxu1 %v7774_v4  ;;  %6001 = vmatpush2.bf16.msra.mxu0 %v7777_v5  ;;  %v7846_v4 = vld [vmem:[#allocation13 + $0xa88] ss:$28 sps:$4 sm:$0xff]   ;;  %v7849_v5 = vld [vmem:[#allocation13 + $0x10] ss:$28 sps:$4 sm:$0xff]  }
 0x3ea   :  { %5959 = vmatprep.subr.bf16.mxu1 %v7782_v6  ;;  %6002 = vmatprep.subr.bf16.mxu0 %v7785_v7  ;;  %v7854_v6 = vld [vmem:[#allocation13 + $0xdd4] ss:$28 sps:$4 sm:$0xff]   ;;  %v7857_v7 = vld [vmem:[#allocation13 + $0x35c] ss:$28 sps:$4 sm:$0xff]  }
 0x3ed   :  { %5960 = vmatpush2.bf16.msra.mxu1 %v7780_v11  ;;  %6003 = vmatpush2.bf16.msra.mxu0 %v7783_v12  ;;  %v7852_v11 = vld [vmem:[#allocation13 + $0xdd0] ss:$28 sps:$4 sm:$0xff]   ;;  %v7855_v12 = vld [vmem:[#allocation13 + $0x358] ss:$28 sps:$4 sm:$0xff]  }
 0x3ee   :  { %5961 = vmatprep.subr.bf16.mxu1 %v7788_v14  ;;  %6004 = vmatprep.subr.bf16.mxu0 %v7791_v15  ;;  %v7860_v14 = vld [vmem:[#allocation13 + $0xd9c] ss:$28 sps:$4 sm:$0xff]   ;;  %v7863_v15 = vld [vmem:[#allocation13 + $0x324] ss:$28 sps:$4 sm:$0xff]  }
 0x3f1   :  { %5962 = vmatpush2.bf16.msra.mxu1 %v7786_v16  ;;  %6005 = vmatpush2.bf16.msra.mxu0 %v7789_v17  ;;  %v7858_v16 = vld [vmem:[#allocation13 + $0xd98] ss:$28 sps:$4 sm:$0xff]   ;;  %v7861_v17 = vld [vmem:[#allocation13 + $0x320] ss:$28 sps:$4 sm:$0xff]  }
 0x3f2   :  { %5963 = vmatprep.subr.bf16.mxu1 %v7794_v18  ;;  %6006 = vmatprep.subr.bf16.mxu0 %v7797_v19  ;;  %v7866_v18 = vld [vmem:[#allocation13 + $0xd64] ss:$28 sps:$4 sm:$0xff]   ;;  %v7869_v19 = vld [vmem:[#allocation13 + $0x2ec] ss:$28 sps:$4 sm:$0xff]  }
 0x3f5   :  { %5964 = vmatpush2.bf16.msra.mxu1 %v7792_v20  ;;  %6007 = vmatpush2.bf16.msra.mxu0 %v7795_v21  ;;  %v7864_v20 = vld [vmem:[#allocation13 + $0xd60] ss:$28 sps:$4 sm:$0xff]   ;;  %v7867_v21 = vld [vmem:[#allocation13 + $0x2e8] ss:$28 sps:$4 sm:$0xff]  }
 0x3f6   :  { %5965 = vmatprep.subr.bf16.mxu1 %v7800_v22  ;;  %6008 = vmatprep.subr.bf16.mxu0 %v7803_v23  ;;  %v7872_v22 = vld [vmem:[#allocation13 + $0xd2c] ss:$28 sps:$4 sm:$0xff]   ;;  %v7875_v23 = vld [vmem:[#allocation13 + $0x2b4] ss:$28 sps:$4 sm:$0xff]  }
 0x3f9   :  { %5966 = vmatpush2.bf16.msra.mxu1 %v7798_v24  ;;  %6009 = vmatpush2.bf16.msra.mxu0 %v7801_v27  ;;  %v7870_v24 = vld [vmem:[#allocation13 + $0xd28] ss:$28 sps:$4 sm:$0xff]   ;;  %v7873_v27 = vld [vmem:[#allocation13 + $0x2b0] ss:$28 sps:$4 sm:$0xff]  }
 0x3fa   :  { %6021 = vmatprep.subr.bf16.mxu1 %v7806_v28  ;;  %6064 = vmatprep.subr.bf16.mxu0 %v7809_v30  ;;  %v7878_v28 = vld [vmem:[#allocation13 + $0xcf4] ss:$28 sps:$4 sm:$0xff]   ;;  %v7881_v30 = vld [vmem:[#allocation13 + $0x27c] ss:$28 sps:$4 sm:$0xff]  }
 0x3fc   :  { %5968 = vmatmul.mubr.bf16.vlgmr.msra.gmra.mxu1 %v8517_v37  ;;  %6011 = vmatmul.mubr.bf16.vlgmr.msra.gmra.mxu0 %v8531_v3 }
 0x3fd   :  { %6022 = vmatpush1.bf16.msra.mxu1 %v7804_v31  ;;  %6053 = vmatprep.mubr.bf16.mxu1 %v8542_v10  ;;  %v7876_v31 = vld [vmem:[#allocation13 + $0xcf0] ss:$28 sps:$4 sm:$0xff]  }
 0x3fe   :  { %6065 = vmatpush1.bf16.msra.mxu0 %v7807_v33  ;;  %6096 = vmatprep.mubr.bf16.mxu0 %v8499_v63  ;;  %v7879_v33 = vld [vmem:[#allocation13 + $0x278] ss:$28 sps:$4 sm:$0xff]  }
 0x3ff   :  { %6023 = vmatprep.subr.bf16.mxu1 %v7812_v39  ;;  %6066 = vmatprep.subr.bf16.mxu0 %v7815_v40  ;;  %v7884_v39 = vld [vmem:[#allocation13 + $0xcbc] ss:$28 sps:$4 sm:$0xff]   ;;  %v7887_v40 = vld [vmem:[#allocation13 + $0x244] ss:$28 sps:$4 sm:$0xff]  }
 0x401   :  { %6024 = vmatpush1.bf16.msra.mxu1 %v7810_v42  ;;  %v7882_v42 = vld [vmem:[#allocation13 + $0xcb8] ss:$28 sps:$4 sm:$0xff]  }
 0x402   :  { %6067 = vmatpush1.bf16.msra.mxu0 %v7813_v46  ;;  %6025 = vmatprep.subr.bf16.mxu1 %v7818_v44  ;;  %v7885_v46 = vld [vmem:[#allocation13 + $0x240] ss:$28 sps:$4 sm:$0xff]  }
 0x403   :  { %6068 = vmatprep.subr.bf16.mxu0 %v7821_v50  ;;  %v7890_v44 = vld [vmem:[#allocation13 + $0xc84] ss:$28 sps:$4 sm:$0xff]   ;;  %v7893_v50 = vld [vmem:[#allocation13 + $0x20c] ss:$28 sps:$4 sm:$0xff]  }
 0x405   :  { %6026 = vmatpush1.bf16.msra.mxu1 %v7816_v51  ;;  %v7888_v51 = vld [vmem:[#allocation13 + $0xc80] ss:$28 sps:$4 sm:$0xff]  }
 0x406   :  { %6069 = vmatpush1.bf16.msra.mxu0 %v7819_v49  ;;  %6027 = vmatprep.subr.bf16.mxu1 %v7824_v47  ;;  %v7891_v49 = vld [vmem:[#allocation13 + $0x208] ss:$28 sps:$4 sm:$0xff]  }
 0x407   :  { %6070 = vmatprep.subr.bf16.mxu0 %v7827_v52  ;;  %v7896_v47 = vld [vmem:[#allocation13 + $0xc4c] ss:$28 sps:$4 sm:$0xff]   ;;  %v7899_v52 = vld [vmem:[#allocation13 + $0x1d4] ss:$28 sps:$4 sm:$0xff]  }
 0x409   :  { %6028 = vmatpush1.bf16.msra.mxu1 %v7822_v53  ;;  %v7894_v53 = vld [vmem:[#allocation13 + $0xc48] ss:$28 sps:$4 sm:$0xff]  }
 0x40a   :  { %6071 = vmatpush1.bf16.msra.mxu0 %v7825_v54  ;;  %6029 = vmatprep.subr.bf16.mxu1 %v7830_v55  ;;  %v7897_v54 = vld [vmem:[#allocation13 + $0x1d0] ss:$28 sps:$4 sm:$0xff]   ;;  %v7902_v55 = vld [vmem:[#allocation13 + $0x51c] ss:$28 sps:$4 sm:$0xff]  }
 0x40b   :  { %6072 = vmatprep.subr.bf16.mxu0 %v7833_v56  ;;  %v7905_v56 = vld [vmem:[#allocation13 + $0x89c] ss:$28 sps:$4 sm:$0xff]  }
 0x40d   :  { %6030 = vmatpush1.bf16.msra.mxu1 %v7828_v57  ;;  %v7900_v57 = vld [vmem:[#allocation13 + $0x518] ss:$28 sps:$4 sm:$0xff]  }
 0x40e   :  { %6073 = vmatpush1.bf16.msra.mxu0 %v7831_v45  ;;  %6031 = vmatprep.subr.bf16.mxu1 %v7836_v58  ;;  %v7903_v45 = vld [vmem:[#allocation13 + $0x898] ss:$28 sps:$4 sm:$0xff]   ;;  %v7908_v58 = vld [vmem:[#allocation13 + $0x4e4] ss:$28 sps:$4 sm:$0xff]  }
 0x40f   :  { %6074 = vmatprep.subr.bf16.mxu0 %v7839_v59  ;;  %v7911_v59 = vld [vmem:[#allocation13 + $0x864] ss:$28 sps:$4 sm:$0xff]  }
 0x411   :  { %6032 = vmatpush1.bf16.msra.mxu1 %v7834_v60  ;;  %v7906_v60 = vld [vmem:[#allocation13 + $0x4e0] ss:$28 sps:$4 sm:$0xff]  }
 0x412   :  { %6075 = vmatpush1.bf16.msra.mxu0 %v7837_v29  ;;  %6033 = vmatprep.subr.bf16.mxu1 %v7842_v61  ;;  %v7909_v29 = vld [vmem:[#allocation13 + $0x860] ss:$28 sps:$4 sm:$0xff]   ;;  %v7914_v61 = vld [vmem:[#allocation13 + $0x4ac] ss:$28 sps:$4 sm:$0xff]  }
 0x413   :  { %6076 = vmatprep.subr.bf16.mxu0 %v7845_v34  ;;  %v7917_v34 = vld [vmem:[#allocation13 + $0x82c] ss:$28 sps:$4 sm:$0xff]  }
 0x415   :  { %6034 = vmatpush1.bf16.msra.mxu1 %v7840_v62  ;;  %v7912_v62 = vld [vmem:[#allocation13 + $0x4a8] ss:$28 sps:$4 sm:$0xff]  }
 0x416   :  { %6077 = vmatpush1.bf16.msra.mxu0 %v7843_v48  ;;  %6035 = vmatprep.subr.bf16.mxu1 %v7848_v1  ;;  %v7915_v48 = vld [vmem:[#allocation13 + $0x828] ss:$28 sps:$4 sm:$0xff]   ;;  %v7920_v1 = vld [vmem:[#allocation13 + $0x474] ss:$28 sps:$4 sm:$0xff]  }
 0x417   :  { %6078 = vmatprep.subr.bf16.mxu0 %v7851_v2  ;;  %v7923_v2 = vld [vmem:[#allocation13 + $0x7f4] ss:$28 sps:$4 sm:$0xff]  }
 0x419   :  { %6036 = vmatpush1.bf16.msra.mxu1 %v7846_v4  ;;  %v7918_v4 = vld [vmem:[#allocation13 + $0x470] ss:$28 sps:$4 sm:$0xff]  }
 0x41a   :  { %6079 = vmatpush1.bf16.msra.mxu0 %v7849_v5  ;;  %6037 = vmatprep.subr.bf16.mxu1 %v7854_v6  ;;  %v7921_v5 = vld [vmem:[#allocation13 + $0x7f0] ss:$28 sps:$4 sm:$0xff]   ;;  %v7926_v6 = vld [vmem:[#allocation13 + $0x43c] ss:$28 sps:$4 sm:$0xff]  }
 0x41b   :  { %6080 = vmatprep.subr.bf16.mxu0 %v7857_v7  ;;  %v7929_v7 = vld [vmem:[#allocation13 + $0x7bc] ss:$28 sps:$4 sm:$0xff]  }
 0x41d   :  { %6038 = vmatpush2.bf16.msra.mxu1 %v7852_v11  ;;  %v7924_v11 = vld [vmem:[#allocation13 + $0x438] ss:$28 sps:$4 sm:$0xff]  }
 0x41e   :  { %6081 = vmatpush2.bf16.msra.mxu0 %v7855_v12  ;;  %6039 = vmatprep.subr.bf16.mxu1 %v7860_v14  ;;  %v7927_v12 = vld [vmem:[#allocation13 + $0x7b8] ss:$28 sps:$4 sm:$0xff]   ;;  %v7932_v14 = vld [vmem:[#allocation13 + $0x404] ss:$28 sps:$4 sm:$0xff]  }
 0x41f   :  { %6082 = vmatprep.subr.bf16.mxu0 %v7863_v15  ;;  %v7935_v15 = vld [vmem:[#allocation13 + $0x784] ss:$28 sps:$4 sm:$0xff]  }
 0x421   :  { %6040 = vmatpush2.bf16.msra.mxu1 %v7858_v16  ;;  %v7930_v16 = vld [vmem:[#allocation13 + $0x400] ss:$28 sps:$4 sm:$0xff]  }
 0x422   :  { %6083 = vmatpush2.bf16.msra.mxu0 %v7861_v17  ;;  %6041 = vmatprep.subr.bf16.mxu1 %v7866_v18  ;;  %v7933_v17 = vld [vmem:[#allocation13 + $0x780] ss:$28 sps:$4 sm:$0xff]   ;;  %v7938_v18 = vld [vmem:[#allocation13 + $0x3cc] ss:$28 sps:$4 sm:$0xff]  }
 0x423   :  { %6084 = vmatprep.subr.bf16.mxu0 %v7869_v19  ;;  %v7941_v19 = vld [vmem:[#allocation13 + $0x74c] ss:$28 sps:$4 sm:$0xff]  }
 0x425   :  { %6042 = vmatpush2.bf16.msra.mxu1 %v7864_v20  ;;  %v7936_v20 = vld [vmem:[#allocation13 + $0x3c8] ss:$28 sps:$4 sm:$0xff]  }
 0x426   :  { %6085 = vmatpush2.bf16.msra.mxu0 %v7867_v21  ;;  %6043 = vmatprep.subr.bf16.mxu1 %v7872_v22  ;;  %v7939_v21 = vld [vmem:[#allocation13 + $0x748] ss:$28 sps:$4 sm:$0xff]   ;;  %v7944_v22 = vld [vmem:[#allocation13 + $0x394] ss:$28 sps:$4 sm:$0xff]  }
 0x427   :  { %6086 = vmatprep.subr.bf16.mxu0 %v7875_v23  ;;  %v7947_v23 = vld [vmem:[#allocation13 + $0x714] ss:$28 sps:$4 sm:$0xff]  }
 0x429   :  { %6044 = vmatpush2.bf16.msra.mxu1 %v7870_v24  ;;  %v7942_v24 = vld [vmem:[#allocation13 + $0x390] ss:$28 sps:$4 sm:$0xff]  }
 0x42a   :  { %6087 = vmatpush2.bf16.msra.mxu0 %v7873_v27  ;;  %6045 = vmatprep.subr.bf16.mxu1 %v7878_v28  ;;  %v7945_v27 = vld [vmem:[#allocation13 + $0x710] ss:$28 sps:$4 sm:$0xff]   ;;  %v7950_v28 = vld [vmem:[#allocation13 + $0x6dc] ss:$28 sps:$4 sm:$0xff]  }
 0x42b   :  { %6088 = vmatprep.subr.bf16.mxu0 %v7881_v30  ;;  %v7953_v30 = vld [vmem:[#allocation13 + $0xa5c] ss:$28 sps:$4 sm:$0xff]  }
 0x42d   :  { %6046 = vmatpush2.bf16.msra.mxu1 %v7876_v31  ;;  %v7948_v31 = vld [vmem:[#allocation13 + $0x6d8] ss:$28 sps:$4 sm:$0xff]  }
 0x42e   :  { %6089 = vmatpush2.bf16.msra.mxu0 %v7879_v33  ;;  %6047 = vmatprep.subr.bf16.mxu1 %v7884_v39  ;;  %v7951_v33 = vld [vmem:[#allocation13 + $0xa58] ss:$28 sps:$4 sm:$0xff]   ;;  %v7956_v39 = vld [vmem:[#allocation13 + $0x6a4] ss:$28 sps:$4 sm:$0xff]  }
 0x42f   :  { %6090 = vmatprep.subr.bf16.mxu0 %v7887_v40  ;;  %v7959_v40 = vld [vmem:[#allocation13 + $0xa24] ss:$28 sps:$4 sm:$0xff]  }
 0x431   :  { %6048 = vmatpush2.bf16.msra.mxu1 %v7882_v42  ;;  %v7954_v42 = vld [vmem:[#allocation13 + $0x6a0] ss:$28 sps:$4 sm:$0xff]  }
 0x432   :  { %6091 = vmatpush2.bf16.msra.mxu0 %v7885_v46  ;;  %6049 = vmatprep.subr.bf16.mxu1 %v7890_v44  ;;  %v7957_v46 = vld [vmem:[#allocation13 + $0xa20] ss:$28 sps:$4 sm:$0xff]   ;;  %v7962_v44 = vld [vmem:[#allocation13 + $0x66c] ss:$28 sps:$4 sm:$0xff]  }
 0x433   :  { %6092 = vmatprep.subr.bf16.mxu0 %v7893_v50  ;;  %v7965_v50 = vld [vmem:[#allocation13 + $0x9ec] ss:$28 sps:$4 sm:$0xff]  }
 0x435   :  { %6050 = vmatpush2.bf16.msra.mxu1 %v7888_v51  ;;  %v7960_v51 = vld [vmem:[#allocation13 + $0x668] ss:$28 sps:$4 sm:$0xff]  }
 0x436   :  { %6093 = vmatpush2.bf16.msra.mxu0 %v7891_v49  ;;  %6051 = vmatprep.subr.bf16.mxu1 %v7896_v47  ;;  %v7963_v49 = vld [vmem:[#allocation13 + $0x9e8] ss:$28 sps:$4 sm:$0xff]   ;;  %v7968_v47 = vld [vmem:[#allocation13 + $0x634] ss:$28 sps:$4 sm:$0xff]  }
 0x437   :  { %6094 = vmatprep.subr.bf16.mxu0 %v7899_v52  ;;  %v7971_v52 = vld [vmem:[#allocation13 + $0x9b4] ss:$28 sps:$4 sm:$0xff]  }
 0x439   :  { %6052 = vmatpush2.bf16.msra.mxu1 %v7894_v53  ;;  %v5754_v53 = vpop.f32.mrf.mxu0 }
 0x43a   :  { %6095 = vmatpush2.bf16.msra.mxu0 %v7897_v54  ;;  %6107 = vmatprep.subr.bf16.mxu1 %v7902_v55  ;;  %v7966_v54 = vld [vmem:[#allocation13 + $0x630] ss:$28 sps:$4 sm:$0xff]  }
 0x43b   :  { %6150 = vmatprep.subr.bf16.mxu0 %v7905_v56  ;;  %v7969_v55 = vld [vmem:[#allocation13 + $0x9b0] ss:$28 sps:$4 sm:$0xff]   ;;  %v7974_v56 = vld [vmem:[#allocation13 + $0x5fc] ss:$28 sps:$4 sm:$0xff]  }
 0x43c   :  { %6054 = vmatmul.mubr.bf16.vlgmr.msra.gmra.mxu1 %v8544_v13 }
 0x43d   :  { %6097 = vmatmul.mubr.bf16.vlgmr.msra.gmra.mxu0 %v8508_v0  ;;  %6108 = vmatpush1.bf16.msra.mxu1 %v7900_v57  ;;  %v7977_v57 = vld [vmem:[#allocation13 + $0x97c] ss:$28 sps:$4 sm:$0xff]  }
 0x43e   :  { %6139 = vmatprep.mubr.bf16.mxu1 %v8515_v32  ;;  %6151 = vmatpush1.bf16.msra.mxu0 %v7903_v45  ;;  %v5756_v45 = vpop.f32.mrf.mxu0 }
 0x43f   :  { %6182 = vmatprep.mubr.bf16.mxu0 %v8529_v35  ;;  %6109 = vmatprep.subr.bf16.mxu1 %v7908_v58  ;;  %v7972_v58 = vld [vmem:[#allocation13 + $0x5f8] ss:$28 sps:$4 sm:$0xff]  }
 0x440   :  { %6152 = vmatprep.subr.bf16.mxu0 %v7911_v59  ;;  %v7975_v59 = vld [vmem:[#allocation13 + $0x978] ss:$28 sps:$4 sm:$0xff]  }
 0x441   :  { %6110 = vmatpush1.bf16.msra.mxu1 %v7906_v60  ;;  %v7980_v60 = vld [vmem:[#allocation13 + $0x5c4] ss:$28 sps:$4 sm:$0xff]  }
 0x442   :  { %6153 = vmatpush1.bf16.msra.mxu0 %v7909_v29  ;;  %6111 = vmatprep.subr.bf16.mxu1 %v7914_v61  ;;  %v7983_v29 = vld [vmem:[#allocation13 + $0x944] ss:$28 sps:$4 sm:$0xff]   ;;  %v5758_v61 = vpop.f32.mrf.mxu0 }
 0x443   :  { %6154 = vmatprep.subr.bf16.mxu0 %v7917_v34  ;;  %v7978_v34 = vld [vmem:[#allocation13 + $0x5c0] ss:$28 sps:$4 sm:$0xff]  }
 0x445   :  { %6112 = vmatpush1.bf16.msra.mxu1 %v7912_v62  ;;  %v5797_v62 = vpop.f32.mrf.mxu1 }
 0x446   :  { %6155 = vmatpush1.bf16.msra.mxu0 %v7915_v48  ;;  %6113 = vmatprep.subr.bf16.mxu1 %v7920_v1  ;;  %v7981_v48 = vld [vmem:[#allocation13 + $0x940] ss:$28 sps:$4 sm:$0xff]   ;;  %v7986_v1 = vld [vmem:[#allocation13 + $0x58c] ss:$28 sps:$4 sm:$0xff]  }
 0x447   :  { %6156 = vmatprep.subr.bf16.mxu0 %v7923_v2  ;;  %v7989_v2 = vld [vmem:[#allocation13 + $0x90c] ss:$28 sps:$4 sm:$0xff]  }
 0x449   :  { %6114 = vmatpush1.bf16.msra.mxu1 %v7918_v4  ;;  %v8559_v4 = vld [vmem:[#allocation15] sm:$0xff] }
 0x44a   :  { %6157 = vmatpush1.bf16.msra.mxu0 %v7921_v5  ;;  %6115 = vmatprep.subr.bf16.mxu1 %v7926_v6  ;;  %v5760_v5 = vpop.f32.mrf.mxu0  ;;  %v7984_v6 = vld [vmem:[#allocation13 + $0x588] ss:$28 sps:$4 sm:$0xff]  }
 0x44b   :  { %6158 = vmatprep.subr.bf16.mxu0 %v7929_v7  ;;  %v5799_v7 = vpop.f32.mrf.mxu1 }
 0x44d   :  { %6116 = vmatpush1.bf16.msra.mxu1 %v7924_v11  ;;  %v5840_v11 = vpop.f32.mrf.mxu0 }
 0x44e   :  { %6159 = vmatpush1.bf16.msra.mxu0 %v7927_v12  ;;  %6117 = vmatprep.subr.bf16.mxu1 %v7932_v14  ;;  %v7987_v12 = vld [vmem:[#allocation13 + $0x908] ss:$28 sps:$4 sm:$0xff]   ;;  %v7992_v14 = vld [vmem:[#allocation13 + $0x554] ss:$28 sps:$4 sm:$0xff]  }
 0x44f   :  { %6160 = vmatprep.subr.bf16.mxu0 %v7935_v15  ;;  %v3384_v15 = vrot.slane %v8559_v4, %v8446_v41  ;;  %v7996_v41 = vld [vmem:[#allocation13 + $0xc18] ss:$28 sps:$4 sm:$0xff]  }
 0x451   :  { %6118 = vmatpush1.bf16.msra.mxu1 %v7930_v16  ;;  %v7995_v16 = vld [vmem:[#allocation13 + $0x8d4] ss:$28 sps:$4 sm:$0xff]  }
 0x452   :  { %6161 = vmatpush1.bf16.msra.mxu0 %v7933_v17  ;;  %6119 = vmatprep.subr.bf16.mxu1 %v7938_v18  ;;  %v3388_v17 = vrot.slane %v8559_v4, %v8449_v43  ;;  %v7990_v18 = vld [vmem:[#allocation13 + $0x550] ss:$28 sps:$4 sm:$0xff]   ;;  %v8000_v43 = vld [vmem:[#allocation13 + $0x1a0] ss:$28 sps:$4 sm:$0xff]  }
 0x453   :  { %6162 = vmatprep.subr.bf16.mxu0 %v7941_v19  ;;  %v5801_v19 = vpop.f32.mrf.mxu1 }
 0x455   :  { %6120 = vmatpush1.bf16.msra.mxu1 %v7936_v20  ;;  %v5842_v20 = vpop.f32.mrf.mxu0 }
 0x456   :  { %6163 = vmatpush1.bf16.msra.mxu0 %v7939_v21  ;;  %6121 = vmatprep.subr.bf16.mxu1 %v7944_v22  ;;  %v7993_v21 = vld [vmem:[#allocation13 + $0x8d0] ss:$28 sps:$4 sm:$0xff]   ;;  %v7998_v22 = vld [vmem:[#allocation13 + $0xc1c] ss:$28 sps:$4 sm:$0xff]  }
 0x457   :  { %6164 = vmatprep.subr.bf16.mxu0 %v7947_v23  ;;  %v5755_v23 = vadd.f32 %v5754_v53, %v3384_v15 }
 0x459   :  { %6122 = vmatpush1.bf16.msra.mxu1 %v7942_v24  ;;  %v7999_v24 = vld [vmem:[#allocation13 + $0x360] ss:$28 sps:$4 sm:$0xff]  }
 0x45a   :  { %6165 = vmatpush1.bf16.msra.mxu0 %v7945_v27  ;;  %6123 = vmatprep.subr.bf16.mxu1 %v7950_v28  ;;  %v5757_v27 = vadd.f32 %v5756_v45, %v3388_v17  ;;  %v5798_v28 = vadd.f32 %v5797_v62, %v5755_v23 }
 0x45b   :  { %6166 = vmatprep.subr.bf16.mxu0 %v7953_v30  ;;  %v5803_v30 = vpop.f32.mrf.mxu1 }
 0x45d   :  { %6124 = vmatpush2.bf16.msra.mxu1 %v7948_v31  ;;  %v5844_v31 = vpop.f32.mrf.mxu0 }
 0x45e   :  { %6167 = vmatpush2.bf16.msra.mxu0 %v7951_v33  ;;  %6125 = vmatprep.subr.bf16.mxu1 %v7956_v39  ;;  %v5759_v33 = vadd.f32 %v5758_v61, %v3384_v15  ;;  %v5800_v39 = vadd.f32 %v5799_v7, %v5757_v27  ;;  %v8018_v7 = vld [vmem:[#allocation13 + $0xb3c] ss:$28 sps:$4 sm:$0xff]   ;;  %v8023_v15 = vld [vmem:[#allocation13 + $0xb04] ss:$28 sps:$4 sm:$0xff]  }
 0x45f   :  { %6168 = vmatprep.subr.bf16.mxu0 %v7959_v40  ;;  %v5841_v40 = vadd.f32 %v5840_v11, %v5798_v28  ;;  %v5846_v53 = vpop.f32.mrf.mxu0  ;;  %v8019_v11 = vld [vmem:[#allocation13 + $0x280] ss:$28 sps:$4 sm:$0xff]   ;;  %v8030_v28 = vld [vmem:[#allocation13 + $0x50] ss:$28 sps:$4 sm:$0xff]  }
 0x461   :  { %6126 = vmatpush2.bf16.msra.mxu1 %v7954_v42  ;;  %v8003_v42 = vld [vmem:[#allocation13 + $0xbe4] ss:$28 sps:$4 sm:$0xff]  }
 0x462   :  { %6169 = vmatpush2.bf16.msra.mxu0 %v7957_v46  ;;  %6127 = vmatprep.subr.bf16.mxu1 %v7962_v44  ;;  %v5761_v46 = vadd.f32 %v5760_v5, %v3388_v17  ;;  %v8014_v5 = vld [vmem:[#allocation13 + $0x2b8] ss:$28 sps:$4 sm:$0xff]  }
 0x463   :  { %6170 = vmatprep.subr.bf16.mxu0 %v7965_v50  ;;  %v8004_v50 = vld [vmem:[#allocation13 + $0x328] ss:$28 sps:$4 sm:$0xff]  }
 0x465   :  { %6128 = vmatpush2.bf16.msra.mxu1 %v7960_v51  ;;  %v5802_v51 = vadd.f32 %v5801_v19, %v5759_v33  ;;  %v8038_v33 = vld [vmem:[#allocation13 + $0xddc] ss:$28 sps:$4 sm:$0xff]  }
 0x466   :  { %6171 = vmatpush2.bf16.msra.mxu0 %v7963_v49  ;;  %6129 = vmatprep.subr.bf16.mxu1 %v7968_v47  ;;  %v5843_v49 = vadd.f32 %v5842_v20, %v5800_v39  ;;  %v8025_v20 = vld [vmem:[#allocation13 + $0x88] ss:$28 sps:$4 sm:$0xff]   ;;  %v8039_v39 = vld [vmem:[#allocation13 + $0xa60] ss:$28 sps:$4 sm:$0xff]  }
 0x467   :  { %6172 = vmatprep.subr.bf16.mxu0 %v7971_v52  ;;  %v8001_v52 = vld [vmem:[#allocation13 + $0xbe0] ss:$28 sps:$4 sm:$0xff]   ;;  %v5845_v45 = vadd.f32 %v5844_v31, %v5802_v51  ;;  %v8031_v31 = vld [vmem:[#allocation13 + $0xa90] ss:$28 sps:$4 sm:$0xff]   ;;  %v8045_v51 = vld [vmem:[#allocation13 + $0x868] ss:$28 sps:$4 sm:$0xff]  }
 0x469   :  { %6130 = vmatpush2.bf16.msra.mxu1 %v7966_v54 }
 0x46a   :  { %6173 = vmatpush2.bf16.msra.mxu0 %v7969_v55  ;;  %6131 = vmatprep.subr.bf16.mxu1 %v7974_v56  ;;  %v8005_v55 = vld [vmem:[#allocation13 + $0x168] ss:$28 sps:$4 sm:$0xff]  }
 0x46b   :  { %6174 = vmatprep.subr.bf16.mxu0 %v7977_v57  ;;  %v8008_v56 = vld [vmem:[#allocation13 + $0xbac] ss:$28 sps:$4 sm:$0xff]   ;;  %v5804_v57 = vadd.f32 %v5803_v30, %v5761_v46  ;;  %v8034_v30 = vld [vmem:[#allocation13 + $0x1d8] ss:$28 sps:$4 sm:$0xff]   ;;  %v8043_v46 = vld [vmem:[#allocation13 + $0xda4] ss:$28 sps:$4 sm:$0xff]  }
 0x46d   :  { %6132 = vmatpush2.bf16.msra.mxu1 %v7972_v58 }
 0x46e   :  { %6175 = vmatpush2.bf16.msra.mxu0 %v7975_v59  ;;  %6133 = vmatprep.subr.bf16.mxu1 %v7980_v60  ;;  %v8009_v59 = vld [vmem:[#allocation13 + $0x2f0] ss:$28 sps:$4 sm:$0xff]  }
 0x46f   :  { %6176 = vmatprep.subr.bf16.mxu0 %v7983_v29  ;;  %v5847_v29 = vadd.f32 %v5846_v53, %v5804_v57  ;;  %v8050_v53 = vld [vmem:[#allocation13 + $0x830] ss:$28 sps:$4 sm:$0xff]   ;;  %v8058_v57 = vld [vmem:[#allocation13 + $0xcfc] ss:$28 sps:$4 sm:$0xff]  }
 0x471   :  { %6134 = vmatpush2.bf16.msra.mxu1 %v7978_v34  ;;  %v8006_v34 = vld [vmem:[#allocation13 + $0xba8] ss:$28 sps:$4 sm:$0xff]  }
 0x472   :  { %6177 = vmatpush2.bf16.msra.mxu0 %v7981_v48  ;;  %6135 = vmatprep.subr.bf16.mxu1 %v7986_v1  ;;  %v8010_v48 = vld [vmem:[#allocation13 + $0x130] ss:$28 sps:$4 sm:$0xff]  }
 0x473   :  { %6178 = vmatprep.subr.bf16.mxu0 %v7989_v2  ;;  %v8013_v1 = vld [vmem:[#allocation13 + $0xb74] ss:$28 sps:$4 sm:$0xff]  }
 0x475   :  { %6136 = vmatpush2.bf16.msra.mxu1 %v7984_v6  ;;  %v8015_v6 = vld [vmem:[#allocation13 + $0xf8] ss:$28 sps:$4 sm:$0xff]  }
 0x476   :  { %6179 = vmatpush2.bf16.msra.mxu0 %v7987_v12  ;;  %6137 = vmatprep.subr.bf16.mxu1 %v7992_v14  ;;  %v8016_v12 = vld [vmem:[#allocation13 + $0xb38] ss:$28 sps:$4 sm:$0xff]   ;;  %v8020_v14 = vld [vmem:[#allocation13 + $0xc0] ss:$28 sps:$4 sm:$0xff]  }
 0x477   :  { %6180 = vmatprep.subr.bf16.mxu0 %v7995_v16  ;;  %v8024_v16 = vld [vmem:[#allocation13 + $0x248] ss:$28 sps:$4 sm:$0xff]  }
 0x479   :  { %6138 = vmatpush2.bf16.msra.mxu1 %v7990_v18  ;;  %v8021_v18 = vld [vmem:[#allocation13 + $0xb00] ss:$28 sps:$4 sm:$0xff]  }
 0x47a   :  { %6181 = vmatpush2.bf16.msra.mxu0 %v7993_v21  ;;  %6193 = vmatprep.subr.bf16.mxu1 %v7998_v22  ;;  %v8028_v21 = vld [vmem:[#allocation13 + $0xacc] ss:$28 sps:$4 sm:$0xff]  }
 0x47b   :  { %7233 = vmatprep.subr.bf16.mxu0 %v7999_v24  ;;  %v8029_v22 = vld [vmem:[#allocation13 + $0x210] ss:$28 sps:$4 sm:$0xff]   ;;  %v8026_v24 = vld [vmem:[#allocation13 + $0xac8] ss:$28 sps:$4 sm:$0xff]  }
 0x47c   :  { %6140 = vmatmul.mubr.bf16.vlgmr.msra.gmra.mxu1 %v8517_v37  ;;  %v5883_v44 = vpop.f32.mrf.mxu1 }
 0x47d   :  { %6183 = vmatmul.mubr.bf16.vlgmr.msra.gmra.mxu0 %v8531_v3  ;;  %v5884_v47 = vadd.f32 %v5883_v44, %v5841_v40  ;;  %6194 = vmatpush1.bf16.msra.mxu1 %v7996_v41  ;;  %v8033_v41 = vld [vmem:[#allocation13 + $0xa94] ss:$28 sps:$4 sm:$0xff]   ;;  %v8044_v44 = vld [vmem:[#allocation13 + $0xa28] ss:$28 sps:$4 sm:$0xff]  }
 0x47e   :  { %6225 = vmatprep.mubr.bf16.mxu1 %v8542_v10  ;;  %7234 = vmatpush3.bf16.msra.mxu0 %v8000_v43  ;;  %v5885_v54 = vpop.f32.mrf.mxu1  ;;  %v8035_v43 = vld [vmem:[#allocation13 + $0x18] ss:$28 sps:$4 sm:$0xff]  }
 0x47f   :  { %8108 = vtanh.f32 %v5884_v47  ;;  %6268 = vmatprep.mubr.bf16.mxu0 %v8499_v63  ;;  %v5886_v58 = vadd.f32 %v5885_v54, %v5843_v49  ;;  %6195 = vmatprep.subr.bf16.mxu1 %v8003_v42  ;;  %v8011_v63 = vld [vmem:[#allocation13 + $0xb70] ss:$28 sps:$4 sm:$0xff]   ;;  %v8036_v40 = vld [vmem:[#allocation13 + $0xdd8] ss:$28 sps:$4 sm:$0xff]   ;;  %v8040_v42 = vld [vmem:[#allocation13 + $0x8a0] ss:$28 sps:$4 sm:$0xff]  }
 0x480   :  { %7235 = vmatprep.subr.bf16.mxu0 %v8004_v50  ;;  %v5887_v60 = vpop.f32.mrf.mxu1  ;;  %v8041_v50 = vld [vmem:[#allocation13 + $0xda0] ss:$28 sps:$4 sm:$0xff]   ;;  %v8048_v49 = vld [vmem:[#allocation13 + $0xd6c] ss:$28 sps:$4 sm:$0xff]   ;;  %v8053_v54 = vld [vmem:[#allocation13 + $0xd34] ss:$28 sps:$4 sm:$0xff]  }
 0x481   :  { %8110 = vtanh.f32 %v5886_v58  ;;  %v5888_v61 = vadd.f32 %v5887_v60, %v5845_v45  ;;  %6196 = vmatpush1.bf16.msra.mxu1 %v8001_v52  ;;  %v8049_v47 = vld [vmem:[#allocation13 + $0x9f0] ss:$28 sps:$4 sm:$0xff]   ;;  %v8046_v52 = vld [vmem:[#allocation13 + $0xd68] ss:$28 sps:$4 sm:$0xff]   ;;  %v8056_v45 = vld [vmem:[#allocation13 + $0xcf8] ss:$28 sps:$4 sm:$0xff]  }
 0x482   :  { %7236 = vmatpush3.bf16.msra.mxu0 %v8005_v55  ;;  %v5889_v62 = vpop.f32.mrf.mxu1  ;;  %6197 = vmatprep.subr.bf16.mxu1 %v8008_v56  ;;  %v8054_v55 = vld [vmem:[#allocation13 + $0x9b8] ss:$28 sps:$4 sm:$0xff]   ;;  %v8060_v58 = vld [vmem:[#allocation13 + $0x7c0] ss:$28 sps:$4 sm:$0xff]   ;;  %v8064_v60 = vld [vmem:[#allocation13 + $0x948] ss:$28 sps:$4 sm:$0xff]  }
 0x483   :  { %8112 = vtanh.f32 %v5888_v61  ;;  %v5890_v2 = vadd.f32 %v5889_v62, %v5847_v29  ;;  %7237 = vmatprep.subr.bf16.mxu0 %v8009_v59  ;;  %v8055_v56 = vld [vmem:[#allocation13 + $0x7f8] ss:$28 sps:$4 sm:$0xff]   ;;  %v8063_v59 = vld [vmem:[#allocation13 + $0xcc4] ss:$28 sps:$4 sm:$0xff]   ;;  %v8069_v62 = vld [vmem:[#allocation13 + $0x910] ss:$28 sps:$4 sm:$0xff]  }
 0x484   :  { %v8061_v29 = vld [vmem:[#allocation13 + $0xcc0] ss:$28 sps:$4 sm:$0xff]   ;;  %v8065_v61 = vld [vmem:[#allocation13 + $0x788] ss:$28 sps:$4 sm:$0xff]  }
 0x485   :  { %8114 = vtanh.f32 %v5890_v2  ;;  %6198 = vmatpush1.bf16.msra.mxu1 %v8006_v34  ;;  %v8068_v34 = vld [vmem:[#allocation13 + $0xc8c] ss:$28 sps:$4 sm:$0xff]   ;;  %v8073_v2 = vld [vmem:[#allocation13 + $0xc54] ss:$28 sps:$4 sm:$0xff]  }
 0x486   :  { %7238 = vmatpush3.bf16.msra.mxu0 %v8010_v48  ;;  %6199 = vmatprep.subr.bf16.mxu1 %v8013_v1  ;;  %v8066_v48 = vld [vmem:[#allocation13 + $0xc88] ss:$28 sps:$4 sm:$0xff]   ;;  %v8070_v1 = vld [vmem:[#allocation13 + $0x750] ss:$28 sps:$4 sm:$0xff]  }
 0x487   :  { %7239 = vmatprep.subr.bf16.mxu0 %v8014_v5  ;;  %v8074_v5 = vld [vmem:[#allocation13 + $0x8d8] ss:$28 sps:$4 sm:$0xff]  }
 0x489   :  { %6200 = vmatpush1.bf16.msra.mxu1 %v8011_v63  ;;  %v8071_v63 = vld [vmem:[#allocation13 + $0xc50] ss:$28 sps:$4 sm:$0xff]  }
 0x48a   :  { %7240 = vmatpush3.bf16.msra.mxu0 %v8015_v6  ;;  %6201 = vmatprep.subr.bf16.mxu1 %v8018_v7  ;;  %v8075_v6 = vld [vmem:[#allocation13 + $0x718] ss:$28 sps:$4 sm:$0xff]   ;;  %v8076_v7 = vld [vmem:[#allocation13 + $0x6e0] ss:$28 sps:$4 sm:$0xff]  }
 0x48b   :  { %7241 = vmatprep.subr.bf16.mxu0 %v8019_v11  ;;  %v8077_v11 = vld [vmem:[#allocation13 + $0x520] ss:$28 sps:$4 sm:$0xff]  }
 0x48c   :  { %v8109_v17 = vpop.eup %8108 }
 0x48d   :  { %6414 = vst [vmem:[%s8643_s11] sm:$0xff] %v8109_v17  ;;  %6202 = vmatpush1.bf16.msra.mxu1 %v8016_v12  ;;  %v8078_v12 = vld [vmem:[#allocation13 + $0x6a8] ss:$28 sps:$4 sm:$0xff]   ;;  %v8082_v17 = vld [vmem:[#allocation13 + $0x638] ss:$28 sps:$4 sm:$0xff]  }
 0x48e   :  { %v8111_v19 = vpop.eup %8110  ;;  %7242 = vmatpush3.bf16.msra.mxu0 %v8020_v14  ;;  %6203 = vmatprep.subr.bf16.mxu1 %v8023_v15  ;;  %v8079_v14 = vld [vmem:[#allocation13 + $0x4e8] ss:$28 sps:$4 sm:$0xff]   ;;  %v8080_v15 = vld [vmem:[#allocation13 + $0x670] ss:$28 sps:$4 sm:$0xff]  }
 0x48f   :  { %6415 = vst [vmem:[%s8643_s11 + $0x8] sm:$0xff] %v8111_v19  ;;  %7243 = vmatprep.subr.bf16.mxu0 %v8024_v16  ;;  %v8081_v16 = vld [vmem:[#allocation13 + $0x4b0] ss:$28 sps:$4 sm:$0xff]   ;;  %v8084_v19 = vld [vmem:[#allocation13 + $0x600] ss:$28 sps:$4 sm:$0xff]  }
 0x490   :  { %v8113_v23 = vpop.eup %8112 }
 0x491   :  { %6421 = vst [vmem:[%s8643_s11 + $0x38] sm:$0xff] %v8113_v23  ;;  %6204 = vmatpush1.bf16.msra.mxu1 %v8021_v18  ;;  %v8083_v18 = vld [vmem:[#allocation13 + $0x478] ss:$28 sps:$4 sm:$0xff]  }
 0x492   :  { %v8115_v27 = vpop.eup %8114  ;;  %7244 = vmatpush3.bf16.msra.mxu0 %v8025_v20  ;;  %6205 = vmatprep.subr.bf16.mxu1 %v8028_v21  ;;  %v8085_v20 = vld [vmem:[#allocation13 + $0x440] ss:$28 sps:$4 sm:$0xff]   ;;  %v8086_v21 = vld [vmem:[#allocation13 + $0x5c8] ss:$28 sps:$4 sm:$0xff]   ;;  %v8090_v23 = vld [vmem:[#allocation13 + $0x558] ss:$28 sps:$4 sm:$0xff]  }
 0x493   :  { %6422 = vst [vmem:[%s8643_s11 + $0x40] sm:$0xff] %v8115_v27  ;;  %7245 = vmatprep.subr.bf16.mxu0 %v8029_v22  ;;  %v8088_v22 = vld [vmem:[#allocation13 + $0x590] ss:$28 sps:$4 sm:$0xff]   ;;  %v8092_v27 = vld [vmem:[#allocation13 + $0xde0] ss:$28 sps:$4 sm:$0xff]  }
 0x495   :  { %6206 = vmatpush1.bf16.msra.mxu1 %v8026_v24  ;;  %v8091_v24 = vld [vmem:[#allocation13 + $0x398] ss:$28 sps:$4 sm:$0xff]  }
 0x496   :  { %7246 = vmatpush3.bf16.msra.mxu0 %v8030_v28  ;;  %6207 = vmatprep.subr.bf16.mxu1 %v8033_v41  ;;  %v8093_v28 = vld [vmem:[#allocation13 + $0xc20] ss:$28 sps:$4 sm:$0xff]   ;;  %v8094_v41 = vld [vmem:[#allocation13 + $0xda8] ss:$28 sps:$4 sm:$0xff]  }
 0x497   :  { %7247 = vmatprep.subr.bf16.mxu0 %v8034_v30  ;;  %v8095_v30 = vld [vmem:[#allocation13 + $0xbe8] ss:$28 sps:$4 sm:$0xff]  }
 0x499   :  { %6208 = vmatpush1.bf16.msra.mxu1 %v8031_v31  ;;  %v8096_v31 = vld [vmem:[#allocation13 + $0xd70] ss:$28 sps:$4 sm:$0xff]  }
 0x49a   :  { %7248 = vmatpush3.bf16.msra.mxu0 %v8035_v43  ;;  %6209 = vmatprep.subr.bf16.mxu1 %v8038_v33  ;;  %v8097_v43 = vld [vmem:[#allocation13 + $0xbb0] ss:$28 sps:$4 sm:$0xff]   ;;  %v8098_v33 = vld [vmem:[#allocation13 + $0xd38] ss:$28 sps:$4 sm:$0xff]  }
 0x49b   :  { %7277 = vmatprep.subr.bf16.mxu0 %v8039_v39  ;;  %v8099_v39 = vld [vmem:[#allocation13 + $0xb78] ss:$28 sps:$4 sm:$0xff]  }
 0x49d   :  { %6269 = vmatmul.mubr.bf16.vlgmr.msra.gmra.mxu0 %v8508_v0  ;;  %6210 = vmatpush2.bf16.msra.mxu1 %v8036_v40  ;;  %v8051_v0 = vld [vmem:[#allocation13 + $0xd30] ss:$28 sps:$4 sm:$0xff]   ;;  %v5926_v40 = vpop.f32.mrf.mxu0 }
 0x49e   :  { %7278 = vmatpush3.bf16.msra.mxu0 %v8040_v42  ;;  %6350 = vmatprep.mubr.bf16.mxu0 %v8529_v35  ;;  %v8059_v35 = vld [vmem:[#allocation13 + $0x980] ss:$28 sps:$4 sm:$0xff]  }
 0x49f   :  { %6211 = vmatprep.subr.bf16.mxu1 %v8043_v46  ;;  %7279 = vmatprep.subr.bf16.mxu0 %v8044_v44  ;;  %v8100_v42 = vld [vmem:[#allocation13 + $0xd00] ss:$28 sps:$4 sm:$0xff]   ;;  %v5928_v44 = vpop.f32.mrf.mxu0 }
 0x4a0   :  { %v8101_v46 = vld [vmem:[#allocation13 + $0xb40] ss:$28 sps:$4 sm:$0xff]  }
 0x4a1   :  { %6212 = vmatpush2.bf16.msra.mxu1 %v8041_v50  ;;  %v8103_v50 = vld [vmem:[#allocation13 + $0xb08] ss:$28 sps:$4 sm:$0xff]  }
 0x4a2   :  { %7280 = vmatpush3.bf16.msra.mxu0 %v8045_v51  ;;  %6213 = vmatprep.subr.bf16.mxu1 %v8048_v49  ;;  %v8104_v49 = vld [vmem:[#allocation13 + $0xc90] ss:$28 sps:$4 sm:$0xff]  }
 0x4a3   :  { %7281 = vmatprep.subr.bf16.mxu0 %v8049_v47  ;;  %v3392_v47 = vrot.slane %v8559_v4, %v8457_v9 }
 0x4a5   :  { %6214 = vmatpush2.bf16.msra.mxu1 %v8046_v52  ;;  %v8105_v52 = vld [vmem:[#allocation13 + $0xad0] ss:$28 sps:$4 sm:$0xff]  }
 0x4a6   :  { %7282 = vmatpush3.bf16.msra.mxu0 %v8050_v53  ;;  %6215 = vmatprep.subr.bf16.mxu1 %v8053_v54 }
 0x4a7   :  { %7283 = vmatprep.subr.bf16.mxu0 %v8054_v55  ;;  %v8106_v55 = vld [vmem:[#allocation13 + $0xc58] ss:$28 sps:$4 sm:$0xff]  }
 0x4a9   :  { %6216 = vmatpush2.bf16.msra.mxu1 %v8051_v0  ;;  %v3396_v0 = vrot.slane %v8559_v4, %v8454_v8 }
 0x4aa   :  { %7284 = vmatpush3.bf16.msra.mxu0 %v8055_v56  ;;  %6217 = vmatprep.subr.bf16.mxu1 %v8058_v57  ;;  %v5927_v57 = vadd.f32 %v5926_v40, %v3392_v47 }
 0x4ab   :  { %7285 = vmatprep.subr.bf16.mxu0 %v8059_v35  ;;  %v8107_v35 = vld [vmem:[#allocation13 + $0xa98] ss:$28 sps:$4 sm:$0xff]  }
 0x4ad   :  { %6218 = vmatpush2.bf16.msra.mxu1 %v8056_v45 }
 0x4ae   :  { %7286 = vmatpush3.bf16.msra.mxu0 %v8060_v58  ;;  %6219 = vmatprep.subr.bf16.mxu1 %v8063_v59  ;;  %v5929_v58 = vadd.f32 %v5928_v44, %v3396_v0 }
 0x4af   :  { %7287 = vmatprep.subr.bf16.mxu0 %v8064_v60 }
 0x4b1   :  { %6220 = vmatpush2.bf16.msra.mxu1 %v8061_v29 }
 0x4b2   :  { %7288 = vmatpush3.bf16.msra.mxu0 %v8065_v61  ;;  %6221 = vmatprep.subr.bf16.mxu1 %v8068_v34 }
 0x4b3   :  { %7289 = vmatprep.subr.bf16.mxu0 %v8069_v62 }
 0x4b5   :  { %6222 = vmatpush2.bf16.msra.mxu1 %v8066_v48 }
 0x4b6   :  { %7290 = vmatpush3.bf16.msra.mxu0 %v8070_v1  ;;  %6223 = vmatprep.subr.bf16.mxu1 %v8073_v2 }
 0x4b7   :  { %7291 = vmatprep.subr.bf16.mxu0 %v8074_v5 }
 0x4b9   :  { %6224 = vmatpush2.bf16.msra.mxu1 %v8071_v63 }
 0x4ba   :  { %7292 = vmatpush3.bf16.msra.mxu0 %v8075_v6  ;;  %7255 = vmatprep.subr.bf16.mxu1 %v8076_v7 }
 0x4bc   :  { %6226 = vmatmul.mubr.bf16.vlgmr.msra.gmra.mxu1 %v8544_v13  ;;  %v5969_v51 = vpop.f32.mrf.mxu1 }
 0x4bd   :  { %6351 = vmatmul.mubr.bf16.vlgmr.msra.gmra.mxu0 %v8531_v3  ;;  %7256 = vmatpush3.bf16.msra.mxu1 %v8077_v11  ;;  %v8087_v3 = vld [vmem:[#allocation13 + $0x408] ss:$28 sps:$4 sm:$0xff]   ;;  %v5970_v59 = vadd.f32 %v5969_v51, %v5927_v57 }
 0x4be   :  { %6309 = vmatprep.mubr.bf16.mxu1 %v8515_v32  ;;  %7257 = vmatprep.subr.bf16.mxu1 %v8078_v12  ;;  %v8089_v32 = vld [vmem:[#allocation13 + $0x3d0] ss:$28 sps:$4 sm:$0xff]   ;;  %v5971_v54 = vpop.f32.mrf.mxu1 }
 0x4bf   :  { %v5972_v9 = vadd.f32 %v5971_v54, %v5929_v58 }
 0x4c0   :  { %v5973_v45 = vpop.f32.mrf.mxu1 }
 0x4c1   :  { %7258 = vmatpush3.bf16.msra.mxu1 %v8079_v14 }
 0x4c2   :  { %7259 = vmatprep.subr.bf16.mxu1 %v8080_v15  ;;  %v5975_v61 = vpop.f32.mrf.mxu1 }
 0x4c5   :  { %7260 = vmatpush3.bf16.msra.mxu1 %v8081_v16 }
 0x4c6   :  { %7261 = vmatprep.subr.bf16.mxu1 %v8082_v17 }
 0x4c9   :  { %7262 = vmatpush3.bf16.msra.mxu1 %v8083_v18 }
 0x4ca   :  { %7263 = vmatprep.subr.bf16.mxu1 %v8084_v19 }
 0x4cd   :  { %7264 = vmatpush3.bf16.msra.mxu1 %v8085_v20 }
 0x4ce   :  { %7265 = vmatprep.subr.bf16.mxu1 %v8086_v21 }
 0x4d1   :  { %7266 = vmatpush3.bf16.msra.mxu1 %v8087_v3 }
 0x4d2   :  { %7267 = vmatprep.subr.bf16.mxu1 %v8088_v22 }
 0x4d5   :  { %7268 = vmatpush3.bf16.msra.mxu1 %v8089_v32 }
 0x4d6   :  { %7269 = vmatprep.subr.bf16.mxu1 %v8090_v23 }
 0x4d9   :  { %7270 = vmatpush3.bf16.msra.mxu1 %v8091_v24  ;;  %v3400_v24 = vrot.slane %v8559_v4, %v1197_v26 }
 0x4da   :  { %7299 = vmatprep.subr.bf16.mxu1 %v8092_v27 }
 0x4dc   :  { %6310 = vmatmul.mubr.bf16.vlgmr.msra.gmra.mxu1 %v8517_v37  ;;  %v8102_v37 = vld [vmem:[#allocation13 + $0xcc8] ss:$28 sps:$4 sm:$0xff]  }
 0x4dd   :  { %7300 = vmatpush3.bf16.msra.mxu1 %v8093_v28  ;;  %6391 = vmatprep.mubr.bf16.mxu1 %v8542_v10  ;;  %v5930_v10 = vpop.f32.mrf.mxu0 }
 0x4de   :  { %7301 = vmatprep.subr.bf16.mxu1 %v8094_v41  ;;  %v5931_v29 = vadd.f32 %v5930_v10, %v3392_v47  ;;  %v3404_v41 = vrot.slane %v8559_v4, %v1201_v25 }
 0x4df   :  { %v5932_v53 = vpop.f32.mrf.mxu0 }
 0x4e0   :  { %v5933_v34 = vadd.f32 %v5932_v53, %v3396_v0  ;;  %v5974_v48 = vadd.f32 %v5973_v45, %v5931_v29 }
 0x4e1   :  { %7302 = vmatpush3.bf16.msra.mxu1 %v8095_v30  ;;  %v6012_v56 = vpop.f32.mrf.mxu0 }
 0x4e2   :  { %7303 = vmatprep.subr.bf16.mxu1 %v8096_v31  ;;  %v6013_v62 = vadd.f32 %v6012_v56, %v5970_v59  ;;  %v5976_v5 = vadd.f32 %v5975_v61, %v5933_v34 }
 0x4e3   :  { %v6014_v60 = vpop.f32.mrf.mxu0 }
 0x4e4   :  { %v6015_v8 = vadd.f32 %v6014_v60, %v5972_v9 }
 0x4e5   :  { %7304 = vmatpush3.bf16.msra.mxu1 %v8097_v43  ;;  %v6016_v1 = vpop.f32.mrf.mxu0 }
 0x4e6   :  { %7305 = vmatprep.subr.bf16.mxu1 %v8098_v33  ;;  %v6017_v7 = vadd.f32 %v6016_v1, %v5974_v48 }
 0x4e7   :  { %v6018_v12 = vpop.f32.mrf.mxu0 }
 0x4e8   :  { %v6019_v15 = vadd.f32 %v6018_v12, %v5976_v5  ;;  %v3408_v5 = vrot.slane %v8559_v4, %v1205_v36 }
 0x4e9   :  { %7306 = vmatpush3.bf16.msra.mxu1 %v8099_v39 }
 0x4ea   :  { %7307 = vmatprep.subr.bf16.mxu1 %v8100_v42 }
 0x4ed   :  { %7308 = vmatpush3.bf16.msra.mxu1 %v8101_v46 }
 0x4ee   :  { %7309 = vmatprep.subr.bf16.mxu1 %v8102_v37 }
 0x4f1   :  { %7310 = vmatpush3.bf16.msra.mxu1 %v8103_v50 }
 0x4f2   :  { %7311 = vmatprep.subr.bf16.mxu1 %v8104_v49 }
 0x4f5   :  { %7312 = vmatpush3.bf16.msra.mxu1 %v8105_v52 }
 0x4f6   :  { %7313 = vmatprep.subr.bf16.mxu1 %v8106_v55 }
 0x4f9   :  { %7314 = vmatpush3.bf16.msra.mxu1 %v8107_v35 }
 0x4fc   :  { %v6055_v2 = vpop.f32.mrf.mxu1  ;;  %6392 = vmatmul.mubr.bf16.vlgmr.msra.gmra.mxu1 %v8544_v13 }
 0x4fd   :  { %v6056_v63 = vadd.f32 %v6055_v2, %v6013_v62  ;;  %v6098_v3 = vpop.f32.mrf.mxu0 }
 0x4fe   :  { %v6057_v6 = vpop.f32.mrf.mxu1  ;;  %v6099_v31 = vadd.f32 %v6098_v3, %v3400_v24 }
 0x4ff   :  { %8116 = vtanh.f32 %v6056_v63  ;;  %v6058_v11 = vadd.f32 %v6057_v6, %v6015_v8  ;;  %v6100_v22 = vpop.f32.mrf.mxu0 }
 0x500   :  { %v6059_v14 = vpop.f32.mrf.mxu1  ;;  %v6101_v33 = vadd.f32 %v6100_v22, %v3404_v41 }
 0x501   :  { %8118 = vtanh.f32 %v6058_v11  ;;  %v6060_v16 = vadd.f32 %v6059_v14, %v6017_v7  ;;  %v6102_v32 = vpop.f32.mrf.mxu0 }
 0x502   :  { %v6061_v17 = vpop.f32.mrf.mxu1  ;;  %v6103_v42 = vadd.f32 %v6102_v32, %v3400_v24 }
 0x503   :  { %8120 = vtanh.f32 %v6060_v16  ;;  %v6062_v18 = vadd.f32 %v6061_v17, %v6019_v15  ;;  %v6104_v27 = vpop.f32.mrf.mxu0 }
 0x504   :  { %v6105_v37 = vadd.f32 %v6104_v27, %v3404_v41 }
 0x505   :  { %8122 = vtanh.f32 %v6062_v18 }
 0x50c   :  { %v8117_v19 = vpop.eup %8116 }
 0x50d   :  { %6416 = vst [vmem:[%s8643_s11 + $0x10] sm:$0xff] %v8117_v19 }
 0x50e   :  { %v8119_v13 = vpop.eup %8118 }
 0x50f   :  { %6417 = vst [vmem:[%s8643_s11 + $0x18] sm:$0xff] %v8119_v13 }
 0x510   :  { %v8121_v20 = vpop.eup %8120 }
 0x511   :  { %6423 = vst [vmem:[%s8643_s11 + $0x48] sm:$0xff] %v8121_v20 }
 0x512   :  { %v8123_v21 = vpop.eup %8122 }
 0x513   :  { %6424 = vst [vmem:[%s8643_s11 + $0x50] sm:$0xff] %v8123_v21 }
 0x53c   :  { %v6141_v23 = vpop.f32.mrf.mxu1 }
 0x53d   :  { %v6184_v30 = vpop.f32.mrf.mxu0  ;;  %v6142_v39 = vadd.f32 %v6141_v23, %v6099_v31 }
 0x53e   :  { %v6143_v28 = vpop.f32.mrf.mxu1 }
 0x53f   :  { %v6186_v40 = vpop.f32.mrf.mxu0  ;;  %v6144_v46 = vadd.f32 %v6143_v28, %v6101_v33  ;;  %v6185_v50 = vadd.f32 %v6184_v30, %v6142_v39 }
 0x540   :  { %v6145_v43 = vpop.f32.mrf.mxu1 }
 0x541   :  { %v6146_v10 = vadd.f32 %v6145_v43, %v6103_v42  ;;  %v6188_v51 = vpop.f32.mrf.mxu0  ;;  %v6187_v49 = vadd.f32 %v6186_v40, %v6144_v46 }
 0x542   :  { %v6147_v44 = vpop.f32.mrf.mxu1 }
 0x543   :  { %v6148_v47 = vadd.f32 %v6147_v44, %v6105_v37  ;;  %v6189_v54 = vadd.f32 %v6188_v51, %v6146_v10  ;;  %v6190_v55 = vpop.f32.mrf.mxu0 }
 0x545   :  { %v6191_v56 = vadd.f32 %v6190_v55, %v6148_v47 }
 0x55d   :  { %v7249_v9 = vpop.f32.mrf.mxu0 }
 0x55f   :  { %v7250_v61 = vpop.f32.mrf.mxu0 }
 0x560   :  { %v7251_v63 = vadd.f32 %v7250_v61, %v7249_v9 }
 0x561   :  { %v7252_v34 = vpop.f32.mrf.mxu0 }
 0x562   :  { %v6271_v12 = vadd.f32 %v7251_v63, %v3408_v5 }
 0x563   :  { %v7253_v48 = vpop.f32.mrf.mxu0 }
 0x564   :  { %v7254_v14 = vadd.f32 %v7253_v48, %v7252_v34 }
 0x566   :  { %v6274_v19 = vadd.f32 %v7254_v14, %v3408_v5 }
 0x57c   :  { %v6227_v26 = vpop.f32.mrf.mxu1 }
 0x57d   :  { %v6228_v52 = vadd.f32 %v6227_v26, %v6185_v50  ;;  %v7293_v2 = vpop.f32.mrf.mxu0 }
 0x57e   :  { %v6229_v53 = vpop.f32.mrf.mxu1 }
 0x57f   :  { %8124 = vtanh.f32 %v6228_v52  ;;  %v6230_v25 = vadd.f32 %v6229_v53, %v6187_v49  ;;  %v7294_v6 = vpop.f32.mrf.mxu0 }
 0x580   :  { %v6231_v0 = vpop.f32.mrf.mxu1  ;;  %v7295_v13 = vadd.f32 %v7294_v6, %v7293_v2 }
 0x581   :  { %8126 = vtanh.f32 %v6230_v25  ;;  %v6232_v57 = vadd.f32 %v6231_v0, %v6189_v54  ;;  %v7296_v15 = vpop.f32.mrf.mxu0 }
 0x582   :  { %v6233_v35 = vpop.f32.mrf.mxu1 }
 0x583   :  { %8128 = vtanh.f32 %v6232_v57  ;;  %v6234_v45 = vadd.f32 %v6233_v35, %v6191_v56  ;;  %v7297_v20 = vpop.f32.mrf.mxu0 }
 0x584   :  { %v7298_v23 = vadd.f32 %v7297_v20, %v7296_v15 }
 0x585   :  { %8130 = vtanh.f32 %v6234_v45 }
 0x58c   :  { %v8125_v58 = vpop.eup %8124 }
 0x58d   :  { %6418 = vst [vmem:[%s8643_s11 + $0x20] sm:$0xff] %v8125_v58 }
 0x58e   :  { %v8127_v59 = vpop.eup %8126 }
 0x58f   :  { %6419 = vst [vmem:[%s8643_s11 + $0x28] sm:$0xff] %v8127_v59 }
 0x590   :  { %v8129_v60 = vpop.eup %8128 }
 0x591   :  { %6425 = vst [vmem:[%s8643_s11 + $0x58] sm:$0xff] %v8129_v60 }
 0x592   :  { %v8131_v29 = vpop.eup %8130 }
 0x593   :  { %6426 = vst [vmem:[%s8643_s11 + $0x60] sm:$0xff] %v8131_v29 }
 0x59c   :  { %v7271_v62 = vpop.f32.mrf.mxu1 }
 0x59e   :  { %v7272_v1 = vpop.f32.mrf.mxu1 }
 0x59f   :  { %v7273_v7 = vadd.f32 %v7272_v1, %v7271_v62 }
 0x5a0   :  { %v7274_v8 = vpop.f32.mrf.mxu1 }
 0x5a1   :  { %v6312_v16 = vadd.f32 %v7273_v7, %v6271_v12 }
 0x5a2   :  { %v7275_v11 = vpop.f32.mrf.mxu1 }
 0x5a3   :  { %v7276_v17 = vadd.f32 %v7275_v11, %v7274_v8  ;;  %v6353_v22 = vadd.f32 %v7295_v13, %v6312_v16 }
 0x5a5   :  { %v6315_v3 = vadd.f32 %v7276_v17, %v6274_v19 }
 0x5a7   :  { %v6356_v24 = vadd.f32 %v7298_v23, %v6315_v3 }
 0x5bc   :  { %v7315_v18 = vpop.f32.mrf.mxu1 }
 0x5be   :  { %v7316_v21 = vpop.f32.mrf.mxu1 }
 0x5bf   :  { %v7317_v32 = vadd.f32 %v7316_v21, %v7315_v18 }
 0x5c0   :  { %v7318_v38 = vpop.f32.mrf.mxu1 }
 0x5c1   :  { %v6394_v36 = vadd.f32 %v7317_v32, %v6353_v22 }
 0x5c2   :  { %v7319_v4 = vpop.f32.mrf.mxu1 }
 0x5c3   :  { %8132 = vtanh.f32 %v6394_v36  ;;  %v7320_v27 = vadd.f32 %v7319_v4, %v7318_v38 }
 0x5c5   :  { %v6397_v28 = vadd.f32 %v7320_v27, %v6356_v24 }
 0x5c7   :  { %8134 = vtanh.f32 %v6397_v28 }
 0x5d0   :  { %v8133_v41 = vpop.eup %8132 }
 0x5d1   :  { %6420 = vst [vmem:[%s8643_s11 + $0x30] sm:$0xff] %v8133_v41 }
 0x5d4   :  { %v8135_v30 = vpop.eup %8134 }
 0x5d5   :  { %6427 = vst [vmem:[%s8643_s11 + $0x68] sm:$0xff] %v8135_v30 }
 0x5d6   :  { %6432 = vsyncpa [#allocation3], 1 }
 0x5d7   :  { %6433 = vsyncpa [#allocation5], 1 }
 0x5d8   :  { %6434 = vsyncpa [#allocation8], 1 }
 0x5d9   :  { %6435 = vsyncpa [#allocation11], 1 }
 0x5da   :  { %6436 = vsyncpa [#allocation14], 1 }

// kernel: generator_forward.1
= control target key start
LH: loop header
LB: loop body
LE: loop exit
PB: predicated region body
PF: predicated region fallthrough
CT: control target
= control target key end

     0   :  { %16 = vsyncpa [#allocation3], 0  ;;  %s8632_s0 = inlined_call_operand.vmem [shape: bf16[16,100], index: 0, kind: input, shape index: {}]   ;;  %s8633_s1 = inlined_call_operand.vmem [shape: bf16[16,50], index: 1, kind: input, shape index: {}]   ;;  %s8634_s2 = inlined_call_operand.hbm [shape: bf16[100,256], index: 2, kind: input, shape index: {}]   ;;  %s8635_s3 = inlined_call_operand.hbm [shape: bf16[50,256], index: 3, kind: input, shape index: {}]   ;;  %s8636_s4 = inlined_call_operand.hbm [shape: f32[1,256], index: 4, kind: input, shape index: {}]   ;;  %s8637_s5 = inlined_call_operand.hbm [shape: bf16[256,512], index: 5, kind: input, shape index: {}]   ;;  %s8638_s6 = inlined_call_operand.hbm [shape: f32[1,512], index: 6, kind: input, shape index: {}]   ;;  %s8639_s7 = inlined_call_operand.hbm [shape: bf16[512,1024], index: 7, kind: input, shape index: {}]   ;;  %s8640_s8 = inlined_call_operand.hbm [shape: f32[1,1024], index: 8, kind: input, shape index: {}]   ;;  %s8641_s9 = inlined_call_operand.hbm [shape: bf16[1024,896], index: 9, kind: input, shape index: {}]   ;;  %s8642_s10 = inlined_call_operand.hbm [shape: f32[1,896], index: 10, kind: input, shape index: {}]   ;;  %s8643_s11 = inlined_call_operand.vmem [shape: f32[16,896], index: 11, kind: output, shape index: {}]  }
   0x1   :  { %17 = vsyncpa [#allocation5], 0 }
   0x2   :  { %18 = vsyncpa [#allocation8], 0 }
   0x3   :  { %19 = vsyncpa [#allocation11], 0 }
   0x4   :  { %20 = vsyncpa [#allocation14], 0  ;;  %s8326_s17 = smov [#allocation4]   ;;  %s8327_s19 = smov [#allocation7]  }
   0x5   :  { %s42_s18 = sshll.u32 %s8326_s17, 4  ;;  %s64_s20 = sshll.u32 %s8327_s19, 4  ;;  %s43_s18 = int_to_ptr.vmem [resolvable:$true] %s42_s18  ;;  %s65_s20 = int_to_ptr.vmem [resolvable:$true] %s64_s20 }
   0x6   :  { %s8144_s21 = scalar_lea.vmem %s43_s18, 896  ;;  %p8149_p1 = scmp.lt.s32.totalorder %s43_s18, %s43_s18 }
   0x7   :  { %p8145_p0 = scmp.ne.s32.totalorder %s43_s18, %s8144_s21  ;;  %p8150_p2 = scmp.lt.s32.totalorder %s8144_s21, %s8144_s21 }
   0x9   :  { %p8151_p3 = por %p8150_p2, %p8149_p1 }
   0xb   :  { %p8152_p4 = pnand %p8151_p3, %p8145_p0 }
   0xd   :  { %8155 = shalt.err (!%p8152_p4)
}
   0xe   :  { %s8328_s22 = smov 128   ;;  %s8329_s23 = smov 8  }
   0xf   :  { %48 = dma.hbm_to_vmem [thread:$0]  %s8635_s3, 896, %s43_s18, [#allocation5], %s8328_s22, %s8328_s22, %s8329_s23  }
  0x10   :  { %s8164_s26 = scalar_lea.vmem %s65_s20, 8192  ;;  %p8169_p6 = scmp.lt.s32.totalorder %s65_s20, %s65_s20 }
  0x11   :  { %p8165_p5 = scmp.ne.s32.totalorder %s65_s20, %s8164_s26  ;;  %p8170_p7 = scmp.lt.s32.totalorder %s8164_s26, %s8164_s26 }
  0x13   :  { %p8171_p8 = por %p8170_p7, %p8169_p6 }
  0x15   :  { %p8172_p9 = pnand %p8171_p8, %p8165_p5 }
  0x17   :  { %8175 = shalt.err (!%p8172_p9)
}
  0x18   :  { %s8330_s27 = smov 256   ;;  %s8331_s28 = smov 16  }
  0x19   :  { %70 = dma.hbm_to_vmem [thread:$0]  %s8637_s5, 8192, %s65_s20, [#allocation8], %s8330_s27, %s8330_s27, %s8331_s28  }
  0x1a   :  { %s8332_s12 = smov [#allocation10]  }
  0x1b   :  { %s86_s13 = sshll.u32 %s8332_s12, 4  ;;  %s87_s13 = int_to_ptr.vmem [resolvable:$true] %s86_s13 }
  0x1c   :  { %s8184_s14 = scalar_lea.vmem %s87_s13, 32768  ;;  %p8189_p11 = scmp.lt.s32.totalorder %s87_s13, %s87_s13 }
  0x1d   :  { %p8185_p10 = scmp.ne.s32.totalorder %s87_s13, %s8184_s14  ;;  %p8190_p12 = scmp.lt.s32.totalorder %s8184_s14, %s8184_s14 }
  0x1f   :  { %p8191_p13 = por %p8190_p12, %p8189_p11 }
  0x21   :  { %p8192_p0 = pnand %p8191_p13, %p8185_p10 }
  0x23   :  { %8195 = shalt.err (!%p8192_p0)
}
  0x24   :  { %s8333_s3 = smov 512   ;;  %s8334_s15 = smov 32  }
  0x25   :  { %92 = dma.hbm_to_vmem [thread:$0]  %s8639_s7, 32768, %s87_s13, [#allocation11], %s8333_s3, %s8333_s3, %s8334_s15  }
  0x26   :  { %s8335_s18 = smov [#allocation13]  }
  0x27   :  { %s108_s19 = sshll.u32 %s8335_s18, 4  ;;  %s109_s19 = int_to_ptr.vmem [resolvable:$true] %s108_s19 }
  0x28   :  { %s8204_s5 = scalar_lea.vmem %s109_s19, 57344  ;;  %p8209_p2 = scmp.lt.s32.totalorder %s109_s19, %s109_s19 }
  0x29   :  { %p8205_p1 = scmp.ne.s32.totalorder %s109_s19, %s8204_s5  ;;  %p8210_p3 = scmp.lt.s32.totalorder %s8204_s5, %s8204_s5 }
  0x2b   :  { %p8211_p4 = por %p8210_p3, %p8209_p2 }
  0x2d   :  { %p8212_p5 = pnand %p8211_p4, %p8205_p1 }
  0x2f   :  { %8215 = shalt.err (!%p8212_p5)
}
  0x30   :  { %s8336_s20 = smov 448   ;;  %s8337_s21 = smov 28  }
  0x31   :  { %114 = dma.hbm_to_vmem [thread:$0]  %s8641_s9, 57344, %s109_s19, [#allocation14], %s8336_s20, %s8336_s20, %s8337_s21  }
  0x32   :  { %s8338_s26 = smov [#allocation2]   ;;  %s8339_s28 = smov [#allocation6]  }
  0x33   :  { %s30_s27 = sshll.u32 %s8338_s26, 4  ;;  %s55_s7 = sshll.u32 %s8339_s28, 4  ;;  %s31_s27 = int_to_ptr.vmem [resolvable:$true] %s30_s27  ;;  %s56_s7 = int_to_ptr.vmem [resolvable:$true] %s55_s7 }
  0x34   :  { %s8224_s29 = scalar_lea.vmem %s31_s27, 1664  ;;  %p8229_p7 = scmp.lt.s32.totalorder %s31_s27, %s31_s27 }
  0x35   :  { %p8225_p6 = scmp.ne.s32.totalorder %s31_s27, %s8224_s29  ;;  %p8230_p8 = scmp.lt.s32.totalorder %s8224_s29, %s8224_s29 }
  0x37   :  { %p8231_p9 = por %p8230_p8, %p8229_p7 }
  0x39   :  { %p8232_p10 = pnand %p8231_p9, %p8225_p6 }
  0x3b   :  { %8235 = shalt.err (!%p8232_p10)
}
  0x3c   :  { %36 = dma.hbm_to_vmem [thread:$0]  %s8634_s2, 1664, %s31_s27, [#allocation3], %s8328_s22, %s8328_s22, %s8329_s23  }
  0x3d   :  { %s8244_s9 = scalar_lea.vmem %s56_s7, 32  ;;  %p8249_p12 = scmp.lt.s32.totalorder %s56_s7, %s56_s7 }
  0x3e   :  { %p8245_p11 = scmp.ne.s32.totalorder %s56_s7, %s8244_s9  ;;  %p8250_p13 = scmp.lt.s32.totalorder %s8244_s9, %s8244_s9 }
  0x40   :  { %p8251_p0 = por %p8250_p13, %p8249_p12 }
  0x42   :  { %p8252_p1 = pnand %p8251_p0, %p8245_p11 }
  0x44   :  { %8255 = shalt.err (!%p8252_p1)
}
  0x45   :  { %58 = dma.hbm_to_vmem [thread:$0]  %s8636_s4, 32, %s56_s7, [#allocation5]  }
  0x46   :  { %s8340_s3 = smov [#allocation9]   ;;  %s8341_s16 = smov [#allocation12]  }
  0x47   :  { %s77_s15 = sshll.u32 %s8340_s3, 4  ;;  %s99_s17 = sshll.u32 %s8341_s16, 4  ;;  %s78_s15 = int_to_ptr.vmem [resolvable:$true] %s77_s15  ;;  %s100_s17 = int_to_ptr.vmem [resolvable:$true] %s99_s17 }
  0x48   :  { %s8264_s18 = scalar_lea.vmem %s78_s15, 64  ;;  %p8269_p3 = scmp.lt.s32.totalorder %s78_s15, %s78_s15 }
  0x49   :  { %p8265_p2 = scmp.ne.s32.totalorder %s78_s15, %s8264_s18  ;;  %p8270_p4 = scmp.lt.s32.totalorder %s8264_s18, %s8264_s18 }
  0x4b   :  { %p8271_p5 = por %p8270_p4, %p8269_p3 }
  0x4d   :  { %p8272_p6 = pnand %p8271_p5, %p8265_p2 }
  0x4f   :  { %8275 = shalt.err (!%p8272_p6)
}
  0x50   :  { %80 = dma.hbm_to_vmem [thread:$0]  %s8638_s6, 64, %s78_s15, [#allocation8]  }
  0x51   :  { %s8284_s23 = scalar_lea.vmem %s100_s17, 128  ;;  %p8289_p8 = scmp.lt.s32.totalorder %s100_s17, %s100_s17 }
  0x52   :  { %p8285_p7 = scmp.ne.s32.totalorder %s100_s17, %s8284_s23  ;;  %p8290_p9 = scmp.lt.s32.totalorder %s8284_s23, %s8284_s23 }
  0x54   :  { %p8291_p10 = por %p8290_p9, %p8289_p8 }
  0x56   :  { %p8292_p11 = pnand %p8291_p10, %p8285_p7 }
  0x58   :  { %8295 = shalt.err (!%p8292_p11)
}
  0x59   :  { %102 = dma.hbm_to_vmem [thread:$0]  %s8640_s8, 128, %s100_s17, [#allocation11]  }
  0x5a   :  { %s8342_s5 = smov [#allocation15]  }
  0x5b   :  { %s121_s20 = sshll.u32 %s8342_s5, 4  ;;  %s122_s20 = int_to_ptr.vmem [resolvable:$true] %s121_s20 }
  0x5c   :  { %s8304_s21 = scalar_lea.vmem %s122_s20, 112  ;;  %s8308_s24 = scalar_lea.vmem %s122_s20, 128 }
  0x5d   :  { %p8305_p12 = scmp.ne.s32.totalorder %s122_s20, %s8304_s21  ;;  %p8309_p13 = scmp.lt.s32.totalorder %s122_s20, %s122_s20 }
  0x5e   :  { %p8310_p0 = scmp.lt.s32.totalorder %s8308_s24, %s8304_s21 }
  0x60   :  { %p8311_p1 = por %p8310_p0, %p8309_p13 }
  0x62   :  { %p8312_p2 = pnand %p8311_p1, %p8305_p12 }
  0x64   :  { %8315 = shalt.err (!%p8312_p2)
}
  0x65   :  { %124 = dma.hbm_to_vmem [thread:$0]  %s8642_s10, 112, %s122_s20, [#allocation14]  }
  0x66   :  { %8316 = dma.done.wait [#allocation3], 1664  }
  0x67   :  { %8317 = vsyncadd [#allocation3], 4294965632 }
  0x68   :  { %8318 = dma.done.wait [#allocation5], 928  }
  0x69   :  { %8319 = vsyncadd [#allocation5], 4294966368 }
  0x6a   :  { %8320 = dma.done.wait [#allocation8], 8256  }
  0x6b   :  { %8321 = vsyncadd [#allocation8], 4294959040 }
  0x6c   :  { %8322 = dma.done.wait [#allocation11], 32896  }
  0x6d   :  { %8323 = vsyncadd [#allocation11], 4294934400 }
  0x6e   :  { %8324 = dma.done.wait [#allocation14], 57456  }
  0x6f   :  { %8325 = vsyncadd [#allocation14], 4294909840  ;;  %v8343_v0 = vmov 0   ;;  %v167_v1 = vld [vmem:[#allocation2 + $0x60] sm:$0x33]  ;;  %vm345_vm0 = vcmask 1041408  }
  0x70   :  { %260 = vmatprep.mubr.bf16.mxu0 %v8343_v0  ;;  %384 = vmatprep.mubr.bf16.mxu1 %v8343_v0  ;;  %v6462_v2 = vcombine.high %v167_v1, %v167_v1  ;;  %v6461_v3 = vcombine.low %v167_v1, %v167_v1  ;;  %v7341_v4 = vld [vmem:[#allocation2 + $0x54] ss:$8 sps:$4 sm:$0xff]   ;;  %vm221_vm1 = vcmask 1040384   ;;  %v7343_v9 = vld [vmem:[#allocation2 + $0x50] ss:$8 sps:$4 sm:$0xff]   ;;  %v7367_v25 = vld [vmem:[%s8633_s1] sm:$0xff]  }
  0x71   :  { %v176_v5 = vld [vmem:[#allocation4 + $0x30] sm:$0x11]  ;;  %v7349_v11 = vld [vmem:[#allocation4 + $0x24] ss:$8 sps:$4 sm:$0xff]   ;;  %v7351_v13 = vld [vmem:[#allocation4 + $0x20] ss:$8 sps:$4 sm:$0xff]  }
  0x72   :  { %v6445_v6 = vcombine.high %v176_v5, %v176_v5  ;;  %v6444_v7 = vcombine.low %v176_v5, %v176_v5  ;;  %6463 = vmatprep.subr.msk.bf16.mxu1 %vm345_vm0, %v6462_v2  ;;  %v347_v8 = vsel %vm345_vm0, %v6461_v3, 0  ;;  %v7346_v12 = vld [vmem:[#allocation2 + $0x44] ss:$8 sps:$4 sm:$0xff]   ;;  %v7348_v15 = vld [vmem:[#allocation2 + $0x40] ss:$8 sps:$4 sm:$0xff]   ;;  %vm217_vm2 = vcmask 408576  }
  0x73   :  { %355 = vmatpush1.bf16.msra.mxu1 %v347_v8  ;;  %v7355_v14 = vld [vmem:[#allocation4 + $0x14] ss:$8 sps:$4 sm:$0xff]   ;;  %v7357_v17 = vld [vmem:[#allocation4 + $0x10] ss:$8 sps:$4 sm:$0xff]   ;;  %v7361_v18 = vld [vmem:[#allocation4 + $0x4] ss:$8 sps:$4 sm:$0xff]  }
  0x74   :  { %6446 = vmatprep.subr.msk.bf16.mxu0 %vm221_vm1, %v6445_v6  ;;  %v223_v10 = vsel %vm221_vm1, %v6444_v7, 0  ;;  %356 = vmatprep.subr.bf16.mxu1 %v7341_v4  ;;  %v7352_v16 = vld [vmem:[#allocation2 + $0x34] ss:$8 sps:$4 sm:$0xff]   ;;  %v7354_v19 = vld [vmem:[#allocation2 + $0x30] ss:$8 sps:$4 sm:$0xff]   ;;  %v7371_v36 = vld [vmem:[%s8632_s0] sm:$0xff]  }
  0x75   :  { %237 = vmatpush1.bf16.msra.mxu0 %v223_v10  ;;  %v7358_v20 = vld [vmem:[#allocation2 + $0x24] ss:$8 sps:$4 sm:$0xff]   ;;  %v7363_v21 = vld [vmem:[#allocation4] ss:$8 sps:$4 sm:$0xff]   ;;  %v7364_v23 = vld [vmem:[#allocation2 + $0x14] ss:$8 sps:$4 sm:$0xff]  }
  0x76   :  { %238 = vmatprep.subr.bf16.mxu0 %v7349_v11  ;;  %v7360_v22 = vld [vmem:[#allocation2 + $0x20] ss:$8 sps:$4 sm:$0xff]   ;;  %v7366_v28 = vld [vmem:[#allocation2 + $0x10] ss:$8 sps:$4 sm:$0xff]   ;;  %v7368_v29 = vld [vmem:[#allocation2 + $0x4] ss:$8 sps:$4 sm:$0xff]  }
  0x77   :  { %357 = vmatpush1.bf16.msra.mxu1 %v7343_v9  ;;  %v7374_v24 = vld [vmem:[#allocation7 + $0xe4] ss:$16 sps:$4 sm:$0xff]   ;;  %v7372_v26 = vld [vmem:[#allocation7 + $0xe0] ss:$16 sps:$4 sm:$0xff]   ;;  %v7377_v33 = vld [vmem:[#allocation7 + $0xec] ss:$16 sps:$4 sm:$0xff]  }
  0x78   :  { %358 = vmatprep.subr.bf16.mxu1 %v7346_v12  ;;  %v7380_v27 = vld [vmem:[#allocation7 + $0xc4] ss:$16 sps:$4 sm:$0xff]   ;;  %v7378_v30 = vld [vmem:[#allocation7 + $0xc0] ss:$16 sps:$4 sm:$0xff]   ;;  %v7375_v37 = vld [vmem:[#allocation7 + $0xe8] ss:$16 sps:$4 sm:$0xff]  }
  0x79   :  { %239 = vmatpush1.bf16.msra.mxu0 %v7351_v13  ;;  %v7386_v31 = vld [vmem:[#allocation7 + $0xa4] ss:$16 sps:$4 sm:$0xff]   ;;  %v7384_v34 = vld [vmem:[#allocation7 + $0xa0] ss:$16 sps:$4 sm:$0xff]   ;;  %vm341_vm3 = vcmask 818176  }
  0x7a   :  { %240 = vmatprep.subr.bf16.mxu0 %v7355_v14  ;;  %v7370_v32 = vld [vmem:[#allocation2] ss:$8 sps:$4 sm:$0xff]  }
  0x7b   :  { %359 = vmatpush1.bf16.msra.mxu1 %v7348_v15  ;;  %v7392_v35 = vld [vmem:[#allocation7 + $0x84] ss:$16 sps:$4 sm:$0xff]   ;;  %v7383_v38 = vld [vmem:[#allocation7 + $0xcc] ss:$16 sps:$4 sm:$0xff]   ;;  %v7390_v39 = vld [vmem:[#allocation7 + $0x80] ss:$16 sps:$4 sm:$0xff]  }
  0x7c   :  { %360 = vmatprep.subr.bf16.mxu1 %v7352_v16  ;;  %v7398_v40 = vld [vmem:[#allocation7 + $0x64] ss:$16 sps:$4 sm:$0xff]   ;;  %v7381_v41 = vld [vmem:[#allocation7 + $0xc8] ss:$16 sps:$4 sm:$0xff]   ;;  %v7389_v42 = vld [vmem:[#allocation7 + $0xac] ss:$16 sps:$4 sm:$0xff]  }
  0x7d   :  { %241 = vmatpush1.bf16.msra.mxu0 %v7357_v17  ;;  %v7396_v43 = vld [vmem:[#allocation7 + $0x60] ss:$16 sps:$4 sm:$0xff]   ;;  %v7404_v44 = vld [vmem:[#allocation7 + $0x44] ss:$16 sps:$4 sm:$0xff]   ;;  %v7387_v45 = vld [vmem:[#allocation7 + $0xa8] ss:$16 sps:$4 sm:$0xff]  }
  0x7e   :  { %242 = vmatprep.subr.bf16.mxu0 %v7361_v18  ;;  %v7395_v46 = vld [vmem:[#allocation7 + $0x8c] ss:$16 sps:$4 sm:$0xff]   ;;  %v7402_v47 = vld [vmem:[#allocation7 + $0x40] ss:$16 sps:$4 sm:$0xff]   ;;  %v7410_v48 = vld [vmem:[#allocation7 + $0x24] ss:$16 sps:$4 sm:$0xff]  }
  0x7f   :  { %361 = vmatpush1.bf16.msra.mxu1 %v7354_v19  ;;  %v7393_v49 = vld [vmem:[#allocation7 + $0x88] ss:$16 sps:$4 sm:$0xff]   ;;  %v7401_v50 = vld [vmem:[#allocation7 + $0x6c] ss:$16 sps:$4 sm:$0xff]   ;;  %v7408_v51 = vld [vmem:[#allocation7 + $0x20] ss:$16 sps:$4 sm:$0xff]  }
  0x80   :  { %362 = vmatprep.subr.bf16.mxu1 %v7358_v20  ;;  %v7399_v52 = vld [vmem:[#allocation7 + $0x68] ss:$16 sps:$4 sm:$0xff]   ;;  %v7416_v53 = vld [vmem:[#allocation7 + $0x4] ss:$16 sps:$4 sm:$0xff]   ;;  %v7407_v54 = vld [vmem:[#allocation7 + $0x4c] ss:$16 sps:$4 sm:$0xff]  }
  0x81   :  { %243 = vmatpush1.bf16.msra.mxu0 %v7363_v21  ;;  %v7414_v55 = vld [vmem:[#allocation7] ss:$16 sps:$4 sm:$0xff]   ;;  %v7422_v56 = vld [vmem:[#allocation7 + $0x1e4] ss:$16 sps:$4 sm:$0xff]   ;;  %v7405_v57 = vld [vmem:[#allocation7 + $0x48] ss:$16 sps:$4 sm:$0xff]  }
  0x82   :  { %823 = vmatprep.subr.bf16.mxu0 %v7374_v24  ;;  %v7413_v58 = vld [vmem:[#allocation7 + $0x2c] ss:$16 sps:$4 sm:$0xff]   ;;  %v7420_v59 = vld [vmem:[#allocation7 + $0x1e0] ss:$16 sps:$4 sm:$0xff]   ;;  %v7428_v60 = vld [vmem:[#allocation7 + $0x1c4] ss:$16 sps:$4 sm:$0xff]  }
  0x83   :  { %363 = vmatpush1.bf16.msra.mxu1 %v7360_v22  ;;  %v7411_v61 = vld [vmem:[#allocation7 + $0x28] ss:$16 sps:$4 sm:$0xff]   ;;  %v7419_v62 = vld [vmem:[#allocation7 + $0xc] ss:$16 sps:$4 sm:$0xff]   ;;  %v7426_v63 = vld [vmem:[#allocation7 + $0x1c0] ss:$16 sps:$4 sm:$0xff]  }
  0x84   :  { %6447 = vmatmul.mubr.msk.bf16.vlgmr.msra.gmra.mxu0 %vm217_vm2, %v7367_v25  ;;  %364 = vmatprep.subr.bf16.mxu1 %v7364_v23  ;;  %v7434_v0 = vld [vmem:[#allocation7 + $0x1a4] ss:$16 sps:$4 sm:$0xff]   ;;  %v7417_v1 = vld [vmem:[#allocation7 + $0x8] ss:$16 sps:$4 sm:$0xff]   ;;  %v7425_v2 = vld [vmem:[#allocation7 + $0x1ec] ss:$16 sps:$4 sm:$0xff]  }
  0x85   :  { %824 = vmatpush1.bf16.msra.mxu0 %v7372_v26  ;;  %v7432_v3 = vld [vmem:[#allocation7 + $0x1a0] ss:$16 sps:$4 sm:$0xff]   ;;  %v7423_v4 = vld [vmem:[#allocation7 + $0x1e8] ss:$16 sps:$4 sm:$0xff]   ;;  %v7431_v5 = vld [vmem:[#allocation7 + $0x1cc] ss:$16 sps:$4 sm:$0xff]  }
  0x86   :  { %825 = vmatprep.subr.bf16.mxu0 %v7380_v27  ;;  %v7429_v6 = vld [vmem:[#allocation7 + $0x1c8] ss:$16 sps:$4 sm:$0xff]   ;;  %v7437_v7 = vld [vmem:[#allocation7 + $0x1ac] ss:$16 sps:$4 sm:$0xff]   ;;  %v7438_v9 = vld [vmem:[#allocation7 + $0x180] ss:$16 sps:$4 sm:$0xff]  }
  0x87   :  { %365 = vmatpush1.bf16.msra.mxu1 %v7366_v28  ;;  %v7435_v8 = vld [vmem:[#allocation7 + $0x1a8] ss:$16 sps:$4 sm:$0xff]   ;;  %v7440_v10 = vld [vmem:[#allocation7 + $0x184] ss:$16 sps:$4 sm:$0xff]   ;;  %v7443_v12 = vld [vmem:[#allocation7 + $0x18c] ss:$16 sps:$4 sm:$0xff]  }
  0x88   :  { %366 = vmatprep.subr.bf16.mxu1 %v7368_v29  ;;  %v7441_v11 = vld [vmem:[#allocation7 + $0x188] ss:$16 sps:$4 sm:$0xff]   ;;  %v7446_v13 = vld [vmem:[#allocation7 + $0x164] ss:$16 sps:$4 sm:$0xff]   ;;  %v7449_v14 = vld [vmem:[#allocation7 + $0x16c] ss:$16 sps:$4 sm:$0xff]  }
  0x89   :  { %826 = vmatpush1.bf16.msra.mxu0 %v7378_v30  ;;  %v7444_v15 = vld [vmem:[#allocation7 + $0x160] ss:$16 sps:$4 sm:$0xff]   ;;  %v7447_v16 = vld [vmem:[#allocation7 + $0x168] ss:$16 sps:$4 sm:$0xff]   ;;  %v7452_v17 = vld [vmem:[#allocation7 + $0x144] ss:$16 sps:$4 sm:$0xff]  }
  0x8a   :  { %827 = vmatprep.subr.bf16.mxu0 %v7386_v31  ;;  %v7455_v18 = vld [vmem:[#allocation7 + $0x14c] ss:$16 sps:$4 sm:$0xff]   ;;  %v7450_v19 = vld [vmem:[#allocation7 + $0x140] ss:$16 sps:$4 sm:$0xff]   ;;  %v7453_v20 = vld [vmem:[#allocation7 + $0x148] ss:$16 sps:$4 sm:$0xff]  }
  0x8b   :  { %367 = vmatpush1.bf16.msra.mxu1 %v7370_v32  ;;  %v7458_v21 = vld [vmem:[#allocation7 + $0x124] ss:$16 sps:$4 sm:$0xff]   ;;  %v7461_v22 = vld [vmem:[#allocation7 + $0x12c] ss:$16 sps:$4 sm:$0xff]   ;;  %v7456_v23 = vld [vmem:[#allocation7 + $0x120] ss:$16 sps:$4 sm:$0xff]  }
  0x8c   :  { %866 = vmatprep.subr.bf16.mxu1 %v7377_v33  ;;  %v7459_v24 = vld [vmem:[#allocation7 + $0x128] ss:$16 sps:$4 sm:$0xff]   ;;  %v7464_v25 = vld [vmem:[#allocation7 + $0x104] ss:$16 sps:$4 sm:$0xff]   ;;  %v7467_v26 = vld [vmem:[#allocation7 + $0x10c] ss:$16 sps:$4 sm:$0xff]  }
  0x8d   :  { %828 = vmatpush1.bf16.msra.mxu0 %v7384_v34  ;;  %v7462_v27 = vld [vmem:[#allocation7 + $0x100] ss:$16 sps:$4 sm:$0xff]   ;;  %v7465_v28 = vld [vmem:[#allocation7 + $0x108] ss:$16 sps:$4 sm:$0xff]  }
  0x8e   :  { %829 = vmatprep.subr.bf16.mxu0 %v7392_v35  ;;  %6464 = vmatmul.mubr.msk.bf16.vlgmr.msra.gmra.mxu1 %vm341_vm3, %v7371_v36  ;;  %v977_v29 = vld [vmem:[#allocation10 + $0x1c0] sm:$0xff] }
  0x8f   :  { %867 = vmatpush1.bf16.msra.mxu1 %v7375_v37  ;;  %v981_v30 = vld [vmem:[#allocation10 + $0x1e0] sm:$0xff]  ;;  %v397_v37 = vlaneseq }
  0x90   :  { %868 = vmatprep.subr.bf16.mxu1 %v7383_v38  ;;  %v1105_v31 = vld [vmem:[#allocation10 + $0x5c0] sm:$0xff]  ;;  %v6585_v32 = vcombine.low %v977_v29, %v981_v30  ;;  %v6586_v33 = vcombine.high %v977_v29, %v981_v30 }
  0x91   :  { %830 = vmatpush1.bf16.msra.mxu0 %v7390_v39  ;;  %v1109_v34 = vld [vmem:[#allocation10 + $0x5e0] sm:$0xff]  ;;  %v8443_v38 = vshrl.u32 %v397_v37, 7 }
  0x92   :  { %831 = vmatprep.subr.bf16.mxu0 %v7398_v40  ;;  %v6713_v35 = vcombine.low %v1105_v31, %v1109_v34  ;;  %v6714_v36 = vcombine.high %v1105_v31, %v1109_v34  ;;  %v395_v40 = vld [vmem:[#allocation6] sm:$0x3]  ;;  %v1065_v34 = vld [vmem:[#allocation10 + $0x480] sm:$0xff] }
  0x93   :  { %869 = vmatpush1.bf16.msra.mxu1 %v7381_v41  ;;  %v8446_v41 = vsub.s32 0, %v8443_v38 }
  0x94   :  { %870 = vmatprep.subr.bf16.mxu1 %v7389_v42 }
  0x95   :  { %832 = vmatpush1.bf16.msra.mxu0 %v7396_v43  ;;  %v8449_v43 = vsub.s32 1, %v8443_v38 }
  0x96   :  { %833 = vmatprep.subr.bf16.mxu0 %v7404_v44 }
  0x97   :  { %871 = vmatpush1.bf16.msra.mxu1 %v7387_v45 }
  0x98   :  { %872 = vmatprep.subr.bf16.mxu1 %v7395_v46  ;;  %v400_v46 = vrot.slane %v395_v40, %v8446_v41 }
  0x99   :  { %834 = vmatpush1.bf16.msra.mxu0 %v7402_v47 }
  0x9a   :  { %835 = vmatprep.subr.bf16.mxu0 %v7410_v48 }
  0x9b   :  { %873 = vmatpush1.bf16.msra.mxu1 %v7393_v49 }
  0x9c   :  { %874 = vmatprep.subr.bf16.mxu1 %v7401_v50  ;;  %v404_v50 = vrot.slane %v395_v40, %v8449_v43 }
  0x9d   :  { %836 = vmatpush1.bf16.msra.mxu0 %v7408_v51 }
  0x9e   :  { %837 = vmatprep.subr.bf16.mxu0 %v7416_v53 }
  0x9f   :  { %875 = vmatpush1.bf16.msra.mxu1 %v7399_v52 }
  0xa0   :  { %876 = vmatprep.subr.bf16.mxu1 %v7407_v54 }
  0xa1   :  { %838 = vmatpush1.bf16.msra.mxu0 %v7414_v55 }
  0xa2   :  { %839 = vmatprep.subr.bf16.mxu0 %v7422_v56 }
  0xa3   :  { %877 = vmatpush1.bf16.msra.mxu1 %v7405_v57 }
  0xa4   :  { %878 = vmatprep.subr.bf16.mxu1 %v7413_v58 }
  0xa5   :  { %840 = vmatpush2.bf16.msra.mxu0 %v7420_v59 }
  0xa6   :  { %841 = vmatprep.subr.bf16.mxu0 %v7428_v60 }
  0xa7   :  { %879 = vmatpush1.bf16.msra.mxu1 %v7411_v61 }
  0xa8   :  { %880 = vmatprep.subr.bf16.mxu1 %v7419_v62  ;;  %v969_v62 = vld [vmem:[#allocation10 + $0x180] sm:$0xff] }
  0xa9   :  { %842 = vmatpush2.bf16.msra.mxu0 %v7426_v63  ;;  %v973_v63 = vld [vmem:[#allocation10 + $0x1a0] sm:$0xff] }
  0xaa   :  { %843 = vmatprep.subr.bf16.mxu0 %v7434_v0  ;;  %v1097_v0 = vld [vmem:[#allocation10 + $0x580] sm:$0xff] }
  0xab   :  { %881 = vmatpush1.bf16.msra.mxu1 %v7417_v1  ;;  %v1101_v1 = vld [vmem:[#allocation10 + $0x5a0] sm:$0xff] }
  0xac   :  { %882 = vmatprep.subr.bf16.mxu1 %v7425_v2 }
  0xad   :  { %844 = vmatpush2.bf16.msra.mxu0 %v7432_v3 }
  0xae   :  { %845 = vmatprep.subr.bf16.mxu0 %v7440_v10  ;;  %v6578_v10 = vcombine.high %v969_v62, %v973_v63 }
  0xaf   :  { %883 = vmatpush2.bf16.msra.mxu1 %v7423_v4 }
  0xb0   :  { %884 = vmatprep.subr.bf16.mxu1 %v7431_v5  ;;  %v961_v5 = vld [vmem:[#allocation10 + $0x140] sm:$0xff] }
  0xb1   :  { %846 = vmatpush2.bf16.msra.mxu0 %v7438_v9 }
  0xb2   :  { %847 = vmatprep.subr.bf16.mxu0 %v7446_v13  ;;  %v6705_v13 = vcombine.low %v1097_v0, %v1101_v1 }
  0xb3   :  { %885 = vmatpush2.bf16.msra.mxu1 %v7429_v6  ;;  %v965_v6 = vld [vmem:[#allocation10 + $0x160] sm:$0xff] }
  0xb4   :  { %886 = vmatprep.subr.bf16.mxu1 %v7437_v7  ;;  %v1089_v7 = vld [vmem:[#allocation10 + $0x540] sm:$0xff] }
  0xb5   :  { %848 = vmatpush2.bf16.msra.mxu0 %v7444_v15  ;;  %v957_v15 = vld [vmem:[#allocation10 + $0x120] sm:$0xff] }
  0xb6   :  { %849 = vmatprep.subr.bf16.mxu0 %v7452_v17  ;;  %v1085_v17 = vld [vmem:[#allocation10 + $0x520] sm:$0xff] }
  0xb7   :  { %887 = vmatpush2.bf16.msra.mxu1 %v7435_v8  ;;  %v1093_v8 = vld [vmem:[#allocation10 + $0x560] sm:$0xff] }
  0xb8   :  { %888 = vmatprep.subr.bf16.mxu1 %v7443_v12  ;;  %v6577_v12 = vcombine.low %v969_v62, %v973_v63  ;;  %v1173_v62 = vld [vmem:[#allocation10 + $0x7e0] sm:$0xff] }
  0xb9   :  { %850 = vmatpush2.bf16.msra.mxu0 %v7450_v19  ;;  %v6698_v19 = vcombine.high %v1089_v7, %v1093_v8 }
  0xba   :  { %851 = vmatprep.subr.bf16.mxu0 %v7458_v21  ;;  %v6697_v21 = vcombine.low %v1089_v7, %v1093_v8 }
  0xbb   :  { %889 = vmatpush2.bf16.msra.mxu1 %v7441_v11  ;;  %v6706_v11 = vcombine.high %v1097_v0, %v1101_v1 }
  0xbc   :  { %890 = vmatprep.subr.bf16.mxu1 %v7449_v14  ;;  %v953_v14 = vld [vmem:[#allocation10 + $0x100] sm:$0xff] }
  0xbd   :  { %852 = vmatpush2.bf16.msra.mxu0 %v7456_v23  ;;  %v949_v23 = vld [vmem:[#allocation10 + $0xe0] sm:$0xff] }
  0xbe   :  { %853 = vmatprep.subr.bf16.mxu0 %v7464_v25  ;;  %v1077_v25 = vld [vmem:[#allocation10 + $0x4e0] sm:$0xff] }
  0xbf   :  { %891 = vmatpush2.bf16.msra.mxu1 %v7447_v16  ;;  %v1081_v16 = vld [vmem:[#allocation10 + $0x500] sm:$0xff] }
  0xc0   :  { %892 = vmatprep.subr.bf16.mxu1 %v7455_v18  ;;  %v6570_v18 = vcombine.high %v961_v5, %v965_v6  ;;  %v6689_v29 = vcombine.low %v1081_v16, %v1085_v17 }
  0xc1   :  { %854 = vmatpush2.bf16.msra.mxu0 %v7462_v27  ;;  %v6690_v27 = vcombine.high %v1081_v16, %v1085_v17 }
  0xc2   :  { %2499 = vmatprep.subr.bf16.mxu0 %v6586_v33  ;;  %v941_v33 = vld [vmem:[#allocation10 + $0xa0] sm:$0xff] }
  0xc3   :  { %893 = vmatpush2.bf16.msra.mxu1 %v7453_v20  ;;  %v6569_v20 = vcombine.low %v961_v5, %v965_v6  ;;  %v1161_v5 = vld [vmem:[#allocation10 + $0x780] sm:$0xff] }
  0xc4   :  { %894 = vmatprep.subr.bf16.mxu1 %v7461_v22  ;;  %v945_v22 = vld [vmem:[#allocation10 + $0xc0] sm:$0xff] }
  0xc5   :  { %v6554_v30 = vcombine.high %v945_v22, %v949_v23  ;;  %v1165_v6 = vld [vmem:[#allocation10 + $0x7a0] sm:$0xff] }
  0xc6   :  { %v6769_v16 = vcombine.low %v1161_v5, %v1165_v6 }
  0xc7   :  { %895 = vmatpush2.bf16.msra.mxu1 %v7459_v24  ;;  %v1073_v24 = vld [vmem:[#allocation10 + $0x4c0] sm:$0xff] }
  0xc8   :  { %896 = vmatprep.subr.bf16.mxu1 %v7467_v26  ;;  %v6562_v26 = vcombine.high %v953_v14, %v957_v15  ;;  %v6682_v31 = vcombine.high %v1073_v24, %v1077_v25  ;;  %v6681_v37 = vcombine.low %v1073_v24, %v1077_v25 }
  0xcb   :  { %897 = vmatpush2.bf16.msra.mxu1 %v7465_v28  ;;  %v6561_v28 = vcombine.low %v953_v14, %v957_v15  ;;  %v1157_v14 = vld [vmem:[#allocation10 + $0x760] sm:$0xff] }
  0xcc   :  { %2542 = vmatprep.subr.bf16.mxu1 %v6714_v36  ;;  %v6553_v36 = vcombine.low %v945_v22, %v949_v23  ;;  %v1149_v22 = vld [vmem:[#allocation10 + $0x720] sm:$0xff] }
 0x144   :  { %v262_v39 = vpop.f32.mrf.mxu0 }
 0x146   :  { %v264_v42 = vpop.f32.mrf.mxu0 }
 0x148   :  { %v266_v47 = vpop.f32.mrf.mxu0 }
 0x14a   :  { %v268_v54 = vpop.f32.mrf.mxu0 }
 0x14e   :  { %v386_v44 = vpop.f32.mrf.mxu1 }
 0x14f   :  { %v387_v45 = vadd.f32 %v386_v44, %v262_v39  ;;  %v933_v44 = vld [vmem:[#allocation10 + $0x60] sm:$0xff] }
 0x150   :  { %v388_v48 = vpop.f32.mrf.mxu1 }
 0x151   :  { %v389_v49 = vadd.f32 %v388_v48, %v264_v42  ;;  %v407_v52 = vadd.f32 %v400_v46, %v387_v45  ;;  %v929_v42 = vld [vmem:[#allocation10 + $0x40] sm:$0xff] }
 0x152   :  { %v390_v51 = vpop.f32.mrf.mxu1  ;;  %v1057_v45 = vld [vmem:[#allocation10 + $0x440] sm:$0xff] }
 0x153   :  { %v391_v53 = vadd.f32 %v390_v51, %v266_v47  ;;  %v408_v56 = vadd.f32 %v404_v50, %v389_v49  ;;  %v411_v59 = vmax.f32 %v407_v52, 0.0  ;;  %v6538_v49 = vcombine.high %v929_v42, %v933_v44  ;;  %v921_v51 = vld [vmem:[#allocation10] sm:$0xff] }
 0x154   :  { %v392_v55 = vpop.f32.mrf.mxu1  ;;  %v925_v52 = vld [vmem:[#allocation10 + $0x20] sm:$0xff] }
 0x155   :  { %v409_v57 = vadd.f32 %v400_v46, %v391_v53  ;;  %v393_v58 = vadd.f32 %v392_v55, %v268_v54  ;;  %v412_v2 = vmax.f32 %v408_v56, 0.0  ;;  %v1061_v46 = vld [vmem:[#allocation10 + $0x460] sm:$0xff]  ;;  %v6537_v55 = vcombine.low %v929_v42, %v933_v44 }
 0x156   :  { %v1049_v53 = vld [vmem:[#allocation10 + $0x400] sm:$0xff]  ;;  %v6665_v56 = vcombine.low %v1057_v45, %v1061_v46  ;;  %v6529_v63 = vcombine.low %v921_v51, %v925_v52 }
 0x157   :  { %v413_v60 = vmax.f32 %v409_v57, 0.0  ;;  %v410_v61 = vadd.f32 %v404_v50, %v393_v58  ;;  %v6666_v50 = vcombine.high %v1057_v45, %v1061_v46  ;;  %v1053_v54 = vld [vmem:[#allocation10 + $0x420] sm:$0xff]  ;;  %v6530_v57 = vcombine.high %v921_v51, %v925_v52 }
 0x158   :  { %v6658_v58 = vcombine.high %v1049_v53, %v1053_v54  ;;  %v6657_v0 = vcombine.low %v1049_v53, %v1053_v54  ;;  %v1133_v44 = vld [vmem:[#allocation10 + $0x6a0] sm:$0xff] }
 0x159   :  { %v414_v3 = vmax.f32 %v410_v61, 0.0  ;;  %v415_v9 = vpack.c.bf16 %v413_v60, %v411_v59  ;;  %v1041_v59 = vld [vmem:[#allocation10 + $0x3c0] sm:$0xff] }
 0x15a   :  { %v1045_v60 = vld [vmem:[#allocation10 + $0x3e0] sm:$0xff] }
 0x15b   :  { %v416_v4 = vpack.c.bf16 %v414_v3, %v412_v2  ;;  %v1169_v61 = vld [vmem:[#allocation10 + $0x7c0] sm:$0xff]  ;;  %v6650_v1 = vcombine.high %v1041_v59, %v1045_v60  ;;  %v6649_v7 = vcombine.low %v1041_v59, %v1045_v60 }
 0x15c   :  { %v6778_v2 = vcombine.high %v1169_v61, %v1173_v62  ;;  %v1033_v3 = vld [vmem:[#allocation10 + $0x380] sm:$0xff]  ;;  %v6777_v8 = vcombine.low %v1169_v61, %v1173_v62 }
 0x15d   :  { %855 = vmatprep.mubr.bf16.mxu0 %v416_v4  ;;  %898 = vmatprep.mubr.bf16.mxu1 %v416_v4  ;;  %v1037_v4 = vld [vmem:[#allocation10 + $0x3a0] sm:$0xff] }
 0x15e   :  { %856 = vmatmul.mubr.bf16.vlgmr.msra.gmra.mxu0 %v415_v9  ;;  %899 = vmatmul.mubr.bf16.vlgmr.msra.gmra.mxu1 %v415_v9  ;;  %v6642_v9 = vcombine.high %v1033_v3, %v1037_v4  ;;  %v6641_v15 = vcombine.low %v1033_v3, %v1037_v4  ;;  %v1125_v52 = vld [vmem:[#allocation10 + $0x660] sm:$0xff]  ;;  %v1110_v4 = vld [vmem:[#allocation10 + $0x5e8] sm:$0xff] }
 0x15f   :  { %2500 = vmatpush1.bf16.msra.mxu0 %v6585_v32  ;;  %2543 = vmatpush1.bf16.msra.mxu1 %v6713_v35  ;;  %v937_v32 = vld [vmem:[#allocation10 + $0x80] sm:$0xff] }
 0x160   :  { %2501 = vmatprep.subr.bf16.mxu0 %v6578_v10  ;;  %2544 = vmatprep.subr.bf16.mxu1 %v6706_v11  ;;  %v1069_v35 = vld [vmem:[#allocation10 + $0x4a0] sm:$0xff]  ;;  %v6546_v39 = vcombine.high %v937_v32, %v941_v33  ;;  %v6545_v47 = vcombine.low %v937_v32, %v941_v33  ;;  %v6770_v10 = vcombine.high %v1161_v5, %v1165_v6 }
 0x161   :  { %v6674_v40 = vcombine.high %v1065_v34, %v1069_v35  ;;  %v6673_v48 = vcombine.low %v1065_v34, %v1069_v35  ;;  %v1025_v11 = vld [vmem:[#allocation10 + $0x340] sm:$0xff] }
 0x162   :  { %v1117_v60 = vld [vmem:[#allocation10 + $0x620] sm:$0xff] }
 0x163   :  { %2502 = vmatpush1.bf16.msra.mxu0 %v6577_v12  ;;  %2545 = vmatpush1.bf16.msra.mxu1 %v6705_v13  ;;  %v1029_v12 = vld [vmem:[#allocation10 + $0x360] sm:$0xff] }
 0x164   :  { %2503 = vmatprep.subr.bf16.mxu0 %v6570_v18  ;;  %2546 = vmatprep.subr.bf16.mxu1 %v6698_v19  ;;  %v1153_v13 = vld [vmem:[#allocation10 + $0x740] sm:$0xff]  ;;  %v6634_v17 = vcombine.high %v1025_v11, %v1029_v12  ;;  %v6633_v23 = vcombine.low %v1025_v11, %v1029_v12 }
 0x165   :  { %v6762_v18 = vcombine.high %v1153_v13, %v1157_v14  ;;  %v1017_v19 = vld [vmem:[#allocation10 + $0x300] sm:$0xff]  ;;  %v6761_v24 = vcombine.low %v1153_v13, %v1157_v14 }
 0x167   :  { %2504 = vmatpush1.bf16.msra.mxu0 %v6569_v20  ;;  %2547 = vmatpush1.bf16.msra.mxu1 %v6697_v21  ;;  %v1021_v20 = vld [vmem:[#allocation10 + $0x320] sm:$0xff] }
 0x168   :  { %2505 = vmatprep.subr.bf16.mxu0 %v6562_v26  ;;  %2548 = vmatprep.subr.bf16.mxu1 %v6690_v27  ;;  %v1145_v21 = vld [vmem:[#allocation10 + $0x700] sm:$0xff]  ;;  %v6626_v25 = vcombine.high %v1017_v19, %v1021_v20 }
 0x169   :  { %v6754_v26 = vcombine.high %v1145_v21, %v1149_v22  ;;  %v1009_v27 = vld [vmem:[#allocation10 + $0x2c0] sm:$0xff]  ;;  %v6753_v32 = vcombine.low %v1145_v21, %v1149_v22 }
 0x16b   :  { %2506 = vmatpush1.bf16.msra.mxu0 %v6561_v28  ;;  %2549 = vmatpush1.bf16.msra.mxu1 %v6689_v29  ;;  %v1013_v28 = vld [vmem:[#allocation10 + $0x2e0] sm:$0xff] }
 0x16c   :  { %2507 = vmatprep.subr.bf16.mxu0 %v6554_v30  ;;  %2550 = vmatprep.subr.bf16.mxu1 %v6682_v31  ;;  %v1137_v29 = vld [vmem:[#allocation10 + $0x6c0] sm:$0xff]  ;;  %v6625_v31 = vcombine.low %v1017_v19, %v1021_v20  ;;  %v6618_v33 = vcombine.high %v1009_v27, %v1013_v28  ;;  %v6617_v35 = vcombine.low %v1009_v27, %v1013_v28 }
 0x16d   :  { %v1141_v30 = vld [vmem:[#allocation10 + $0x6e0] sm:$0xff] }
 0x16e   :  { %v6746_v34 = vcombine.high %v1137_v29, %v1141_v30 }
 0x16f   :  { %2508 = vmatpush1.bf16.msra.mxu0 %v6553_v36  ;;  %2551 = vmatpush1.bf16.msra.mxu1 %v6681_v37  ;;  %v6745_v36 = vcombine.low %v1137_v29, %v1141_v30  ;;  %v1001_v37 = vld [vmem:[#allocation10 + $0x280] sm:$0xff] }
 0x170   :  { %2509 = vmatprep.subr.bf16.mxu0 %v6546_v39  ;;  %2552 = vmatprep.subr.bf16.mxu1 %v6674_v40  ;;  %v1005_v39 = vld [vmem:[#allocation10 + $0x2a0] sm:$0xff] }
 0x171   :  { %v1129_v40 = vld [vmem:[#allocation10 + $0x680] sm:$0xff]  ;;  %v6610_v42 = vcombine.high %v1001_v37, %v1005_v39  ;;  %v6609_v45 = vcombine.low %v1001_v37, %v1005_v39  ;;  %v970_v37 = vld [vmem:[#allocation10 + $0x188] sm:$0xff] }
 0x172   :  { %v6737_v46 = vcombine.low %v1129_v40, %v1133_v44 }
 0x173   :  { %2510 = vmatpush1.bf16.msra.mxu0 %v6545_v47  ;;  %2553 = vmatpush1.bf16.msra.mxu1 %v6673_v48  ;;  %v6738_v47 = vcombine.high %v1129_v40, %v1133_v44  ;;  %v993_v48 = vld [vmem:[#allocation10 + $0x240] sm:$0xff]  ;;  %v1098_v44 = vld [vmem:[#allocation10 + $0x588] sm:$0xff] }
 0x174   :  { %2511 = vmatprep.subr.bf16.mxu0 %v6538_v49  ;;  %2554 = vmatprep.subr.bf16.mxu1 %v6666_v50  ;;  %v997_v49 = vld [vmem:[#allocation10 + $0x260] sm:$0xff] }
 0x175   :  { %v1121_v50 = vld [vmem:[#allocation10 + $0x640] sm:$0xff]  ;;  %v6602_v51 = vcombine.high %v993_v48, %v997_v49  ;;  %v6601_v53 = vcombine.low %v993_v48, %v997_v49 }
 0x176   :  { %v6729_v54 = vcombine.low %v1121_v50, %v1125_v52 }
 0x177   :  { %2512 = vmatpush1.bf16.msra.mxu0 %v6537_v55  ;;  %2555 = vmatpush1.bf16.msra.mxu1 %v6665_v56  ;;  %v6730_v55 = vcombine.high %v1121_v50, %v1125_v52  ;;  %v985_v56 = vld [vmem:[#allocation10 + $0x200] sm:$0xff]  ;;  %v962_v50 = vld [vmem:[#allocation10 + $0x148] sm:$0xff] }
 0x178   :  { %2513 = vmatprep.subr.bf16.mxu0 %v6530_v57  ;;  %2556 = vmatprep.subr.bf16.mxu1 %v6658_v58  ;;  %v989_v57 = vld [vmem:[#allocation10 + $0x220] sm:$0xff] }
 0x179   :  { %v1113_v58 = vld [vmem:[#allocation10 + $0x600] sm:$0xff]  ;;  %v6594_v59 = vcombine.high %v985_v56, %v989_v57  ;;  %v6593_v61 = vcombine.low %v985_v56, %v989_v57 }
 0x17a   :  { %v6721_v62 = vcombine.low %v1113_v58, %v1117_v60 }
 0x17b   :  { %2514 = vmatpush1.bf16.msra.mxu0 %v6529_v63  ;;  %2557 = vmatpush1.bf16.msra.mxu1 %v6657_v0  ;;  %v6722_v63 = vcombine.high %v1113_v58, %v1117_v60  ;;  %v978_v0 = vld [vmem:[#allocation10 + $0x1c8] sm:$0xff] }
 0x17c   :  { %2515 = vmatprep.subr.bf16.mxu0 %v6650_v1  ;;  %2558 = vmatprep.subr.bf16.mxu1 %v6778_v2  ;;  %v982_v1 = vld [vmem:[#allocation10 + $0x1e8] sm:$0xff] }
 0x17d   :  { %v1106_v2 = vld [vmem:[#allocation10 + $0x5c8] sm:$0xff]  ;;  %v6588_v3 = vcombine.high %v978_v0, %v982_v1  ;;  %v6587_v5 = vcombine.low %v978_v0, %v982_v1 }
 0x17e   :  { %v6715_v6 = vcombine.low %v1106_v2, %v1110_v4  ;;  %v954_v60 = vld [vmem:[#allocation10 + $0x108] sm:$0xff] }
 0x17f   :  { %2516 = vmatpush2.bf16.msra.mxu0 %v6649_v7  ;;  %2559 = vmatpush2.bf16.msra.mxu1 %v6777_v8  ;;  %v6716_v7 = vcombine.high %v1106_v2, %v1110_v4  ;;  %v8454_v8 = vsub.s32 3, %v8443_v38  ;;  %v946_v4 = vld [vmem:[#allocation10 + $0xc8] sm:$0xff] }
 0x180   :  { %2517 = vmatprep.subr.bf16.mxu0 %v6642_v9  ;;  %2560 = vmatprep.subr.bf16.mxu1 %v6770_v10  ;;  %v8457_v9 = vsub.s32 2, %v8443_v38  ;;  %v481_v10 = vld [vmem:[#allocation9] sm:$0xf] }
 0x181   :  { %v490_v13 = vrot.slane %v481_v10, %v8449_v43  ;;  %v498_v14 = vrot.slane %v481_v10, %v8454_v8 }
 0x183   :  { %2518 = vmatpush2.bf16.msra.mxu0 %v6641_v15  ;;  %2561 = vmatpush2.bf16.msra.mxu1 %v6769_v16  ;;  %v486_v15 = vrot.slane %v481_v10, %v8446_v41  ;;  %v494_v16 = vrot.slane %v481_v10, %v8457_v9 }
 0x184   :  { %2519 = vmatprep.subr.bf16.mxu0 %v6634_v17  ;;  %2562 = vmatprep.subr.bf16.mxu1 %v6762_v18 }
 0x187   :  { %2520 = vmatpush2.bf16.msra.mxu0 %v6633_v23  ;;  %2563 = vmatpush2.bf16.msra.mxu1 %v6761_v24 }
 0x188   :  { %2521 = vmatprep.subr.bf16.mxu0 %v6626_v25  ;;  %2564 = vmatprep.subr.bf16.mxu1 %v6754_v26 }
 0x18b   :  { %2522 = vmatpush2.bf16.msra.mxu0 %v6625_v31  ;;  %2565 = vmatpush2.bf16.msra.mxu1 %v6753_v32 }
 0x18c   :  { %2523 = vmatprep.subr.bf16.mxu0 %v6618_v33  ;;  %2566 = vmatprep.subr.bf16.mxu1 %v6746_v34 }
 0x18f   :  { %2524 = vmatpush2.bf16.msra.mxu0 %v6617_v35  ;;  %2567 = vmatpush2.bf16.msra.mxu1 %v6745_v36 }
 0x190   :  { %2525 = vmatprep.subr.bf16.mxu0 %v6610_v42  ;;  %2568 = vmatprep.subr.bf16.mxu1 %v6738_v47  ;;  %v974_v42 = vld [vmem:[#allocation10 + $0x1a8] sm:$0xff] }
 0x191   :  { %v6579_v56 = vcombine.low %v970_v37, %v974_v42 }
 0x193   :  { %2526 = vmatpush2.bf16.msra.mxu0 %v6609_v45  ;;  %2569 = vmatpush2.bf16.msra.mxu1 %v6737_v46  ;;  %v1102_v45 = vld [vmem:[#allocation10 + $0x5a8] sm:$0xff] }
 0x194   :  { %2527 = vmatprep.subr.bf16.mxu0 %v6602_v51  ;;  %2570 = vmatprep.subr.bf16.mxu1 %v6730_v55  ;;  %v6580_v51 = vcombine.high %v970_v37, %v974_v42  ;;  %v6708_v52 = vcombine.high %v1098_v44, %v1102_v45  ;;  %v1094_v55 = vld [vmem:[#allocation10 + $0x568] sm:$0xff]  ;;  %v6707_v57 = vcombine.low %v1098_v44, %v1102_v45 }
 0x195   :  { %v1170_v42 = vld [vmem:[#allocation10 + $0x7c8] sm:$0xff] }
 0x196   :  { %v1174_v44 = vld [vmem:[#allocation10 + $0x7e8] sm:$0xff] }
 0x197   :  { %2528 = vmatpush2.bf16.msra.mxu0 %v6601_v53  ;;  %2571 = vmatpush2.bf16.msra.mxu1 %v6729_v54  ;;  %v966_v53 = vld [vmem:[#allocation10 + $0x168] sm:$0xff] }
 0x198   :  { %2529 = vmatprep.subr.bf16.mxu0 %v6594_v59  ;;  %2572 = vmatprep.subr.bf16.mxu1 %v6722_v63  ;;  %v1090_v54 = vld [vmem:[#allocation10 + $0x548] sm:$0xff]  ;;  %v6572_v58 = vcombine.high %v962_v50, %v966_v53  ;;  %v6571_v0 = vcombine.low %v962_v50, %v966_v53 }
 0x199   :  { %v6700_v59 = vcombine.high %v1090_v54, %v1094_v55  ;;  %v1086_v63 = vld [vmem:[#allocation10 + $0x528] sm:$0xff]  ;;  %v6699_v1 = vcombine.low %v1090_v54, %v1094_v55 }
 0x19a   :  { %v1034_v53 = vld [vmem:[#allocation10 + $0x388] sm:$0xff] }
 0x19b   :  { %2530 = vmatpush2.bf16.msra.mxu0 %v6593_v61  ;;  %2573 = vmatpush2.bf16.msra.mxu1 %v6721_v62  ;;  %v958_v61 = vld [vmem:[#allocation10 + $0x128] sm:$0xff] }
 0x19c   :  { %2585 = vmatprep.subr.bf16.mxu0 %v6588_v3  ;;  %2628 = vmatprep.subr.bf16.mxu1 %v6716_v7  ;;  %v1082_v62 = vld [vmem:[#allocation10 + $0x508] sm:$0xff]  ;;  %v6564_v2 = vcombine.high %v954_v60, %v958_v61  ;;  %v6563_v10 = vcombine.low %v954_v60, %v958_v61 }
 0x19d   :  { %v6692_v3 = vcombine.high %v1082_v62, %v1086_v63  ;;  %v1078_v7 = vld [vmem:[#allocation10 + $0x4e8] sm:$0xff] }
 0x19e   :  { %v1038_v54 = vld [vmem:[#allocation10 + $0x3a8] sm:$0xff] }
 0x19f   :  { %v1162_v55 = vld [vmem:[#allocation10 + $0x788] sm:$0xff] }
 0x1a0   :  { %v1026_v61 = vld [vmem:[#allocation10 + $0x348] sm:$0xff] }
 0x21e   :  { %v857_v11 = vpop.f32.mrf.mxu0  ;;  %v900_v12 = vpop.f32.mrf.mxu1 }
 0x21f   :  { %v858_v25 = vadd.f32 %v857_v11, %v486_v15  ;;  %v901_v26 = vadd.f32 %v900_v12, %v494_v16  ;;  %v6691_v11 = vcombine.low %v1082_v62, %v1086_v63  ;;  %v1030_v62 = vld [vmem:[#allocation10 + $0x368] sm:$0xff] }
 0x220   :  { %v859_v17 = vpop.f32.mrf.mxu0  ;;  %v902_v18 = vpop.f32.mrf.mxu1  ;;  %v1154_v63 = vld [vmem:[#allocation10 + $0x748] sm:$0xff] }
 0x221   :  { %v860_v21 = vadd.f32 %v859_v17, %v490_v13  ;;  %v903_v22 = vadd.f32 %v902_v18, %v498_v14  ;;  %v909_v39 = vmax.f32 %v858_v25, 0.0  ;;  %v911_v40 = vmax.f32 %v901_v26, 0.0  ;;  %v1070_v17 = vld [vmem:[#allocation10 + $0x4a8] sm:$0xff] }
 0x222   :  { %v861_v19 = vpop.f32.mrf.mxu0  ;;  %v904_v20 = vpop.f32.mrf.mxu1  ;;  %v1062_v25 = vld [vmem:[#allocation10 + $0x468] sm:$0xff] }
 0x223   :  { %v862_v23 = vadd.f32 %v861_v19, %v486_v15  ;;  %v905_v24 = vadd.f32 %v904_v20, %v494_v16  ;;  %v910_v33 = vmax.f32 %v860_v21, 0.0  ;;  %v912_v34 = vmax.f32 %v903_v22, 0.0  ;;  %v942_v15 = vld [vmem:[#allocation10 + $0xa8] sm:$0xff] }
 0x224   :  { %v863_v27 = vpop.f32.mrf.mxu0  ;;  %v906_v28 = vpop.f32.mrf.mxu1  ;;  %v1066_v16 = vld [vmem:[#allocation10 + $0x488] sm:$0xff] }
 0x225   :  { %v864_v29 = vadd.f32 %v863_v27, %v490_v13  ;;  %v907_v30 = vadd.f32 %v906_v28, %v498_v14  ;;  %v913_v31 = vmax.f32 %v862_v23, 0.0  ;;  %v915_v32 = vmax.f32 %v905_v24, 0.0  ;;  %v938_v14 = vld [vmem:[#allocation10 + $0x88] sm:$0xff] }
 0x226   :  { %v6548_v20 = vcombine.high %v938_v14, %v942_v15  ;;  %v6676_v21 = vcombine.high %v1066_v16, %v1070_v17  ;;  %v930_v22 = vld [vmem:[#allocation10 + $0x48] sm:$0xff]  ;;  %v6547_v26 = vcombine.low %v938_v14, %v942_v15  ;;  %v6675_v27 = vcombine.low %v1066_v16, %v1070_v17 }
 0x227   :  { %v914_v35 = vmax.f32 %v864_v29, 0.0  ;;  %v916_v36 = vmax.f32 %v907_v30, 0.0  ;;  %v8467_v48 = vpack.c.bf16 %v913_v31, %v909_v39  ;;  %v8469_v49 = vpack.c.bf16 %v915_v32, %v911_v40  ;;  %v934_v23 = vld [vmem:[#allocation10 + $0x68] sm:$0xff] }
 0x228   :  { %v1058_v24 = vld [vmem:[#allocation10 + $0x448] sm:$0xff]  ;;  %v6540_v28 = vcombine.high %v930_v22, %v934_v23 }
 0x229   :  { %v8463_v46 = vpack.c.bf16 %v914_v35, %v910_v33  ;;  %v8465_v47 = vpack.c.bf16 %v916_v36, %v912_v34  ;;  %v6668_v29 = vcombine.high %v1058_v24, %v1062_v25  ;;  %v922_v30 = vld [vmem:[#allocation10 + $0x8] sm:$0xff]  ;;  %v6539_v34 = vcombine.low %v930_v22, %v934_v23 }
 0x22a   :  { %v926_v31 = vld [vmem:[#allocation10 + $0x28] sm:$0xff]  ;;  %v6667_v35 = vcombine.low %v1058_v24, %v1062_v25 }
 0x22b   :  { %2531 = vmatprep.mubr.bf16.mxu0 %v8463_v46  ;;  %2574 = vmatprep.mubr.bf16.mxu1 %v8465_v47  ;;  %v1050_v32 = vld [vmem:[#allocation10 + $0x408] sm:$0xff]  ;;  %v6532_v36 = vcombine.high %v922_v30, %v926_v31  ;;  %v6531_v45 = vcombine.low %v922_v30, %v926_v31 }
 0x22c   :  { %2532 = vmatmul.mubr.bf16.vlgmr.msra.gmra.mxu0 %v8467_v48  ;;  %2575 = vmatmul.mubr.bf16.vlgmr.msra.gmra.mxu1 %v8469_v49  ;;  %v1054_v33 = vld [vmem:[#allocation10 + $0x428] sm:$0xff] }
 0x22d   :  { %2586 = vmatpush1.bf16.msra.mxu0 %v6587_v5  ;;  %2629 = vmatpush1.bf16.msra.mxu1 %v6715_v6  ;;  %v950_v5 = vld [vmem:[#allocation10 + $0xe8] sm:$0xff]  ;;  %v6660_v37 = vcombine.high %v1050_v32, %v1054_v33  ;;  %v6659_v50 = vcombine.low %v1050_v32, %v1054_v33 }
 0x22e   :  { %2617 = vmatprep.mubr.bf16.mxu0 %v8463_v46  ;;  %2660 = vmatprep.mubr.bf16.mxu1 %v8465_v47  ;;  %v1074_v6 = vld [vmem:[#allocation10 + $0x4c8] sm:$0xff]  ;;  %v6556_v12 = vcombine.high %v946_v4, %v950_v5  ;;  %v6555_v18 = vcombine.low %v946_v4, %v950_v5 }
 0x22f   :  { %2587 = vmatprep.subr.bf16.mxu0 %v6580_v51  ;;  %2630 = vmatprep.subr.bf16.mxu1 %v6708_v52  ;;  %v6684_v13 = vcombine.high %v1074_v6, %v1078_v7  ;;  %v6683_v19 = vcombine.low %v1074_v6, %v1078_v7  ;;  %v1042_v39 = vld [vmem:[#allocation10 + $0x3c8] sm:$0xff]  ;;  %v6780_v52 = vcombine.high %v1170_v42, %v1174_v44 }
 0x230   :  { %v1046_v40 = vld [vmem:[#allocation10 + $0x3e8] sm:$0xff] }
 0x231   :  { %2588 = vmatpush1.bf16.msra.mxu0 %v6579_v56  ;;  %2631 = vmatpush1.bf16.msra.mxu1 %v6707_v57  ;;  %v6652_v51 = vcombine.high %v1042_v39, %v1046_v40  ;;  %v1166_v56 = vld [vmem:[#allocation10 + $0x7a8] sm:$0xff]  ;;  %v6651_v57 = vcombine.low %v1042_v39, %v1046_v40 }
 0x232   :  { %2589 = vmatprep.subr.bf16.mxu0 %v6572_v58  ;;  %2632 = vmatprep.subr.bf16.mxu1 %v6700_v59  ;;  %v6779_v58 = vcombine.low %v1170_v42, %v1174_v44  ;;  %v6644_v59 = vcombine.high %v1034_v53, %v1038_v54  ;;  %v6772_v60 = vcombine.high %v1162_v55, %v1166_v56  ;;  %v1018_v5 = vld [vmem:[#allocation10 + $0x308] sm:$0xff] }
 0x233   :  { %v1022_v6 = vld [vmem:[#allocation10 + $0x328] sm:$0xff] }
 0x234   :  { %v1146_v7 = vld [vmem:[#allocation10 + $0x708] sm:$0xff] }
 0x235   :  { %2590 = vmatpush1.bf16.msra.mxu0 %v6571_v0  ;;  %2633 = vmatpush1.bf16.msra.mxu1 %v6699_v1  ;;  %v1158_v0 = vld [vmem:[#allocation10 + $0x768] sm:$0xff]  ;;  %v6643_v1 = vcombine.low %v1034_v53, %v1038_v54  ;;  %v979_v54 = vld [vmem:[#allocation10 + $0x1d0] sm:$0xff] }
 0x236   :  { %2591 = vmatprep.subr.bf16.mxu0 %v6564_v2  ;;  %2634 = vmatprep.subr.bf16.mxu1 %v6692_v3  ;;  %v6771_v2 = vcombine.low %v1162_v55, %v1166_v56  ;;  %v6636_v3 = vcombine.high %v1026_v61, %v1030_v62  ;;  %v6764_v4 = vcombine.high %v1154_v63, %v1158_v0  ;;  %v1010_v15 = vld [vmem:[#allocation10 + $0x2c8] sm:$0xff]  ;;  %v983_v55 = vld [vmem:[#allocation10 + $0x1f0] sm:$0xff] }
 0x237   :  { %v1014_v16 = vld [vmem:[#allocation10 + $0x2e8] sm:$0xff]  ;;  %v1107_v56 = vld [vmem:[#allocation10 + $0x5d0] sm:$0xff] }
 0x238   :  { %v1138_v17 = vld [vmem:[#allocation10 + $0x6c8] sm:$0xff] }
 0x239   :  { %2592 = vmatpush1.bf16.msra.mxu0 %v6563_v10  ;;  %2635 = vmatpush1.bf16.msra.mxu1 %v6691_v11  ;;  %v1150_v10 = vld [vmem:[#allocation10 + $0x728] sm:$0xff]  ;;  %v6635_v11 = vcombine.low %v1026_v61, %v1030_v62  ;;  %v971_v62 = vld [vmem:[#allocation10 + $0x190] sm:$0xff] }
 0x23a   :  { %2593 = vmatprep.subr.bf16.mxu0 %v6556_v12  ;;  %2636 = vmatprep.subr.bf16.mxu1 %v6684_v13  ;;  %v6763_v12 = vcombine.low %v1154_v63, %v1158_v0  ;;  %v6628_v13 = vcombine.high %v1018_v5, %v1022_v6  ;;  %v6756_v14 = vcombine.high %v1146_v7, %v1150_v10  ;;  %v1002_v23 = vld [vmem:[#allocation10 + $0x288] sm:$0xff]  ;;  %v975_v63 = vld [vmem:[#allocation10 + $0x1b0] sm:$0xff] }
 0x23b   :  { %v1006_v24 = vld [vmem:[#allocation10 + $0x2a8] sm:$0xff]  ;;  %v1099_v0 = vld [vmem:[#allocation10 + $0x590] sm:$0xff] }
 0x23c   :  { %v1130_v25 = vld [vmem:[#allocation10 + $0x688] sm:$0xff] }
 0x23d   :  { %2594 = vmatpush1.bf16.msra.mxu0 %v6555_v18  ;;  %2637 = vmatpush1.bf16.msra.mxu1 %v6683_v19  ;;  %v1142_v18 = vld [vmem:[#allocation10 + $0x6e8] sm:$0xff]  ;;  %v6627_v19 = vcombine.low %v1018_v5, %v1022_v6  ;;  %v963_v6 = vld [vmem:[#allocation10 + $0x150] sm:$0xff] }
 0x23e   :  { %2595 = vmatprep.subr.bf16.mxu0 %v6548_v20  ;;  %2638 = vmatprep.subr.bf16.mxu1 %v6676_v21  ;;  %v6755_v20 = vcombine.low %v1146_v7, %v1150_v10  ;;  %v6620_v21 = vcombine.high %v1010_v15, %v1014_v16  ;;  %v6748_v22 = vcombine.high %v1138_v17, %v1142_v18  ;;  %v994_v31 = vld [vmem:[#allocation10 + $0x248] sm:$0xff]  ;;  %v967_v7 = vld [vmem:[#allocation10 + $0x170] sm:$0xff] }
 0x23f   :  { %v998_v32 = vld [vmem:[#allocation10 + $0x268] sm:$0xff]  ;;  %v1091_v10 = vld [vmem:[#allocation10 + $0x550] sm:$0xff] }
 0x240   :  { %v1122_v33 = vld [vmem:[#allocation10 + $0x648] sm:$0xff] }
 0x241   :  { %2596 = vmatpush1.bf16.msra.mxu0 %v6547_v26  ;;  %2639 = vmatpush1.bf16.msra.mxu1 %v6675_v27  ;;  %v1134_v26 = vld [vmem:[#allocation10 + $0x6a8] sm:$0xff]  ;;  %v6619_v27 = vcombine.low %v1010_v15, %v1014_v16  ;;  %v955_v16 = vld [vmem:[#allocation10 + $0x110] sm:$0xff] }
 0x242   :  { %2597 = vmatprep.subr.bf16.mxu0 %v6540_v28  ;;  %2640 = vmatprep.subr.bf16.mxu1 %v6668_v29  ;;  %v6747_v28 = vcombine.low %v1138_v17, %v1142_v18  ;;  %v6612_v29 = vcombine.high %v1002_v23, %v1006_v24  ;;  %v6740_v30 = vcombine.high %v1130_v25, %v1134_v26  ;;  %v986_v40 = vld [vmem:[#allocation10 + $0x208] sm:$0xff]  ;;  %v959_v17 = vld [vmem:[#allocation10 + $0x130] sm:$0xff] }
 0x243   :  { %v990_v42 = vld [vmem:[#allocation10 + $0x228] sm:$0xff]  ;;  %v1083_v18 = vld [vmem:[#allocation10 + $0x510] sm:$0xff] }
 0x244   :  { %v1114_v44 = vld [vmem:[#allocation10 + $0x608] sm:$0xff] }
 0x245   :  { %2598 = vmatpush1.bf16.msra.mxu0 %v6539_v34  ;;  %2641 = vmatpush1.bf16.msra.mxu1 %v6667_v35  ;;  %v1126_v34 = vld [vmem:[#allocation10 + $0x668] sm:$0xff]  ;;  %v6611_v35 = vcombine.low %v1002_v23, %v1006_v24  ;;  %v947_v24 = vld [vmem:[#allocation10 + $0xd0] sm:$0xff] }
 0x246   :  { %2599 = vmatprep.subr.bf16.mxu0 %v6532_v36  ;;  %2642 = vmatprep.subr.bf16.mxu1 %v6660_v37  ;;  %v6739_v36 = vcombine.low %v1130_v25, %v1134_v26  ;;  %v6604_v37 = vcombine.high %v994_v31, %v998_v32  ;;  %v6732_v39 = vcombine.high %v1122_v33, %v1126_v34  ;;  %v951_v25 = vld [vmem:[#allocation10 + $0xf0] sm:$0xff] }
 0x247   :  { %v1075_v26 = vld [vmem:[#allocation10 + $0x4d0] sm:$0xff] }
 0x249   :  { %2600 = vmatpush1.bf16.msra.mxu0 %v6531_v45  ;;  %2643 = vmatpush1.bf16.msra.mxu1 %v6659_v50  ;;  %v1118_v45 = vld [vmem:[#allocation10 + $0x628] sm:$0xff]  ;;  %v6603_v50 = vcombine.low %v994_v31, %v998_v32  ;;  %v939_v32 = vld [vmem:[#allocation10 + $0x90] sm:$0xff] }
 0x24a   :  { %2601 = vmatprep.subr.bf16.mxu0 %v6652_v51  ;;  %2644 = vmatprep.subr.bf16.mxu1 %v6780_v52  ;;  %v6731_v51 = vcombine.low %v1122_v33, %v1126_v34  ;;  %v6596_v52 = vcombine.high %v986_v40, %v990_v42  ;;  %v6724_v53 = vcombine.high %v1114_v44, %v1118_v45  ;;  %v943_v33 = vld [vmem:[#allocation10 + $0xb0] sm:$0xff] }
 0x24b   :  { %v1067_v34 = vld [vmem:[#allocation10 + $0x490] sm:$0xff] }
 0x24d   :  { %2602 = vmatpush2.bf16.msra.mxu0 %v6651_v57  ;;  %2645 = vmatpush2.bf16.msra.mxu1 %v6779_v58  ;;  %v1111_v57 = vld [vmem:[#allocation10 + $0x5f0] sm:$0xff]  ;;  %v6595_v58 = vcombine.low %v986_v40, %v990_v42 }
 0x24e   :  { %2603 = vmatprep.subr.bf16.mxu0 %v6644_v59  ;;  %2646 = vmatprep.subr.bf16.mxu1 %v6772_v60  ;;  %v6723_v59 = vcombine.low %v1114_v44, %v1118_v45  ;;  %v6590_v60 = vcombine.high %v979_v54, %v983_v55  ;;  %v6718_v61 = vcombine.high %v1107_v56, %v1111_v57  ;;  %v931_v42 = vld [vmem:[#allocation10 + $0x50] sm:$0xff] }
 0x24f   :  { %v935_v44 = vld [vmem:[#allocation10 + $0x70] sm:$0xff] }
 0x250   :  { %v1059_v45 = vld [vmem:[#allocation10 + $0x450] sm:$0xff] }
 0x251   :  { %2604 = vmatpush2.bf16.msra.mxu0 %v6643_v1  ;;  %2647 = vmatpush2.bf16.msra.mxu1 %v6771_v2  ;;  %v1103_v1 = vld [vmem:[#allocation10 + $0x5b0] sm:$0xff]  ;;  %v6589_v2 = vcombine.low %v979_v54, %v983_v55 }
 0x252   :  { %2605 = vmatprep.subr.bf16.mxu0 %v6636_v3  ;;  %2648 = vmatprep.subr.bf16.mxu1 %v6764_v4  ;;  %v6717_v3 = vcombine.low %v1107_v56, %v1111_v57  ;;  %v6582_v4 = vcombine.high %v971_v62, %v975_v63  ;;  %v6710_v5 = vcombine.high %v1099_v0, %v1103_v1  ;;  %v923_v55 = vld [vmem:[#allocation10 + $0x10] sm:$0xff] }
 0x253   :  { %v927_v56 = vld [vmem:[#allocation10 + $0x30] sm:$0xff] }
 0x254   :  { %v1051_v57 = vld [vmem:[#allocation10 + $0x410] sm:$0xff] }
 0x255   :  { %2606 = vmatpush2.bf16.msra.mxu0 %v6635_v11  ;;  %2649 = vmatpush2.bf16.msra.mxu1 %v6763_v12  ;;  %v1095_v11 = vld [vmem:[#allocation10 + $0x570] sm:$0xff]  ;;  %v6581_v12 = vcombine.low %v971_v62, %v975_v63 }
 0x256   :  { %2607 = vmatprep.subr.bf16.mxu0 %v6628_v13  ;;  %2650 = vmatprep.subr.bf16.mxu1 %v6756_v14  ;;  %v6709_v13 = vcombine.low %v1099_v0, %v1103_v1  ;;  %v6574_v14 = vcombine.high %v963_v6, %v967_v7  ;;  %v6702_v15 = vcombine.high %v1091_v10, %v1095_v11  ;;  %v1043_v63 = vld [vmem:[#allocation10 + $0x3d0] sm:$0xff] }
 0x257   :  { %v1047_v0 = vld [vmem:[#allocation10 + $0x3f0] sm:$0xff] }
 0x258   :  { %v1171_v1 = vld [vmem:[#allocation10 + $0x7d0] sm:$0xff] }
 0x259   :  { %2608 = vmatpush2.bf16.msra.mxu0 %v6627_v19  ;;  %2651 = vmatpush2.bf16.msra.mxu1 %v6755_v20  ;;  %v1087_v19 = vld [vmem:[#allocation10 + $0x530] sm:$0xff]  ;;  %v6573_v20 = vcombine.low %v963_v6, %v967_v7 }
 0x25a   :  { %2609 = vmatprep.subr.bf16.mxu0 %v6620_v21  ;;  %2652 = vmatprep.subr.bf16.mxu1 %v6748_v22  ;;  %v6701_v21 = vcombine.low %v1091_v10, %v1095_v11  ;;  %v6566_v22 = vcombine.high %v955_v16, %v959_v17  ;;  %v6694_v23 = vcombine.high %v1083_v18, %v1087_v19  ;;  %v1035_v7 = vld [vmem:[#allocation10 + $0x390] sm:$0xff] }
 0x25b   :  { %v1039_v10 = vld [vmem:[#allocation10 + $0x3b0] sm:$0xff] }
 0x25c   :  { %v1163_v11 = vld [vmem:[#allocation10 + $0x790] sm:$0xff] }
 0x25d   :  { %2610 = vmatpush2.bf16.msra.mxu0 %v6619_v27  ;;  %2653 = vmatpush2.bf16.msra.mxu1 %v6747_v28  ;;  %v1079_v27 = vld [vmem:[#allocation10 + $0x4f0] sm:$0xff]  ;;  %v6565_v28 = vcombine.low %v955_v16, %v959_v17 }
 0x25e   :  { %2611 = vmatprep.subr.bf16.mxu0 %v6612_v29  ;;  %2654 = vmatprep.subr.bf16.mxu1 %v6740_v30  ;;  %v6693_v29 = vcombine.low %v1083_v18, %v1087_v19  ;;  %v6558_v30 = vcombine.high %v947_v24, %v951_v25  ;;  %v6686_v31 = vcombine.high %v1075_v26, %v1079_v27  ;;  %v1027_v17 = vld [vmem:[#allocation10 + $0x350] sm:$0xff] }
 0x25f   :  { %v1031_v18 = vld [vmem:[#allocation10 + $0x370] sm:$0xff] }
 0x260   :  { %v1155_v19 = vld [vmem:[#allocation10 + $0x750] sm:$0xff] }
 0x261   :  { %2612 = vmatpush2.bf16.msra.mxu0 %v6611_v35  ;;  %2655 = vmatpush2.bf16.msra.mxu1 %v6739_v36  ;;  %v1071_v35 = vld [vmem:[#allocation10 + $0x4b0] sm:$0xff]  ;;  %v6557_v36 = vcombine.low %v947_v24, %v951_v25 }
 0x262   :  { %2613 = vmatprep.subr.bf16.mxu0 %v6604_v37  ;;  %2656 = vmatprep.subr.bf16.mxu1 %v6732_v39  ;;  %v6685_v37 = vcombine.low %v1075_v26, %v1079_v27  ;;  %v6550_v39 = vcombine.high %v939_v32, %v943_v33  ;;  %v6678_v40 = vcombine.high %v1067_v34, %v1071_v35  ;;  %v1019_v25 = vld [vmem:[#allocation10 + $0x310] sm:$0xff] }
 0x263   :  { %v1023_v26 = vld [vmem:[#allocation10 + $0x330] sm:$0xff] }
 0x264   :  { %v1147_v27 = vld [vmem:[#allocation10 + $0x710] sm:$0xff] }
 0x265   :  { %2614 = vmatpush2.bf16.msra.mxu0 %v6603_v50  ;;  %2657 = vmatpush2.bf16.msra.mxu1 %v6731_v51  ;;  %v1063_v50 = vld [vmem:[#allocation10 + $0x470] sm:$0xff]  ;;  %v6549_v51 = vcombine.low %v939_v32, %v943_v33 }
 0x266   :  { %2615 = vmatprep.subr.bf16.mxu0 %v6596_v52  ;;  %2658 = vmatprep.subr.bf16.mxu1 %v6724_v53  ;;  %v6677_v52 = vcombine.low %v1067_v34, %v1071_v35  ;;  %v6542_v53 = vcombine.high %v931_v42, %v935_v44  ;;  %v6670_v54 = vcombine.high %v1059_v45, %v1063_v50  ;;  %v1011_v33 = vld [vmem:[#allocation10 + $0x2d0] sm:$0xff] }
 0x267   :  { %v1015_v34 = vld [vmem:[#allocation10 + $0x2f0] sm:$0xff] }
 0x268   :  { %v1139_v35 = vld [vmem:[#allocation10 + $0x6d0] sm:$0xff] }
 0x269   :  { %2616 = vmatpush2.bf16.msra.mxu0 %v6595_v58  ;;  %2659 = vmatpush2.bf16.msra.mxu1 %v6723_v59  ;;  %v1055_v58 = vld [vmem:[#allocation10 + $0x430] sm:$0xff]  ;;  %v6541_v59 = vcombine.low %v931_v42, %v935_v44 }
 0x26a   :  { %2671 = vmatprep.subr.bf16.mxu0 %v6590_v60  ;;  %2714 = vmatprep.subr.bf16.mxu1 %v6718_v61  ;;  %v6669_v60 = vcombine.low %v1059_v45, %v1063_v50  ;;  %v6534_v61 = vcombine.high %v923_v55, %v927_v56  ;;  %v6662_v62 = vcombine.high %v1051_v57, %v1055_v58  ;;  %v1003_v44 = vld [vmem:[#allocation10 + $0x290] sm:$0xff] }
 0x26b   :  { %v1007_v45 = vld [vmem:[#allocation10 + $0x2b0] sm:$0xff] }
 0x26c   :  { %2618 = vmatmul.mubr.bf16.vlgmr.msra.gmra.mxu0 %v8467_v48  ;;  %2661 = vmatmul.mubr.bf16.vlgmr.msra.gmra.mxu1 %v8469_v49  ;;  %v1131_v50 = vld [vmem:[#allocation10 + $0x690] sm:$0xff] }
 0x26d   :  { %2672 = vmatpush1.bf16.msra.mxu0 %v6589_v2  ;;  %2703 = vmatprep.mubr.bf16.mxu0 %v8463_v46  ;;  %v1175_v2 = vld [vmem:[#allocation10 + $0x7f0] sm:$0xff] }
 0x26e   :  { %2715 = vmatpush1.bf16.msra.mxu1 %v6717_v3  ;;  %2746 = vmatprep.mubr.bf16.mxu1 %v8465_v47  ;;  %v6533_v3 = vcombine.low %v923_v55, %v927_v56  ;;  %v6782_v6 = vcombine.high %v1171_v1, %v1175_v2  ;;  %v995_v56 = vld [vmem:[#allocation10 + $0x250] sm:$0xff] }
 0x26f   :  { %2673 = vmatprep.subr.bf16.mxu0 %v6582_v4  ;;  %2716 = vmatprep.subr.bf16.mxu1 %v6710_v5  ;;  %v6661_v4 = vcombine.low %v1051_v57, %v1055_v58  ;;  %v6654_v5 = vcombine.high %v1043_v63, %v1047_v0  ;;  %v999_v57 = vld [vmem:[#allocation10 + $0x270] sm:$0xff] }
 0x270   :  { %v1123_v58 = vld [vmem:[#allocation10 + $0x650] sm:$0xff] }
 0x271   :  { %2674 = vmatpush1.bf16.msra.mxu0 %v6581_v12  ;;  %v1167_v12 = vld [vmem:[#allocation10 + $0x7b0] sm:$0xff] }
 0x272   :  { %2717 = vmatpush1.bf16.msra.mxu1 %v6709_v13  ;;  %2675 = vmatprep.subr.bf16.mxu0 %v6574_v14  ;;  %v6653_v13 = vcombine.low %v1043_v63, %v1047_v0  ;;  %v6781_v14 = vcombine.low %v1171_v1, %v1175_v2  ;;  %v6774_v16 = vcombine.high %v1163_v11, %v1167_v12  ;;  %v987_v0 = vld [vmem:[#allocation10 + $0x210] sm:$0xff] }
 0x273   :  { %2718 = vmatprep.subr.bf16.mxu1 %v6702_v15  ;;  %v6646_v15 = vcombine.high %v1035_v7, %v1039_v10  ;;  %v991_v1 = vld [vmem:[#allocation10 + $0x230] sm:$0xff] }
 0x274   :  { %v1115_v2 = vld [vmem:[#allocation10 + $0x610] sm:$0xff] }
 0x275   :  { %2676 = vmatpush1.bf16.msra.mxu0 %v6573_v20  ;;  %v1159_v20 = vld [vmem:[#allocation10 + $0x770] sm:$0xff] }
 0x276   :  { %2719 = vmatpush1.bf16.msra.mxu1 %v6701_v21  ;;  %2677 = vmatprep.subr.bf16.mxu0 %v6566_v22  ;;  %v6645_v21 = vcombine.low %v1035_v7, %v1039_v10  ;;  %v6773_v22 = vcombine.low %v1163_v11, %v1167_v12  ;;  %v6766_v24 = vcombine.high %v1155_v19, %v1159_v20  ;;  %v980_v10 = vld [vmem:[#allocation10 + $0x1d8] sm:$0xff] }
 0x277   :  { %2720 = vmatprep.subr.bf16.mxu1 %v6694_v23  ;;  %v6638_v23 = vcombine.high %v1027_v17, %v1031_v18  ;;  %v984_v11 = vld [vmem:[#allocation10 + $0x1f8] sm:$0xff] }
 0x278   :  { %v1108_v12 = vld [vmem:[#allocation10 + $0x5d8] sm:$0xff] }
 0x279   :  { %2678 = vmatpush1.bf16.msra.mxu0 %v6565_v28  ;;  %v1151_v28 = vld [vmem:[#allocation10 + $0x730] sm:$0xff] }
 0x27a   :  { %2721 = vmatpush1.bf16.msra.mxu1 %v6693_v29  ;;  %2679 = vmatprep.subr.bf16.mxu0 %v6558_v30  ;;  %v6637_v29 = vcombine.low %v1027_v17, %v1031_v18  ;;  %v6765_v30 = vcombine.low %v1155_v19, %v1159_v20  ;;  %v6758_v32 = vcombine.high %v1147_v27, %v1151_v28  ;;  %v972_v18 = vld [vmem:[#allocation10 + $0x198] sm:$0xff] }
 0x27b   :  { %2722 = vmatprep.subr.bf16.mxu1 %v6686_v31  ;;  %v6630_v31 = vcombine.high %v1019_v25, %v1023_v26  ;;  %v976_v19 = vld [vmem:[#allocation10 + $0x1b8] sm:$0xff]  ;;  %v6591_v20 = vcombine.low %v980_v10, %v984_v11 }
 0x27d   :  { %2680 = vmatpush1.bf16.msra.mxu0 %v6557_v36  ;;  %v1143_v36 = vld [vmem:[#allocation10 + $0x6f0] sm:$0xff] }
 0x27e   :  { %2723 = vmatpush1.bf16.msra.mxu1 %v6685_v37  ;;  %2681 = vmatprep.subr.bf16.mxu0 %v6550_v39  ;;  %v6629_v37 = vcombine.low %v1019_v25, %v1023_v26  ;;  %v6757_v39 = vcombine.low %v1147_v27, %v1151_v28  ;;  %v6750_v42 = vcombine.high %v1139_v35, %v1143_v36  ;;  %v964_v25 = vld [vmem:[#allocation10 + $0x158] sm:$0xff] }
 0x27f   :  { %2724 = vmatprep.subr.bf16.mxu1 %v6678_v40  ;;  %v6622_v40 = vcombine.high %v1011_v33, %v1015_v34  ;;  %v968_v26 = vld [vmem:[#allocation10 + $0x178] sm:$0xff] }
 0x280   :  { %v1092_v28 = vld [vmem:[#allocation10 + $0x558] sm:$0xff] }
 0x281   :  { %2682 = vmatpush1.bf16.msra.mxu0 %v6549_v51  ;;  %v1135_v51 = vld [vmem:[#allocation10 + $0x6b0] sm:$0xff] }
 0x282   :  { %2725 = vmatpush1.bf16.msra.mxu1 %v6677_v52  ;;  %2683 = vmatprep.subr.bf16.mxu0 %v6542_v53  ;;  %v6621_v52 = vcombine.low %v1011_v33, %v1015_v34  ;;  %v6749_v53 = vcombine.low %v1139_v35, %v1143_v36  ;;  %v6742_v55 = vcombine.high %v1131_v50, %v1135_v51  ;;  %v956_v34 = vld [vmem:[#allocation10 + $0x118] sm:$0xff] }
 0x283   :  { %2726 = vmatprep.subr.bf16.mxu1 %v6670_v54  ;;  %v6614_v54 = vcombine.high %v1003_v44, %v1007_v45  ;;  %v960_v35 = vld [vmem:[#allocation10 + $0x138] sm:$0xff] }
 0x284   :  { %v1084_v36 = vld [vmem:[#allocation10 + $0x518] sm:$0xff] }
 0x285   :  { %2684 = vmatpush1.bf16.msra.mxu0 %v6541_v59  ;;  %v1127_v59 = vld [vmem:[#allocation10 + $0x670] sm:$0xff] }
 0x286   :  { %2727 = vmatpush1.bf16.msra.mxu1 %v6669_v60  ;;  %2685 = vmatprep.subr.bf16.mxu0 %v6534_v61  ;;  %v6613_v60 = vcombine.low %v1003_v44, %v1007_v45  ;;  %v6741_v61 = vcombine.low %v1131_v50, %v1135_v51  ;;  %v6734_v63 = vcombine.high %v1123_v58, %v1127_v59  ;;  %v948_v44 = vld [vmem:[#allocation10 + $0xd8] sm:$0xff] }
 0x287   :  { %2728 = vmatprep.subr.bf16.mxu1 %v6662_v62  ;;  %v6606_v62 = vcombine.high %v995_v56, %v999_v57  ;;  %v952_v45 = vld [vmem:[#allocation10 + $0xf8] sm:$0xff] }
 0x288   :  { %v1076_v50 = vld [vmem:[#allocation10 + $0x4d8] sm:$0xff] }
 0x289   :  { %2686 = vmatpush1.bf16.msra.mxu0 %v6533_v3  ;;  %v1119_v3 = vld [vmem:[#allocation10 + $0x630] sm:$0xff]  ;;  %v1080_v51 = vld [vmem:[#allocation10 + $0x4f8] sm:$0xff] }
 0x28a   :  { %2729 = vmatpush1.bf16.msra.mxu1 %v6661_v4  ;;  %2687 = vmatprep.subr.bf16.mxu0 %v6654_v5  ;;  %v6605_v4 = vcombine.low %v995_v56, %v999_v57  ;;  %v6733_v5 = vcombine.low %v1123_v58, %v1127_v59  ;;  %v6726_v7 = vcombine.high %v1115_v2, %v1119_v3  ;;  %v944_v56 = vld [vmem:[#allocation10 + $0xb8] sm:$0xff] }
 0x28b   :  { %2730 = vmatprep.subr.bf16.mxu1 %v6782_v6  ;;  %v6598_v6 = vcombine.high %v987_v0, %v991_v1  ;;  %v1068_v57 = vld [vmem:[#allocation10 + $0x498] sm:$0xff]  ;;  %v6559_v59 = vcombine.low %v948_v44, %v952_v45 }
 0x28c   :  { %v1072_v58 = vld [vmem:[#allocation10 + $0x4b8] sm:$0xff] }
 0x28d   :  { %2688 = vmatpush2.bf16.msra.mxu0 %v6653_v13  ;;  %v1112_v13 = vld [vmem:[#allocation10 + $0x5f8] sm:$0xff] }
 0x28e   :  { %2731 = vmatpush2.bf16.msra.mxu1 %v6781_v14  ;;  %2689 = vmatprep.subr.bf16.mxu0 %v6646_v15  ;;  %v6597_v14 = vcombine.low %v987_v0, %v991_v1  ;;  %v6725_v15 = vcombine.low %v1115_v2, %v1119_v3  ;;  %v6720_v17 = vcombine.high %v1108_v12, %v1112_v13  ;;  %v936_v0 = vld [vmem:[#allocation10 + $0x78] sm:$0xff] }
 0x28f   :  { %2732 = vmatprep.subr.bf16.mxu1 %v6774_v16  ;;  %v6592_v16 = vcombine.high %v980_v10, %v984_v11  ;;  %v1060_v1 = vld [vmem:[#allocation10 + $0x458] sm:$0xff] }
 0x290   :  { %v1064_v2 = vld [vmem:[#allocation10 + $0x478] sm:$0xff] }
 0x291   :  { %2690 = vmatpush2.bf16.msra.mxu0 %v6645_v21  ;;  %v1100_v21 = vld [vmem:[#allocation10 + $0x598] sm:$0xff] }
 0x292   :  { %2733 = vmatpush2.bf16.msra.mxu1 %v6773_v22  ;;  %2691 = vmatprep.subr.bf16.mxu0 %v6638_v23  ;;  %v1104_v22 = vld [vmem:[#allocation10 + $0x5b8] sm:$0xff]  ;;  %v6719_v23 = vcombine.low %v1108_v12, %v1112_v13 }
 0x293   :  { %2734 = vmatprep.subr.bf16.mxu1 %v6766_v24  ;;  %v6584_v24 = vcombine.high %v972_v18, %v976_v19  ;;  %v6712_v27 = vcombine.high %v1100_v21, %v1104_v22  ;;  %v928_v10 = vld [vmem:[#allocation10 + $0x38] sm:$0xff] }
 0x294   :  { %v1052_v11 = vld [vmem:[#allocation10 + $0x418] sm:$0xff] }
 0x295   :  { %2692 = vmatpush2.bf16.msra.mxu0 %v6637_v29  ;;  %v1096_v29 = vld [vmem:[#allocation10 + $0x578] sm:$0xff] }
 0x296   :  { %2735 = vmatpush2.bf16.msra.mxu1 %v6765_v30  ;;  %2693 = vmatprep.subr.bf16.mxu0 %v6630_v31  ;;  %v6583_v30 = vcombine.low %v972_v18, %v976_v19  ;;  %v6711_v31 = vcombine.low %v1100_v21, %v1104_v22  ;;  %v6704_v33 = vcombine.high %v1092_v28, %v1096_v29  ;;  %v1056_v12 = vld [vmem:[#allocation10 + $0x438] sm:$0xff] }
 0x297   :  { %2736 = vmatprep.subr.bf16.mxu1 %v6758_v32  ;;  %v6576_v32 = vcombine.high %v964_v25, %v968_v26  ;;  %v1048_v18 = vld [vmem:[#allocation10 + $0x3f8] sm:$0xff]  ;;  %v6663_v22 = vcombine.low %v1052_v11, %v1056_v12 }
 0x298   :  { %v1172_v19 = vld [vmem:[#allocation10 + $0x7d8] sm:$0xff] }
 0x299   :  { %2694 = vmatpush2.bf16.msra.mxu0 %v6629_v37  ;;  %v1088_v37 = vld [vmem:[#allocation10 + $0x538] sm:$0xff] }
 0x29a   :  { %2737 = vmatpush2.bf16.msra.mxu1 %v6757_v39  ;;  %2695 = vmatprep.subr.bf16.mxu0 %v6622_v40  ;;  %v6575_v39 = vcombine.low %v964_v25, %v968_v26  ;;  %v6703_v40 = vcombine.low %v1092_v28, %v1096_v29  ;;  %v1036_v25 = vld [vmem:[#allocation10 + $0x398] sm:$0xff] }
 0x29b   :  { %2738 = vmatprep.subr.bf16.mxu1 %v6750_v42  ;;  %v6568_v42 = vcombine.high %v956_v34, %v960_v35  ;;  %v1040_v26 = vld [vmem:[#allocation10 + $0x3b8] sm:$0xff] }
 0x29c   :  { %v1168_v28 = vld [vmem:[#allocation10 + $0x7b8] sm:$0xff] }
 0x29d   :  { %2696 = vmatpush2.bf16.msra.mxu0 %v6621_v52  ;;  %v6695_v52 = vcombine.low %v1084_v36, %v1088_v37 }
 0x29e   :  { %2739 = vmatpush2.bf16.msra.mxu1 %v6749_v53  ;;  %2697 = vmatprep.subr.bf16.mxu0 %v6614_v54  ;;  %v6560_v53 = vcombine.high %v948_v44, %v952_v45  ;;  %v6688_v54 = vcombine.high %v1076_v50, %v1080_v51  ;;  %v1024_v44 = vld [vmem:[#allocation10 + $0x338] sm:$0xff] }
 0x29f   :  { %2740 = vmatprep.subr.bf16.mxu1 %v6742_v55  ;;  %v940_v55 = vld [vmem:[#allocation10 + $0x98] sm:$0xff] }
 0x2a0   :  { %v6551_v3 = vcombine.low %v940_v55, %v944_v56  ;;  %v1148_v45 = vld [vmem:[#allocation10 + $0x718] sm:$0xff] }
 0x2a1   :  { %2698 = vmatpush2.bf16.msra.mxu0 %v6613_v60  ;;  %v6687_v60 = vcombine.low %v1076_v50, %v1080_v51  ;;  %v1152_v50 = vld [vmem:[#allocation10 + $0x738] sm:$0xff] }
 0x2a2   :  { %2741 = vmatpush2.bf16.msra.mxu1 %v6741_v61  ;;  %2699 = vmatprep.subr.bf16.mxu0 %v6606_v62  ;;  %v6552_v61 = vcombine.high %v940_v55, %v944_v56  ;;  %v6680_v62 = vcombine.high %v1068_v57, %v1072_v58  ;;  %v1016_v55 = vld [vmem:[#allocation10 + $0x2f8] sm:$0xff] }
 0x2a3   :  { %2742 = vmatprep.subr.bf16.mxu1 %v6734_v63  ;;  %v932_v63 = vld [vmem:[#allocation10 + $0x58] sm:$0xff] }
 0x2a4   :  { %v6543_v13 = vcombine.low %v932_v63, %v936_v0  ;;  %v1140_v56 = vld [vmem:[#allocation10 + $0x6d8] sm:$0xff] }
 0x2a5   :  { %2700 = vmatpush2.bf16.msra.mxu0 %v6605_v4  ;;  %v6679_v4 = vcombine.low %v1068_v57, %v1072_v58  ;;  %v1144_v57 = vld [vmem:[#allocation10 + $0x6f8] sm:$0xff] }
 0x2a6   :  { %2743 = vmatpush2.bf16.msra.mxu1 %v6733_v5  ;;  %2701 = vmatprep.subr.bf16.mxu0 %v6598_v6  ;;  %v6544_v5 = vcombine.high %v932_v63, %v936_v0  ;;  %v6672_v6 = vcombine.high %v1060_v1, %v1064_v2  ;;  %v1008_v63 = vld [vmem:[#allocation10 + $0x2b8] sm:$0xff] }
 0x2a7   :  { %2744 = vmatprep.subr.bf16.mxu1 %v6726_v7  ;;  %v924_v7 = vld [vmem:[#allocation10 + $0x18] sm:$0xff] }
 0x2a8   :  { %v6535_v21 = vcombine.low %v924_v7, %v928_v10  ;;  %v1132_v0 = vld [vmem:[#allocation10 + $0x698] sm:$0xff] }
 0x2a9   :  { %2702 = vmatpush2.bf16.msra.mxu0 %v6597_v14  ;;  %v6671_v14 = vcombine.low %v1060_v1, %v1064_v2  ;;  %v1136_v1 = vld [vmem:[#allocation10 + $0x6b8] sm:$0xff] }
 0x2aa   :  { %2745 = vmatpush2.bf16.msra.mxu1 %v6725_v15  ;;  %2757 = vmatprep.subr.bf16.mxu0 %v6592_v16  ;;  %v6536_v15 = vcombine.high %v924_v7, %v928_v10  ;;  %v6664_v16 = vcombine.high %v1052_v11, %v1056_v12  ;;  %v1000_v7 = vld [vmem:[#allocation10 + $0x278] sm:$0xff] }
 0x2ab   :  { %2800 = vmatprep.subr.bf16.mxu1 %v6720_v17  ;;  %v1044_v17 = vld [vmem:[#allocation10 + $0x3d8] sm:$0xff] }
 0x2ac   :  { %2704 = vmatmul.mubr.bf16.vlgmr.msra.gmra.mxu0 %v8467_v48  ;;  %v6655_v29 = vcombine.low %v1044_v17, %v1048_v18  ;;  %v1124_v10 = vld [vmem:[#allocation10 + $0x658] sm:$0xff] }
 0x2ad   :  { %2747 = vmatmul.mubr.bf16.vlgmr.msra.gmra.mxu1 %v8469_v49  ;;  %2758 = vmatpush1.bf16.msra.mxu0 %v6591_v20  ;;  %v1176_v20 = vld [vmem:[#allocation10 + $0x7f8] sm:$0xff] }
 0x2ae   :  { %2789 = vmatprep.mubr.bf16.mxu0 %v8463_v46  ;;  %2801 = vmatpush1.bf16.msra.mxu1 %v6719_v23  ;;  %v6696_v46 = vcombine.high %v1084_v36, %v1088_v37  ;;  %v6656_v23 = vcombine.high %v1044_v17, %v1048_v18  ;;  %v1160_v36 = vld [vmem:[#allocation10 + $0x778] sm:$0xff]  ;;  %v6647_v37 = vcombine.low %v1036_v25, %v1040_v26 }
 0x2af   :  { %2832 = vmatprep.mubr.bf16.mxu1 %v8465_v47  ;;  %2759 = vmatprep.subr.bf16.mxu0 %v6584_v24  ;;  %v6567_v47 = vcombine.low %v956_v34, %v960_v35  ;;  %v6784_v24 = vcombine.high %v1172_v19, %v1176_v20  ;;  %v1032_v34 = vld [vmem:[#allocation10 + $0x378] sm:$0xff] }
 0x2b0   :  { %2802 = vmatprep.subr.bf16.mxu1 %v6712_v27  ;;  %v1164_v27 = vld [vmem:[#allocation10 + $0x798] sm:$0xff] }
 0x2b1   :  { %2760 = vmatpush1.bf16.msra.mxu0 %v6583_v30  ;;  %v6783_v30 = vcombine.low %v1172_v19, %v1176_v20  ;;  %v1156_v35 = vld [vmem:[#allocation10 + $0x758] sm:$0xff] }
 0x2b2   :  { %2803 = vmatpush1.bf16.msra.mxu1 %v6711_v31  ;;  %2761 = vmatprep.subr.bf16.mxu0 %v6576_v32  ;;  %v6648_v31 = vcombine.high %v1036_v25, %v1040_v26  ;;  %v6776_v32 = vcombine.high %v1164_v27, %v1168_v28  ;;  %v1128_v11 = vld [vmem:[#allocation10 + $0x678] sm:$0xff]  ;;  %v7470_v26 = vld [vmem:[#allocation13 + $0x18c] ss:$28 sps:$4 sm:$0xff]  }
 0x2b3   :  { %2804 = vmatprep.subr.bf16.mxu1 %v6704_v33  ;;  %v1028_v33 = vld [vmem:[#allocation10 + $0x358] sm:$0xff] }
 0x2b4   :  { %v6639_v51 = vcombine.low %v1028_v33, %v1032_v34  ;;  %v992_v17 = vld [vmem:[#allocation10 + $0x238] sm:$0xff] }
 0x2b5   :  { %2762 = vmatpush1.bf16.msra.mxu0 %v6575_v39  ;;  %v6775_v39 = vcombine.low %v1164_v27, %v1168_v28  ;;  %v1116_v18 = vld [vmem:[#allocation10 + $0x618] sm:$0xff]  ;;  %v7485_v27 = vld [vmem:[#allocation13 + $0x50c] ss:$28 sps:$4 sm:$0xff]  }
 0x2b6   :  { %2805 = vmatpush1.bf16.msra.mxu1 %v6703_v40  ;;  %2763 = vmatprep.subr.bf16.mxu0 %v6568_v42  ;;  %v6640_v40 = vcombine.high %v1028_v33, %v1032_v34  ;;  %v6768_v42 = vcombine.high %v1156_v35, %v1160_v36  ;;  %v1120_v19 = vld [vmem:[#allocation10 + $0x638] sm:$0xff]  ;;  %v7468_v28 = vld [vmem:[#allocation13 + $0x188] ss:$28 sps:$4 sm:$0xff]  }
 0x2b7   :  { %2806 = vmatprep.subr.bf16.mxu1 %v6696_v46  ;;  %v1020_v46 = vld [vmem:[#allocation10 + $0x318] sm:$0xff]  ;;  %v6727_v25 = vcombine.low %v1116_v18, %v1120_v19 }
 0x2b8   :  { %v6631_v58 = vcombine.low %v1020_v46, %v1024_v44  ;;  %v7491_v33 = vld [vmem:[#allocation13 + $0x4d4] ss:$28 sps:$4 sm:$0xff]  }
 0x2b9   :  { %2764 = vmatpush1.bf16.msra.mxu0 %v6567_v47  ;;  %v6767_v47 = vcombine.low %v1156_v35, %v1160_v36  ;;  %v7471_v36 = vld [vmem:[#allocation13 + $0x150] ss:$28 sps:$4 sm:$0xff]  }
 0x2ba   :  { %2807 = vmatpush1.bf16.msra.mxu1 %v6695_v52  ;;  %2765 = vmatprep.subr.bf16.mxu0 %v6560_v53  ;;  %v6632_v52 = vcombine.high %v1020_v46, %v1024_v44  ;;  %v6760_v53 = vcombine.high %v1148_v45, %v1152_v50  ;;  %v7497_v44 = vld [vmem:[#allocation13 + $0x49c] ss:$28 sps:$4 sm:$0xff]  }
 0x2bb   :  { %2808 = vmatprep.subr.bf16.mxu1 %v6688_v54  ;;  %v1012_v54 = vld [vmem:[#allocation10 + $0x2d8] sm:$0xff] }
 0x2bc   :  { %v6623_v2 = vcombine.low %v1012_v54, %v1016_v55 }
 0x2bd   :  { %2766 = vmatpush1.bf16.msra.mxu0 %v6559_v59  ;;  %v6759_v59 = vcombine.low %v1148_v45, %v1152_v50  ;;  %v7474_v50 = vld [vmem:[#allocation13 + $0x118] ss:$28 sps:$4 sm:$0xff]  }
 0x2be   :  { %2809 = vmatpush1.bf16.msra.mxu1 %v6687_v60  ;;  %2767 = vmatprep.subr.bf16.mxu0 %v6552_v61  ;;  %v6624_v60 = vcombine.high %v1012_v54, %v1016_v55  ;;  %v6752_v61 = vcombine.high %v1140_v56, %v1144_v57  ;;  %v7503_v54 = vld [vmem:[#allocation13 + $0x464] ss:$28 sps:$4 sm:$0xff]  }
 0x2bf   :  { %2810 = vmatprep.subr.bf16.mxu1 %v6680_v62  ;;  %v1004_v62 = vld [vmem:[#allocation10 + $0x298] sm:$0xff] }
 0x2c0   :  { %v6615_v12 = vcombine.low %v1004_v62, %v1008_v63 }
 0x2c1   :  { %2768 = vmatpush1.bf16.msra.mxu0 %v6551_v3  ;;  %v6751_v3 = vcombine.low %v1140_v56, %v1144_v57  ;;  %v7477_v57 = vld [vmem:[#allocation13 + $0xe0] ss:$28 sps:$4 sm:$0xff]  }
 0x2c2   :  { %2811 = vmatpush1.bf16.msra.mxu1 %v6679_v4  ;;  %2769 = vmatprep.subr.bf16.mxu0 %v6544_v5  ;;  %v6616_v4 = vcombine.high %v1004_v62, %v1008_v63  ;;  %v6744_v5 = vcombine.high %v1132_v0, %v1136_v1  ;;  %v7509_v62 = vld [vmem:[#allocation13 + $0x42c] ss:$28 sps:$4 sm:$0xff]  }
 0x2c3   :  { %2812 = vmatprep.subr.bf16.mxu1 %v6672_v6  ;;  %v996_v6 = vld [vmem:[#allocation10 + $0x258] sm:$0xff] }
 0x2c4   :  { %v6607_v20 = vcombine.low %v996_v6, %v1000_v7 }
 0x2c5   :  { %2770 = vmatpush1.bf16.msra.mxu0 %v6543_v13  ;;  %v6743_v13 = vcombine.low %v1132_v0, %v1136_v1  ;;  %v7480_v0 = vld [vmem:[#allocation13 + $0xa8] ss:$28 sps:$4 sm:$0xff]   ;;  %v7488_v1 = vld [vmem:[#allocation13 + $0x74] ss:$28 sps:$4 sm:$0xff]  }
 0x2c6   :  { %2813 = vmatpush1.bf16.msra.mxu1 %v6671_v14  ;;  %2771 = vmatprep.subr.bf16.mxu0 %v6536_v15  ;;  %v6608_v14 = vcombine.high %v996_v6, %v1000_v7  ;;  %v6736_v15 = vcombine.high %v1124_v10, %v1128_v11  ;;  %v7513_v6 = vld [vmem:[#allocation13 + $0x3f0] ss:$28 sps:$4 sm:$0xff]   ;;  %v7521_v7 = vld [vmem:[#allocation13 + $0x3bc] ss:$28 sps:$4 sm:$0xff]  }
 0x2c7   :  { %2814 = vmatprep.subr.bf16.mxu1 %v6664_v16  ;;  %v988_v16 = vld [vmem:[#allocation10 + $0x218] sm:$0xff] }
 0x2c9   :  { %2772 = vmatpush1.bf16.msra.mxu0 %v6535_v21  ;;  %v6735_v21 = vcombine.low %v1124_v10, %v1128_v11  ;;  %v7492_v10 = vld [vmem:[#allocation13 + $0x38] ss:$28 sps:$4 sm:$0xff]   ;;  %v7500_v11 = vld [vmem:[#allocation13 + $0x4] ss:$28 sps:$4 sm:$0xff]  }
 0x2ca   :  { %2815 = vmatpush1.bf16.msra.mxu1 %v6663_v22  ;;  %2773 = vmatprep.subr.bf16.mxu0 %v6656_v23  ;;  %v6600_v22 = vcombine.high %v988_v16, %v992_v17  ;;  %v6728_v23 = vcombine.high %v1116_v18, %v1120_v19  ;;  %v7504_v18 = vld [vmem:[#allocation13 + $0x348] ss:$28 sps:$4 sm:$0xff]   ;;  %v7512_v19 = vld [vmem:[#allocation13 + $0x314] ss:$28 sps:$4 sm:$0xff]  }
 0x2cb   :  { %2816 = vmatprep.subr.bf16.mxu1 %v6784_v24  ;;  %v6599_v24 = vcombine.low %v988_v16, %v992_v17  ;;  %v7525_v16 = vld [vmem:[#allocation13 + $0x380] ss:$28 sps:$4 sm:$0xff]   ;;  %v7533_v17 = vld [vmem:[#allocation13 + $0x6cc] ss:$28 sps:$4 sm:$0xff]  }
 0x2cd   :  { %2774 = vmatpush2.bf16.msra.mxu0 %v6655_v29  ;;  %v8485_v29 = vld [vmem:[#allocation12] sm:$0xff] }
 0x2ce   :  { %2817 = vmatpush2.bf16.msra.mxu1 %v6783_v30  ;;  %2775 = vmatprep.subr.bf16.mxu0 %v6648_v31  ;;  %v7473_v30 = vld [vmem:[#allocation13 + $0x154] ss:$28 sps:$4 sm:$0xff]   ;;  %v7483_v31 = vld [vmem:[#allocation13 + $0x508] ss:$28 sps:$4 sm:$0xff]  }
 0x2cf   :  { %2818 = vmatprep.subr.bf16.mxu1 %v6776_v32  ;;  %v1186_v32 = vrot.slane %v8485_v29, %v8449_v43 }
 0x2d1   :  { %2776 = vmatpush2.bf16.msra.mxu0 %v6647_v37 }
 0x2d2   :  { %2819 = vmatpush2.bf16.msra.mxu1 %v6775_v39  ;;  %2777 = vmatprep.subr.bf16.mxu0 %v6640_v40  ;;  %v7476_v40 = vld [vmem:[#allocation13 + $0x11c] ss:$28 sps:$4 sm:$0xff]  }
 0x2d3   :  { %2820 = vmatprep.subr.bf16.mxu1 %v6768_v42  ;;  %v7489_v42 = vld [vmem:[#allocation13 + $0x4d0] ss:$28 sps:$4 sm:$0xff]  }
 0x2d5   :  { %2778 = vmatpush2.bf16.msra.mxu0 %v6639_v51 }
 0x2d6   :  { %2821 = vmatpush2.bf16.msra.mxu1 %v6767_v47  ;;  %2779 = vmatprep.subr.bf16.mxu0 %v6632_v52  ;;  %v7495_v47 = vld [vmem:[#allocation13 + $0x498] ss:$28 sps:$4 sm:$0xff]  }
 0x2d7   :  { %2822 = vmatprep.subr.bf16.mxu1 %v6760_v53 }
 0x2d9   :  { %2780 = vmatpush2.bf16.msra.mxu0 %v6631_v58  ;;  %v7482_v58 = vld [vmem:[#allocation13 + $0xac] ss:$28 sps:$4 sm:$0xff]  }
 0x2da   :  { %2823 = vmatpush2.bf16.msra.mxu1 %v6759_v59  ;;  %2781 = vmatprep.subr.bf16.mxu0 %v6624_v60  ;;  %v7501_v59 = vld [vmem:[#allocation13 + $0x460] ss:$28 sps:$4 sm:$0xff]  }
 0x2db   :  { %2824 = vmatprep.subr.bf16.mxu1 %v6752_v61 }
 0x2dd   :  { %2782 = vmatpush2.bf16.msra.mxu0 %v6623_v2  ;;  %v7507_v2 = vld [vmem:[#allocation13 + $0x428] ss:$28 sps:$4 sm:$0xff]  }
 0x2de   :  { %2825 = vmatpush2.bf16.msra.mxu1 %v6751_v3  ;;  %2783 = vmatprep.subr.bf16.mxu0 %v6616_v4  ;;  %v7515_v3 = vld [vmem:[#allocation13 + $0x3f4] ss:$28 sps:$4 sm:$0xff]  }
 0x2df   :  { %2826 = vmatprep.subr.bf16.mxu1 %v6744_v5  ;;  %v7486_v4 = vld [vmem:[#allocation13 + $0x70] ss:$28 sps:$4 sm:$0xff]   ;;  %v7494_v5 = vld [vmem:[#allocation13 + $0x3c] ss:$28 sps:$4 sm:$0xff]  }
 0x2e1   :  { %2784 = vmatpush2.bf16.msra.mxu0 %v6615_v12  ;;  %v7519_v12 = vld [vmem:[#allocation13 + $0x3b8] ss:$28 sps:$4 sm:$0xff]  }
 0x2e2   :  { %2827 = vmatpush2.bf16.msra.mxu1 %v6743_v13  ;;  %2785 = vmatprep.subr.bf16.mxu0 %v6608_v14  ;;  %v7527_v13 = vld [vmem:[#allocation13 + $0x384] ss:$28 sps:$4 sm:$0xff]  }
 0x2e3   :  { %2828 = vmatprep.subr.bf16.mxu1 %v6736_v15  ;;  %v7498_v14 = vld [vmem:[#allocation13] ss:$28 sps:$4 sm:$0xff]   ;;  %v7506_v15 = vld [vmem:[#allocation13 + $0x34c] ss:$28 sps:$4 sm:$0xff]  }
 0x2e5   :  { %2786 = vmatpush2.bf16.msra.mxu0 %v6607_v20  ;;  %v7531_v20 = vld [vmem:[#allocation13 + $0x6c8] ss:$28 sps:$4 sm:$0xff]  }
 0x2e6   :  { %2829 = vmatpush2.bf16.msra.mxu1 %v6735_v21  ;;  %2787 = vmatprep.subr.bf16.mxu0 %v6600_v22  ;;  %v7539_v21 = vld [vmem:[#allocation13 + $0x694] ss:$28 sps:$4 sm:$0xff]  }
 0x2e7   :  { %2830 = vmatprep.subr.bf16.mxu1 %v6728_v23  ;;  %v7510_v22 = vld [vmem:[#allocation13 + $0x310] ss:$28 sps:$4 sm:$0xff]   ;;  %v7518_v23 = vld [vmem:[#allocation13 + $0x2dc] ss:$28 sps:$4 sm:$0xff]  }
 0x2e9   :  { %2788 = vmatpush2.bf16.msra.mxu0 %v6599_v24  ;;  %v7537_v24 = vld [vmem:[#allocation13 + $0x690] ss:$28 sps:$4 sm:$0xff]  }
 0x2ea   :  { %2831 = vmatpush2.bf16.msra.mxu1 %v6727_v25  ;;  %5720 = vmatprep.subr.bf16.mxu0 %v7470_v26  ;;  %v7545_v25 = vld [vmem:[#allocation13 + $0x65c] ss:$28 sps:$4 sm:$0xff]  }
 0x2eb   :  { %5763 = vmatprep.subr.bf16.mxu1 %v7485_v27  ;;  %v7516_v26 = vld [vmem:[#allocation13 + $0x2d8] ss:$28 sps:$4 sm:$0xff]   ;;  %v7524_v27 = vld [vmem:[#allocation13 + $0x2a4] ss:$28 sps:$4 sm:$0xff]  }
 0x2ec   :  { %2790 = vmatmul.mubr.bf16.vlgmr.msra.gmra.mxu0 %v8467_v48  ;;  %v8490_v34 = vpop.f32.mrf.mxu0  ;;  %v8492_v35 = vpop.f32.mrf.mxu1 }
 0x2ed   :  { %2833 = vmatmul.mubr.bf16.vlgmr.msra.gmra.mxu1 %v8469_v49  ;;  %5721 = vmatpush1.bf16.msra.mxu0 %v7468_v28  ;;  %v7479_v49 = vld [vmem:[#allocation13 + $0xe4] ss:$28 sps:$4 sm:$0xff]   ;;  %v7543_v28 = vld [vmem:[#allocation13 + $0x658] ss:$28 sps:$4 sm:$0xff]  }
 0x2ee   :  { %v2535_v37 = vpop.f32.mrf.mxu0  ;;  %v2578_v39 = vpop.f32.mrf.mxu1  ;;  %5722 = vmatprep.subr.bf16.mxu0 %v7473_v30  ;;  %5764 = vmatpush1.bf16.msra.mxu1 %v7483_v31  ;;  %v7551_v30 = vld [vmem:[#allocation13 + $0x624] ss:$28 sps:$4 sm:$0xff]  }
 0x2ef   :  { %v2536_v46 = vadd.f32 %v2535_v37, %v1186_v32  ;;  %5765 = vmatprep.subr.bf16.mxu1 %v7491_v33  ;;  %v7522_v31 = vld [vmem:[#allocation13 + $0x2a0] ss:$28 sps:$4 sm:$0xff]   ;;  %v7528_v37 = vld [vmem:[#allocation13 + $0x268] ss:$28 sps:$4 sm:$0xff]  }
 0x2f0   :  { %v8495_v45 = vpop.f32.mrf.mxu0  ;;  %v8497_v48 = vpop.f32.mrf.mxu1  ;;  %v7549_v33 = vld [vmem:[#allocation13 + $0x620] ss:$28 sps:$4 sm:$0xff]  }
 0x2f1   :  { %5723 = vmatpush1.bf16.msra.mxu0 %v7471_v36  ;;  %v2579_v52 = vadd.f32 %v2578_v39, %v2536_v46  ;;  %v7554_v36 = vld [vmem:[#allocation13 + $0x5ec] ss:$28 sps:$4 sm:$0xff]   ;;  %v7536_v39 = vld [vmem:[#allocation13 + $0x234] ss:$28 sps:$4 sm:$0xff]   ;;  %v1182_v46 = vrot.slane %v8485_v29, %v8446_v41 }
 0x2f2   :  { %v2539_v51 = vpop.f32.mrf.mxu0  ;;  %5724 = vmatprep.subr.bf16.mxu0 %v7476_v40  ;;  %5766 = vmatpush1.bf16.msra.mxu1 %v7489_v42  ;;  %v2582_v55 = vpop.f32.mrf.mxu1  ;;  %v7552_v40 = vld [vmem:[#allocation13 + $0x5e8] ss:$28 sps:$4 sm:$0xff]   ;;  %v7557_v42 = vld [vmem:[#allocation13 + $0x5b4] ss:$28 sps:$4 sm:$0xff]  }
 0x2f3   :  { %v2540_v53 = vadd.f32 %v2539_v51, %v1186_v32  ;;  %5767 = vmatprep.subr.bf16.mxu1 %v7497_v44  ;;  %v2844_v60 = vmax.f32 %v2579_v52, 0.0  ;;  %v7530_v32 = vld [vmem:[#allocation13 + $0x26c] ss:$28 sps:$4 sm:$0xff]   ;;  %v7542_v51 = vld [vmem:[#allocation13 + $0x1fc] ss:$28 sps:$4 sm:$0xff]   ;;  %v2534_v52 = vadd.f32 %v8490_v34, %v1182_v46 }
 0x2f4   :  { %v7534_v44 = vld [vmem:[#allocation13 + $0x230] ss:$28 sps:$4 sm:$0xff]  }
 0x2f5   :  { %v2583_v56 = vadd.f32 %v2582_v55, %v2540_v53  ;;  %5725 = vmatpush1.bf16.msra.mxu0 %v7474_v50  ;;  %v2538_v50 = vadd.f32 %v8495_v45, %v1182_v46  ;;  %v7540_v53 = vld [vmem:[#allocation13 + $0x1f8] ss:$28 sps:$4 sm:$0xff]   ;;  %v7548_v55 = vld [vmem:[#allocation13 + $0x1c4] ss:$28 sps:$4 sm:$0xff]   ;;  %v2577_v45 = vadd.f32 %v8492_v35, %v2534_v52  ;;  %v7614_v34 = vld [vmem:[#allocation13 + $0xc0c] ss:$28 sps:$4 sm:$0xff]   ;;  %v1194_v35 = vrot.slane %v8485_v29, %v8454_v8 }
 0x2f6   :  { %5726 = vmatprep.subr.bf16.mxu0 %v7479_v49  ;;  %5768 = vmatpush1.bf16.msra.mxu1 %v7495_v47  ;;  %v7555_v49 = vld [vmem:[#allocation13 + $0x5b0] ss:$28 sps:$4 sm:$0xff]   ;;  %v7560_v47 = vld [vmem:[#allocation13 + $0x57c] ss:$28 sps:$4 sm:$0xff]   ;;  %v7632_v52 = vld [vmem:[#allocation13 + $0xb64] ss:$28 sps:$4 sm:$0xff]  }
 0x2f7   :  { %v2852_v61 = vmax.f32 %v2583_v56, 0.0  ;;  %5769 = vmatprep.subr.bf16.mxu1 %v7503_v54  ;;  %v2581_v54 = vadd.f32 %v8497_v48, %v2538_v50  ;;  %v7558_v56 = vld [vmem:[#allocation13 + $0x578] ss:$28 sps:$4 sm:$0xff]   ;;  %v7564_v48 = vld [vmem:[#allocation13 + $0x888] ss:$28 sps:$4 sm:$0xff]  }
 0x2f8   :  { %v7618_v46 = vld [vmem:[#allocation13 + $0xbd0] ss:$28 sps:$4 sm:$0xff]   ;;  %v7626_v50 = vld [vmem:[#allocation13 + $0xb9c] ss:$28 sps:$4 sm:$0xff]  }
 0x2f9   :  { %v8499_v63 = vpack.c.bf16 %v2852_v61, %v2844_v60  ;;  %5727 = vmatpush1.bf16.msra.mxu0 %v7477_v57  ;;  %v7563_v57 = vld [vmem:[#allocation13 + $0x544] ss:$28 sps:$4 sm:$0xff]   ;;  %v7566_v61 = vld [vmem:[#allocation13 + $0x88c] ss:$28 sps:$4 sm:$0xff]  }
 0x2fa   :  { %5728 = vmatprep.subr.bf16.mxu0 %v7482_v58  ;;  %5770 = vmatpush1.bf16.msra.mxu1 %v7501_v59  ;;  %v7546_v58 = vld [vmem:[#allocation13 + $0x1c0] ss:$28 sps:$4 sm:$0xff]   ;;  %v2851_v59 = vmax.f32 %v2581_v54, 0.0 }
 0x2fb   :  { %5752 = vmatprep.mubr.bf16.mxu0 %v8499_v63  ;;  %5771 = vmatprep.subr.bf16.mxu1 %v7509_v62  ;;  %v7561_v60 = vld [vmem:[#allocation13 + $0x540] ss:$28 sps:$4 sm:$0xff]   ;;  %v2843_v62 = vmax.f32 %v2577_v45, 0.0  ;;  %v7636_v45 = vld [vmem:[#allocation13 + $0xb28] ss:$28 sps:$4 sm:$0xff]  }
 0x2fc   :  { %v7630_v54 = vld [vmem:[#allocation13 + $0xb60] ss:$28 sps:$4 sm:$0xff]  }
 0x2fd   :  { %5729 = vmatpush1.bf16.msra.mxu0 %v7480_v0  ;;  %v8508_v0 = vpack.c.bf16 %v2851_v59, %v2843_v62  ;;  %v7644_v59 = vld [vmem:[#allocation13 + $0xaf4] ss:$28 sps:$4 sm:$0xff]   ;;  %v7650_v62 = vld [vmem:[#allocation13 + $0xabc] ss:$28 sps:$4 sm:$0xff]  }
 0x2fe   :  { %5730 = vmatprep.subr.bf16.mxu0 %v7488_v1  ;;  %5772 = vmatpush1.bf16.msra.mxu1 %v7507_v2  ;;  %v7569_v1 = vld [vmem:[#allocation13 + $0x854] ss:$28 sps:$4 sm:$0xff]   ;;  %v1190_v2 = vrot.slane %v8485_v29, %v8457_v9 }
 0x2ff   :  { %5773 = vmatprep.subr.bf16.mxu1 %v7515_v3 }
 0x301   :  { %5731 = vmatpush1.bf16.msra.mxu0 %v7486_v4 }
 0x302   :  { %5732 = vmatprep.subr.bf16.mxu0 %v7494_v5  ;;  %5774 = vmatpush1.bf16.msra.mxu1 %v7513_v6  ;;  %v7567_v5 = vld [vmem:[#allocation13 + $0x850] ss:$28 sps:$4 sm:$0xff]  }
 0x303   :  { %5775 = vmatprep.subr.bf16.mxu1 %v7521_v7 }
 0x305   :  { %5733 = vmatpush1.bf16.msra.mxu0 %v7492_v10  ;;  %v7572_v10 = vld [vmem:[#allocation13 + $0x81c] ss:$28 sps:$4 sm:$0xff]  }
 0x306   :  { %5734 = vmatprep.subr.bf16.mxu0 %v7500_v11  ;;  %5776 = vmatpush1.bf16.msra.mxu1 %v7519_v12 }
 0x307   :  { %5777 = vmatprep.subr.bf16.mxu1 %v7527_v13 }
 0x309   :  { %5735 = vmatpush1.bf16.msra.mxu0 %v7498_v14 }
 0x30a   :  { %5736 = vmatprep.subr.bf16.mxu0 %v7506_v15  ;;  %5778 = vmatpush1.bf16.msra.mxu1 %v7525_v16  ;;  %v7570_v16 = vld [vmem:[#allocation13 + $0x818] ss:$28 sps:$4 sm:$0xff]  }
 0x30b   :  { %5779 = vmatprep.subr.bf16.mxu1 %v7533_v17 }
 0x30d   :  { %5737 = vmatpush2.bf16.msra.mxu0 %v7504_v18  ;;  %v7575_v18 = vld [vmem:[#allocation13 + $0x7e4] ss:$28 sps:$4 sm:$0xff]  }
 0x30e   :  { %5738 = vmatprep.subr.bf16.mxu0 %v7512_v19  ;;  %5780 = vmatpush2.bf16.msra.mxu1 %v7531_v20 }
 0x30f   :  { %5781 = vmatprep.subr.bf16.mxu1 %v7539_v21 }
 0x311   :  { %5739 = vmatpush2.bf16.msra.mxu0 %v7510_v22 }
 0x312   :  { %5740 = vmatprep.subr.bf16.mxu0 %v7518_v23  ;;  %5782 = vmatpush2.bf16.msra.mxu1 %v7537_v24 }
 0x313   :  { %5783 = vmatprep.subr.bf16.mxu1 %v7545_v25  ;;  %v7573_v25 = vld [vmem:[#allocation13 + $0x7e0] ss:$28 sps:$4 sm:$0xff]  }
 0x315   :  { %5741 = vmatpush2.bf16.msra.mxu0 %v7516_v26 }
 0x316   :  { %5742 = vmatprep.subr.bf16.mxu0 %v7524_v27  ;;  %5784 = vmatpush2.bf16.msra.mxu1 %v7543_v28  ;;  %v7578_v27 = vld [vmem:[#allocation13 + $0x7ac] ss:$28 sps:$4 sm:$0xff]  }
 0x317   :  { %5785 = vmatprep.subr.bf16.mxu1 %v7551_v30 }
 0x319   :  { %5743 = vmatpush2.bf16.msra.mxu0 %v7522_v31 }
 0x31a   :  { %5744 = vmatprep.subr.bf16.mxu0 %v7530_v32  ;;  %5786 = vmatpush2.bf16.msra.mxu1 %v7549_v33  ;;  %v7576_v33 = vld [vmem:[#allocation13 + $0x7a8] ss:$28 sps:$4 sm:$0xff]  }
 0x31b   :  { %5787 = vmatprep.subr.bf16.mxu1 %v7554_v36  ;;  %v7612_v36 = vld [vmem:[#allocation13 + $0xc08] ss:$28 sps:$4 sm:$0xff]  }
 0x31d   :  { %5745 = vmatpush2.bf16.msra.mxu0 %v7528_v37 }
 0x31e   :  { %5746 = vmatprep.subr.bf16.mxu0 %v7536_v39  ;;  %5788 = vmatpush2.bf16.msra.mxu1 %v7552_v40  ;;  %v7581_v39 = vld [vmem:[#allocation13 + $0x774] ss:$28 sps:$4 sm:$0xff]  }
 0x31f   :  { %5789 = vmatprep.subr.bf16.mxu1 %v7557_v42  ;;  %v7620_v40 = vld [vmem:[#allocation13 + $0xbd4] ss:$28 sps:$4 sm:$0xff]  }
 0x320   :  { %v7579_v42 = vld [vmem:[#allocation13 + $0x770] ss:$28 sps:$4 sm:$0xff]  }
 0x321   :  { %5747 = vmatpush2.bf16.msra.mxu0 %v7534_v44  ;;  %v7584_v44 = vld [vmem:[#allocation13 + $0x73c] ss:$28 sps:$4 sm:$0xff]  }
 0x322   :  { %5748 = vmatprep.subr.bf16.mxu0 %v7542_v51  ;;  %5790 = vmatpush2.bf16.msra.mxu1 %v7555_v49  ;;  %v7582_v51 = vld [vmem:[#allocation13 + $0x738] ss:$28 sps:$4 sm:$0xff]  }
 0x323   :  { %5791 = vmatprep.subr.bf16.mxu1 %v7560_v47  ;;  %v7624_v49 = vld [vmem:[#allocation13 + $0xb98] ss:$28 sps:$4 sm:$0xff]   ;;  %v7587_v47 = vld [vmem:[#allocation13 + $0x704] ss:$28 sps:$4 sm:$0xff]  }
 0x325   :  { %5749 = vmatpush2.bf16.msra.mxu0 %v7540_v53  ;;  %v7585_v53 = vld [vmem:[#allocation13 + $0x700] ss:$28 sps:$4 sm:$0xff]  }
 0x326   :  { %5750 = vmatprep.subr.bf16.mxu0 %v7548_v55  ;;  %5792 = vmatpush2.bf16.msra.mxu1 %v7558_v56  ;;  %v7590_v55 = vld [vmem:[#allocation13 + $0xa4c] ss:$28 sps:$4 sm:$0xff]  }
 0x327   :  { %5793 = vmatprep.subr.bf16.mxu1 %v7563_v57  ;;  %v7638_v56 = vld [vmem:[#allocation13 + $0xb2c] ss:$28 sps:$4 sm:$0xff]  }
 0x328   :  { %v7588_v57 = vld [vmem:[#allocation13 + $0xa48] ss:$28 sps:$4 sm:$0xff]  }
 0x329   :  { %5751 = vmatpush2.bf16.msra.mxu0 %v7546_v58  ;;  %v7593_v58 = vld [vmem:[#allocation13 + $0xa14] ss:$28 sps:$4 sm:$0xff]  }
 0x32a   :  { %5794 = vmatpush2.bf16.msra.mxu1 %v7561_v60  ;;  %5806 = vmatprep.subr.bf16.mxu0 %v7566_v61  ;;  %v7591_v60 = vld [vmem:[#allocation13 + $0xa10] ss:$28 sps:$4 sm:$0xff]  }
 0x32b   :  { %5849 = vmatprep.subr.bf16.mxu1 %v7614_v34  ;;  %v7642_v61 = vld [vmem:[#allocation13 + $0xaf0] ss:$28 sps:$4 sm:$0xff]   ;;  %v7596_v34 = vld [vmem:[#allocation13 + $0x9dc] ss:$28 sps:$4 sm:$0xff]  }
 0x32c   :  { %v2619_v3 = vpop.f32.mrf.mxu0  ;;  %v2662_v4 = vpop.f32.mrf.mxu1  ;;  %5753 = vmatmul.mubr.bf16.vlgmr.msra.gmra.mxu0 %v8508_v0 }
 0x32d   :  { %5807 = vmatpush1.bf16.msra.mxu0 %v7564_v48  ;;  %v2620_v12 = vadd.f32 %v2619_v3, %v1190_v2  ;;  %v7594_v48 = vld [vmem:[#allocation13 + $0x9d8] ss:$28 sps:$4 sm:$0xff]   ;;  %v7597_v3 = vld [vmem:[#allocation13 + $0x9a0] ss:$28 sps:$4 sm:$0xff]  }
 0x32e   :  { %v2621_v6 = vpop.f32.mrf.mxu0  ;;  %v2664_v7 = vpop.f32.mrf.mxu1  ;;  %5808 = vmatprep.subr.bf16.mxu0 %v7569_v1  ;;  %v7648_v1 = vld [vmem:[#allocation13 + $0xab8] ss:$28 sps:$4 sm:$0xff]  }
 0x32f   :  { %v2622_v11 = vadd.f32 %v2621_v6, %v1194_v35  ;;  %v2663_v22 = vadd.f32 %v2662_v4, %v2620_v12  ;;  %v7654_v4 = vld [vmem:[#allocation13 + $0xa80] ss:$28 sps:$4 sm:$0xff]   ;;  %v7662_v6 = vld [vmem:[#allocation13 + $0xdcc] ss:$28 sps:$4 sm:$0xff]   ;;  %v7668_v12 = vld [vmem:[#allocation13 + $0xd94] ss:$28 sps:$4 sm:$0xff]  }
 0x330   :  { %v2623_v13 = vpop.f32.mrf.mxu0  ;;  %v2666_v14 = vpop.f32.mrf.mxu1 }
 0x331   :  { %v2624_v15 = vadd.f32 %v2623_v13, %v1190_v2  ;;  %5809 = vmatpush1.bf16.msra.mxu0 %v7567_v5  ;;  %v2665_v19 = vadd.f32 %v2664_v7, %v2622_v11  ;;  %v2845_v31 = vmax.f32 %v2663_v22, 0.0  ;;  %v7656_v2 = vld [vmem:[#allocation13 + $0xa84] ss:$28 sps:$4 sm:$0xff]   ;;  %v7602_v5 = vld [vmem:[#allocation13 + $0x96c] ss:$28 sps:$4 sm:$0xff]  }
 0x332   :  { %v2625_v17 = vpop.f32.mrf.mxu0  ;;  %5810 = vmatprep.subr.bf16.mxu0 %v7572_v10  ;;  %v2668_v23 = vpop.f32.mrf.mxu1  ;;  %v7600_v7 = vld [vmem:[#allocation13 + $0x968] ss:$28 sps:$4 sm:$0xff]   ;;  %v7605_v11 = vld [vmem:[#allocation13 + $0x934] ss:$28 sps:$4 sm:$0xff]   ;;  %v7678_v22 = vld [vmem:[#allocation13 + $0xd20] ss:$28 sps:$4 sm:$0xff]  }
 0x333   :  { %v2667_v20 = vadd.f32 %v2666_v14, %v2624_v15  ;;  %v2626_v21 = vadd.f32 %v2625_v17, %v1194_v35  ;;  %v2846_v28 = vmax.f32 %v2665_v19, 0.0  ;;  %v7599_v35 = vld [vmem:[#allocation13 + $0x9a4] ss:$28 sps:$4 sm:$0xff]   ;;  %v7603_v13 = vld [vmem:[#allocation13 + $0x930] ss:$28 sps:$4 sm:$0xff]  }
 0x334   :  { %v7660_v10 = vld [vmem:[#allocation13 + $0xdc8] ss:$28 sps:$4 sm:$0xff]   ;;  %v7666_v14 = vld [vmem:[#allocation13 + $0xd90] ss:$28 sps:$4 sm:$0xff]   ;;  %v7608_v15 = vld [vmem:[#allocation13 + $0x8fc] ss:$28 sps:$4 sm:$0xff]  }
 0x335   :  { %v2669_v24 = vadd.f32 %v2668_v23, %v2626_v21  ;;  %5811 = vmatpush1.bf16.msra.mxu0 %v7570_v16  ;;  %v2853_v26 = vmax.f32 %v2667_v20, 0.0  ;;  %v7674_v16 = vld [vmem:[#allocation13 + $0xd5c] ss:$28 sps:$4 sm:$0xff]   ;;  %v7611_v19 = vld [vmem:[#allocation13 + $0x8c4] ss:$28 sps:$4 sm:$0xff]  }
 0x336   :  { %5812 = vmatprep.subr.bf16.mxu0 %v7575_v18  ;;  %v7606_v17 = vld [vmem:[#allocation13 + $0x8f8] ss:$28 sps:$4 sm:$0xff]   ;;  %v7680_v20 = vld [vmem:[#allocation13 + $0xd24] ss:$28 sps:$4 sm:$0xff]  }
 0x337   :  { %v2854_v30 = vmax.f32 %v2669_v24, 0.0  ;;  %v8517_v37 = vpack.c.bf16 %v2853_v26, %v2845_v31  ;;  %v7672_v18 = vld [vmem:[#allocation13 + $0xd58] ss:$28 sps:$4 sm:$0xff]   ;;  %v7609_v21 = vld [vmem:[#allocation13 + $0x8c0] ss:$28 sps:$4 sm:$0xff]   ;;  %v1197_v26 = vsub.s32 4, %v8443_v38 }
 0x338   :  { %v7617_v23 = vld [vmem:[#allocation13 + $0x194] ss:$28 sps:$4 sm:$0xff]   ;;  %v7686_v24 = vld [vmem:[#allocation13 + $0xcec] ss:$28 sps:$4 sm:$0xff]  }
 0x339   :  { %v8515_v32 = vpack.c.bf16 %v2854_v30, %v2846_v28  ;;  %5813 = vmatpush1.bf16.msra.mxu0 %v7573_v25  ;;  %v1201_v25 = vsub.s32 5, %v8443_v38  ;;  %v7692_v28 = vld [vmem:[#allocation13 + $0xcb4] ss:$28 sps:$4 sm:$0xff]   ;;  %v1198_v31 = vrot.slane %v8485_v29, %v1197_v26 }
 0x33a   :  { %5814 = vmatprep.subr.bf16.mxu0 %v7578_v27  ;;  %v7684_v27 = vld [vmem:[#allocation13 + $0xce8] ss:$28 sps:$4 sm:$0xff]  }
 0x33b   :  { %5795 = vmatprep.mubr.bf16.mxu1 %v8515_v32  ;;  %v1202_v30 = vrot.slane %v8485_v29, %v1201_v25 }
 0x33c   :  { %5796 = vmatmul.mubr.bf16.vlgmr.msra.gmra.mxu1 %v8517_v37 }
 0x33d   :  { %5815 = vmatpush1.bf16.msra.mxu0 %v7576_v33  ;;  %5850 = vmatpush1.bf16.msra.mxu1 %v7612_v36 }
 0x33e   :  { %5816 = vmatprep.subr.bf16.mxu0 %v7581_v39  ;;  %5851 = vmatprep.subr.bf16.mxu1 %v7620_v40  ;;  %v7690_v39 = vld [vmem:[#allocation13 + $0xcb0] ss:$28 sps:$4 sm:$0xff]  }
 0x341   :  { %5817 = vmatpush1.bf16.msra.mxu0 %v7579_v42  ;;  %5852 = vmatpush1.bf16.msra.mxu1 %v7618_v46  ;;  %v7698_v42 = vld [vmem:[#allocation13 + $0xc7c] ss:$28 sps:$4 sm:$0xff]  }
 0x342   :  { %5818 = vmatprep.subr.bf16.mxu0 %v7584_v44  ;;  %5853 = vmatprep.subr.bf16.mxu1 %v7626_v50 }
 0x345   :  { %5819 = vmatpush1.bf16.msra.mxu0 %v7582_v51  ;;  %5854 = vmatpush1.bf16.msra.mxu1 %v7624_v49 }
 0x346   :  { %5820 = vmatprep.subr.bf16.mxu0 %v7587_v47  ;;  %5855 = vmatprep.subr.bf16.mxu1 %v7632_v52  ;;  %v7696_v52 = vld [vmem:[#allocation13 + $0xc78] ss:$28 sps:$4 sm:$0xff]  }
 0x349   :  { %5821 = vmatpush1.bf16.msra.mxu0 %v7585_v53  ;;  %5856 = vmatpush1.bf16.msra.mxu1 %v7630_v54  ;;  %v7704_v54 = vld [vmem:[#allocation13 + $0xc44] ss:$28 sps:$4 sm:$0xff]  }
 0x34a   :  { %5822 = vmatprep.subr.bf16.mxu0 %v7590_v55  ;;  %5857 = vmatprep.subr.bf16.mxu1 %v7638_v56 }
 0x34d   :  { %5823 = vmatpush2.bf16.msra.mxu0 %v7588_v57  ;;  %5858 = vmatpush1.bf16.msra.mxu1 %v7636_v45 }
 0x34e   :  { %5824 = vmatprep.subr.bf16.mxu0 %v7593_v58  ;;  %5859 = vmatprep.subr.bf16.mxu1 %v7644_v59 }
 0x351   :  { %5825 = vmatpush2.bf16.msra.mxu0 %v7591_v60  ;;  %5860 = vmatpush1.bf16.msra.mxu1 %v7642_v61  ;;  %v7702_v60 = vld [vmem:[#allocation13 + $0xc40] ss:$28 sps:$4 sm:$0xff]  }
 0x352   :  { %5826 = vmatprep.subr.bf16.mxu0 %v7596_v34  ;;  %5861 = vmatprep.subr.bf16.mxu1 %v7650_v62  ;;  %v7710_v34 = vld [vmem:[#allocation13 + $0x514] ss:$28 sps:$4 sm:$0xff]  }
 0x355   :  { %5827 = vmatpush2.bf16.msra.mxu0 %v7594_v48  ;;  %5862 = vmatpush1.bf16.msra.mxu1 %v7648_v1 }
 0x356   :  { %5828 = vmatprep.subr.bf16.mxu0 %v7599_v35  ;;  %5863 = vmatprep.subr.bf16.mxu1 %v7656_v2  ;;  %v7615_v2 = vld [vmem:[#allocation13 + $0x190] ss:$28 sps:$4 sm:$0xff]  }
 0x359   :  { %5829 = vmatpush2.bf16.msra.mxu0 %v7597_v3  ;;  %5864 = vmatpush1.bf16.msra.mxu1 %v7654_v4  ;;  %v7623_v4 = vld [vmem:[#allocation13 + $0x15c] ss:$28 sps:$4 sm:$0xff]  }
 0x35a   :  { %5830 = vmatprep.subr.bf16.mxu0 %v7602_v5  ;;  %5865 = vmatprep.subr.bf16.mxu1 %v7662_v6  ;;  %v7621_v5 = vld [vmem:[#allocation13 + $0x158] ss:$28 sps:$4 sm:$0xff]   ;;  %v7629_v6 = vld [vmem:[#allocation13 + $0x124] ss:$28 sps:$4 sm:$0xff]  }
 0x35d   :  { %5831 = vmatpush2.bf16.msra.mxu0 %v7600_v7  ;;  %5866 = vmatpush2.bf16.msra.mxu1 %v7660_v10  ;;  %v7627_v7 = vld [vmem:[#allocation13 + $0x120] ss:$28 sps:$4 sm:$0xff]   ;;  %v7635_v10 = vld [vmem:[#allocation13 + $0xec] ss:$28 sps:$4 sm:$0xff]  }
 0x35e   :  { %5832 = vmatprep.subr.bf16.mxu0 %v7605_v11  ;;  %5867 = vmatprep.subr.bf16.mxu1 %v7668_v12  ;;  %v7633_v11 = vld [vmem:[#allocation13 + $0xe8] ss:$28 sps:$4 sm:$0xff]   ;;  %v7641_v12 = vld [vmem:[#allocation13 + $0xb4] ss:$28 sps:$4 sm:$0xff]  }
 0x361   :  { %5833 = vmatpush2.bf16.msra.mxu0 %v7603_v13  ;;  %5868 = vmatpush2.bf16.msra.mxu1 %v7666_v14  ;;  %v7639_v13 = vld [vmem:[#allocation13 + $0xb0] ss:$28 sps:$4 sm:$0xff]   ;;  %v7647_v14 = vld [vmem:[#allocation13 + $0x7c] ss:$28 sps:$4 sm:$0xff]  }
 0x362   :  { %5834 = vmatprep.subr.bf16.mxu0 %v7608_v15  ;;  %5869 = vmatprep.subr.bf16.mxu1 %v7674_v16  ;;  %v7645_v15 = vld [vmem:[#allocation13 + $0x78] ss:$28 sps:$4 sm:$0xff]   ;;  %v7653_v16 = vld [vmem:[#allocation13 + $0x44] ss:$28 sps:$4 sm:$0xff]  }
 0x365   :  { %5835 = vmatpush2.bf16.msra.mxu0 %v7606_v17  ;;  %5870 = vmatpush2.bf16.msra.mxu1 %v7672_v18  ;;  %v7651_v17 = vld [vmem:[#allocation13 + $0x40] ss:$28 sps:$4 sm:$0xff]   ;;  %v7659_v18 = vld [vmem:[#allocation13 + $0xc] ss:$28 sps:$4 sm:$0xff]  }
 0x366   :  { %5836 = vmatprep.subr.bf16.mxu0 %v7611_v19  ;;  %5871 = vmatprep.subr.bf16.mxu1 %v7680_v20  ;;  %v7657_v19 = vld [vmem:[#allocation13 + $0x8] ss:$28 sps:$4 sm:$0xff]   ;;  %v7665_v20 = vld [vmem:[#allocation13 + $0x354] ss:$28 sps:$4 sm:$0xff]  }
 0x369   :  { %5837 = vmatpush2.bf16.msra.mxu0 %v7609_v21  ;;  %5872 = vmatpush2.bf16.msra.mxu1 %v7678_v22  ;;  %v7663_v21 = vld [vmem:[#allocation13 + $0x350] ss:$28 sps:$4 sm:$0xff]   ;;  %v7671_v22 = vld [vmem:[#allocation13 + $0x31c] ss:$28 sps:$4 sm:$0xff]  }
 0x36a   :  { %5892 = vmatprep.subr.bf16.mxu0 %v7617_v23  ;;  %5873 = vmatprep.subr.bf16.mxu1 %v7686_v24  ;;  %v7669_v23 = vld [vmem:[#allocation13 + $0x318] ss:$28 sps:$4 sm:$0xff]   ;;  %v7677_v24 = vld [vmem:[#allocation13 + $0x2e4] ss:$28 sps:$4 sm:$0xff]  }
 0x36c   :  { %v2705_v33 = vpop.f32.mrf.mxu0 }
 0x36d   :  { %v2748_v36 = vpop.f32.mrf.mxu1  ;;  %5874 = vmatpush2.bf16.msra.mxu1 %v7684_v27  ;;  %v2706_v50 = vadd.f32 %v2705_v33, %v1198_v31  ;;  %v7675_v27 = vld [vmem:[#allocation13 + $0x2e0] ss:$28 sps:$4 sm:$0xff]   ;;  %v1209_v33 = vsub.s32 7, %v8443_v38 }
 0x36e   :  { %v2707_v40 = vpop.f32.mrf.mxu0  ;;  %5875 = vmatprep.subr.bf16.mxu1 %v7692_v28  ;;  %v7683_v28 = vld [vmem:[#allocation13 + $0x2ac] ss:$28 sps:$4 sm:$0xff]  }
 0x36f   :  { %v2708_v46 = vadd.f32 %v2707_v40, %v1202_v30  ;;  %v2750_v44 = vpop.f32.mrf.mxu1  ;;  %v2749_v45 = vadd.f32 %v2748_v36, %v2706_v50  ;;  %v1205_v36 = vsub.s32 6, %v8443_v38  ;;  %v7695_v40 = vld [vmem:[#allocation13 + $0x23c] ss:$28 sps:$4 sm:$0xff]  }
 0x370   :  { %v2709_v51 = vpop.f32.mrf.mxu0 }
 0x371   :  { %v2710_v49 = vadd.f32 %v2709_v51, %v1198_v31  ;;  %v2752_v47 = vpop.f32.mrf.mxu1  ;;  %5876 = vmatpush2.bf16.msra.mxu1 %v7690_v39  ;;  %v2751_v55 = vadd.f32 %v2750_v44, %v2708_v46  ;;  %v2847_v1 = vmax.f32 %v2749_v45, 0.0  ;;  %v7689_v31 = vld [vmem:[#allocation13 + $0x274] ss:$28 sps:$4 sm:$0xff]   ;;  %v1206_v46 = vrot.slane %v8485_v29, %v1205_v36  ;;  %v7699_v45 = vld [vmem:[#allocation13 + $0x200] ss:$28 sps:$4 sm:$0xff]  }
 0x372   :  { %v2711_v53 = vpop.f32.mrf.mxu0  ;;  %5877 = vmatprep.subr.bf16.mxu1 %v7698_v42  ;;  %v7687_v39 = vld [vmem:[#allocation13 + $0x270] ss:$28 sps:$4 sm:$0xff]   ;;  %v1210_v42 = vrot.slane %v8485_v29, %v1209_v33  ;;  %v7693_v51 = vld [vmem:[#allocation13 + $0x238] ss:$28 sps:$4 sm:$0xff]  }
 0x373   :  { %v2753_v56 = vadd.f32 %v2752_v47, %v2710_v49  ;;  %v2712_v57 = vadd.f32 %v2711_v53, %v1202_v30  ;;  %v2754_v58 = vpop.f32.mrf.mxu1  ;;  %v2848_v62 = vmax.f32 %v2751_v55, 0.0  ;;  %v7681_v30 = vld [vmem:[#allocation13 + $0x2a8] ss:$28 sps:$4 sm:$0xff]   ;;  %v7735_v33 = vld [vmem:[#allocation13 + $0x7b0] ss:$28 sps:$4 sm:$0xff]  }
 0x374   :  { %v7701_v47 = vld [vmem:[#allocation13 + $0x204] ss:$28 sps:$4 sm:$0xff]  }
 0x375   :  { %v2755_v59 = vadd.f32 %v2754_v58, %v2712_v57  ;;  %5878 = vmatpush2.bf16.msra.mxu1 %v7696_v52  ;;  %v2855_v61 = vmax.f32 %v2753_v56, 0.0 }
 0x376   :  { %5879 = vmatprep.subr.bf16.mxu1 %v7704_v54 }
 0x377   :  { %v2856_v48 = vmax.f32 %v2755_v59, 0.0  ;;  %v8531_v3 = vpack.c.bf16 %v2855_v61, %v2847_v1  ;;  %v7707_v59 = vld [vmem:[#allocation13 + $0x1cc] ss:$28 sps:$4 sm:$0xff]  }
 0x378   :  { %v7705_v1 = vld [vmem:[#allocation13 + $0x1c8] ss:$28 sps:$4 sm:$0xff]  }
 0x379   :  { %v8529_v35 = vpack.c.bf16 %v2856_v48, %v2848_v62  ;;  %5880 = vmatpush2.bf16.msra.mxu1 %v7702_v60 }
 0x37a   :  { %5935 = vmatprep.subr.bf16.mxu1 %v7710_v34 }
 0x37b   :  { %5838 = vmatprep.mubr.bf16.mxu0 %v8529_v35 }
 0x37c   :  { %5839 = vmatmul.mubr.bf16.vlgmr.msra.gmra.mxu0 %v8531_v3 }
 0x37d   :  { %5893 = vmatpush1.bf16.msra.mxu0 %v7615_v2  ;;  %5924 = vmatprep.mubr.bf16.mxu0 %v8499_v63 }
 0x37e   :  { %5894 = vmatprep.subr.bf16.mxu0 %v7623_v4  ;;  %v7713_v4 = vld [vmem:[#allocation13 + $0x894] ss:$28 sps:$4 sm:$0xff]  }
 0x381   :  { %5895 = vmatpush1.bf16.msra.mxu0 %v7621_v5 }
 0x382   :  { %5896 = vmatprep.subr.bf16.mxu0 %v7629_v6 }
 0x385   :  { %5897 = vmatpush1.bf16.msra.mxu0 %v7627_v7 }
 0x386   :  { %5898 = vmatprep.subr.bf16.mxu0 %v7635_v10 }
 0x389   :  { %5899 = vmatpush1.bf16.msra.mxu0 %v7633_v11  ;;  %v7708_v11 = vld [vmem:[#allocation13 + $0x510] ss:$28 sps:$4 sm:$0xff]  }
 0x38a   :  { %5900 = vmatprep.subr.bf16.mxu0 %v7641_v12  ;;  %v7711_v12 = vld [vmem:[#allocation13 + $0x890] ss:$28 sps:$4 sm:$0xff]  }
 0x38d   :  { %5901 = vmatpush1.bf16.msra.mxu0 %v7639_v13 }
 0x38e   :  { %5902 = vmatprep.subr.bf16.mxu0 %v7647_v14  ;;  %v7716_v14 = vld [vmem:[#allocation13 + $0x4dc] ss:$28 sps:$4 sm:$0xff]  }
 0x391   :  { %5903 = vmatpush1.bf16.msra.mxu0 %v7645_v15  ;;  %v7719_v15 = vld [vmem:[#allocation13 + $0x85c] ss:$28 sps:$4 sm:$0xff]  }
 0x392   :  { %5904 = vmatprep.subr.bf16.mxu0 %v7653_v16  ;;  %v7714_v16 = vld [vmem:[#allocation13 + $0x4d8] ss:$28 sps:$4 sm:$0xff]  }
 0x395   :  { %5905 = vmatpush1.bf16.msra.mxu0 %v7651_v17  ;;  %v7717_v17 = vld [vmem:[#allocation13 + $0x858] ss:$28 sps:$4 sm:$0xff]  }
 0x396   :  { %5906 = vmatprep.subr.bf16.mxu0 %v7659_v18  ;;  %v7722_v18 = vld [vmem:[#allocation13 + $0x4a4] ss:$28 sps:$4 sm:$0xff]  }
 0x399   :  { %5907 = vmatpush1.bf16.msra.mxu0 %v7657_v19  ;;  %v7725_v19 = vld [vmem:[#allocation13 + $0x824] ss:$28 sps:$4 sm:$0xff]  }
 0x39a   :  { %5908 = vmatprep.subr.bf16.mxu0 %v7665_v20  ;;  %v7720_v20 = vld [vmem:[#allocation13 + $0x4a0] ss:$28 sps:$4 sm:$0xff]  }
 0x39d   :  { %5909 = vmatpush2.bf16.msra.mxu0 %v7663_v21  ;;  %v7723_v21 = vld [vmem:[#allocation13 + $0x820] ss:$28 sps:$4 sm:$0xff]  }
 0x39e   :  { %5910 = vmatprep.subr.bf16.mxu0 %v7671_v22  ;;  %v7728_v22 = vld [vmem:[#allocation13 + $0x46c] ss:$28 sps:$4 sm:$0xff]  }
 0x3a1   :  { %5911 = vmatpush2.bf16.msra.mxu0 %v7669_v23  ;;  %v7731_v23 = vld [vmem:[#allocation13 + $0x7ec] ss:$28 sps:$4 sm:$0xff]  }
 0x3a2   :  { %5912 = vmatprep.subr.bf16.mxu0 %v7677_v24  ;;  %v7726_v24 = vld [vmem:[#allocation13 + $0x468] ss:$28 sps:$4 sm:$0xff]  }
 0x3a5   :  { %5913 = vmatpush2.bf16.msra.mxu0 %v7675_v27  ;;  %v7729_v27 = vld [vmem:[#allocation13 + $0x7e8] ss:$28 sps:$4 sm:$0xff]  }
 0x3a6   :  { %5914 = vmatprep.subr.bf16.mxu0 %v7683_v28  ;;  %v7734_v28 = vld [vmem:[#allocation13 + $0x434] ss:$28 sps:$4 sm:$0xff]  }
 0x3a9   :  { %5915 = vmatpush2.bf16.msra.mxu0 %v7681_v30  ;;  %v7737_v30 = vld [vmem:[#allocation13 + $0x7b4] ss:$28 sps:$4 sm:$0xff]  }
 0x3aa   :  { %5916 = vmatprep.subr.bf16.mxu0 %v7689_v31  ;;  %v7732_v31 = vld [vmem:[#allocation13 + $0x430] ss:$28 sps:$4 sm:$0xff]  }
 0x3ac   :  { %v2791_v44 = vpop.f32.mrf.mxu0 }
 0x3ad   :  { %v2834_v50 = vpop.f32.mrf.mxu1  ;;  %5917 = vmatpush2.bf16.msra.mxu0 %v7687_v39  ;;  %v2792_v54 = vadd.f32 %v2791_v44, %v1206_v46  ;;  %v7740_v39 = vld [vmem:[#allocation13 + $0x3fc] ss:$28 sps:$4 sm:$0xff]   ;;  %v7746_v44 = vld [vmem:[#allocation13 + $0x3c4] ss:$28 sps:$4 sm:$0xff]  }
 0x3ae   :  { %v2793_v49 = vpop.f32.mrf.mxu0  ;;  %5918 = vmatprep.subr.bf16.mxu0 %v7695_v40  ;;  %v7743_v40 = vld [vmem:[#allocation13 + $0x77c] ss:$28 sps:$4 sm:$0xff]  }
 0x3af   :  { %v2794_v52 = vadd.f32 %v2793_v49, %v1210_v42  ;;  %v2836_v53 = vpop.f32.mrf.mxu1  ;;  %v2835_v34 = vadd.f32 %v2834_v50, %v2792_v54  ;;  %v7749_v50 = vld [vmem:[#allocation13 + $0x744] ss:$28 sps:$4 sm:$0xff]  }
 0x3b0   :  { %v2795_v55 = vpop.f32.mrf.mxu0  ;;  %v7747_v49 = vld [vmem:[#allocation13 + $0x740] ss:$28 sps:$4 sm:$0xff]   ;;  %v7753_v54 = vld [vmem:[#allocation13 + $0x708] ss:$28 sps:$4 sm:$0xff]  }
 0x3b1   :  { %v2796_v56 = vadd.f32 %v2795_v55, %v1206_v46  ;;  %v2838_v57 = vpop.f32.mrf.mxu1  ;;  %5919 = vmatpush2.bf16.msra.mxu0 %v7693_v51  ;;  %v2837_v60 = vadd.f32 %v2836_v53, %v2794_v52  ;;  %v2849_v7 = vmax.f32 %v2835_v34, 0.0  ;;  %v7741_v46 = vld [vmem:[#allocation13 + $0x778] ss:$28 sps:$4 sm:$0xff]   ;;  %v7744_v51 = vld [vmem:[#allocation13 + $0x3c0] ss:$28 sps:$4 sm:$0xff]  }
 0x3b2   :  { %v2797_v58 = vpop.f32.mrf.mxu0  ;;  %5920 = vmatprep.subr.bf16.mxu0 %v7701_v47  ;;  %v7752_v47 = vld [vmem:[#allocation13 + $0x38c] ss:$28 sps:$4 sm:$0xff]   ;;  %v7758_v55 = vld [vmem:[#allocation13 + $0x6d4] ss:$28 sps:$4 sm:$0xff]   ;;  %v7773_v34 = vld [vmem:[#allocation13 + $0x9e4] ss:$28 sps:$4 sm:$0xff]  }
 0x3b3   :  { %v2839_v29 = vadd.f32 %v2838_v57, %v2796_v56  ;;  %v2798_v61 = vadd.f32 %v2797_v58, %v1210_v42  ;;  %v2840_v62 = vpop.f32.mrf.mxu1  ;;  %v2850_v5 = vmax.f32 %v2837_v60, 0.0  ;;  %v7738_v42 = vld [vmem:[#allocation13 + $0x3f8] ss:$28 sps:$4 sm:$0xff]   ;;  %v7755_v52 = vld [vmem:[#allocation13 + $0x70c] ss:$28 sps:$4 sm:$0xff]  }
 0x3b4   :  { %v7750_v53 = vld [vmem:[#allocation13 + $0x388] ss:$28 sps:$4 sm:$0xff]   ;;  %v7761_v56 = vld [vmem:[#allocation13 + $0xa54] ss:$28 sps:$4 sm:$0xff]   ;;  %v7764_v58 = vld [vmem:[#allocation13 + $0x69c] ss:$28 sps:$4 sm:$0xff]  }
 0x3b5   :  { %v2841_v48 = vadd.f32 %v2840_v62, %v2798_v61  ;;  %5921 = vmatpush2.bf16.msra.mxu0 %v7699_v45  ;;  %v2857_v2 = vmax.f32 %v2839_v29, 0.0  ;;  %v7756_v57 = vld [vmem:[#allocation13 + $0x6d0] ss:$28 sps:$4 sm:$0xff]   ;;  %v7762_v60 = vld [vmem:[#allocation13 + $0x698] ss:$28 sps:$4 sm:$0xff]  }
 0x3b6   :  { %5922 = vmatprep.subr.bf16.mxu0 %v7707_v59  ;;  %v7759_v45 = vld [vmem:[#allocation13 + $0xa50] ss:$28 sps:$4 sm:$0xff]   ;;  %v7767_v59 = vld [vmem:[#allocation13 + $0xa1c] ss:$28 sps:$4 sm:$0xff]   ;;  %v7770_v61 = vld [vmem:[#allocation13 + $0x664] ss:$28 sps:$4 sm:$0xff]  }
 0x3b7   :  { %v2858_v6 = vmax.f32 %v2841_v48, 0.0  ;;  %v8544_v13 = vpack.c.bf16 %v2857_v2, %v2849_v7  ;;  %v7765_v29 = vld [vmem:[#allocation13 + $0xa18] ss:$28 sps:$4 sm:$0xff]   ;;  %v7768_v62 = vld [vmem:[#allocation13 + $0x660] ss:$28 sps:$4 sm:$0xff]  }
 0x3b8   :  { %v7771_v48 = vld [vmem:[#allocation13 + $0x9e0] ss:$28 sps:$4 sm:$0xff]   ;;  %v7779_v2 = vld [vmem:[#allocation13 + $0x9ac] ss:$28 sps:$4 sm:$0xff]   ;;  %v7785_v7 = vld [vmem:[#allocation13 + $0x974] ss:$28 sps:$4 sm:$0xff]  }
 0x3b9   :  { %v8542_v10 = vpack.c.bf16 %v2858_v6, %v2850_v5  ;;  %5923 = vmatpush2.bf16.msra.mxu0 %v7705_v1  ;;  %v7776_v1 = vld [vmem:[#allocation13 + $0x62c] ss:$28 sps:$4 sm:$0xff]   ;;  %v7782_v6 = vld [vmem:[#allocation13 + $0x5f4] ss:$28 sps:$4 sm:$0xff]  }
 0x3ba   :  { %5978 = vmatprep.subr.bf16.mxu0 %v7713_v4  ;;  %v7774_v4 = vld [vmem:[#allocation13 + $0x628] ss:$28 sps:$4 sm:$0xff]  }
 0x3bb   :  { %5881 = vmatprep.mubr.bf16.mxu1 %v8542_v10  ;;  %v7777_v5 = vld [vmem:[#allocation13 + $0x9a8] ss:$28 sps:$4 sm:$0xff]  }
 0x3bc   :  { %5925 = vmatmul.mubr.bf16.vlgmr.msra.gmra.mxu0 %v8508_v0  ;;  %5882 = vmatmul.mubr.bf16.vlgmr.msra.gmra.mxu1 %v8544_v13 }
 0x3bd   :  { %5936 = vmatpush1.bf16.msra.mxu1 %v7708_v11  ;;  %5979 = vmatpush1.bf16.msra.mxu0 %v7711_v12  ;;  %v7780_v11 = vld [vmem:[#allocation13 + $0x5f0] ss:$28 sps:$4 sm:$0xff]  }
 0x3be   :  { %6010 = vmatprep.mubr.bf16.mxu0 %v8529_v35  ;;  %5967 = vmatprep.mubr.bf16.mxu1 %v8515_v32  ;;  %v7783_v12 = vld [vmem:[#allocation13 + $0x970] ss:$28 sps:$4 sm:$0xff]  }
 0x3bf   :  { %5937 = vmatprep.subr.bf16.mxu1 %v7716_v14  ;;  %5980 = vmatprep.subr.bf16.mxu0 %v7719_v15  ;;  %v7788_v14 = vld [vmem:[#allocation13 + $0x5bc] ss:$28 sps:$4 sm:$0xff]  }
 0x3c0   :  { %v7791_v15 = vld [vmem:[#allocation13 + $0x93c] ss:$28 sps:$4 sm:$0xff]  }
 0x3c1   :  { %5938 = vmatpush1.bf16.msra.mxu1 %v7714_v16  ;;  %5981 = vmatpush1.bf16.msra.mxu0 %v7717_v17  ;;  %v7786_v16 = vld [vmem:[#allocation13 + $0x5b8] ss:$28 sps:$4 sm:$0xff]  }
 0x3c2   :  { %5939 = vmatprep.subr.bf16.mxu1 %v7722_v18  ;;  %5982 = vmatprep.subr.bf16.mxu0 %v7725_v19  ;;  %v7789_v17 = vld [vmem:[#allocation13 + $0x938] ss:$28 sps:$4 sm:$0xff]   ;;  %v7794_v18 = vld [vmem:[#allocation13 + $0x584] ss:$28 sps:$4 sm:$0xff]  }
 0x3c3   :  { %v7797_v19 = vld [vmem:[#allocation13 + $0x904] ss:$28 sps:$4 sm:$0xff]  }
 0x3c5   :  { %5940 = vmatpush1.bf16.msra.mxu1 %v7720_v20  ;;  %5983 = vmatpush1.bf16.msra.mxu0 %v7723_v21  ;;  %v7792_v20 = vld [vmem:[#allocation13 + $0x580] ss:$28 sps:$4 sm:$0xff]  }
 0x3c6   :  { %5941 = vmatprep.subr.bf16.mxu1 %v7728_v22  ;;  %5984 = vmatprep.subr.bf16.mxu0 %v7731_v23  ;;  %v7795_v21 = vld [vmem:[#allocation13 + $0x900] ss:$28 sps:$4 sm:$0xff]   ;;  %v7800_v22 = vld [vmem:[#allocation13 + $0x54c] ss:$28 sps:$4 sm:$0xff]  }
 0x3c7   :  { %v7803_v23 = vld [vmem:[#allocation13 + $0x8cc] ss:$28 sps:$4 sm:$0xff]  }
 0x3c9   :  { %5942 = vmatpush1.bf16.msra.mxu1 %v7726_v24  ;;  %5985 = vmatpush1.bf16.msra.mxu0 %v7729_v27  ;;  %v7798_v24 = vld [vmem:[#allocation13 + $0x548] ss:$28 sps:$4 sm:$0xff]  }
 0x3ca   :  { %5943 = vmatprep.subr.bf16.mxu1 %v7734_v28  ;;  %5986 = vmatprep.subr.bf16.mxu0 %v7737_v30  ;;  %v7801_v27 = vld [vmem:[#allocation13 + $0x8c8] ss:$28 sps:$4 sm:$0xff]   ;;  %v7806_v28 = vld [vmem:[#allocation13 + $0xc14] ss:$28 sps:$4 sm:$0xff]   ;;  %v7809_v30 = vld [vmem:[#allocation13 + $0x19c] ss:$28 sps:$4 sm:$0xff]  }
 0x3cd   :  { %5944 = vmatpush1.bf16.msra.mxu1 %v7732_v31  ;;  %5987 = vmatpush1.bf16.msra.mxu0 %v7735_v33  ;;  %v7804_v31 = vld [vmem:[#allocation13 + $0xc10] ss:$28 sps:$4 sm:$0xff]   ;;  %v7807_v33 = vld [vmem:[#allocation13 + $0x198] ss:$28 sps:$4 sm:$0xff]  }
 0x3ce   :  { %5945 = vmatprep.subr.bf16.mxu1 %v7740_v39  ;;  %5988 = vmatprep.subr.bf16.mxu0 %v7743_v40  ;;  %v7812_v39 = vld [vmem:[#allocation13 + $0xbdc] ss:$28 sps:$4 sm:$0xff]   ;;  %v7815_v40 = vld [vmem:[#allocation13 + $0x164] ss:$28 sps:$4 sm:$0xff]  }
 0x3d1   :  { %5946 = vmatpush1.bf16.msra.mxu1 %v7738_v42  ;;  %5989 = vmatpush1.bf16.msra.mxu0 %v7741_v46  ;;  %v7810_v42 = vld [vmem:[#allocation13 + $0xbd8] ss:$28 sps:$4 sm:$0xff]   ;;  %v7813_v46 = vld [vmem:[#allocation13 + $0x160] ss:$28 sps:$4 sm:$0xff]  }
 0x3d2   :  { %5947 = vmatprep.subr.bf16.mxu1 %v7746_v44  ;;  %5990 = vmatprep.subr.bf16.mxu0 %v7749_v50  ;;  %v7818_v44 = vld [vmem:[#allocation13 + $0xba4] ss:$28 sps:$4 sm:$0xff]   ;;  %v7821_v50 = vld [vmem:[#allocation13 + $0x12c] ss:$28 sps:$4 sm:$0xff]  }
 0x3d5   :  { %5948 = vmatpush1.bf16.msra.mxu1 %v7744_v51  ;;  %5991 = vmatpush1.bf16.msra.mxu0 %v7747_v49  ;;  %v7816_v51 = vld [vmem:[#allocation13 + $0xba0] ss:$28 sps:$4 sm:$0xff]   ;;  %v7819_v49 = vld [vmem:[#allocation13 + $0x128] ss:$28 sps:$4 sm:$0xff]  }
 0x3d6   :  { %5949 = vmatprep.subr.bf16.mxu1 %v7752_v47  ;;  %5992 = vmatprep.subr.bf16.mxu0 %v7755_v52  ;;  %v7824_v47 = vld [vmem:[#allocation13 + $0xb6c] ss:$28 sps:$4 sm:$0xff]   ;;  %v7827_v52 = vld [vmem:[#allocation13 + $0xf4] ss:$28 sps:$4 sm:$0xff]  }
 0x3d9   :  { %5950 = vmatpush1.bf16.msra.mxu1 %v7750_v53  ;;  %5993 = vmatpush1.bf16.msra.mxu0 %v7753_v54  ;;  %v7822_v53 = vld [vmem:[#allocation13 + $0xb68] ss:$28 sps:$4 sm:$0xff]   ;;  %v7825_v54 = vld [vmem:[#allocation13 + $0xf0] ss:$28 sps:$4 sm:$0xff]  }
 0x3da   :  { %5951 = vmatprep.subr.bf16.mxu1 %v7758_v55  ;;  %5994 = vmatprep.subr.bf16.mxu0 %v7761_v56  ;;  %v7830_v55 = vld [vmem:[#allocation13 + $0xb34] ss:$28 sps:$4 sm:$0xff]   ;;  %v7833_v56 = vld [vmem:[#allocation13 + $0xbc] ss:$28 sps:$4 sm:$0xff]  }
 0x3dd   :  { %5952 = vmatpush2.bf16.msra.mxu1 %v7756_v57  ;;  %5995 = vmatpush2.bf16.msra.mxu0 %v7759_v45  ;;  %v7828_v57 = vld [vmem:[#allocation13 + $0xb30] ss:$28 sps:$4 sm:$0xff]   ;;  %v7831_v45 = vld [vmem:[#allocation13 + $0xb8] ss:$28 sps:$4 sm:$0xff]  }
 0x3de   :  { %5953 = vmatprep.subr.bf16.mxu1 %v7764_v58  ;;  %5996 = vmatprep.subr.bf16.mxu0 %v7767_v59  ;;  %v7836_v58 = vld [vmem:[#allocation13 + $0xafc] ss:$28 sps:$4 sm:$0xff]   ;;  %v7839_v59 = vld [vmem:[#allocation13 + $0x84] ss:$28 sps:$4 sm:$0xff]  }
 0x3e1   :  { %5954 = vmatpush2.bf16.msra.mxu1 %v7762_v60  ;;  %5997 = vmatpush2.bf16.msra.mxu0 %v7765_v29  ;;  %v7834_v60 = vld [vmem:[#allocation13 + $0xaf8] ss:$28 sps:$4 sm:$0xff]   ;;  %v7837_v29 = vld [vmem:[#allocation13 + $0x80] ss:$28 sps:$4 sm:$0xff]  }
 0x3e2   :  { %5955 = vmatprep.subr.bf16.mxu1 %v7770_v61  ;;  %5998 = vmatprep.subr.bf16.mxu0 %v7773_v34  ;;  %v7842_v61 = vld [vmem:[#allocation13 + $0xac4] ss:$28 sps:$4 sm:$0xff]   ;;  %v7845_v34 = vld [vmem:[#allocation13 + $0x4c] ss:$28 sps:$4 sm:$0xff]  }
 0x3e5   :  { %5956 = vmatpush2.bf16.msra.mxu1 %v7768_v62  ;;  %5999 = vmatpush2.bf16.msra.mxu0 %v7771_v48  ;;  %v7840_v62 = vld [vmem:[#allocation13 + $0xac0] ss:$28 sps:$4 sm:$0xff]   ;;  %v7843_v48 = vld [vmem:[#allocation13 + $0x48] ss:$28 sps:$4 sm:$0xff]  }
 0x3e6   :  { %5957 = vmatprep.subr.bf16.mxu1 %v7776_v1  ;;  %6000 = vmatprep.subr.bf16.mxu0 %v7779_v2  ;;  %v7848_v1 = vld [vmem:[#allocation13 + $0xa8c] ss:$28 sps:$4 sm:$0xff]   ;;  %v7851_v2 = vld [vmem:[#allocation13 + $0x14] ss:$28 sps:$4 sm:$0xff]  }
 0x3e9   :  { %5958 = vmatpush2.bf16.msra.mxu1 %v7774_v4  ;;  %6001 = vmatpush2.bf16.msra.mxu0 %v7777_v5  ;;  %v7846_v4 = vld [vmem:[#allocation13 + $0xa88] ss:$28 sps:$4 sm:$0xff]   ;;  %v7849_v5 = vld [vmem:[#allocation13 + $0x10] ss:$28 sps:$4 sm:$0xff]  }
 0x3ea   :  { %5959 = vmatprep.subr.bf16.mxu1 %v7782_v6  ;;  %6002 = vmatprep.subr.bf16.mxu0 %v7785_v7  ;;  %v7854_v6 = vld [vmem:[#allocation13 + $0xdd4] ss:$28 sps:$4 sm:$0xff]   ;;  %v7857_v7 = vld [vmem:[#allocation13 + $0x35c] ss:$28 sps:$4 sm:$0xff]  }
 0x3ed   :  { %5960 = vmatpush2.bf16.msra.mxu1 %v7780_v11  ;;  %6003 = vmatpush2.bf16.msra.mxu0 %v7783_v12  ;;  %v7852_v11 = vld [vmem:[#allocation13 + $0xdd0] ss:$28 sps:$4 sm:$0xff]   ;;  %v7855_v12 = vld [vmem:[#allocation13 + $0x358] ss:$28 sps:$4 sm:$0xff]  }
 0x3ee   :  { %5961 = vmatprep.subr.bf16.mxu1 %v7788_v14  ;;  %6004 = vmatprep.subr.bf16.mxu0 %v7791_v15  ;;  %v7860_v14 = vld [vmem:[#allocation13 + $0xd9c] ss:$28 sps:$4 sm:$0xff]   ;;  %v7863_v15 = vld [vmem:[#allocation13 + $0x324] ss:$28 sps:$4 sm:$0xff]  }
 0x3f1   :  { %5962 = vmatpush2.bf16.msra.mxu1 %v7786_v16  ;;  %6005 = vmatpush2.bf16.msra.mxu0 %v7789_v17  ;;  %v7858_v16 = vld [vmem:[#allocation13 + $0xd98] ss:$28 sps:$4 sm:$0xff]   ;;  %v7861_v17 = vld [vmem:[#allocation13 + $0x320] ss:$28 sps:$4 sm:$0xff]  }
 0x3f2   :  { %5963 = vmatprep.subr.bf16.mxu1 %v7794_v18  ;;  %6006 = vmatprep.subr.bf16.mxu0 %v7797_v19  ;;  %v7866_v18 = vld [vmem:[#allocation13 + $0xd64] ss:$28 sps:$4 sm:$0xff]   ;;  %v7869_v19 = vld [vmem:[#allocation13 + $0x2ec] ss:$28 sps:$4 sm:$0xff]  }
 0x3f5   :  { %5964 = vmatpush2.bf16.msra.mxu1 %v7792_v20  ;;  %6007 = vmatpush2.bf16.msra.mxu0 %v7795_v21  ;;  %v7864_v20 = vld [vmem:[#allocation13 + $0xd60] ss:$28 sps:$4 sm:$0xff]   ;;  %v7867_v21 = vld [vmem:[#allocation13 + $0x2e8] ss:$28 sps:$4 sm:$0xff]  }
 0x3f6   :  { %5965 = vmatprep.subr.bf16.mxu1 %v7800_v22  ;;  %6008 = vmatprep.subr.bf16.mxu0 %v7803_v23  ;;  %v7872_v22 = vld [vmem:[#allocation13 + $0xd2c] ss:$28 sps:$4 sm:$0xff]   ;;  %v7875_v23 = vld [vmem:[#allocation13 + $0x2b4] ss:$28 sps:$4 sm:$0xff]  }
 0x3f9   :  { %5966 = vmatpush2.bf16.msra.mxu1 %v7798_v24  ;;  %6009 = vmatpush2.bf16.msra.mxu0 %v7801_v27  ;;  %v7870_v24 = vld [vmem:[#allocation13 + $0xd28] ss:$28 sps:$4 sm:$0xff]   ;;  %v7873_v27 = vld [vmem:[#allocation13 + $0x2b0] ss:$28 sps:$4 sm:$0xff]  }
 0x3fa   :  { %6021 = vmatprep.subr.bf16.mxu1 %v7806_v28  ;;  %6064 = vmatprep.subr.bf16.mxu0 %v7809_v30  ;;  %v7878_v28 = vld [vmem:[#allocation13 + $0xcf4] ss:$28 sps:$4 sm:$0xff]   ;;  %v7881_v30 = vld [vmem:[#allocation13 + $0x27c] ss:$28 sps:$4 sm:$0xff]  }
 0x3fc   :  { %5968 = vmatmul.mubr.bf16.vlgmr.msra.gmra.mxu1 %v8517_v37  ;;  %6011 = vmatmul.mubr.bf16.vlgmr.msra.gmra.mxu0 %v8531_v3 }
 0x3fd   :  { %6022 = vmatpush1.bf16.msra.mxu1 %v7804_v31  ;;  %6053 = vmatprep.mubr.bf16.mxu1 %v8542_v10  ;;  %v7876_v31 = vld [vmem:[#allocation13 + $0xcf0] ss:$28 sps:$4 sm:$0xff]  }
 0x3fe   :  { %6065 = vmatpush1.bf16.msra.mxu0 %v7807_v33  ;;  %6096 = vmatprep.mubr.bf16.mxu0 %v8499_v63  ;;  %v7879_v33 = vld [vmem:[#allocation13 + $0x278] ss:$28 sps:$4 sm:$0xff]  }
 0x3ff   :  { %6023 = vmatprep.subr.bf16.mxu1 %v7812_v39  ;;  %6066 = vmatprep.subr.bf16.mxu0 %v7815_v40  ;;  %v7884_v39 = vld [vmem:[#allocation13 + $0xcbc] ss:$28 sps:$4 sm:$0xff]   ;;  %v7887_v40 = vld [vmem:[#allocation13 + $0x244] ss:$28 sps:$4 sm:$0xff]  }
 0x401   :  { %6024 = vmatpush1.bf16.msra.mxu1 %v7810_v42  ;;  %v7882_v42 = vld [vmem:[#allocation13 + $0xcb8] ss:$28 sps:$4 sm:$0xff]  }
 0x402   :  { %6067 = vmatpush1.bf16.msra.mxu0 %v7813_v46  ;;  %6025 = vmatprep.subr.bf16.mxu1 %v7818_v44  ;;  %v7885_v46 = vld [vmem:[#allocation13 + $0x240] ss:$28 sps:$4 sm:$0xff]  }
 0x403   :  { %6068 = vmatprep.subr.bf16.mxu0 %v7821_v50  ;;  %v7890_v44 = vld [vmem:[#allocation13 + $0xc84] ss:$28 sps:$4 sm:$0xff]   ;;  %v7893_v50 = vld [vmem:[#allocation13 + $0x20c] ss:$28 sps:$4 sm:$0xff]  }
 0x405   :  { %6026 = vmatpush1.bf16.msra.mxu1 %v7816_v51  ;;  %v7888_v51 = vld [vmem:[#allocation13 + $0xc80] ss:$28 sps:$4 sm:$0xff]  }
 0x406   :  { %6069 = vmatpush1.bf16.msra.mxu0 %v7819_v49  ;;  %6027 = vmatprep.subr.bf16.mxu1 %v7824_v47  ;;  %v7891_v49 = vld [vmem:[#allocation13 + $0x208] ss:$28 sps:$4 sm:$0xff]  }
 0x407   :  { %6070 = vmatprep.subr.bf16.mxu0 %v7827_v52  ;;  %v7896_v47 = vld [vmem:[#allocation13 + $0xc4c] ss:$28 sps:$4 sm:$0xff]   ;;  %v7899_v52 = vld [vmem:[#allocation13 + $0x1d4] ss:$28 sps:$4 sm:$0xff]  }
 0x409   :  { %6028 = vmatpush1.bf16.msra.mxu1 %v7822_v53  ;;  %v7894_v53 = vld [vmem:[#allocation13 + $0xc48] ss:$28 sps:$4 sm:$0xff]  }
 0x40a   :  { %6071 = vmatpush1.bf16.msra.mxu0 %v7825_v54  ;;  %6029 = vmatprep.subr.bf16.mxu1 %v7830_v55  ;;  %v7897_v54 = vld [vmem:[#allocation13 + $0x1d0] ss:$28 sps:$4 sm:$0xff]   ;;  %v7902_v55 = vld [vmem:[#allocation13 + $0x51c] ss:$28 sps:$4 sm:$0xff]  }
 0x40b   :  { %6072 = vmatprep.subr.bf16.mxu0 %v7833_v56  ;;  %v7905_v56 = vld [vmem:[#allocation13 + $0x89c] ss:$28 sps:$4 sm:$0xff]  }
 0x40d   :  { %6030 = vmatpush1.bf16.msra.mxu1 %v7828_v57  ;;  %v7900_v57 = vld [vmem:[#allocation13 + $0x518] ss:$28 sps:$4 sm:$0xff]  }
 0x40e   :  { %6073 = vmatpush1.bf16.msra.mxu0 %v7831_v45  ;;  %6031 = vmatprep.subr.bf16.mxu1 %v7836_v58  ;;  %v7903_v45 = vld [vmem:[#allocation13 + $0x898] ss:$28 sps:$4 sm:$0xff]   ;;  %v7908_v58 = vld [vmem:[#allocation13 + $0x4e4] ss:$28 sps:$4 sm:$0xff]  }
 0x40f   :  { %6074 = vmatprep.subr.bf16.mxu0 %v7839_v59  ;;  %v7911_v59 = vld [vmem:[#allocation13 + $0x864] ss:$28 sps:$4 sm:$0xff]  }
 0x411   :  { %6032 = vmatpush1.bf16.msra.mxu1 %v7834_v60  ;;  %v7906_v60 = vld [vmem:[#allocation13 + $0x4e0] ss:$28 sps:$4 sm:$0xff]  }
 0x412   :  { %6075 = vmatpush1.bf16.msra.mxu0 %v7837_v29  ;;  %6033 = vmatprep.subr.bf16.mxu1 %v7842_v61  ;;  %v7909_v29 = vld [vmem:[#allocation13 + $0x860] ss:$28 sps:$4 sm:$0xff]   ;;  %v7914_v61 = vld [vmem:[#allocation13 + $0x4ac] ss:$28 sps:$4 sm:$0xff]  }
 0x413   :  { %6076 = vmatprep.subr.bf16.mxu0 %v7845_v34  ;;  %v7917_v34 = vld [vmem:[#allocation13 + $0x82c] ss:$28 sps:$4 sm:$0xff]  }
 0x415   :  { %6034 = vmatpush1.bf16.msra.mxu1 %v7840_v62  ;;  %v7912_v62 = vld [vmem:[#allocation13 + $0x4a8] ss:$28 sps:$4 sm:$0xff]  }
 0x416   :  { %6077 = vmatpush1.bf16.msra.mxu0 %v7843_v48  ;;  %6035 = vmatprep.subr.bf16.mxu1 %v7848_v1  ;;  %v7915_v48 = vld [vmem:[#allocation13 + $0x828] ss:$28 sps:$4 sm:$0xff]   ;;  %v7920_v1 = vld [vmem:[#allocation13 + $0x474] ss:$28 sps:$4 sm:$0xff]  }
 0x417   :  { %6078 = vmatprep.subr.bf16.mxu0 %v7851_v2  ;;  %v7923_v2 = vld [vmem:[#allocation13 + $0x7f4] ss:$28 sps:$4 sm:$0xff]  }
 0x419   :  { %6036 = vmatpush1.bf16.msra.mxu1 %v7846_v4  ;;  %v7918_v4 = vld [vmem:[#allocation13 + $0x470] ss:$28 sps:$4 sm:$0xff]  }
 0x41a   :  { %6079 = vmatpush1.bf16.msra.mxu0 %v7849_v5  ;;  %6037 = vmatprep.subr.bf16.mxu1 %v7854_v6  ;;  %v7921_v5 = vld [vmem:[#allocation13 + $0x7f0] ss:$28 sps:$4 sm:$0xff]   ;;  %v7926_v6 = vld [vmem:[#allocation13 + $0x43c] ss:$28 sps:$4 sm:$0xff]  }
 0x41b   :  { %6080 = vmatprep.subr.bf16.mxu0 %v7857_v7  ;;  %v7929_v7 = vld [vmem:[#allocation13 + $0x7bc] ss:$28 sps:$4 sm:$0xff]  }
 0x41d   :  { %6038 = vmatpush2.bf16.msra.mxu1 %v7852_v11  ;;  %v7924_v11 = vld [vmem:[#allocation13 + $0x438] ss:$28 sps:$4 sm:$0xff]  }
 0x41e   :  { %6081 = vmatpush2.bf16.msra.mxu0 %v7855_v12  ;;  %6039 = vmatprep.subr.bf16.mxu1 %v7860_v14  ;;  %v7927_v12 = vld [vmem:[#allocation13 + $0x7b8] ss:$28 sps:$4 sm:$0xff]   ;;  %v7932_v14 = vld [vmem:[#allocation13 + $0x404] ss:$28 sps:$4 sm:$0xff]  }
 0x41f   :  { %6082 = vmatprep.subr.bf16.mxu0 %v7863_v15  ;;  %v7935_v15 = vld [vmem:[#allocation13 + $0x784] ss:$28 sps:$4 sm:$0xff]  }
 0x421   :  { %6040 = vmatpush2.bf16.msra.mxu1 %v7858_v16  ;;  %v7930_v16 = vld [vmem:[#allocation13 + $0x400] ss:$28 sps:$4 sm:$0xff]  }
 0x422   :  { %6083 = vmatpush2.bf16.msra.mxu0 %v7861_v17  ;;  %6041 = vmatprep.subr.bf16.mxu1 %v7866_v18  ;;  %v7933_v17 = vld [vmem:[#allocation13 + $0x780] ss:$28 sps:$4 sm:$0xff]   ;;  %v7938_v18 = vld [vmem:[#allocation13 + $0x3cc] ss:$28 sps:$4 sm:$0xff]  }
 0x423   :  { %6084 = vmatprep.subr.bf16.mxu0 %v7869_v19  ;;  %v7941_v19 = vld [vmem:[#allocation13 + $0x74c] ss:$28 sps:$4 sm:$0xff]  }
 0x425   :  { %6042 = vmatpush2.bf16.msra.mxu1 %v7864_v20  ;;  %v7936_v20 = vld [vmem:[#allocation13 + $0x3c8] ss:$28 sps:$4 sm:$0xff]  }
 0x426   :  { %6085 = vmatpush2.bf16.msra.mxu0 %v7867_v21  ;;  %6043 = vmatprep.subr.bf16.mxu1 %v7872_v22  ;;  %v7939_v21 = vld [vmem:[#allocation13 + $0x748] ss:$28 sps:$4 sm:$0xff]   ;;  %v7944_v22 = vld [vmem:[#allocation13 + $0x394] ss:$28 sps:$4 sm:$0xff]  }
 0x427   :  { %6086 = vmatprep.subr.bf16.mxu0 %v7875_v23  ;;  %v7947_v23 = vld [vmem:[#allocation13 + $0x714] ss:$28 sps:$4 sm:$0xff]  }
 0x429   :  { %6044 = vmatpush2.bf16.msra.mxu1 %v7870_v24  ;;  %v7942_v24 = vld [vmem:[#allocation13 + $0x390] ss:$28 sps:$4 sm:$0xff]  }
 0x42a   :  { %6087 = vmatpush2.bf16.msra.mxu0 %v7873_v27  ;;  %6045 = vmatprep.subr.bf16.mxu1 %v7878_v28  ;;  %v7945_v27 = vld [vmem:[#allocation13 + $0x710] ss:$28 sps:$4 sm:$0xff]   ;;  %v7950_v28 = vld [vmem:[#allocation13 + $0x6dc] ss:$28 sps:$4 sm:$0xff]  }
 0x42b   :  { %6088 = vmatprep.subr.bf16.mxu0 %v7881_v30  ;;  %v7953_v30 = vld [vmem:[#allocation13 + $0xa5c] ss:$28 sps:$4 sm:$0xff]  }
 0x42d   :  { %6046 = vmatpush2.bf16.msra.mxu1 %v7876_v31  ;;  %v7948_v31 = vld [vmem:[#allocation13 + $0x6d8] ss:$28 sps:$4 sm:$0xff]  }
 0x42e   :  { %6089 = vmatpush2.bf16.msra.mxu0 %v7879_v33  ;;  %6047 = vmatprep.subr.bf16.mxu1 %v7884_v39  ;;  %v7951_v33 = vld [vmem:[#allocation13 + $0xa58] ss:$28 sps:$4 sm:$0xff]   ;;  %v7956_v39 = vld [vmem:[#allocation13 + $0x6a4] ss:$28 sps:$4 sm:$0xff]  }
 0x42f   :  { %6090 = vmatprep.subr.bf16.mxu0 %v7887_v40  ;;  %v7959_v40 = vld [vmem:[#allocation13 + $0xa24] ss:$28 sps:$4 sm:$0xff]  }
 0x431   :  { %6048 = vmatpush2.bf16.msra.mxu1 %v7882_v42  ;;  %v7954_v42 = vld [vmem:[#allocation13 + $0x6a0] ss:$28 sps:$4 sm:$0xff]  }
 0x432   :  { %6091 = vmatpush2.bf16.msra.mxu0 %v7885_v46  ;;  %6049 = vmatprep.subr.bf16.mxu1 %v7890_v44  ;;  %v7957_v46 = vld [vmem:[#allocation13 + $0xa20] ss:$28 sps:$4 sm:$0xff]   ;;  %v7962_v44 = vld [vmem:[#allocation13 + $0x66c] ss:$28 sps:$4 sm:$0xff]  }
 0x433   :  { %6092 = vmatprep.subr.bf16.mxu0 %v7893_v50  ;;  %v7965_v50 = vld [vmem:[#allocation13 + $0x9ec] ss:$28 sps:$4 sm:$0xff]  }
 0x435   :  { %6050 = vmatpush2.bf16.msra.mxu1 %v7888_v51  ;;  %v7960_v51 = vld [vmem:[#allocation13 + $0x668] ss:$28 sps:$4 sm:$0xff]  }
 0x436   :  { %6093 = vmatpush2.bf16.msra.mxu0 %v7891_v49  ;;  %6051 = vmatprep.subr.bf16.mxu1 %v7896_v47  ;;  %v7963_v49 = vld [vmem:[#allocation13 + $0x9e8] ss:$28 sps:$4 sm:$0xff]   ;;  %v7968_v47 = vld [vmem:[#allocation13 + $0x634] ss:$28 sps:$4 sm:$0xff]  }
 0x437   :  { %6094 = vmatprep.subr.bf16.mxu0 %v7899_v52  ;;  %v7971_v52 = vld [vmem:[#allocation13 + $0x9b4] ss:$28 sps:$4 sm:$0xff]  }
 0x439   :  { %6052 = vmatpush2.bf16.msra.mxu1 %v7894_v53  ;;  %v5754_v53 = vpop.f32.mrf.mxu0 }
 0x43a   :  { %6095 = vmatpush2.bf16.msra.mxu0 %v7897_v54  ;;  %6107 = vmatprep.subr.bf16.mxu1 %v7902_v55  ;;  %v7966_v54 = vld [vmem:[#allocation13 + $0x630] ss:$28 sps:$4 sm:$0xff]  }
 0x43b   :  { %6150 = vmatprep.subr.bf16.mxu0 %v7905_v56  ;;  %v7969_v55 = vld [vmem:[#allocation13 + $0x9b0] ss:$28 sps:$4 sm:$0xff]   ;;  %v7974_v56 = vld [vmem:[#allocation13 + $0x5fc] ss:$28 sps:$4 sm:$0xff]  }
 0x43c   :  { %6054 = vmatmul.mubr.bf16.vlgmr.msra.gmra.mxu1 %v8544_v13 }
 0x43d   :  { %6097 = vmatmul.mubr.bf16.vlgmr.msra.gmra.mxu0 %v8508_v0  ;;  %6108 = vmatpush1.bf16.msra.mxu1 %v7900_v57  ;;  %v7977_v57 = vld [vmem:[#allocation13 + $0x97c] ss:$28 sps:$4 sm:$0xff]  }
 0x43e   :  { %6139 = vmatprep.mubr.bf16.mxu1 %v8515_v32  ;;  %6151 = vmatpush1.bf16.msra.mxu0 %v7903_v45  ;;  %v5756_v45 = vpop.f32.mrf.mxu0 }
 0x43f   :  { %6182 = vmatprep.mubr.bf16.mxu0 %v8529_v35  ;;  %6109 = vmatprep.subr.bf16.mxu1 %v7908_v58  ;;  %v7972_v58 = vld [vmem:[#allocation13 + $0x5f8] ss:$28 sps:$4 sm:$0xff]  }
 0x440   :  { %6152 = vmatprep.subr.bf16.mxu0 %v7911_v59  ;;  %v7975_v59 = vld [vmem:[#allocation13 + $0x978] ss:$28 sps:$4 sm:$0xff]  }
 0x441   :  { %6110 = vmatpush1.bf16.msra.mxu1 %v7906_v60  ;;  %v7980_v60 = vld [vmem:[#allocation13 + $0x5c4] ss:$28 sps:$4 sm:$0xff]  }
 0x442   :  { %6153 = vmatpush1.bf16.msra.mxu0 %v7909_v29  ;;  %6111 = vmatprep.subr.bf16.mxu1 %v7914_v61  ;;  %v7983_v29 = vld [vmem:[#allocation13 + $0x944] ss:$28 sps:$4 sm:$0xff]   ;;  %v5758_v61 = vpop.f32.mrf.mxu0 }
 0x443   :  { %6154 = vmatprep.subr.bf16.mxu0 %v7917_v34  ;;  %v7978_v34 = vld [vmem:[#allocation13 + $0x5c0] ss:$28 sps:$4 sm:$0xff]  }
 0x445   :  { %6112 = vmatpush1.bf16.msra.mxu1 %v7912_v62  ;;  %v5797_v62 = vpop.f32.mrf.mxu1 }
 0x446   :  { %6155 = vmatpush1.bf16.msra.mxu0 %v7915_v48  ;;  %6113 = vmatprep.subr.bf16.mxu1 %v7920_v1  ;;  %v7981_v48 = vld [vmem:[#allocation13 + $0x940] ss:$28 sps:$4 sm:$0xff]   ;;  %v7986_v1 = vld [vmem:[#allocation13 + $0x58c] ss:$28 sps:$4 sm:$0xff]  }
 0x447   :  { %6156 = vmatprep.subr.bf16.mxu0 %v7923_v2  ;;  %v7989_v2 = vld [vmem:[#allocation13 + $0x90c] ss:$28 sps:$4 sm:$0xff]  }
 0x449   :  { %6114 = vmatpush1.bf16.msra.mxu1 %v7918_v4  ;;  %v8559_v4 = vld [vmem:[#allocation15] sm:$0xff] }
 0x44a   :  { %6157 = vmatpush1.bf16.msra.mxu0 %v7921_v5  ;;  %6115 = vmatprep.subr.bf16.mxu1 %v7926_v6  ;;  %v5760_v5 = vpop.f32.mrf.mxu0  ;;  %v7984_v6 = vld [vmem:[#allocation13 + $0x588] ss:$28 sps:$4 sm:$0xff]  }
 0x44b   :  { %6158 = vmatprep.subr.bf16.mxu0 %v7929_v7  ;;  %v5799_v7 = vpop.f32.mrf.mxu1 }
 0x44d   :  { %6116 = vmatpush1.bf16.msra.mxu1 %v7924_v11  ;;  %v5840_v11 = vpop.f32.mrf.mxu0 }
 0x44e   :  { %6159 = vmatpush1.bf16.msra.mxu0 %v7927_v12  ;;  %6117 = vmatprep.subr.bf16.mxu1 %v7932_v14  ;;  %v7987_v12 = vld [vmem:[#allocation13 + $0x908] ss:$28 sps:$4 sm:$0xff]   ;;  %v7992_v14 = vld [vmem:[#allocation13 + $0x554] ss:$28 sps:$4 sm:$0xff]  }
 0x44f   :  { %6160 = vmatprep.subr.bf16.mxu0 %v7935_v15  ;;  %v3384_v15 = vrot.slane %v8559_v4, %v8446_v41  ;;  %v7996_v41 = vld [vmem:[#allocation13 + $0xc18] ss:$28 sps:$4 sm:$0xff]  }
 0x451   :  { %6118 = vmatpush1.bf16.msra.mxu1 %v7930_v16  ;;  %v7995_v16 = vld [vmem:[#allocation13 + $0x8d4] ss:$28 sps:$4 sm:$0xff]  }
 0x452   :  { %6161 = vmatpush1.bf16.msra.mxu0 %v7933_v17  ;;  %6119 = vmatprep.subr.bf16.mxu1 %v7938_v18  ;;  %v3388_v17 = vrot.slane %v8559_v4, %v8449_v43  ;;  %v7990_v18 = vld [vmem:[#allocation13 + $0x550] ss:$28 sps:$4 sm:$0xff]   ;;  %v8000_v43 = vld [vmem:[#allocation13 + $0x1a0] ss:$28 sps:$4 sm:$0xff]  }
 0x453   :  { %6162 = vmatprep.subr.bf16.mxu0 %v7941_v19  ;;  %v5801_v19 = vpop.f32.mrf.mxu1 }
 0x455   :  { %6120 = vmatpush1.bf16.msra.mxu1 %v7936_v20  ;;  %v5842_v20 = vpop.f32.mrf.mxu0 }
 0x456   :  { %6163 = vmatpush1.bf16.msra.mxu0 %v7939_v21  ;;  %6121 = vmatprep.subr.bf16.mxu1 %v7944_v22  ;;  %v7993_v21 = vld [vmem:[#allocation13 + $0x8d0] ss:$28 sps:$4 sm:$0xff]   ;;  %v7998_v22 = vld [vmem:[#allocation13 + $0xc1c] ss:$28 sps:$4 sm:$0xff]  }
 0x457   :  { %6164 = vmatprep.subr.bf16.mxu0 %v7947_v23  ;;  %v5755_v23 = vadd.f32 %v5754_v53, %v3384_v15 }
 0x459   :  { %6122 = vmatpush1.bf16.msra.mxu1 %v7942_v24  ;;  %v7999_v24 = vld [vmem:[#allocation13 + $0x360] ss:$28 sps:$4 sm:$0xff]  }
 0x45a   :  { %6165 = vmatpush1.bf16.msra.mxu0 %v7945_v27  ;;  %6123 = vmatprep.subr.bf16.mxu1 %v7950_v28  ;;  %v5757_v27 = vadd.f32 %v5756_v45, %v3388_v17  ;;  %v5798_v28 = vadd.f32 %v5797_v62, %v5755_v23 }
 0x45b   :  { %6166 = vmatprep.subr.bf16.mxu0 %v7953_v30  ;;  %v5803_v30 = vpop.f32.mrf.mxu1 }
 0x45d   :  { %6124 = vmatpush2.bf16.msra.mxu1 %v7948_v31  ;;  %v5844_v31 = vpop.f32.mrf.mxu0 }
 0x45e   :  { %6167 = vmatpush2.bf16.msra.mxu0 %v7951_v33  ;;  %6125 = vmatprep.subr.bf16.mxu1 %v7956_v39  ;;  %v5759_v33 = vadd.f32 %v5758_v61, %v3384_v15  ;;  %v5800_v39 = vadd.f32 %v5799_v7, %v5757_v27  ;;  %v8018_v7 = vld [vmem:[#allocation13 + $0xb3c] ss:$28 sps:$4 sm:$0xff]   ;;  %v8023_v15 = vld [vmem:[#allocation13 + $0xb04] ss:$28 sps:$4 sm:$0xff]  }
 0x45f   :  { %6168 = vmatprep.subr.bf16.mxu0 %v7959_v40  ;;  %v5841_v40 = vadd.f32 %v5840_v11, %v5798_v28  ;;  %v5846_v53 = vpop.f32.mrf.mxu0  ;;  %v8019_v11 = vld [vmem:[#allocation13 + $0x280] ss:$28 sps:$4 sm:$0xff]   ;;  %v8030_v28 = vld [vmem:[#allocation13 + $0x50] ss:$28 sps:$4 sm:$0xff]  }
 0x461   :  { %6126 = vmatpush2.bf16.msra.mxu1 %v7954_v42  ;;  %v8003_v42 = vld [vmem:[#allocation13 + $0xbe4] ss:$28 sps:$4 sm:$0xff]  }
 0x462   :  { %6169 = vmatpush2.bf16.msra.mxu0 %v7957_v46  ;;  %6127 = vmatprep.subr.bf16.mxu1 %v7962_v44  ;;  %v5761_v46 = vadd.f32 %v5760_v5, %v3388_v17  ;;  %v8014_v5 = vld [vmem:[#allocation13 + $0x2b8] ss:$28 sps:$4 sm:$0xff]  }
 0x463   :  { %6170 = vmatprep.subr.bf16.mxu0 %v7965_v50  ;;  %v8004_v50 = vld [vmem:[#allocation13 + $0x328] ss:$28 sps:$4 sm:$0xff]  }
 0x465   :  { %6128 = vmatpush2.bf16.msra.mxu1 %v7960_v51  ;;  %v5802_v51 = vadd.f32 %v5801_v19, %v5759_v33  ;;  %v8038_v33 = vld [vmem:[#allocation13 + $0xddc] ss:$28 sps:$4 sm:$0xff]  }
 0x466   :  { %6171 = vmatpush2.bf16.msra.mxu0 %v7963_v49  ;;  %6129 = vmatprep.subr.bf16.mxu1 %v7968_v47  ;;  %v5843_v49 = vadd.f32 %v5842_v20, %v5800_v39  ;;  %v8025_v20 = vld [vmem:[#allocation13 + $0x88] ss:$28 sps:$4 sm:$0xff]   ;;  %v8039_v39 = vld [vmem:[#allocation13 + $0xa60] ss:$28 sps:$4 sm:$0xff]  }
 0x467   :  { %6172 = vmatprep.subr.bf16.mxu0 %v7971_v52  ;;  %v8001_v52 = vld [vmem:[#allocation13 + $0xbe0] ss:$28 sps:$4 sm:$0xff]   ;;  %v5845_v45 = vadd.f32 %v5844_v31, %v5802_v51  ;;  %v8031_v31 = vld [vmem:[#allocation13 + $0xa90] ss:$28 sps:$4 sm:$0xff]   ;;  %v8045_v51 = vld [vmem:[#allocation13 + $0x868] ss:$28 sps:$4 sm:$0xff]  }
 0x469   :  { %6130 = vmatpush2.bf16.msra.mxu1 %v7966_v54 }
 0x46a   :  { %6173 = vmatpush2.bf16.msra.mxu0 %v7969_v55  ;;  %6131 = vmatprep.subr.bf16.mxu1 %v7974_v56  ;;  %v8005_v55 = vld [vmem:[#allocation13 + $0x168] ss:$28 sps:$4 sm:$0xff]  }
 0x46b   :  { %6174 = vmatprep.subr.bf16.mxu0 %v7977_v57  ;;  %v8008_v56 = vld [vmem:[#allocation13 + $0xbac] ss:$28 sps:$4 sm:$0xff]   ;;  %v5804_v57 = vadd.f32 %v5803_v30, %v5761_v46  ;;  %v8034_v30 = vld [vmem:[#allocation13 + $0x1d8] ss:$28 sps:$4 sm:$0xff]   ;;  %v8043_v46 = vld [vmem:[#allocation13 + $0xda4] ss:$28 sps:$4 sm:$0xff]  }
 0x46d   :  { %6132 = vmatpush2.bf16.msra.mxu1 %v7972_v58 }
 0x46e   :  { %6175 = vmatpush2.bf16.msra.mxu0 %v7975_v59  ;;  %6133 = vmatprep.subr.bf16.mxu1 %v7980_v60  ;;  %v8009_v59 = vld [vmem:[#allocation13 + $0x2f0] ss:$28 sps:$4 sm:$0xff]  }
 0x46f   :  { %6176 = vmatprep.subr.bf16.mxu0 %v7983_v29  ;;  %v5847_v29 = vadd.f32 %v5846_v53, %v5804_v57  ;;  %v8050_v53 = vld [vmem:[#allocation13 + $0x830] ss:$28 sps:$4 sm:$0xff]   ;;  %v8058_v57 = vld [vmem:[#allocation13 + $0xcfc] ss:$28 sps:$4 sm:$0xff]  }
 0x471   :  { %6134 = vmatpush2.bf16.msra.mxu1 %v7978_v34  ;;  %v8006_v34 = vld [vmem:[#allocation13 + $0xba8] ss:$28 sps:$4 sm:$0xff]  }
 0x472   :  { %6177 = vmatpush2.bf16.msra.mxu0 %v7981_v48  ;;  %6135 = vmatprep.subr.bf16.mxu1 %v7986_v1  ;;  %v8010_v48 = vld [vmem:[#allocation13 + $0x130] ss:$28 sps:$4 sm:$0xff]  }
 0x473   :  { %6178 = vmatprep.subr.bf16.mxu0 %v7989_v2  ;;  %v8013_v1 = vld [vmem:[#allocation13 + $0xb74] ss:$28 sps:$4 sm:$0xff]  }
 0x475   :  { %6136 = vmatpush2.bf16.msra.mxu1 %v7984_v6  ;;  %v8015_v6 = vld [vmem:[#allocation13 + $0xf8] ss:$28 sps:$4 sm:$0xff]  }
 0x476   :  { %6179 = vmatpush2.bf16.msra.mxu0 %v7987_v12  ;;  %6137 = vmatprep.subr.bf16.mxu1 %v7992_v14  ;;  %v8016_v12 = vld [vmem:[#allocation13 + $0xb38] ss:$28 sps:$4 sm:$0xff]   ;;  %v8020_v14 = vld [vmem:[#allocation13 + $0xc0] ss:$28 sps:$4 sm:$0xff]  }
 0x477   :  { %6180 = vmatprep.subr.bf16.mxu0 %v7995_v16  ;;  %v8024_v16 = vld [vmem:[#allocation13 + $0x248] ss:$28 sps:$4 sm:$0xff]  }
 0x479   :  { %6138 = vmatpush2.bf16.msra.mxu1 %v7990_v18  ;;  %v8021_v18 = vld [vmem:[#allocation13 + $0xb00] ss:$28 sps:$4 sm:$0xff]  }
 0x47a   :  { %6181 = vmatpush2.bf16.msra.mxu0 %v7993_v21  ;;  %6193 = vmatprep.subr.bf16.mxu1 %v7998_v22  ;;  %v8028_v21 = vld [vmem:[#allocation13 + $0xacc] ss:$28 sps:$4 sm:$0xff]  }
 0x47b   :  { %7233 = vmatprep.subr.bf16.mxu0 %v7999_v24  ;;  %v8029_v22 = vld [vmem:[#allocation13 + $0x210] ss:$28 sps:$4 sm:$0xff]   ;;  %v8026_v24 = vld [vmem:[#allocation13 + $0xac8] ss:$28 sps:$4 sm:$0xff]  }
 0x47c   :  { %6140 = vmatmul.mubr.bf16.vlgmr.msra.gmra.mxu1 %v8517_v37  ;;  %v5883_v44 = vpop.f32.mrf.mxu1 }
 0x47d   :  { %6183 = vmatmul.mubr.bf16.vlgmr.msra.gmra.mxu0 %v8531_v3  ;;  %v5884_v47 = vadd.f32 %v5883_v44, %v5841_v40  ;;  %6194 = vmatpush1.bf16.msra.mxu1 %v7996_v41  ;;  %v8033_v41 = vld [vmem:[#allocation13 + $0xa94] ss:$28 sps:$4 sm:$0xff]   ;;  %v8044_v44 = vld [vmem:[#allocation13 + $0xa28] ss:$28 sps:$4 sm:$0xff]  }
 0x47e   :  { %6225 = vmatprep.mubr.bf16.mxu1 %v8542_v10  ;;  %7234 = vmatpush3.bf16.msra.mxu0 %v8000_v43  ;;  %v5885_v54 = vpop.f32.mrf.mxu1  ;;  %v8035_v43 = vld [vmem:[#allocation13 + $0x18] ss:$28 sps:$4 sm:$0xff]  }
 0x47f   :  { %8108 = vtanh.f32 %v5884_v47  ;;  %6268 = vmatprep.mubr.bf16.mxu0 %v8499_v63  ;;  %v5886_v58 = vadd.f32 %v5885_v54, %v5843_v49  ;;  %6195 = vmatprep.subr.bf16.mxu1 %v8003_v42  ;;  %v8011_v63 = vld [vmem:[#allocation13 + $0xb70] ss:$28 sps:$4 sm:$0xff]   ;;  %v8036_v40 = vld [vmem:[#allocation13 + $0xdd8] ss:$28 sps:$4 sm:$0xff]   ;;  %v8040_v42 = vld [vmem:[#allocation13 + $0x8a0] ss:$28 sps:$4 sm:$0xff]  }
 0x480   :  { %7235 = vmatprep.subr.bf16.mxu0 %v8004_v50  ;;  %v5887_v60 = vpop.f32.mrf.mxu1  ;;  %v8041_v50 = vld [vmem:[#allocation13 + $0xda0] ss:$28 sps:$4 sm:$0xff]   ;;  %v8048_v49 = vld [vmem:[#allocation13 + $0xd6c] ss:$28 sps:$4 sm:$0xff]   ;;  %v8053_v54 = vld [vmem:[#allocation13 + $0xd34] ss:$28 sps:$4 sm:$0xff]  }
 0x481   :  { %8110 = vtanh.f32 %v5886_v58  ;;  %v5888_v61 = vadd.f32 %v5887_v60, %v5845_v45  ;;  %6196 = vmatpush1.bf16.msra.mxu1 %v8001_v52  ;;  %v8049_v47 = vld [vmem:[#allocation13 + $0x9f0] ss:$28 sps:$4 sm:$0xff]   ;;  %v8046_v52 = vld [vmem:[#allocation13 + $0xd68] ss:$28 sps:$4 sm:$0xff]   ;;  %v8056_v45 = vld [vmem:[#allocation13 + $0xcf8] ss:$28 sps:$4 sm:$0xff]  }
 0x482   :  { %7236 = vmatpush3.bf16.msra.mxu0 %v8005_v55  ;;  %v5889_v62 = vpop.f32.mrf.mxu1  ;;  %6197 = vmatprep.subr.bf16.mxu1 %v8008_v56  ;;  %v8054_v55 = vld [vmem:[#allocation13 + $0x9b8] ss:$28 sps:$4 sm:$0xff]   ;;  %v8060_v58 = vld [vmem:[#allocation13 + $0x7c0] ss:$28 sps:$4 sm:$0xff]   ;;  %v8064_v60 = vld [vmem:[#allocation13 + $0x948] ss:$28 sps:$4 sm:$0xff]  }
 0x483   :  { %8112 = vtanh.f32 %v5888_v61  ;;  %v5890_v2 = vadd.f32 %v5889_v62, %v5847_v29  ;;  %7237 = vmatprep.subr.bf16.mxu0 %v8009_v59  ;;  %v8055_v56 = vld [vmem:[#allocation13 + $0x7f8] ss:$28 sps:$4 sm:$0xff]   ;;  %v8063_v59 = vld [vmem:[#allocation13 + $0xcc4] ss:$28 sps:$4 sm:$0xff]   ;;  %v8069_v62 = vld [vmem:[#allocation13 + $0x910] ss:$28 sps:$4 sm:$0xff]  }
 0x484   :  { %v8061_v29 = vld [vmem:[#allocation13 + $0xcc0] ss:$28 sps:$4 sm:$0xff]   ;;  %v8065_v61 = vld [vmem:[#allocation13 + $0x788] ss:$28 sps:$4 sm:$0xff]  }
 0x485   :  { %8114 = vtanh.f32 %v5890_v2  ;;  %6198 = vmatpush1.bf16.msra.mxu1 %v8006_v34  ;;  %v8068_v34 = vld [vmem:[#allocation13 + $0xc8c] ss:$28 sps:$4 sm:$0xff]   ;;  %v8073_v2 = vld [vmem:[#allocation13 + $0xc54] ss:$28 sps:$4 sm:$0xff]  }
 0x486   :  { %7238 = vmatpush3.bf16.msra.mxu0 %v8010_v48  ;;  %6199 = vmatprep.subr.bf16.mxu1 %v8013_v1  ;;  %v8066_v48 = vld [vmem:[#allocation13 + $0xc88] ss:$28 sps:$4 sm:$0xff]   ;;  %v8070_v1 = vld [vmem:[#allocation13 + $0x750] ss:$28 sps:$4 sm:$0xff]  }
 0x487   :  { %7239 = vmatprep.subr.bf16.mxu0 %v8014_v5  ;;  %v8074_v5 = vld [vmem:[#allocation13 + $0x8d8] ss:$28 sps:$4 sm:$0xff]  }
 0x489   :  { %6200 = vmatpush1.bf16.msra.mxu1 %v8011_v63  ;;  %v8071_v63 = vld [vmem:[#allocation13 + $0xc50] ss:$28 sps:$4 sm:$0xff]  }
 0x48a   :  { %7240 = vmatpush3.bf16.msra.mxu0 %v8015_v6  ;;  %6201 = vmatprep.subr.bf16.mxu1 %v8018_v7  ;;  %v8075_v6 = vld [vmem:[#allocation13 + $0x718] ss:$28 sps:$4 sm:$0xff]   ;;  %v8076_v7 = vld [vmem:[#allocation13 + $0x6e0] ss:$28 sps:$4 sm:$0xff]  }
 0x48b   :  { %7241 = vmatprep.subr.bf16.mxu0 %v8019_v11  ;;  %v8077_v11 = vld [vmem:[#allocation13 + $0x520] ss:$28 sps:$4 sm:$0xff]  }
 0x48c   :  { %v8109_v17 = vpop.eup %8108 }
 0x48d   :  { %6414 = vst [vmem:[%s8643_s11] sm:$0xff] %v8109_v17  ;;  %6202 = vmatpush1.bf16.msra.mxu1 %v8016_v12  ;;  %v8078_v12 = vld [vmem:[#allocation13 + $0x6a8] ss:$28 sps:$4 sm:$0xff]   ;;  %v8082_v17 = vld [vmem:[#allocation13 + $0x638] ss:$28 sps:$4 sm:$0xff]  }
 0x48e   :  { %v8111_v19 = vpop.eup %8110  ;;  %7242 = vmatpush3.bf16.msra.mxu0 %v8020_v14  ;;  %6203 = vmatprep.subr.bf16.mxu1 %v8023_v15  ;;  %v8079_v14 = vld [vmem:[#allocation13 + $0x4e8] ss:$28 sps:$4 sm:$0xff]   ;;  %v8080_v15 = vld [vmem:[#allocation13 + $0x670] ss:$28 sps:$4 sm:$0xff]  }
 0x48f   :  { %6415 = vst [vmem:[%s8643_s11 + $0x8] sm:$0xff] %v8111_v19  ;;  %7243 = vmatprep.subr.bf16.mxu0 %v8024_v16  ;;  %v8081_v16 = vld [vmem:[#allocation13 + $0x4b0] ss:$28 sps:$4 sm:$0xff]   ;;  %v8084_v19 = vld [vmem:[#allocation13 + $0x600] ss:$28 sps:$4 sm:$0xff]  }
 0x490   :  { %v8113_v23 = vpop.eup %8112 }
 0x491   :  { %6421 = vst [vmem:[%s8643_s11 + $0x38] sm:$0xff] %v8113_v23  ;;  %6204 = vmatpush1.bf16.msra.mxu1 %v8021_v18  ;;  %v8083_v18 = vld [vmem:[#allocation13 + $0x478] ss:$28 sps:$4 sm:$0xff]  }
 0x492   :  { %v8115_v27 = vpop.eup %8114  ;;  %7244 = vmatpush3.bf16.msra.mxu0 %v8025_v20  ;;  %6205 = vmatprep.subr.bf16.mxu1 %v8028_v21  ;;  %v8085_v20 = vld [vmem:[#allocation13 + $0x440] ss:$28 sps:$4 sm:$0xff]   ;;  %v8086_v21 = vld [vmem:[#allocation13 + $0x5c8] ss:$28 sps:$4 sm:$0xff]   ;;  %v8090_v23 = vld [vmem:[#allocation13 + $0x558] ss:$28 sps:$4 sm:$0xff]  }
 0x493   :  { %6422 = vst [vmem:[%s8643_s11 + $0x40] sm:$0xff] %v8115_v27  ;;  %7245 = vmatprep.subr.bf16.mxu0 %v8029_v22  ;;  %v8088_v22 = vld [vmem:[#allocation13 + $0x590] ss:$28 sps:$4 sm:$0xff]   ;;  %v8092_v27 = vld [vmem:[#allocation13 + $0xde0] ss:$28 sps:$4 sm:$0xff]  }
 0x495   :  { %6206 = vmatpush1.bf16.msra.mxu1 %v8026_v24  ;;  %v8091_v24 = vld [vmem:[#allocation13 + $0x398] ss:$28 sps:$4 sm:$0xff]  }
 0x496   :  { %7246 = vmatpush3.bf16.msra.mxu0 %v8030_v28  ;;  %6207 = vmatprep.subr.bf16.mxu1 %v8033_v41  ;;  %v8093_v28 = vld [vmem:[#allocation13 + $0xc20] ss:$28 sps:$4 sm:$0xff]   ;;  %v8094_v41 = vld [vmem:[#allocation13 + $0xda8] ss:$28 sps:$4 sm:$0xff]  }
 0x497   :  { %7247 = vmatprep.subr.bf16.mxu0 %v8034_v30  ;;  %v8095_v30 = vld [vmem:[#allocation13 + $0xbe8] ss:$28 sps:$4 sm:$0xff]  }
 0x499   :  { %6208 = vmatpush1.bf16.msra.mxu1 %v8031_v31  ;;  %v8096_v31 = vld [vmem:[#allocation13 + $0xd70] ss:$28 sps:$4 sm:$0xff]  }
 0x49a   :  { %7248 = vmatpush3.bf16.msra.mxu0 %v8035_v43  ;;  %6209 = vmatprep.subr.bf16.mxu1 %v8038_v33  ;;  %v8097_v43 = vld [vmem:[#allocation13 + $0xbb0] ss:$28 sps:$4 sm:$0xff]   ;;  %v8098_v33 = vld [vmem:[#allocation13 + $0xd38] ss:$28 sps:$4 sm:$0xff]  }
 0x49b   :  { %7277 = vmatprep.subr.bf16.mxu0 %v8039_v39  ;;  %v8099_v39 = vld [vmem:[#allocation13 + $0xb78] ss:$28 sps:$4 sm:$0xff]  }
 0x49d   :  { %6269 = vmatmul.mubr.bf16.vlgmr.msra.gmra.mxu0 %v8508_v0  ;;  %6210 = vmatpush2.bf16.msra.mxu1 %v8036_v40  ;;  %v8051_v0 = vld [vmem:[#allocation13 + $0xd30] ss:$28 sps:$4 sm:$0xff]   ;;  %v5926_v40 = vpop.f32.mrf.mxu0 }
 0x49e   :  { %7278 = vmatpush3.bf16.msra.mxu0 %v8040_v42  ;;  %6350 = vmatprep.mubr.bf16.mxu0 %v8529_v35  ;;  %v8059_v35 = vld [vmem:[#allocation13 + $0x980] ss:$28 sps:$4 sm:$0xff]  }
 0x49f   :  { %6211 = vmatprep.subr.bf16.mxu1 %v8043_v46  ;;  %7279 = vmatprep.subr.bf16.mxu0 %v8044_v44  ;;  %v8100_v42 = vld [vmem:[#allocation13 + $0xd00] ss:$28 sps:$4 sm:$0xff]   ;;  %v5928_v44 = vpop.f32.mrf.mxu0 }
 0x4a0   :  { %v8101_v46 = vld [vmem:[#allocation13 + $0xb40] ss:$28 sps:$4 sm:$0xff]  }
 0x4a1   :  { %6212 = vmatpush2.bf16.msra.mxu1 %v8041_v50  ;;  %v8103_v50 = vld [vmem:[#allocation13 + $0xb08] ss:$28 sps:$4 sm:$0xff]  }
 0x4a2   :  { %7280 = vmatpush3.bf16.msra.mxu0 %v8045_v51  ;;  %6213 = vmatprep.subr.bf16.mxu1 %v8048_v49  ;;  %v8104_v49 = vld [vmem:[#allocation13 + $0xc90] ss:$28 sps:$4 sm:$0xff]  }
 0x4a3   :  { %7281 = vmatprep.subr.bf16.mxu0 %v8049_v47  ;;  %v3392_v47 = vrot.slane %v8559_v4, %v8457_v9 }
 0x4a5   :  { %6214 = vmatpush2.bf16.msra.mxu1 %v8046_v52  ;;  %v8105_v52 = vld [vmem:[#allocation13 + $0xad0] ss:$28 sps:$4 sm:$0xff]  }
 0x4a6   :  { %7282 = vmatpush3.bf16.msra.mxu0 %v8050_v53  ;;  %6215 = vmatprep.subr.bf16.mxu1 %v8053_v54 }
 0x4a7   :  { %7283 = vmatprep.subr.bf16.mxu0 %v8054_v55  ;;  %v8106_v55 = vld [vmem:[#allocation13 + $0xc58] ss:$28 sps:$4 sm:$0xff]  }
 0x4a9   :  { %6216 = vmatpush2.bf16.msra.mxu1 %v8051_v0  ;;  %v3396_v0 = vrot.slane %v8559_v4, %v8454_v8 }
 0x4aa   :  { %7284 = vmatpush3.bf16.msra.mxu0 %v8055_v56  ;;  %6217 = vmatprep.subr.bf16.mxu1 %v8058_v57  ;;  %v5927_v57 = vadd.f32 %v5926_v40, %v3392_v47 }
 0x4ab   :  { %7285 = vmatprep.subr.bf16.mxu0 %v8059_v35  ;;  %v8107_v35 = vld [vmem:[#allocation13 + $0xa98] ss:$28 sps:$4 sm:$0xff]  }
 0x4ad   :  { %6218 = vmatpush2.bf16.msra.mxu1 %v8056_v45 }
 0x4ae   :  { %7286 = vmatpush3.bf16.msra.mxu0 %v8060_v58  ;;  %6219 = vmatprep.subr.bf16.mxu1 %v8063_v59  ;;  %v5929_v58 = vadd.f32 %v5928_v44, %v3396_v0 }
 0x4af   :  { %7287 = vmatprep.subr.bf16.mxu0 %v8064_v60 }
 0x4b1   :  { %6220 = vmatpush2.bf16.msra.mxu1 %v8061_v29 }
 0x4b2   :  { %7288 = vmatpush3.bf16.msra.mxu0 %v8065_v61  ;;  %6221 = vmatprep.subr.bf16.mxu1 %v8068_v34 }
 0x4b3   :  { %7289 = vmatprep.subr.bf16.mxu0 %v8069_v62 }
 0x4b5   :  { %6222 = vmatpush2.bf16.msra.mxu1 %v8066_v48 }
 0x4b6   :  { %7290 = vmatpush3.bf16.msra.mxu0 %v8070_v1  ;;  %6223 = vmatprep.subr.bf16.mxu1 %v8073_v2 }
 0x4b7   :  { %7291 = vmatprep.subr.bf16.mxu0 %v8074_v5 }
 0x4b9   :  { %6224 = vmatpush2.bf16.msra.mxu1 %v8071_v63 }
 0x4ba   :  { %7292 = vmatpush3.bf16.msra.mxu0 %v8075_v6  ;;  %7255 = vmatprep.subr.bf16.mxu1 %v8076_v7 }
 0x4bc   :  { %6226 = vmatmul.mubr.bf16.vlgmr.msra.gmra.mxu1 %v8544_v13  ;;  %v5969_v51 = vpop.f32.mrf.mxu1 }
 0x4bd   :  { %6351 = vmatmul.mubr.bf16.vlgmr.msra.gmra.mxu0 %v8531_v3  ;;  %7256 = vmatpush3.bf16.msra.mxu1 %v8077_v11  ;;  %v8087_v3 = vld [vmem:[#allocation13 + $0x408] ss:$28 sps:$4 sm:$0xff]   ;;  %v5970_v59 = vadd.f32 %v5969_v51, %v5927_v57 }
 0x4be   :  { %6309 = vmatprep.mubr.bf16.mxu1 %v8515_v32  ;;  %7257 = vmatprep.subr.bf16.mxu1 %v8078_v12  ;;  %v8089_v32 = vld [vmem:[#allocation13 + $0x3d0] ss:$28 sps:$4 sm:$0xff]   ;;  %v5971_v54 = vpop.f32.mrf.mxu1 }
 0x4bf   :  { %v5972_v9 = vadd.f32 %v5971_v54, %v5929_v58 }
 0x4c0   :  { %v5973_v45 = vpop.f32.mrf.mxu1 }
 0x4c1   :  { %7258 = vmatpush3.bf16.msra.mxu1 %v8079_v14 }
 0x4c2   :  { %7259 = vmatprep.subr.bf16.mxu1 %v8080_v15  ;;  %v5975_v61 = vpop.f32.mrf.mxu1 }
 0x4c5   :  { %7260 = vmatpush3.bf16.msra.mxu1 %v8081_v16 }
 0x4c6   :  { %7261 = vmatprep.subr.bf16.mxu1 %v8082_v17 }
 0x4c9   :  { %7262 = vmatpush3.bf16.msra.mxu1 %v8083_v18 }
 0x4ca   :  { %7263 = vmatprep.subr.bf16.mxu1 %v8084_v19 }
 0x4cd   :  { %7264 = vmatpush3.bf16.msra.mxu1 %v8085_v20 }
 0x4ce   :  { %7265 = vmatprep.subr.bf16.mxu1 %v8086_v21 }
 0x4d1   :  { %7266 = vmatpush3.bf16.msra.mxu1 %v8087_v3 }
 0x4d2   :  { %7267 = vmatprep.subr.bf16.mxu1 %v8088_v22 }
 0x4d5   :  { %7268 = vmatpush3.bf16.msra.mxu1 %v8089_v32 }
 0x4d6   :  { %7269 = vmatprep.subr.bf16.mxu1 %v8090_v23 }
 0x4d9   :  { %7270 = vmatpush3.bf16.msra.mxu1 %v8091_v24  ;;  %v3400_v24 = vrot.slane %v8559_v4, %v1197_v26 }
 0x4da   :  { %7299 = vmatprep.subr.bf16.mxu1 %v8092_v27 }
 0x4dc   :  { %6310 = vmatmul.mubr.bf16.vlgmr.msra.gmra.mxu1 %v8517_v37  ;;  %v8102_v37 = vld [vmem:[#allocation13 + $0xcc8] ss:$28 sps:$4 sm:$0xff]  }
 0x4dd   :  { %7300 = vmatpush3.bf16.msra.mxu1 %v8093_v28  ;;  %6391 = vmatprep.mubr.bf16.mxu1 %v8542_v10  ;;  %v5930_v10 = vpop.f32.mrf.mxu0 }
 0x4de   :  { %7301 = vmatprep.subr.bf16.mxu1 %v8094_v41  ;;  %v5931_v29 = vadd.f32 %v5930_v10, %v3392_v47  ;;  %v3404_v41 = vrot.slane %v8559_v4, %v1201_v25 }
 0x4df   :  { %v5932_v53 = vpop.f32.mrf.mxu0 }
 0x4e0   :  { %v5933_v34 = vadd.f32 %v5932_v53, %v3396_v0  ;;  %v5974_v48 = vadd.f32 %v5973_v45, %v5931_v29 }
 0x4e1   :  { %7302 = vmatpush3.bf16.msra.mxu1 %v8095_v30  ;;  %v6012_v56 = vpop.f32.mrf.mxu0 }
 0x4e2   :  { %7303 = vmatprep.subr.bf16.mxu1 %v8096_v31  ;;  %v6013_v62 = vadd.f32 %v6012_v56, %v5970_v59  ;;  %v5976_v5 = vadd.f32 %v5975_v61, %v5933_v34 }
 0x4e3   :  { %v6014_v60 = vpop.f32.mrf.mxu0 }
 0x4e4   :  { %v6015_v8 = vadd.f32 %v6014_v60, %v5972_v9 }
 0x4e5   :  { %7304 = vmatpush3.bf16.msra.mxu1 %v8097_v43  ;;  %v6016_v1 = vpop.f32.mrf.mxu0 }
 0x4e6   :  { %7305 = vmatprep.subr.bf16.mxu1 %v8098_v33  ;;  %v6017_v7 = vadd.f32 %v6016_v1, %v5974_v48 }
 0x4e7   :  { %v6018_v12 = vpop.f32.mrf.mxu0 }
 0x4e8   :  { %v6019_v15 = vadd.f32 %v6018_v12, %v5976_v5  ;;  %v3408_v5 = vrot.slane %v8559_v4, %v1205_v36 }
 0x4e9   :  { %7306 = vmatpush3.bf16.msra.mxu1 %v8099_v39 }
 0x4ea   :  { %7307 = vmatprep.subr.bf16.mxu1 %v8100_v42 }
 0x4ed   :  { %7308 = vmatpush3.bf16.msra.mxu1 %v8101_v46 }
 0x4ee   :  { %7309 = vmatprep.subr.bf16.mxu1 %v8102_v37 }
 0x4f1   :  { %7310 = vmatpush3.bf16.msra.mxu1 %v8103_v50 }
 0x4f2   :  { %7311 = vmatprep.subr.bf16.mxu1 %v8104_v49 }
 0x4f5   :  { %7312 = vmatpush3.bf16.msra.mxu1 %v8105_v52 }
 0x4f6   :  { %7313 = vmatprep.subr.bf16.mxu1 %v8106_v55 }
 0x4f9   :  { %7314 = vmatpush3.bf16.msra.mxu1 %v8107_v35 }
 0x4fc   :  { %v6055_v2 = vpop.f32.mrf.mxu1  ;;  %6392 = vmatmul.mubr.bf16.vlgmr.msra.gmra.mxu1 %v8544_v13 }
 0x4fd   :  { %v6056_v63 = vadd.f32 %v6055_v2, %v6013_v62  ;;  %v6098_v3 = vpop.f32.mrf.mxu0 }
 0x4fe   :  { %v6057_v6 = vpop.f32.mrf.mxu1  ;;  %v6099_v31 = vadd.f32 %v6098_v3, %v3400_v24 }
 0x4ff   :  { %8116 = vtanh.f32 %v6056_v63  ;;  %v6058_v11 = vadd.f32 %v6057_v6, %v6015_v8  ;;  %v6100_v22 = vpop.f32.mrf.mxu0 }
 0x500   :  { %v6059_v14 = vpop.f32.mrf.mxu1  ;;  %v6101_v33 = vadd.f32 %v6100_v22, %v3404_v41 }
 0x501   :  { %8118 = vtanh.f32 %v6058_v11  ;;  %v6060_v16 = vadd.f32 %v6059_v14, %v6017_v7  ;;  %v6102_v32 = vpop.f32.mrf.mxu0 }
 0x502   :  { %v6061_v17 = vpop.f32.mrf.mxu1  ;;  %v6103_v42 = vadd.f32 %v6102_v32, %v3400_v24 }
 0x503   :  { %8120 = vtanh.f32 %v6060_v16  ;;  %v6062_v18 = vadd.f32 %v6061_v17, %v6019_v15  ;;  %v6104_v27 = vpop.f32.mrf.mxu0 }
 0x504   :  { %v6105_v37 = vadd.f32 %v6104_v27, %v3404_v41 }
 0x505   :  { %8122 = vtanh.f32 %v6062_v18 }
 0x50c   :  { %v8117_v19 = vpop.eup %8116 }
 0x50d   :  { %6416 = vst [vmem:[%s8643_s11 + $0x10] sm:$0xff] %v8117_v19 }
 0x50e   :  { %v8119_v13 = vpop.eup %8118 }
 0x50f   :  { %6417 = vst [vmem:[%s8643_s11 + $0x18] sm:$0xff] %v8119_v13 }
 0x510   :  { %v8121_v20 = vpop.eup %8120 }
 0x511   :  { %6423 = vst [vmem:[%s8643_s11 + $0x48] sm:$0xff] %v8121_v20 }
 0x512   :  { %v8123_v21 = vpop.eup %8122 }
 0x513   :  { %6424 = vst [vmem:[%s8643_s11 + $0x50] sm:$0xff] %v8123_v21 }
 0x53c   :  { %v6141_v23 = vpop.f32.mrf.mxu1 }
 0x53d   :  { %v6184_v30 = vpop.f32.mrf.mxu0  ;;  %v6142_v39 = vadd.f32 %v6141_v23, %v6099_v31 }
 0x53e   :  { %v6143_v28 = vpop.f32.mrf.mxu1 }
 0x53f   :  { %v6186_v40 = vpop.f32.mrf.mxu0  ;;  %v6144_v46 = vadd.f32 %v6143_v28, %v6101_v33  ;;  %v6185_v50 = vadd.f32 %v6184_v30, %v6142_v39 }
 0x540   :  { %v6145_v43 = vpop.f32.mrf.mxu1 }
 0x541   :  { %v6146_v10 = vadd.f32 %v6145_v43, %v6103_v42  ;;  %v6188_v51 = vpop.f32.mrf.mxu0  ;;  %v6187_v49 = vadd.f32 %v6186_v40, %v6144_v46 }
 0x542   :  { %v6147_v44 = vpop.f32.mrf.mxu1 }
 0x543   :  { %v6148_v47 = vadd.f32 %v6147_v44, %v6105_v37  ;;  %v6189_v54 = vadd.f32 %v6188_v51, %v6146_v10  ;;  %v6190_v55 = vpop.f32.mrf.mxu0 }
 0x545   :  { %v6191_v56 = vadd.f32 %v6190_v55, %v6148_v47 }
 0x55d   :  { %v7249_v9 = vpop.f32.mrf.mxu0 }
 0x55f   :  { %v7250_v61 = vpop.f32.mrf.mxu0 }
 0x560   :  { %v7251_v63 = vadd.f32 %v7250_v61, %v7249_v9 }
 0x561   :  { %v7252_v34 = vpop.f32.mrf.mxu0 }
 0x562   :  { %v6271_v12 = vadd.f32 %v7251_v63, %v3408_v5 }
 0x563   :  { %v7253_v48 = vpop.f32.mrf.mxu0 }
 0x564   :  { %v7254_v14 = vadd.f32 %v7253_v48, %v7252_v34 }
 0x566   :  { %v6274_v19 = vadd.f32 %v7254_v14, %v3408_v5 }
 0x57c   :  { %v6227_v26 = vpop.f32.mrf.mxu1 }
 0x57d   :  { %v6228_v52 = vadd.f32 %v6227_v26, %v6185_v50  ;;  %v7293_v2 = vpop.f32.mrf.mxu0 }
 0x57e   :  { %v6229_v53 = vpop.f32.mrf.mxu1 }
 0x57f   :  { %8124 = vtanh.f32 %v6228_v52  ;;  %v6230_v25 = vadd.f32 %v6229_v53, %v6187_v49  ;;  %v7294_v6 = vpop.f32.mrf.mxu0 }
 0x580   :  { %v6231_v0 = vpop.f32.mrf.mxu1  ;;  %v7295_v13 = vadd.f32 %v7294_v6, %v7293_v2 }
 0x581   :  { %8126 = vtanh.f32 %v6230_v25  ;;  %v6232_v57 = vadd.f32 %v6231_v0, %v6189_v54  ;;  %v7296_v15 = vpop.f32.mrf.mxu0 }
 0x582   :  { %v6233_v35 = vpop.f32.mrf.mxu1 }
 0x583   :  { %8128 = vtanh.f32 %v6232_v57  ;;  %v6234_v45 = vadd.f32 %v6233_v35, %v6191_v56  ;;  %v7297_v20 = vpop.f32.mrf.mxu0 }
 0x584   :  { %v7298_v23 = vadd.f32 %v7297_v20, %v7296_v15 }
 0x585   :  { %8130 = vtanh.f32 %v6234_v45 }
 0x58c   :  { %v8125_v58 = vpop.eup %8124 }
 0x58d   :  { %6418 = vst [vmem:[%s8643_s11 + $0x20] sm:$0xff] %v8125_v58 }
 0x58e   :  { %v8127_v59 = vpop.eup %8126 }
 0x58f   :  { %6419 = vst [vmem:[%s8643_s11 + $0x28] sm:$0xff] %v8127_v59 }
 0x590   :  { %v8129_v60 = vpop.eup %8128 }
 0x591   :  { %6425 = vst [vmem:[%s8643_s11 + $0x58] sm:$0xff] %v8129_v60 }
 0x592   :  { %v8131_v29 = vpop.eup %8130 }
 0x593   :  { %6426 = vst [vmem:[%s8643_s11 + $0x60] sm:$0xff] %v8131_v29 }
 0x59c   :  { %v7271_v62 = vpop.f32.mrf.mxu1 }
 0x59e   :  { %v7272_v1 = vpop.f32.mrf.mxu1 }
 0x59f   :  { %v7273_v7 = vadd.f32 %v7272_v1, %v7271_v62 }
 0x5a0   :  { %v7274_v8 = vpop.f32.mrf.mxu1 }
 0x5a1   :  { %v6312_v16 = vadd.f32 %v7273_v7, %v6271_v12 }
 0x5a2   :  { %v7275_v11 = vpop.f32.mrf.mxu1 }
 0x5a3   :  { %v7276_v17 = vadd.f32 %v7275_v11, %v7274_v8  ;;  %v6353_v22 = vadd.f32 %v7295_v13, %v6312_v16 }
 0x5a5   :  { %v6315_v3 = vadd.f32 %v7276_v17, %v6274_v19 }
 0x5a7   :  { %v6356_v24 = vadd.f32 %v7298_v23, %v6315_v3 }
 0x5bc   :  { %v7315_v18 = vpop.f32.mrf.mxu1 }
 0x5be   :  { %v7316_v21 = vpop.f32.mrf.mxu1 }
 0x5bf   :  { %v7317_v32 = vadd.f32 %v7316_v21, %v7315_v18 }
 0x5c0   :  { %v7318_v38 = vpop.f32.mrf.mxu1 }
 0x5c1   :  { %v6394_v36 = vadd.f32 %v7317_v32, %v6353_v22 }
 0x5c2   :  { %v7319_v4 = vpop.f32.mrf.mxu1 }
 0x5c3   :  { %8132 = vtanh.f32 %v6394_v36  ;;  %v7320_v27 = vadd.f32 %v7319_v4, %v7318_v38 }
 0x5c5   :  { %v6397_v28 = vadd.f32 %v7320_v27, %v6356_v24 }
 0x5c7   :  { %8134 = vtanh.f32 %v6397_v28 }
 0x5d0   :  { %v8133_v41 = vpop.eup %8132 }
 0x5d1   :  { %6420 = vst [vmem:[%s8643_s11 + $0x30] sm:$0xff] %v8133_v41 }
 0x5d4   :  { %v8135_v30 = vpop.eup %8134 }
 0x5d5   :  { %6427 = vst [vmem:[%s8643_s11 + $0x68] sm:$0xff] %v8135_v30 }
 0x5d6   :  { %6432 = vsyncpa [#allocation3], 1 }
 0x5d7   :  { %6433 = vsyncpa [#allocation5], 1 }
 0x5d8   :  { %6434 = vsyncpa [#allocation8], 1 }
 0x5d9   :  { %6435 = vsyncpa [#allocation11], 1 }
 0x5da   :  { %6436 = vsyncpa [#allocation14], 1 }

</bundles_post_ra>
